<compile_context>
chip_gen: v7x
topology: tpu7x:2x2x1
jax: 0.10.0
libtpu: 0.0.40
codegen_flags: <defaults>
</compile_context>

<pallas_src>
import numpy as np
import jax
import jax.numpy as jnp
from jax import lax
from jax.experimental import pallas as pl
from jax.experimental.pallas import tpu as pltpu

# ---------------- sizes (small, consistent with the module) ----------------
B = 2            # real batch
BP = 8           # sublane-padded batch (caption/LSTM path only)
H = W = 16       # spatial
C_IN = 4         # input channels
D = 64           # net_vlad.dim
K = 64           # net_vlad.num_clusters  (D * K == 4096 == image_dim)
E = 32           # embedding_dim
N = H * W
IMAGE_DIM = D * K
assert IMAGE_DIM == 4096


# ------------------------- fused kernel ------------------------------------
def make_fused_kernel(T):
    """Build the fused image+caption kernel for a static max caption length T."""

    def kernel(img_ref, emb_ref, mask_ref,
               wb_ref, bb_ref, wa_ref, ba_ref, cent_ref,
               wi_hbm_ref, bi_ref,
               wih_ref, whh_ref, bl_ref, wt_ref, bt_ref,
               img_out_ref, cap_out_ref,
               wi_vmem, wi_sem):
        # ---- start streaming W_i (largest input by far) so its HBM->VMEM DMA
        # overlaps the whole softmax / einsum / norm phase that doesn't need it.
        wi_copy = pltpu.make_async_copy(wi_hbm_ref, wi_vmem, wi_sem)
        wi_copy.start()

        # ============== image path (real batch B, no padded rows) =============
        img = img_ref[...]                                   # (B*N, C_IN) f32
        wb = wb_ref[...]                                     # (C_IN, D)   f32
        # base 1x1 conv as C_IN broadcast FMAs on the VPU (a 4-deep contraction
        # would waste an MXU weight load).
        feat = bb_ref[...] + img[:, 0:1] * wb[0:1, :]
        for ci in range(1, C_IN):
            feat = feat + img[:, ci:ci + 1] * wb[ci:ci + 1, :]   # (B*N, D) f32

        # NetVLAD soft assignment (1x1 conv D->K) + softmax over clusters.
        logits = jnp.dot(feat.astype(jnp.bfloat16), wa_ref[...],
                         preferred_element_type=jnp.float32) + ba_ref[...]   # (B*N, K)
        logits = logits - jnp.max(logits, axis=-1, keepdims=True)
        ex = jnp.exp(logits)                                 # f32 (v5e EUP has no bf16)
        a = ex * pl.reciprocal(jnp.sum(ex, axis=-1, keepdims=True), approx=True)

        a3 = a.reshape(B, N, K)          # leading-dim split (N % 8 == 0): layout-free
        f3 = feat.reshape(B, N, D)
        a_sum = jnp.sum(a3, axis=1)                                          # (B, K)
        # vlad[b,k,d] = sum_n a[b,n,k] * (feat[b,n,d] - c[k,d])
        vlad = jnp.einsum('bnk,bnd->bkd', a3.astype(jnp.bfloat16),
                          f3.astype(jnp.bfloat16),
                          preferred_element_type=jnp.float32)                # (B, K, D)
        vlad = vlad - a_sum[:, :, None] * cent_ref[...]
        # intra-normalization (per cluster)
        vlad = vlad * lax.rsqrt(jnp.sum(vlad * vlad, axis=-1, keepdims=True) + 1e-12)
        # global L2 scale computed on (B,K,D); folded in AFTER the W_i matmul
        # (per-row scalar on one vreg instead of rescaling the whole tensor).
        gsq = jnp.sum(jnp.sum(vlad * vlad, axis=-1), axis=-1, keepdims=True)  # (B, 1)
        g = lax.rsqrt(gsq + 1e-12)

        # cast BEFORE the flatten so the one remaining relayout moves bf16 bytes.
        # TODO(synk): a two-contracting-dim 'bkd,kde->be' dot_general would avoid
        # this relayout but Mosaic's single-contracting-dim lowering rejects it.
        q = vlad.astype(jnp.bfloat16).reshape(B, K * D)                       # (B, 4096)
        wi_copy.wait()                                       # W_i resident in VMEM now
        x = jnp.dot(q, wi_vmem[...], preferred_element_type=jnp.float32)      # (B, E)
        x = g * x + bi_ref[...]
        # x / torch.norm(x, dim=1, keepdim=True)  (no epsilon, matching torch)
        x = x * lax.rsqrt(jnp.sum(x * x, axis=-1, keepdims=True))
        img_out_ref[...] = x

        # ============== caption path: LSTM (packed-seq) + ReLU + W_t ===========
        # input projection hoisted out of the recurrence: one (T*BP, E)@(E, 4E)
        # matmul; b_ih + b_hh pre-fused host-side into bl_ref.
        gates_x = jnp.dot(emb_ref[...], wih_ref[...],
                          preferred_element_type=jnp.float32) + bl_ref[...]   # (T*BP, 4E)
        mask = mask_ref[...]                                                  # (T*BP, 1)
        h = jnp.zeros((BP, E), jnp.float32)
        c = jnp.zeros((BP, E), jnp.float32)
        # TODO(synk): keep W_hh resident in the MXU across steps
        # (pltpu.matmul_push_rhs / matmul_acc_lhs / matmul_pop) to drop the
        # per-step weight re-push from the serial recurrence chain.
        for t in range(T):   # T is a small static trace-time constant -> fully unrolled
            gx = gates_x[t * BP:(t + 1) * BP, :]                              # (BP, 4E)
            m = mask[t * BP:(t + 1) * BP, :] > 0.0                            # (BP, 1)
            gates = gx + jnp.dot(h.astype(jnp.bfloat16), whh_ref[...],
                                 preferred_element_type=jnp.float32)          # [i, f, g, o]
            i_g = jax.nn.sigmoid(gates[:, 0:E])
            f_g = jax.nn.sigmoid(gates[:, E:2 * E])
            g_g = jnp.tanh(gates[:, 2 * E:3 * E])
            o_g = jax.nn.sigmoid(gates[:, 3 * E:4 * E])
            c_new = f_g * c + i_g * g_g
            h_new = o_g * jnp.tanh(c_new)
            # pack_padded_sequence semantics: past a caption's length the state
            # freezes, so the final h equals h_n of the packed LSTM.
            h = jnp.where(m, h_new, h)
            c = jnp.where(m, c_new, c)
        h = jnp.maximum(h, 0.0)                                               # F.relu
        y = jnp.dot(h.astype(jnp.bfloat16), wt_ref[...],
                    preferred_element_type=jnp.float32) + bt_ref[...]         # (BP, E)
        y = y * lax.rsqrt(jnp.sum(y * y, axis=-1, keepdims=True))
        cap_out_ref[...] = y

    return kernel


# ------------------------- host-side wrappers -------------------------------
def _prepare_params(p):
    """Cast / fuse the logical (PyTorch-layout) params into kernel form."""
    bf = jnp.bfloat16
    return {
        'emb_weight': p['emb_weight'],
        'W_base': p['W_base'], 'b_base': p['b_base'],          # f32 (VPU base conv)
        'W_assign': p['W_assign'].astype(bf), 'b_assign': p['b_assign'],
        'centroids': p['centroids'],
        'W_i': p['W_i'].astype(bf),                            # (4096, 32) unpadded, streamed
        'b_i': p['b_i'],
        'W_ih': p['W_ih'].astype(bf), 'W_hh': p['W_hh'].astype(bf),
        'b_lstm': p['b_ih'] + p['b_hh'],                       # fused LSTM bias (i,f,g,o)
        'W_t': p['W_t'].astype(bf), 'b_t': p['b_t'],
    }


def forward(images_nhwc, captions, params, word_dictionary, padding_idx=0):
    kp = _prepare_params(params)

    # ---- captions: host-side glue (tokenization / dictionary / padding) ----
    # TODO(synk): string tokenization & dictionary lookup are host-side Python glue.
    word_indices = [[word_dictionary.get(w, padding_idx) for w in cap.split()]
                    for cap in captions]
    lengths = [len(w) for w in word_indices]
    bsz, T = len(word_indices), max(lengths)
    assert bsz == images_nhwc.shape[0] == B
    padded = np.full((bsz, T), padding_idx, np.int32)
    for i, L in enumerate(lengths):
        padded[i, :L] = word_indices[i]
    idx = jnp.asarray(padded)                                        # (B, T)
    emb = jnp.take(kp['emb_weight'], idx, axis=0)                    # (B, T, E) gather
    emb = jnp.transpose(emb, (1, 0, 2))                              # (T, B, E)
    emb = jnp.zeros((T, BP, E), jnp.float32).at[:, :B, :].set(emb)   # pad batch -> BP
    emb_flat = emb.reshape(T * BP, E).astype(jnp.bfloat16)           # (T*BP, E)

    lens = jnp.zeros((BP,), jnp.int32).at[:B].set(jnp.asarray(lengths, jnp.int32))
    mask = (jnp.arange(T, dtype=jnp.int32)[:, None] < lens[None, :]).astype(jnp.float32)
    mask_flat = mask.reshape(T * BP, 1)                              # (T*BP, 1)

    # ---- images: REAL batch B (no padding rows), flattened spatial ----
    img_flat = images_nhwc.astype(jnp.float32).reshape(B * N, C_IN)  # (B*N, C_IN)

    kernel = make_fused_kernel(T)
    vmem_spec = pl.BlockSpec(memory_space=pltpu.MemorySpace.VMEM)
    in_specs = ([vmem_spec] * 8
                + [pl.BlockSpec(memory_space=pl.ANY)]                # W_i: streamed manually
                + [vmem_spec] * 6)
    out_shape = (jax.ShapeDtypeStruct((B, E), jnp.float32),
                 jax.ShapeDtypeStruct((BP, E), jnp.float32))
    x, v_pad = pl.pallas_call(
        kernel,
        out_shape=out_shape,
        in_specs=in_specs,
        scratch_shapes=[pltpu.VMEM((IMAGE_DIM, E), jnp.bfloat16),    # W_i landing buffer
                        pltpu.SemaphoreType.DMA],
    )(img_flat, emb_flat, mask_flat,
      kp['W_base'], kp['b_base'], kp['W_assign'], kp['b_assign'], kp['centroids'],
      kp['W_i'], kp['b_i'],
      kp['W_ih'], kp['W_hh'], kp['b_lstm'], kp['W_t'], kp['b_t'])

    v = v_pad[:B, :]
    assert x.shape == v.shape
    return x, v


# ------------------------- deterministic parameter init --------------------
def init_params(key, vocab_size):
    ks = jax.random.split(key, 12)
    sc = 0.1
    emb_weight = sc * jax.random.normal(ks[0], (vocab_size + 1, E), jnp.float32)
    emb_weight = emb_weight.at[0].set(0.0)                # padding_idx row = 0
    return {
        # text side (x @ W_ih layout, gate order i,f,g,o; transpose real torch ckpts)
        'emb_weight': emb_weight,
        'W_ih': sc * jax.random.normal(ks[1], (E, 4 * E), jnp.float32),
        'W_hh': sc * jax.random.normal(ks[2], (E, 4 * E), jnp.float32),
        'b_ih': sc * jax.random.normal(ks[3], (1, 4 * E), jnp.float32),
        'b_hh': sc * jax.random.normal(ks[4], (1, 4 * E), jnp.float32),
        'W_t': sc * jax.random.normal(ks[5], (E, E), jnp.float32),
        'b_t': sc * jax.random.normal(ks[6], (1, E), jnp.float32),
        # synthetic image model (1x1 conv base + NetVLAD)
        'W_base': sc * jax.random.normal(ks[7], (C_IN, D), jnp.float32),
        'b_base': sc * jax.random.normal(ks[8], (1, D), jnp.float32),
        'W_assign': sc * jax.random.normal(ks[9], (D, K), jnp.float32),
        'b_assign': sc * jax.random.normal(ks[10], (1, K), jnp.float32),
        'centroids': sc * jax.random.normal(ks[11], (K, D), jnp.float32),
        # W_i: Linear(4096, E)
        'W_i': sc * jax.random.normal(jax.random.fold_in(key, 100),
                                      (IMAGE_DIM, E), jnp.float32),
        'b_i': sc * jax.random.normal(jax.random.fold_in(key, 101),
                                      (1, E), jnp.float32),
    }


if __name__ == "__main__":
    key = jax.random.PRNGKey(0)
    known_words = ["a", "the", "cat", "dog", "sits", "on", "mat", "runs", "fast", "big"]
    word_dictionary = {w: i + 1 for i, w in enumerate(known_words)}

    params = init_params(key, len(known_words))
    images = jax.random.normal(jax.random.fold_in(key, 7), (B, H, W, C_IN), jnp.float32)
    captions = ["the cat sits on the mat",        # length 6
                "a big dog runs zoom"]            # length 5 ("zoom" -> padding idx)

    x, v = forward(images, captions, params, word_dictionary)
    x = jax.block_until_ready(x)
    v = jax.block_until_ready(v)

    assert x.shape == (B, E) and v.shape == (B, E)
    assert bool(jnp.all(jnp.isfinite(x))) and bool(jnp.all(jnp.isfinite(v)))
    # both outputs are L2-normalized per row
    assert bool(jnp.allclose(jnp.sum(x * x, axis=1), 1.0, atol=1e-4))
    assert bool(jnp.allclose(jnp.sum(v * v, axis=1), 1.0, atol=1e-4))
    print("KERNEL_OK")
</pallas_src>

<mosaic_0001>
module attributes {stable_mosaic.version = 11 : i64} {
  func.func @kernel(%arg0: memref<512x4xf32, #tpu.memory_space<vmem>>, %arg1: memref<48x32xbf16, #tpu.memory_space<vmem>>, %arg2: memref<48x1xf32, #tpu.memory_space<vmem>>, %arg3: memref<4x64xf32, #tpu.memory_space<vmem>>, %arg4: memref<1x64xf32, #tpu.memory_space<vmem>>, %arg5: memref<64x64xbf16, #tpu.memory_space<vmem>>, %arg6: memref<1x64xf32, #tpu.memory_space<vmem>>, %arg7: memref<64x64xf32, #tpu.memory_space<vmem>>, %arg8: memref<4096x32xbf16, #tpu.memory_space<any>>, %arg9: memref<1x32xf32, #tpu.memory_space<vmem>>, %arg10: memref<32x128xbf16, #tpu.memory_space<vmem>>, %arg11: memref<32x128xbf16, #tpu.memory_space<vmem>>, %arg12: memref<1x128xf32, #tpu.memory_space<vmem>>, %arg13: memref<32x32xbf16, #tpu.memory_space<vmem>>, %arg14: memref<1x32xf32, #tpu.memory_space<vmem>>, %arg15: memref<2x32xf32, #tpu.memory_space<vmem>>, %arg16: memref<8x32xf32, #tpu.memory_space<vmem>>, %arg17: memref<4096x32xbf16, #tpu.memory_space<vmem>>, %arg18: memref<!tpu.dma_semaphore, #tpu.memory_space<semaphore_mem>>) attributes {dimension_semantics = [], scalar_prefetch = 0 : i64, scratch_operands = 2 : i64, tpu.core_type = #tpu.core_type<tc>} {
    tpu.enqueue_dma source(%arg8 : memref<4096x32xbf16, #tpu.memory_space<any>>) target(%arg17 : memref<4096x32xbf16, #tpu.memory_space<vmem>>) target_semaphore(%arg18 : memref<!tpu.dma_semaphore, #tpu.memory_space<semaphore_mem>>)
    %c0 = arith.constant 0 : index
    %c0_0 = arith.constant 0 : index
    %0 = vector.load %arg0[%c0, %c0_0] : memref<512x4xf32, #tpu.memory_space<vmem>>, vector<512x4xf32>
    %c0_1 = arith.constant 0 : index
    %c0_2 = arith.constant 0 : index
    %1 = vector.load %arg3[%c0_1, %c0_2] : memref<4x64xf32, #tpu.memory_space<vmem>>, vector<4x64xf32>
    %c0_3 = arith.constant 0 : index
    %c0_4 = arith.constant 0 : index
    %2 = vector.load %arg4[%c0_3, %c0_4] : memref<1x64xf32, #tpu.memory_space<vmem>>, vector<1x64xf32>
    %3 = vector.extract_strided_slice %0 {offsets = [0, 0], sizes = [512, 1], strides = [1, 1]} : vector<512x4xf32> to vector<512x1xf32>
    %4 = vector.extract_strided_slice %1 {offsets = [0, 0], sizes = [1, 64], strides = [1, 1]} : vector<4x64xf32> to vector<1x64xf32>
    %5 = vector.broadcast %3 : vector<512x1xf32> to vector<512x64xf32>
    %6 = vector.broadcast %4 : vector<1x64xf32> to vector<512x64xf32>
    %7 = arith.mulf %5, %6 : vector<512x64xf32>
    %8 = vector.broadcast %2 : vector<1x64xf32> to vector<512x64xf32>
    %9 = arith.addf %8, %7 : vector<512x64xf32>
    %10 = vector.extract_strided_slice %0 {offsets = [0, 1], sizes = [512, 1], strides = [1, 1]} : vector<512x4xf32> to vector<512x1xf32>
    %11 = vector.extract_strided_slice %1 {offsets = [1, 0], sizes = [1, 64], strides = [1, 1]} : vector<4x64xf32> to vector<1x64xf32>
    %12 = vector.broadcast %10 : vector<512x1xf32> to vector<512x64xf32>
    %13 = vector.broadcast %11 : vector<1x64xf32> to vector<512x64xf32>
    %14 = arith.mulf %12, %13 : vector<512x64xf32>
    %15 = arith.addf %9, %14 : vector<512x64xf32>
    %16 = vector.extract_strided_slice %0 {offsets = [0, 2], sizes = [512, 1], strides = [1, 1]} : vector<512x4xf32> to vector<512x1xf32>
    %17 = vector.extract_strided_slice %1 {offsets = [2, 0], sizes = [1, 64], strides = [1, 1]} : vector<4x64xf32> to vector<1x64xf32>
    %18 = vector.broadcast %16 : vector<512x1xf32> to vector<512x64xf32>
    %19 = vector.broadcast %17 : vector<1x64xf32> to vector<512x64xf32>
    %20 = arith.mulf %18, %19 : vector<512x64xf32>
    %21 = arith.addf %15, %20 : vector<512x64xf32>
    %22 = vector.extract_strided_slice %0 {offsets = [0, 3], sizes = [512, 1], strides = [1, 1]} : vector<512x4xf32> to vector<512x1xf32>
    %23 = vector.extract_strided_slice %1 {offsets = [3, 0], sizes = [1, 64], strides = [1, 1]} : vector<4x64xf32> to vector<1x64xf32>
    %24 = vector.broadcast %22 : vector<512x1xf32> to vector<512x64xf32>
    %25 = vector.broadcast %23 : vector<1x64xf32> to vector<512x64xf32>
    %26 = arith.mulf %24, %25 : vector<512x64xf32>
    %27 = arith.addf %21, %26 : vector<512x64xf32>
    %28 = arith.truncf %27 : vector<512x64xf32> to vector<512x64xbf16>
    %c0_5 = arith.constant 0 : index
    %c0_6 = arith.constant 0 : index
    %29 = vector.load %arg5[%c0_5, %c0_6] : memref<64x64xbf16, #tpu.memory_space<vmem>>, vector<64x64xbf16>
    %cst = arith.constant dense<0.000000e+00> : vector<512x64xf32>
    %30 = tpu.matmul %28, %29, %cst {dimension_numbers = #tpu.dot_dimension_numbers<[1], [0], [0], [1], [0, 0, 1, 1], [], []>} : vector<512x64xbf16>, vector<64x64xbf16>, vector<512x64xf32> -> vector<512x64xf32>
    %c0_7 = arith.constant 0 : index
    %c0_8 = arith.constant 0 : index
    %31 = vector.load %arg6[%c0_7, %c0_8] : memref<1x64xf32, #tpu.memory_space<vmem>>, vector<1x64xf32>
    %32 = vector.broadcast %31 : vector<1x64xf32> to vector<512x64xf32>
    %33 = arith.addf %30, %32 : vector<512x64xf32>
    %cst_9 = arith.constant dense<0xFF800000> : vector<512xf32>
    %34 = vector.multi_reduction <maximumf>, %33, %cst_9 [1] : vector<512x64xf32> to vector<512xf32>
    %35 = vector.shape_cast %34 : vector<512xf32> to vector<512x1xf32>
    %36 = vector.broadcast %35 : vector<512x1xf32> to vector<512x64xf32>
    %37 = arith.subf %33, %36 : vector<512x64xf32>
    %38 = math.exp %37 : vector<512x64xf32>
    %cst_10 = arith.constant dense<0.000000e+00> : vector<512xf32>
    %39 = vector.multi_reduction <add>, %38, %cst_10 [1] : vector<512x64xf32> to vector<512xf32>
    %40 = vector.shape_cast %39 : vector<512xf32> to vector<512x1xf32>
    %41 = tpu.reciprocal %40 {approx = true} : vector<512x1xf32> -> vector<512x1xf32>
    %42 = vector.broadcast %41 : vector<512x1xf32> to vector<512x64xf32>
    %43 = arith.mulf %38, %42 : vector<512x64xf32>
    %44 = vector.shape_cast %43 : vector<512x64xf32> to vector<2x256x64xf32>
    %45 = vector.shape_cast %27 : vector<512x64xf32> to vector<2x256x64xf32>
    %cst_11 = arith.constant dense<0.000000e+00> : vector<2x64xf32>
    %46 = vector.multi_reduction <add>, %44, %cst_11 [1] : vector<2x256x64xf32> to vector<2x64xf32>
    %47 = arith.truncf %44 : vector<2x256x64xf32> to vector<2x256x64xbf16>
    %48 = arith.truncf %45 : vector<2x256x64xf32> to vector<2x256x64xbf16>
    "tpu.trace_start"() <{level = 10 : i32, message = "bnk,bnd->bkd"}> : () -> ()
    %cst_12 = arith.constant dense<0.000000e+00> : vector<2x64x64xf32>
    %49 = tpu.matmul %47, %48, %cst_12 {dimension_numbers = #tpu.dot_dimension_numbers<[1], [1], [2], [2], [0, 0, 0, 2, 1, 2], [0], [0]>} : vector<2x256x64xbf16>, vector<2x256x64xbf16>, vector<2x64x64xf32> -> vector<2x64x64xf32>
    "tpu.trace_stop"() : () -> ()
    %50 = vector.shape_cast %46 : vector<2x64xf32> to vector<2x64x1xf32>
    %c0_13 = arith.constant 0 : index
    %c0_14 = arith.constant 0 : index
    %51 = vector.load %arg7[%c0_13, %c0_14] : memref<64x64xf32, #tpu.memory_space<vmem>>, vector<64x64xf32>
    %52 = vector.shape_cast %51 : vector<64x64xf32> to vector<1x64x64xf32>
    %53 = vector.broadcast %50 : vector<2x64x1xf32> to vector<2x64x64xf32>
    %54 = vector.broadcast %52 : vector<1x64x64xf32> to vector<2x64x64xf32>
    %55 = arith.mulf %53, %54 : vector<2x64x64xf32>
    %56 = arith.subf %49, %55 : vector<2x64x64xf32>
    %57 = arith.mulf %56, %56 : vector<2x64x64xf32>
    %cst_15 = arith.constant dense<0.000000e+00> : vector<2x64xf32>
    %58 = vector.multi_reduction <add>, %57, %cst_15 [2] : vector<2x64x64xf32> to vector<2x64xf32>
    %59 = vector.shape_cast %58 : vector<2x64xf32> to vector<2x64x1xf32>
    %cst_16 = arith.constant 9.99999996E-13 : f32
    %60 = vector.broadcast %cst_16 : f32 to vector<2x64x1xf32>
    %61 = arith.addf %59, %60 : vector<2x64x1xf32>
    %62 = math.rsqrt %61 : vector<2x64x1xf32>
    %63 = vector.broadcast %62 : vector<2x64x1xf32> to vector<2x64x64xf32>
    %64 = arith.mulf %56, %63 : vector<2x64x64xf32>
    %65 = arith.mulf %64, %64 : vector<2x64x64xf32>
    %cst_17 = arith.constant dense<0.000000e+00> : vector<2x64xf32>
    %66 = vector.multi_reduction <add>, %65, %cst_17 [2] : vector<2x64x64xf32> to vector<2x64xf32>
    %cst_18 = arith.constant dense<0.000000e+00> : vector<2xf32>
    %67 = vector.multi_reduction <add>, %66, %cst_18 [1] : vector<2x64xf32> to vector<2xf32>
    %68 = vector.shape_cast %67 : vector<2xf32> to vector<2x1xf32>
    %cst_19 = arith.constant 9.99999996E-13 : f32
    %69 = vector.broadcast %cst_19 : f32 to vector<2x1xf32>
    %70 = arith.addf %68, %69 : vector<2x1xf32>
    %71 = math.rsqrt %70 : vector<2x1xf32>
    %72 = arith.truncf %64 : vector<2x64x64xf32> to vector<2x64x64xbf16>
    %73 = vector.shape_cast %72 : vector<2x64x64xbf16> to vector<2x4096xbf16>
    tpu.wait_dma2 semaphore(%arg18 : memref<!tpu.dma_semaphore, #tpu.memory_space<semaphore_mem>>) src(%arg8 : memref<4096x32xbf16, #tpu.memory_space<any>>) dst(%arg17 : memref<4096x32xbf16, #tpu.memory_space<vmem>>)
    %c0_20 = arith.constant 0 : index
    %c0_21 = arith.constant 0 : index
    %74 = vector.load %arg17[%c0_20, %c0_21] : memref<4096x32xbf16, #tpu.memory_space<vmem>>, vector<4096x32xbf16>
    %cst_22 = arith.constant dense<0.000000e+00> : vector<2x32xf32>
    %75 = tpu.matmul %73, %74, %cst_22 {dimension_numbers = #tpu.dot_dimension_numbers<[1], [0], [0], [1], [0, 0, 1, 1], [], []>} : vector<2x4096xbf16>, vector<4096x32xbf16>, vector<2x32xf32> -> vector<2x32xf32>
    %76 = vector.broadcast %71 : vector<2x1xf32> to vector<2x32xf32>
    %77 = arith.mulf %76, %75 : vector<2x32xf32>
    %c0_23 = arith.constant 0 : index
    %c0_24 = arith.constant 0 : index
    %78 = vector.load %arg9[%c0_23, %c0_24] : memref<1x32xf32, #tpu.memory_space<vmem>>, vector<1x32xf32>
    %79 = vector.broadcast %78 : vector<1x32xf32> to vector<2x32xf32>
    %80 = arith.addf %77, %79 : vector<2x32xf32>
    %81 = arith.mulf %80, %80 : vector<2x32xf32>
    %cst_25 = arith.constant dense<0.000000e+00> : vector<2xf32>
    %82 = vector.multi_reduction <add>, %81, %cst_25 [1] : vector<2x32xf32> to vector<2xf32>
    %83 = vector.shape_cast %82 : vector<2xf32> to vector<2x1xf32>
    %84 = math.rsqrt %83 : vector<2x1xf32>
    %85 = vector.broadcast %84 : vector<2x1xf32> to vector<2x32xf32>
    %86 = arith.mulf %80, %85 : vector<2x32xf32>
    %c0_26 = arith.constant 0 : index
    %c0_27 = arith.constant 0 : index
    %87 = vector.load %arg15[%c0_26, %c0_27] : memref<2x32xf32, #tpu.memory_space<vmem>>, vector<2x32xf32>
    tpu.vector_store %arg15[%c0_26, %c0_27], %86 {strides = array<i32>} : memref<2x32xf32, #tpu.memory_space<vmem>>, vector<2x32xf32>,
    %c0_28 = arith.constant 0 : index
    %c0_29 = arith.constant 0 : index
    %88 = vector.load %arg1[%c0_28, %c0_29] : memref<48x32xbf16, #tpu.memory_space<vmem>>, vector<48x32xbf16>
    %c0_30 = arith.constant 0 : index
    %c0_31 = arith.constant 0 : index
    %89 = vector.load %arg10[%c0_30, %c0_31] : memref<32x128xbf16, #tpu.memory_space<vmem>>, vector<32x128xbf16>
    %cst_32 = arith.constant dense<0.000000e+00> : vector<48x128xf32>
    %90 = tpu.matmul %88, %89, %cst_32 {dimension_numbers = #tpu.dot_dimension_numbers<[1], [0], [0], [1], [0, 0, 1, 1], [], []>} : vector<48x32xbf16>, vector<32x128xbf16>, vector<48x128xf32> -> vector<48x128xf32>
    %c0_33 = arith.constant 0 : index
    %c0_34 = arith.constant 0 : index
    %91 = vector.load %arg12[%c0_33, %c0_34] : memref<1x128xf32, #tpu.memory_space<vmem>>, vector<1x128xf32>
    %92 = vector.broadcast %91 : vector<1x128xf32> to vector<48x128xf32>
    %93 = arith.addf %90, %92 : vector<48x128xf32>
    %c0_35 = arith.constant 0 : index
    %c0_36 = arith.constant 0 : index
    %94 = vector.load %arg2[%c0_35, %c0_36] : memref<48x1xf32, #tpu.memory_space<vmem>>, vector<48x1xf32>
    %cst_37 = arith.constant 0.000000e+00 : f32
    %95 = vector.broadcast %cst_37 : f32 to vector<8x32xf32>
    %cst_38 = arith.constant 0.000000e+00 : f32
    %96 = vector.broadcast %cst_38 : f32 to vector<8x32xf32>
    %97 = vector.extract_strided_slice %93 {offsets = [0, 0], sizes = [8, 128], strides = [1, 1]} : vector<48x128xf32> to vector<8x128xf32>
    %98 = vector.extract_strided_slice %94 {offsets = [0, 0], sizes = [8, 1], strides = [1, 1]} : vector<48x1xf32> to vector<8x1xf32>
    %cst_39 = arith.constant 0.000000e+00 : f32
    %99 = vector.broadcast %cst_39 : f32 to vector<8x1xf32>
    %100 = arith.cmpf ogt, %98, %99 : vector<8x1xf32>
    %101 = arith.truncf %95 : vector<8x32xf32> to vector<8x32xbf16>
    %c0_40 = arith.constant 0 : index
    %c0_41 = arith.constant 0 : index
    %102 = vector.load %arg11[%c0_40, %c0_41] : memref<32x128xbf16, #tpu.memory_space<vmem>>, vector<32x128xbf16>
    %cst_42 = arith.constant dense<0.000000e+00> : vector<8x128xf32>
    %103 = tpu.matmul %101, %102, %cst_42 {dimension_numbers = #tpu.dot_dimension_numbers<[1], [0], [0], [1], [0, 0, 1, 1], [], []>} : vector<8x32xbf16>, vector<32x128xbf16>, vector<8x128xf32> -> vector<8x128xf32>
    %104 = arith.addf %97, %103 : vector<8x128xf32>
    %105 = vector.extract_strided_slice %104 {offsets = [0, 0], sizes = [8, 32], strides = [1, 1]} : vector<8x128xf32> to vector<8x32xf32>
    %106 = arith.negf %105 : vector<8x32xf32>
    %107 = math.exp %106 : vector<8x32xf32>
    %cst_43 = arith.constant 1.000000e+00 : f32
    %108 = vector.broadcast %cst_43 : f32 to vector<8x32xf32>
    %109 = arith.addf %108, %107 : vector<8x32xf32>
    %110 = arith.divf %108, %109 : vector<8x32xf32>
    %111 = vector.extract_strided_slice %104 {offsets = [0, 32], sizes = [8, 32], strides = [1, 1]} : vector<8x128xf32> to vector<8x32xf32>
    %112 = arith.negf %111 : vector<8x32xf32>
    %113 = math.exp %112 : vector<8x32xf32>
    %cst_44 = arith.constant 1.000000e+00 : f32
    %114 = vector.broadcast %cst_44 : f32 to vector<8x32xf32>
    %115 = arith.addf %114, %113 : vector<8x32xf32>
    %116 = arith.divf %114, %115 : vector<8x32xf32>
    %117 = vector.extract_strided_slice %104 {offsets = [0, 64], sizes = [8, 32], strides = [1, 1]} : vector<8x128xf32> to vector<8x32xf32>
    %118 = math.tanh %117 : vector<8x32xf32>
    %119 = vector.extract_strided_slice %104 {offsets = [0, 96], sizes = [8, 32], strides = [1, 1]} : vector<8x128xf32> to vector<8x32xf32>
    %120 = arith.negf %119 : vector<8x32xf32>
    %121 = math.exp %120 : vector<8x32xf32>
    %cst_45 = arith.constant 1.000000e+00 : f32
    %122 = vector.broadcast %cst_45 : f32 to vector<8x32xf32>
    %123 = arith.addf %122, %121 : vector<8x32xf32>
    %124 = arith.divf %122, %123 : vector<8x32xf32>
    %125 = arith.mulf %116, %96 : vector<8x32xf32>
    %126 = arith.mulf %110, %118 : vector<8x32xf32>
    %127 = arith.addf %125, %126 : vector<8x32xf32>
    %128 = math.tanh %127 : vector<8x32xf32>
    %129 = arith.mulf %124, %128 : vector<8x32xf32>
    %130 = vector.shape_cast %100 : vector<8x1xi1> to vector<8x1xi1>
    %131 = vector.broadcast %130 : vector<8x1xi1> to vector<8x32xi1>
    %132 = arith.select %131, %129, %95 : vector<8x32xi1>, vector<8x32xf32>
    %133 = vector.shape_cast %100 : vector<8x1xi1> to vector<8x1xi1>
    %134 = vector.broadcast %133 : vector<8x1xi1> to vector<8x32xi1>
    %135 = arith.select %134, %127, %96 : vector<8x32xi1>, vector<8x32xf32>
    %136 = vector.extract_strided_slice %93 {offsets = [8, 0], sizes = [8, 128], strides = [1, 1]} : vector<48x128xf32> to vector<8x128xf32>
    %137 = vector.extract_strided_slice %94 {offsets = [8, 0], sizes = [8, 1], strides = [1, 1]} : vector<48x1xf32> to vector<8x1xf32>
    %cst_46 = arith.constant 0.000000e+00 : f32
    %138 = vector.broadcast %cst_46 : f32 to vector<8x1xf32>
    %139 = arith.cmpf ogt, %137, %138 : vector<8x1xf32>
    %140 = arith.truncf %132 : vector<8x32xf32> to vector<8x32xbf16>
    %c0_47 = arith.constant 0 : index
    %c0_48 = arith.constant 0 : index
    %141 = vector.load %arg11[%c0_47, %c0_48] : memref<32x128xbf16, #tpu.memory_space<vmem>>, vector<32x128xbf16>
    %cst_49 = arith.constant dense<0.000000e+00> : vector<8x128xf32>
    %142 = tpu.matmul %140, %141, %cst_49 {dimension_numbers = #tpu.dot_dimension_numbers<[1], [0], [0], [1], [0, 0, 1, 1], [], []>} : vector<8x32xbf16>, vector<32x128xbf16>, vector<8x128xf32> -> vector<8x128xf32>
    %143 = arith.addf %136, %142 : vector<8x128xf32>
    %144 = vector.extract_strided_slice %143 {offsets = [0, 0], sizes = [8, 32], strides = [1, 1]} : vector<8x128xf32> to vector<8x32xf32>
    %145 = arith.negf %144 : vector<8x32xf32>
    %146 = math.exp %145 : vector<8x32xf32>
    %cst_50 = arith.constant 1.000000e+00 : f32
    %147 = vector.broadcast %cst_50 : f32 to vector<8x32xf32>
    %148 = arith.addf %147, %146 : vector<8x32xf32>
    %149 = arith.divf %147, %148 : vector<8x32xf32>
    %150 = vector.extract_strided_slice %143 {offsets = [0, 32], sizes = [8, 32], strides = [1, 1]} : vector<8x128xf32> to vector<8x32xf32>
    %151 = arith.negf %150 : vector<8x32xf32>
    %152 = math.exp %151 : vector<8x32xf32>
    %cst_51 = arith.constant 1.000000e+00 : f32
    %153 = vector.broadcast %cst_51 : f32 to vector<8x32xf32>
    %154 = arith.addf %153, %152 : vector<8x32xf32>
    %155 = arith.divf %153, %154 : vector<8x32xf32>
    %156 = vector.extract_strided_slice %143 {offsets = [0, 64], sizes = [8, 32], strides = [1, 1]} : vector<8x128xf32> to vector<8x32xf32>
    %157 = math.tanh %156 : vector<8x32xf32>
    %158 = vector.extract_strided_slice %143 {offsets = [0, 96], sizes = [8, 32], strides = [1, 1]} : vector<8x128xf32> to vector<8x32xf32>
    %159 = arith.negf %158 : vector<8x32xf32>
    %160 = math.exp %159 : vector<8x32xf32>
    %cst_52 = arith.constant 1.000000e+00 : f32
    %161 = vector.broadcast %cst_52 : f32 to vector<8x32xf32>
    %162 = arith.addf %161, %160 : vector<8x32xf32>
    %163 = arith.divf %161, %162 : vector<8x32xf32>
    %164 = arith.mulf %155, %135 : vector<8x32xf32>
    %165 = arith.mulf %149, %157 : vector<8x32xf32>
    %166 = arith.addf %164, %165 : vector<8x32xf32>
    %167 = math.tanh %166 : vector<8x32xf32>
    %168 = arith.mulf %163, %167 : vector<8x32xf32>
    %169 = vector.shape_cast %139 : vector<8x1xi1> to vector<8x1xi1>
    %170 = vector.broadcast %169 : vector<8x1xi1> to vector<8x32xi1>
    %171 = arith.select %170, %168, %132 : vector<8x32xi1>, vector<8x32xf32>
    %172 = vector.shape_cast %139 : vector<8x1xi1> to vector<8x1xi1>
    %173 = vector.broadcast %172 : vector<8x1xi1> to vector<8x32xi1>
    %174 = arith.select %173, %166, %135 : vector<8x32xi1>, vector<8x32xf32>
    %175 = vector.extract_strided_slice %93 {offsets = [16, 0], sizes = [8, 128], strides = [1, 1]} : vector<48x128xf32> to vector<8x128xf32>
    %176 = vector.extract_strided_slice %94 {offsets = [16, 0], sizes = [8, 1], strides = [1, 1]} : vector<48x1xf32> to vector<8x1xf32>
    %cst_53 = arith.constant 0.000000e+00 : f32
    %177 = vector.broadcast %cst_53 : f32 to vector<8x1xf32>
    %178 = arith.cmpf ogt, %176, %177 : vector<8x1xf32>
    %179 = arith.truncf %171 : vector<8x32xf32> to vector<8x32xbf16>
    %c0_54 = arith.constant 0 : index
    %c0_55 = arith.constant 0 : index
    %180 = vector.load %arg11[%c0_54, %c0_55] : memref<32x128xbf16, #tpu.memory_space<vmem>>, vector<32x128xbf16>
    %cst_56 = arith.constant dense<0.000000e+00> : vector<8x128xf32>
    %181 = tpu.matmul %179, %180, %cst_56 {dimension_numbers = #tpu.dot_dimension_numbers<[1], [0], [0], [1], [0, 0, 1, 1], [], []>} : vector<8x32xbf16>, vector<32x128xbf16>, vector<8x128xf32> -> vector<8x128xf32>
    %182 = arith.addf %175, %181 : vector<8x128xf32>
    %183 = vector.extract_strided_slice %182 {offsets = [0, 0], sizes = [8, 32], strides = [1, 1]} : vector<8x128xf32> to vector<8x32xf32>
    %184 = arith.negf %183 : vector<8x32xf32>
    %185 = math.exp %184 : vector<8x32xf32>
    %cst_57 = arith.constant 1.000000e+00 : f32
    %186 = vector.broadcast %cst_57 : f32 to vector<8x32xf32>
    %187 = arith.addf %186, %185 : vector<8x32xf32>
    %188 = arith.divf %186, %187 : vector<8x32xf32>
    %189 = vector.extract_strided_slice %182 {offsets = [0, 32], sizes = [8, 32], strides = [1, 1]} : vector<8x128xf32> to vector<8x32xf32>
    %190 = arith.negf %189 : vector<8x32xf32>
    %191 = math.exp %190 : vector<8x32xf32>
    %cst_58 = arith.constant 1.000000e+00 : f32
    %192 = vector.broadcast %cst_58 : f32 to vector<8x32xf32>
    %193 = arith.addf %192, %191 : vector<8x32xf32>
    %194 = arith.divf %192, %193 : vector<8x32xf32>
    %195 = vector.extract_strided_slice %182 {offsets = [0, 64], sizes = [8, 32], strides = [1, 1]} : vector<8x128xf32> to vector<8x32xf32>
    %196 = math.tanh %195 : vector<8x32xf32>
    %197 = vector.extract_strided_slice %182 {offsets = [0, 96], sizes = [8, 32], strides = [1, 1]} : vector<8x128xf32> to vector<8x32xf32>
    %198 = arith.negf %197 : vector<8x32xf32>
    %199 = math.exp %198 : vector<8x32xf32>
    %cst_59 = arith.constant 1.000000e+00 : f32
    %200 = vector.broadcast %cst_59 : f32 to vector<8x32xf32>
    %201 = arith.addf %200, %199 : vector<8x32xf32>
    %202 = arith.divf %200, %201 : vector<8x32xf32>
    %203 = arith.mulf %194, %174 : vector<8x32xf32>
    %204 = arith.mulf %188, %196 : vector<8x32xf32>
    %205 = arith.addf %203, %204 : vector<8x32xf32>
    %206 = math.tanh %205 : vector<8x32xf32>
    %207 = arith.mulf %202, %206 : vector<8x32xf32>
    %208 = vector.shape_cast %178 : vector<8x1xi1> to vector<8x1xi1>
    %209 = vector.broadcast %208 : vector<8x1xi1> to vector<8x32xi1>
    %210 = arith.select %209, %207, %171 : vector<8x32xi1>, vector<8x32xf32>
    %211 = vector.shape_cast %178 : vector<8x1xi1> to vector<8x1xi1>
    %212 = vector.broadcast %211 : vector<8x1xi1> to vector<8x32xi1>
    %213 = arith.select %212, %205, %174 : vector<8x32xi1>, vector<8x32xf32>
    %214 = vector.extract_strided_slice %93 {offsets = [24, 0], sizes = [8, 128], strides = [1, 1]} : vector<48x128xf32> to vector<8x128xf32>
    %215 = vector.extract_strided_slice %94 {offsets = [24, 0], sizes = [8, 1], strides = [1, 1]} : vector<48x1xf32> to vector<8x1xf32>
    %cst_60 = arith.constant 0.000000e+00 : f32
    %216 = vector.broadcast %cst_60 : f32 to vector<8x1xf32>
    %217 = arith.cmpf ogt, %215, %216 : vector<8x1xf32>
    %218 = arith.truncf %210 : vector<8x32xf32> to vector<8x32xbf16>
    %c0_61 = arith.constant 0 : index
    %c0_62 = arith.constant 0 : index
    %219 = vector.load %arg11[%c0_61, %c0_62] : memref<32x128xbf16, #tpu.memory_space<vmem>>, vector<32x128xbf16>
    %cst_63 = arith.constant dense<0.000000e+00> : vector<8x128xf32>
    %220 = tpu.matmul %218, %219, %cst_63 {dimension_numbers = #tpu.dot_dimension_numbers<[1], [0], [0], [1], [0, 0, 1, 1], [], []>} : vector<8x32xbf16>, vector<32x128xbf16>, vector<8x128xf32> -> vector<8x128xf32>
    %221 = arith.addf %214, %220 : vector<8x128xf32>
    %222 = vector.extract_strided_slice %221 {offsets = [0, 0], sizes = [8, 32], strides = [1, 1]} : vector<8x128xf32> to vector<8x32xf32>
    %223 = arith.negf %222 : vector<8x32xf32>
    %224 = math.exp %223 : vector<8x32xf32>
    %cst_64 = arith.constant 1.000000e+00 : f32
    %225 = vector.broadcast %cst_64 : f32 to vector<8x32xf32>
    %226 = arith.addf %225, %224 : vector<8x32xf32>
    %227 = arith.divf %225, %226 : vector<8x32xf32>
    %228 = vector.extract_strided_slice %221 {offsets = [0, 32], sizes = [8, 32], strides = [1, 1]} : vector<8x128xf32> to vector<8x32xf32>
    %229 = arith.negf %228 : vector<8x32xf32>
    %230 = math.exp %229 : vector<8x32xf32>
    %cst_65 = arith.constant 1.000000e+00 : f32
    %231 = vector.broadcast %cst_65 : f32 to vector<8x32xf32>
    %232 = arith.addf %231, %230 : vector<8x32xf32>
    %233 = arith.divf %231, %232 : vector<8x32xf32>
    %234 = vector.extract_strided_slice %221 {offsets = [0, 64], sizes = [8, 32], strides = [1, 1]} : vector<8x128xf32> to vector<8x32xf32>
    %235 = math.tanh %234 : vector<8x32xf32>
    %236 = vector.extract_strided_slice %221 {offsets = [0, 96], sizes = [8, 32], strides = [1, 1]} : vector<8x128xf32> to vector<8x32xf32>
    %237 = arith.negf %236 : vector<8x32xf32>
    %238 = math.exp %237 : vector<8x32xf32>
    %cst_66 = arith.constant 1.000000e+00 : f32
    %239 = vector.broadcast %cst_66 : f32 to vector<8x32xf32>
    %240 = arith.addf %239, %238 : vector<8x32xf32>
    %241 = arith.divf %239, %240 : vector<8x32xf32>
    %242 = arith.mulf %233, %213 : vector<8x32xf32>
    %243 = arith.mulf %227, %235 : vector<8x32xf32>
    %244 = arith.addf %242, %243 : vector<8x32xf32>
    %245 = math.tanh %244 : vector<8x32xf32>
    %246 = arith.mulf %241, %245 : vector<8x32xf32>
    %247 = vector.shape_cast %217 : vector<8x1xi1> to vector<8x1xi1>
    %248 = vector.broadcast %247 : vector<8x1xi1> to vector<8x32xi1>
    %249 = arith.select %248, %246, %210 : vector<8x32xi1>, vector<8x32xf32>
    %250 = vector.shape_cast %217 : vector<8x1xi1> to vector<8x1xi1>
    %251 = vector.broadcast %250 : vector<8x1xi1> to vector<8x32xi1>
    %252 = arith.select %251, %244, %213 : vector<8x32xi1>, vector<8x32xf32>
    %253 = vector.extract_strided_slice %93 {offsets = [32, 0], sizes = [8, 128], strides = [1, 1]} : vector<48x128xf32> to vector<8x128xf32>
    %254 = vector.extract_strided_slice %94 {offsets = [32, 0], sizes = [8, 1], strides = [1, 1]} : vector<48x1xf32> to vector<8x1xf32>
    %cst_67 = arith.constant 0.000000e+00 : f32
    %255 = vector.broadcast %cst_67 : f32 to vector<8x1xf32>
    %256 = arith.cmpf ogt, %254, %255 : vector<8x1xf32>
    %257 = arith.truncf %249 : vector<8x32xf32> to vector<8x32xbf16>
    %c0_68 = arith.constant 0 : index
    %c0_69 = arith.constant 0 : index
    %258 = vector.load %arg11[%c0_68, %c0_69] : memref<32x128xbf16, #tpu.memory_space<vmem>>, vector<32x128xbf16>
    %cst_70 = arith.constant dense<0.000000e+00> : vector<8x128xf32>
    %259 = tpu.matmul %257, %258, %cst_70 {dimension_numbers = #tpu.dot_dimension_numbers<[1], [0], [0], [1], [0, 0, 1, 1], [], []>} : vector<8x32xbf16>, vector<32x128xbf16>, vector<8x128xf32> -> vector<8x128xf32>
    %260 = arith.addf %253, %259 : vector<8x128xf32>
    %261 = vector.extract_strided_slice %260 {offsets = [0, 0], sizes = [8, 32], strides = [1, 1]} : vector<8x128xf32> to vector<8x32xf32>
    %262 = arith.negf %261 : vector<8x32xf32>
    %263 = math.exp %262 : vector<8x32xf32>
    %cst_71 = arith.constant 1.000000e+00 : f32
    %264 = vector.broadcast %cst_71 : f32 to vector<8x32xf32>
    %265 = arith.addf %264, %263 : vector<8x32xf32>
    %266 = arith.divf %264, %265 : vector<8x32xf32>
    %267 = vector.extract_strided_slice %260 {offsets = [0, 32], sizes = [8, 32], strides = [1, 1]} : vector<8x128xf32> to vector<8x32xf32>
    %268 = arith.negf %267 : vector<8x32xf32>
    %269 = math.exp %268 : vector<8x32xf32>
    %cst_72 = arith.constant 1.000000e+00 : f32
    %270 = vector.broadcast %cst_72 : f32 to vector<8x32xf32>
    %271 = arith.addf %270, %269 : vector<8x32xf32>
    %272 = arith.divf %270, %271 : vector<8x32xf32>
    %273 = vector.extract_strided_slice %260 {offsets = [0, 64], sizes = [8, 32], strides = [1, 1]} : vector<8x128xf32> to vector<8x32xf32>
    %274 = math.tanh %273 : vector<8x32xf32>
    %275 = vector.extract_strided_slice %260 {offsets = [0, 96], sizes = [8, 32], strides = [1, 1]} : vector<8x128xf32> to vector<8x32xf32>
    %276 = arith.negf %275 : vector<8x32xf32>
    %277 = math.exp %276 : vector<8x32xf32>
    %cst_73 = arith.constant 1.000000e+00 : f32
    %278 = vector.broadcast %cst_73 : f32 to vector<8x32xf32>
    %279 = arith.addf %278, %277 : vector<8x32xf32>
    %280 = arith.divf %278, %279 : vector<8x32xf32>
    %281 = arith.mulf %272, %252 : vector<8x32xf32>
    %282 = arith.mulf %266, %274 : vector<8x32xf32>
    %283 = arith.addf %281, %282 : vector<8x32xf32>
    %284 = math.tanh %283 : vector<8x32xf32>
    %285 = arith.mulf %280, %284 : vector<8x32xf32>
    %286 = vector.shape_cast %256 : vector<8x1xi1> to vector<8x1xi1>
    %287 = vector.broadcast %286 : vector<8x1xi1> to vector<8x32xi1>
    %288 = arith.select %287, %285, %249 : vector<8x32xi1>, vector<8x32xf32>
    %289 = vector.shape_cast %256 : vector<8x1xi1> to vector<8x1xi1>
    %290 = vector.broadcast %289 : vector<8x1xi1> to vector<8x32xi1>
    %291 = arith.select %290, %283, %252 : vector<8x32xi1>, vector<8x32xf32>
    %292 = vector.extract_strided_slice %93 {offsets = [40, 0], sizes = [8, 128], strides = [1, 1]} : vector<48x128xf32> to vector<8x128xf32>
    %293 = vector.extract_strided_slice %94 {offsets = [40, 0], sizes = [8, 1], strides = [1, 1]} : vector<48x1xf32> to vector<8x1xf32>
    %cst_74 = arith.constant 0.000000e+00 : f32
    %294 = vector.broadcast %cst_74 : f32 to vector<8x1xf32>
    %295 = arith.cmpf ogt, %293, %294 : vector<8x1xf32>
    %296 = arith.truncf %288 : vector<8x32xf32> to vector<8x32xbf16>
    %c0_75 = arith.constant 0 : index
    %c0_76 = arith.constant 0 : index
    %297 = vector.load %arg11[%c0_75, %c0_76] : memref<32x128xbf16, #tpu.memory_space<vmem>>, vector<32x128xbf16>
    %cst_77 = arith.constant dense<0.000000e+00> : vector<8x128xf32>
    %298 = tpu.matmul %296, %297, %cst_77 {dimension_numbers = #tpu.dot_dimension_numbers<[1], [0], [0], [1], [0, 0, 1, 1], [], []>} : vector<8x32xbf16>, vector<32x128xbf16>, vector<8x128xf32> -> vector<8x128xf32>
    %299 = arith.addf %292, %298 : vector<8x128xf32>
    %300 = vector.extract_strided_slice %299 {offsets = [0, 0], sizes = [8, 32], strides = [1, 1]} : vector<8x128xf32> to vector<8x32xf32>
    %301 = arith.negf %300 : vector<8x32xf32>
    %302 = math.exp %301 : vector<8x32xf32>
    %cst_78 = arith.constant 1.000000e+00 : f32
    %303 = vector.broadcast %cst_78 : f32 to vector<8x32xf32>
    %304 = arith.addf %303, %302 : vector<8x32xf32>
    %305 = arith.divf %303, %304 : vector<8x32xf32>
    %306 = vector.extract_strided_slice %299 {offsets = [0, 32], sizes = [8, 32], strides = [1, 1]} : vector<8x128xf32> to vector<8x32xf32>
    %307 = arith.negf %306 : vector<8x32xf32>
    %308 = math.exp %307 : vector<8x32xf32>
    %cst_79 = arith.constant 1.000000e+00 : f32
    %309 = vector.broadcast %cst_79 : f32 to vector<8x32xf32>
    %310 = arith.addf %309, %308 : vector<8x32xf32>
    %311 = arith.divf %309, %310 : vector<8x32xf32>
    %312 = vector.extract_strided_slice %299 {offsets = [0, 64], sizes = [8, 32], strides = [1, 1]} : vector<8x128xf32> to vector<8x32xf32>
    %313 = math.tanh %312 : vector<8x32xf32>
    %314 = vector.extract_strided_slice %299 {offsets = [0, 96], sizes = [8, 32], strides = [1, 1]} : vector<8x128xf32> to vector<8x32xf32>
    %315 = arith.negf %314 : vector<8x32xf32>
    %316 = math.exp %315 : vector<8x32xf32>
    %cst_80 = arith.constant 1.000000e+00 : f32
    %317 = vector.broadcast %cst_80 : f32 to vector<8x32xf32>
    %318 = arith.addf %317, %316 : vector<8x32xf32>
    %319 = arith.divf %317, %318 : vector<8x32xf32>
    %320 = arith.mulf %311, %291 : vector<8x32xf32>
    %321 = arith.mulf %305, %313 : vector<8x32xf32>
    %322 = arith.addf %320, %321 : vector<8x32xf32>
    %323 = math.tanh %322 : vector<8x32xf32>
    %324 = arith.mulf %319, %323 : vector<8x32xf32>
    %325 = vector.shape_cast %295 : vector<8x1xi1> to vector<8x1xi1>
    %326 = vector.broadcast %325 : vector<8x1xi1> to vector<8x32xi1>
    %327 = arith.select %326, %324, %288 : vector<8x32xi1>, vector<8x32xf32>
    %cst_81 = arith.constant 0.000000e+00 : f32
    %328 = vector.broadcast %cst_81 : f32 to vector<8x32xf32>
    %329 = arith.maximumf %327, %328 : vector<8x32xf32>
    %330 = arith.truncf %329 : vector<8x32xf32> to vector<8x32xbf16>
    %c0_82 = arith.constant 0 : index
    %c0_83 = arith.constant 0 : index
    %331 = vector.load %arg13[%c0_82, %c0_83] : memref<32x32xbf16, #tpu.memory_space<vmem>>, vector<32x32xbf16>
    %cst_84 = arith.constant dense<0.000000e+00> : vector<8x32xf32>
    %332 = tpu.matmul %330, %331, %cst_84 {dimension_numbers = #tpu.dot_dimension_numbers<[1], [0], [0], [1], [0, 0, 1, 1], [], []>} : vector<8x32xbf16>, vector<32x32xbf16>, vector<8x32xf32> -> vector<8x32xf32>
    %c0_85 = arith.constant 0 : index
    %c0_86 = arith.constant 0 : index
    %333 = vector.load %arg14[%c0_85, %c0_86] : memref<1x32xf32, #tpu.memory_space<vmem>>, vector<1x32xf32>
    %334 = vector.broadcast %333 : vector<1x32xf32> to vector<8x32xf32>
    %335 = arith.addf %332, %334 : vector<8x32xf32>
    %336 = arith.mulf %335, %335 : vector<8x32xf32>
    %cst_87 = arith.constant dense<0.000000e+00> : vector<8xf32>
    %337 = vector.multi_reduction <add>, %336, %cst_87 [1] : vector<8x32xf32> to vector<8xf32>
    %338 = vector.shape_cast %337 : vector<8xf32> to vector<8x1xf32>
    %339 = math.rsqrt %338 : vector<8x1xf32>
    %340 = vector.broadcast %339 : vector<8x1xf32> to vector<8x32xf32>
    %341 = arith.mulf %335, %340 : vector<8x32xf32>
    %c0_88 = arith.constant 0 : index
    %c0_89 = arith.constant 0 : index
    %342 = vector.load %arg16[%c0_88, %c0_89] : memref<8x32xf32, #tpu.memory_space<vmem>>, vector<8x32xf32>
    tpu.vector_store %arg16[%c0_88, %c0_89], %341 {strides = array<i32>} : memref<8x32xf32, #tpu.memory_space<vmem>>, vector<8x32xf32>,
    return
  }
}

</mosaic_0001>

<bundles_post_ra>
// kernel: tpu_custom_call.1
= control target key start
LH: loop header
LB: loop body
LE: loop exit
PB: predicated region body
PF: predicated region fallthrough
CT: control target
= control target key end

     0   :  { %s12961_s0 = inlined_call_operand.vmem [shape: f32[512,4], index: 0, kind: input, shape index: {}]   ;;  %s12962_s1 = inlined_call_operand.vmem [shape: bf16[48,32], index: 1, kind: input, shape index: {}]   ;;  %s12963_s2 = inlined_call_operand.vmem [shape: f32[48,1], index: 2, kind: input, shape index: {}]   ;;  %s12964_s3 = inlined_call_operand.vmem [shape: f32[4,64], index: 3, kind: input, shape index: {}]   ;;  %s12965_s4 = inlined_call_operand.vmem [shape: f32[1,64], index: 4, kind: input, shape index: {}]   ;;  %s12966_s5 = inlined_call_operand.vmem [shape: bf16[64,64], index: 5, kind: input, shape index: {}]   ;;  %s12967_s6 = inlined_call_operand.vmem [shape: f32[1,64], index: 6, kind: input, shape index: {}]   ;;  %s12968_s7 = inlined_call_operand.vmem [shape: f32[64,64], index: 7, kind: input, shape index: {}]   ;;  %s12969_s8 = inlined_call_operand.vmem [shape: bf16[4096,32], index: 8, kind: input, shape index: {}]   ;;  %s12970_s9 = inlined_call_operand.vmem [shape: f32[1,32], index: 9, kind: input, shape index: {}]   ;;  %s12971_s10 = inlined_call_operand.vmem [shape: bf16[32,128], index: 10, kind: input, shape index: {}]   ;;  %s12972_s11 = inlined_call_operand.vmem [shape: bf16[32,128], index: 11, kind: input, shape index: {}]   ;;  %s12973_s12 = inlined_call_operand.vmem [shape: f32[1,128], index: 12, kind: input, shape index: {}]   ;;  %s12974_s13 = inlined_call_operand.vmem [shape: bf16[32,32], index: 13, kind: input, shape index: {}]   ;;  %s12975_s14 = inlined_call_operand.vmem [shape: f32[1,32], index: 14, kind: input, shape index: {}]   ;;  %s12976_s15 = inlined_call_operand.hbm [shape: f32[2,32], index: 15, kind: output, shape index: {0}]   ;;  %s12977_s16 = inlined_call_operand.hbm [shape: f32[8,32], index: 16, kind: output, shape index: {1}]  }
   0x1   :  { %13054 = sst [smem:[#allocation388_spill]] %s12961_s0 }
   0x2   :  { %22 = vsyncpa [#allocation5], 0 }
   0x3   :  { %23 = vsyncpa [#allocation7], 0  ;;  %v7811_v0 = vld [vmem:[%s12969_s8] sm:$0xff]  ;;  %v7816_v1 = vld [vmem:[%s12969_s8 + $0x8] sm:$0xff]  ;;  %s13311_s25 = sld [smem:[#allocation388_spill]] }
   0x4   :  { %13055 = vst [vmem:[#allocation12_spill] sm:$0xff] %v7811_v0  ;;  %13056 = vst [vmem:[#allocation13_spill] sm:$0xff] %v7816_v1  ;;  %v7821_v2 = vld [vmem:[%s12969_s8 + $0x10] sm:$0xff]  ;;  %v7826_v3 = vld [vmem:[%s12969_s8 + $0x18] sm:$0xff] }
   0x5   :  { %13057 = vst [vmem:[#allocation14_spill] sm:$0xff] %v7821_v2  ;;  %13058 = vst [vmem:[#allocation15_spill] sm:$0xff] %v7826_v3  ;;  %v7831_v4 = vld [vmem:[%s12969_s8 + $0x20] sm:$0xff]  ;;  %v7836_v5 = vld [vmem:[%s12969_s8 + $0x28] sm:$0xff] }
   0x6   :  { %13059 = vst [vmem:[#allocation16_spill] sm:$0xff] %v7831_v4  ;;  %13060 = vst [vmem:[#allocation17_spill] sm:$0xff] %v7836_v5  ;;  %v7841_v6 = vld [vmem:[%s12969_s8 + $0x30] sm:$0xff]  ;;  %v7846_v7 = vld [vmem:[%s12969_s8 + $0x38] sm:$0xff] }
   0x7   :  { %13061 = vst [vmem:[#allocation18_spill] sm:$0xff] %v7841_v6  ;;  %13062 = vst [vmem:[#allocation19_spill] sm:$0xff] %v7846_v7  ;;  %v7851_v8 = vld [vmem:[%s12969_s8 + $0x40] sm:$0xff]  ;;  %v7856_v9 = vld [vmem:[%s12969_s8 + $0x48] sm:$0xff] }
   0x8   :  { %13063 = vst [vmem:[#allocation20_spill] sm:$0xff] %v7851_v8  ;;  %13064 = vst [vmem:[#allocation21_spill] sm:$0xff] %v7856_v9  ;;  %v7861_v10 = vld [vmem:[%s12969_s8 + $0x50] sm:$0xff]  ;;  %v7866_v11 = vld [vmem:[%s12969_s8 + $0x58] sm:$0xff] }
   0x9   :  { %13065 = vst [vmem:[#allocation22_spill] sm:$0xff] %v7861_v10  ;;  %13066 = vst [vmem:[#allocation23_spill] sm:$0xff] %v7866_v11  ;;  %v7871_v12 = vld [vmem:[%s12969_s8 + $0x60] sm:$0xff]  ;;  %v7876_v13 = vld [vmem:[%s12969_s8 + $0x68] sm:$0xff] }
   0xa   :  { %13067 = vst [vmem:[#allocation24_spill] sm:$0xff] %v7871_v12  ;;  %13068 = vst [vmem:[#allocation25_spill] sm:$0xff] %v7876_v13  ;;  %v7881_v14 = vld [vmem:[%s12969_s8 + $0x70] sm:$0xff]  ;;  %v7886_v15 = vld [vmem:[%s12969_s8 + $0x78] sm:$0xff] }
   0xb   :  { %13069 = vst [vmem:[#allocation26_spill] sm:$0xff] %v7881_v14  ;;  %13070 = vst [vmem:[#allocation27_spill] sm:$0xff] %v7886_v15  ;;  %v7891_v16 = vld [vmem:[%s12969_s8 + $0x80] sm:$0xff]  ;;  %v7896_v17 = vld [vmem:[%s12969_s8 + $0x88] sm:$0xff] }
   0xc   :  { %13071 = vst [vmem:[#allocation28_spill] sm:$0xff] %v7891_v16  ;;  %13072 = vst [vmem:[#allocation29_spill] sm:$0xff] %v7896_v17  ;;  %v7901_v18 = vld [vmem:[%s12969_s8 + $0x90] sm:$0xff]  ;;  %v7906_v19 = vld [vmem:[%s12969_s8 + $0x98] sm:$0xff] }
   0xd   :  { %13073 = vst [vmem:[#allocation30_spill] sm:$0xff] %v7901_v18  ;;  %13074 = vst [vmem:[#allocation31_spill] sm:$0xff] %v7906_v19  ;;  %v7911_v20 = vld [vmem:[%s12969_s8 + $0xa0] sm:$0xff]  ;;  %v7916_v21 = vld [vmem:[%s12969_s8 + $0xa8] sm:$0xff] }
   0xe   :  { %13075 = vst [vmem:[#allocation32_spill] sm:$0xff] %v7911_v20  ;;  %13076 = vst [vmem:[#allocation33_spill] sm:$0xff] %v7916_v21  ;;  %v7921_v22 = vld [vmem:[%s12969_s8 + $0xb0] sm:$0xff]  ;;  %v7926_v23 = vld [vmem:[%s12969_s8 + $0xb8] sm:$0xff] }
   0xf   :  { %13077 = vst [vmem:[#allocation34_spill] sm:$0xff] %v7921_v22  ;;  %13078 = vst [vmem:[#allocation35_spill] sm:$0xff] %v7926_v23  ;;  %v7931_v24 = vld [vmem:[%s12969_s8 + $0xc0] sm:$0xff]  ;;  %v7936_v25 = vld [vmem:[%s12969_s8 + $0xc8] sm:$0xff] }
  0x10   :  { %13079 = vst [vmem:[#allocation36_spill] sm:$0xff] %v7931_v24  ;;  %13080 = vst [vmem:[#allocation37_spill] sm:$0xff] %v7936_v25  ;;  %v7941_v26 = vld [vmem:[%s12969_s8 + $0xd0] sm:$0xff]  ;;  %v7946_v27 = vld [vmem:[%s12969_s8 + $0xd8] sm:$0xff] }
  0x11   :  { %13081 = vst [vmem:[#allocation38_spill] sm:$0xff] %v7941_v26  ;;  %13082 = vst [vmem:[#allocation39_spill] sm:$0xff] %v7946_v27  ;;  %v7951_v28 = vld [vmem:[%s12969_s8 + $0xe0] sm:$0xff]  ;;  %v7956_v29 = vld [vmem:[%s12969_s8 + $0xe8] sm:$0xff] }
  0x12   :  { %13083 = vst [vmem:[#allocation40_spill] sm:$0xff] %v7951_v28  ;;  %13084 = vst [vmem:[#allocation41_spill] sm:$0xff] %v7956_v29  ;;  %v7961_v30 = vld [vmem:[%s12969_s8 + $0xf0] sm:$0xff]  ;;  %v7966_v31 = vld [vmem:[%s12969_s8 + $0xf8] sm:$0xff] }
  0x13   :  { %13085 = vst [vmem:[#allocation42_spill] sm:$0xff] %v7961_v30  ;;  %13086 = vst [vmem:[#allocation43_spill] sm:$0xff] %v7966_v31  ;;  %v7971_v32 = vld [vmem:[%s12969_s8 + $0x100] sm:$0xff]  ;;  %v7976_v33 = vld [vmem:[%s12969_s8 + $0x108] sm:$0xff] }
  0x14   :  { %13087 = vst [vmem:[#allocation44_spill] sm:$0xff] %v7971_v32  ;;  %13088 = vst [vmem:[#allocation45_spill] sm:$0xff] %v7976_v33  ;;  %v7981_v34 = vld [vmem:[%s12969_s8 + $0x110] sm:$0xff]  ;;  %v7986_v35 = vld [vmem:[%s12969_s8 + $0x118] sm:$0xff] }
  0x15   :  { %13089 = vst [vmem:[#allocation46_spill] sm:$0xff] %v7981_v34  ;;  %13090 = vst [vmem:[#allocation47_spill] sm:$0xff] %v7986_v35  ;;  %v7991_v36 = vld [vmem:[%s12969_s8 + $0x120] sm:$0xff]  ;;  %v7996_v37 = vld [vmem:[%s12969_s8 + $0x128] sm:$0xff] }
  0x16   :  { %13091 = vst [vmem:[#allocation48_spill] sm:$0xff] %v7991_v36  ;;  %13092 = vst [vmem:[#allocation49_spill] sm:$0xff] %v7996_v37  ;;  %v8001_v38 = vld [vmem:[%s12969_s8 + $0x130] sm:$0xff]  ;;  %v8006_v39 = vld [vmem:[%s12969_s8 + $0x138] sm:$0xff] }
  0x17   :  { %13093 = vst [vmem:[#allocation50_spill] sm:$0xff] %v8001_v38  ;;  %13094 = vst [vmem:[#allocation51_spill] sm:$0xff] %v8006_v39  ;;  %v8011_v40 = vld [vmem:[%s12969_s8 + $0x140] sm:$0xff]  ;;  %v8016_v41 = vld [vmem:[%s12969_s8 + $0x148] sm:$0xff] }
  0x18   :  { %13095 = vst [vmem:[#allocation52_spill] sm:$0xff] %v8011_v40  ;;  %13096 = vst [vmem:[#allocation53_spill] sm:$0xff] %v8016_v41  ;;  %v8021_v42 = vld [vmem:[%s12969_s8 + $0x150] sm:$0xff]  ;;  %v8026_v43 = vld [vmem:[%s12969_s8 + $0x158] sm:$0xff] }
  0x19   :  { %13097 = vst [vmem:[#allocation54_spill] sm:$0xff] %v8021_v42  ;;  %13098 = vst [vmem:[#allocation55_spill] sm:$0xff] %v8026_v43  ;;  %v8031_v44 = vld [vmem:[%s12969_s8 + $0x160] sm:$0xff]  ;;  %v8036_v45 = vld [vmem:[%s12969_s8 + $0x168] sm:$0xff] }
  0x1a   :  { %13099 = vst [vmem:[#allocation56_spill] sm:$0xff] %v8031_v44  ;;  %13100 = vst [vmem:[#allocation57_spill] sm:$0xff] %v8036_v45  ;;  %v8041_v46 = vld [vmem:[%s12969_s8 + $0x170] sm:$0xff]  ;;  %v8046_v47 = vld [vmem:[%s12969_s8 + $0x178] sm:$0xff] }
  0x1b   :  { %13101 = vst [vmem:[#allocation58_spill] sm:$0xff] %v8041_v46  ;;  %13102 = vst [vmem:[#allocation59_spill] sm:$0xff] %v8046_v47  ;;  %v8051_v48 = vld [vmem:[%s12969_s8 + $0x180] sm:$0xff]  ;;  %v8056_v49 = vld [vmem:[%s12969_s8 + $0x188] sm:$0xff] }
  0x1c   :  { %13103 = vst [vmem:[#allocation60_spill] sm:$0xff] %v8051_v48  ;;  %13104 = vst [vmem:[#allocation61_spill] sm:$0xff] %v8056_v49  ;;  %v8061_v50 = vld [vmem:[%s12969_s8 + $0x190] sm:$0xff]  ;;  %v8066_v51 = vld [vmem:[%s12969_s8 + $0x198] sm:$0xff] }
  0x1d   :  { %13105 = vst [vmem:[#allocation62_spill] sm:$0xff] %v8061_v50  ;;  %13106 = vst [vmem:[#allocation63_spill] sm:$0xff] %v8066_v51  ;;  %v8071_v52 = vld [vmem:[%s12969_s8 + $0x1a0] sm:$0xff]  ;;  %v8076_v53 = vld [vmem:[%s12969_s8 + $0x1a8] sm:$0xff] }
  0x1e   :  { %13107 = vst [vmem:[#allocation64_spill] sm:$0xff] %v8071_v52  ;;  %13108 = vst [vmem:[#allocation65_spill] sm:$0xff] %v8076_v53  ;;  %v8081_v54 = vld [vmem:[%s12969_s8 + $0x1b0] sm:$0xff]  ;;  %v8086_v55 = vld [vmem:[%s12969_s8 + $0x1b8] sm:$0xff] }
  0x1f   :  { %13109 = vst [vmem:[#allocation66_spill] sm:$0xff] %v8081_v54  ;;  %13110 = vst [vmem:[#allocation67_spill] sm:$0xff] %v8086_v55  ;;  %v8091_v56 = vld [vmem:[%s12969_s8 + $0x1c0] sm:$0xff]  ;;  %v8096_v57 = vld [vmem:[%s12969_s8 + $0x1c8] sm:$0xff] }
  0x20   :  { %13111 = vst [vmem:[#allocation68_spill] sm:$0xff] %v8091_v56  ;;  %13112 = vst [vmem:[#allocation69_spill] sm:$0xff] %v8096_v57  ;;  %v8101_v58 = vld [vmem:[%s12969_s8 + $0x1d0] sm:$0xff]  ;;  %v8106_v59 = vld [vmem:[%s12969_s8 + $0x1d8] sm:$0xff] }
  0x21   :  { %13113 = vst [vmem:[#allocation70_spill] sm:$0xff] %v8101_v58  ;;  %13114 = vst [vmem:[#allocation71_spill] sm:$0xff] %v8106_v59  ;;  %v8111_v60 = vld [vmem:[%s12969_s8 + $0x1e0] sm:$0xff]  ;;  %v8116_v61 = vld [vmem:[%s12969_s8 + $0x1e8] sm:$0xff] }
  0x22   :  { %13115 = vst [vmem:[#allocation72_spill] sm:$0xff] %v8111_v60  ;;  %13116 = vst [vmem:[#allocation73_spill] sm:$0xff] %v8116_v61  ;;  %v8121_v62 = vld [vmem:[%s12969_s8 + $0x1f0] sm:$0xff]  ;;  %v8126_v63 = vld [vmem:[%s12969_s8 + $0x1f8] sm:$0xff] }
  0x23   :  { %13117 = vst [vmem:[#allocation74_spill] sm:$0xff] %v8121_v62  ;;  %13118 = vst [vmem:[#allocation75_spill] sm:$0xff] %v8126_v63  ;;  %v8131_v55 = vld [vmem:[%s12969_s8 + $0x200] sm:$0xff]  ;;  %v8136_v54 = vld [vmem:[%s12969_s8 + $0x208] sm:$0xff] }
  0x24   :  { %13119 = vst [vmem:[#allocation76_spill] sm:$0xff] %v8131_v55  ;;  %13120 = vst [vmem:[#allocation77_spill] sm:$0xff] %v8136_v54  ;;  %v8141_v53 = vld [vmem:[%s12969_s8 + $0x210] sm:$0xff]  ;;  %v8146_v62 = vld [vmem:[%s12969_s8 + $0x218] sm:$0xff] }
  0x25   :  { %13121 = vst [vmem:[#allocation78_spill] sm:$0xff] %v8141_v53  ;;  %13122 = vst [vmem:[#allocation79_spill] sm:$0xff] %v8146_v62  ;;  %v8151_v63 = vld [vmem:[%s12969_s8 + $0x220] sm:$0xff]  ;;  %v8156_v61 = vld [vmem:[%s12969_s8 + $0x228] sm:$0xff] }
  0x26   :  { %13123 = vst [vmem:[#allocation80_spill] sm:$0xff] %v8151_v63  ;;  %13124 = vst [vmem:[#allocation81_spill] sm:$0xff] %v8156_v61  ;;  %v8161_v52 = vld [vmem:[%s12969_s8 + $0x230] sm:$0xff]  ;;  %v8166_v60 = vld [vmem:[%s12969_s8 + $0x238] sm:$0xff] }
  0x27   :  { %13125 = vst [vmem:[#allocation82_spill] sm:$0xff] %v8161_v52  ;;  %13126 = vst [vmem:[#allocation83_spill] sm:$0xff] %v8166_v60  ;;  %v8171_v51 = vld [vmem:[%s12969_s8 + $0x240] sm:$0xff]  ;;  %v8176_v59 = vld [vmem:[%s12969_s8 + $0x248] sm:$0xff] }
  0x28   :  { %13127 = vst [vmem:[#allocation84_spill] sm:$0xff] %v8171_v51  ;;  %13128 = vst [vmem:[#allocation85_spill] sm:$0xff] %v8176_v59  ;;  %v8181_v50 = vld [vmem:[%s12969_s8 + $0x250] sm:$0xff]  ;;  %v8186_v58 = vld [vmem:[%s12969_s8 + $0x258] sm:$0xff] }
  0x29   :  { %13129 = vst [vmem:[#allocation86_spill] sm:$0xff] %v8181_v50  ;;  %13130 = vst [vmem:[#allocation87_spill] sm:$0xff] %v8186_v58  ;;  %v8191_v49 = vld [vmem:[%s12969_s8 + $0x260] sm:$0xff]  ;;  %v8196_v57 = vld [vmem:[%s12969_s8 + $0x268] sm:$0xff] }
  0x2a   :  { %13131 = vst [vmem:[#allocation88_spill] sm:$0xff] %v8191_v49  ;;  %13132 = vst [vmem:[#allocation89_spill] sm:$0xff] %v8196_v57  ;;  %v8201_v48 = vld [vmem:[%s12969_s8 + $0x270] sm:$0xff]  ;;  %v8206_v60 = vld [vmem:[%s12969_s8 + $0x278] sm:$0xff] }
  0x2b   :  { %13133 = vst [vmem:[#allocation90_spill] sm:$0xff] %v8201_v48  ;;  %13134 = vst [vmem:[#allocation91_spill] sm:$0xff] %v8206_v60  ;;  %v8211_v56 = vld [vmem:[%s12969_s8 + $0x280] sm:$0xff]  ;;  %v8216_v23 = vld [vmem:[%s12969_s8 + $0x288] sm:$0xff] }
  0x2c   :  { %13135 = vst [vmem:[#allocation92_spill] sm:$0xff] %v8211_v56  ;;  %13136 = vst [vmem:[#allocation93_spill] sm:$0xff] %v8216_v23  ;;  %v8221_v52 = vld [vmem:[%s12969_s8 + $0x290] sm:$0xff]  ;;  %v8226_v31 = vld [vmem:[%s12969_s8 + $0x298] sm:$0xff] }
  0x2d   :  { %13137 = vst [vmem:[#allocation94_spill] sm:$0xff] %v8221_v52  ;;  %13138 = vst [vmem:[#allocation95_spill] sm:$0xff] %v8226_v31  ;;  %v8231_v60 = vld [vmem:[%s12969_s8 + $0x2a0] sm:$0xff]  ;;  %v8236_v56 = vld [vmem:[%s12969_s8 + $0x2a8] sm:$0xff] }
  0x2e   :  { %13139 = vst [vmem:[#allocation96_spill] sm:$0xff] %v8231_v60  ;;  %13140 = vst [vmem:[#allocation97_spill] sm:$0xff] %v8236_v56  ;;  %v8241_v23 = vld [vmem:[%s12969_s8 + $0x2b0] sm:$0xff]  ;;  %v8246_v52 = vld [vmem:[%s12969_s8 + $0x2b8] sm:$0xff] }
  0x2f   :  { %13141 = vst [vmem:[#allocation98_spill] sm:$0xff] %v8241_v23  ;;  %13142 = vst [vmem:[#allocation99_spill] sm:$0xff] %v8246_v52  ;;  %v8251_v31 = vld [vmem:[%s12969_s8 + $0x2c0] sm:$0xff]  ;;  %v8256_v60 = vld [vmem:[%s12969_s8 + $0x2c8] sm:$0xff] }
  0x30   :  { %13143 = vst [vmem:[#allocation100_spill] sm:$0xff] %v8251_v31  ;;  %13144 = vst [vmem:[#allocation101_spill] sm:$0xff] %v8256_v60  ;;  %v8261_v56 = vld [vmem:[%s12969_s8 + $0x2d0] sm:$0xff]  ;;  %v8266_v23 = vld [vmem:[%s12969_s8 + $0x2d8] sm:$0xff] }
  0x31   :  { %13145 = vst [vmem:[#allocation102_spill] sm:$0xff] %v8261_v56  ;;  %13146 = vst [vmem:[#allocation103_spill] sm:$0xff] %v8266_v23  ;;  %v8271_v52 = vld [vmem:[%s12969_s8 + $0x2e0] sm:$0xff]  ;;  %v8276_v31 = vld [vmem:[%s12969_s8 + $0x2e8] sm:$0xff] }
  0x32   :  { %13147 = vst [vmem:[#allocation104_spill] sm:$0xff] %v8271_v52  ;;  %13148 = vst [vmem:[#allocation105_spill] sm:$0xff] %v8276_v31  ;;  %v8281_v60 = vld [vmem:[%s12969_s8 + $0x2f0] sm:$0xff]  ;;  %v8286_v56 = vld [vmem:[%s12969_s8 + $0x2f8] sm:$0xff] }
  0x33   :  { %13149 = vst [vmem:[#allocation106_spill] sm:$0xff] %v8281_v60  ;;  %13150 = vst [vmem:[#allocation107_spill] sm:$0xff] %v8286_v56  ;;  %v8291_v23 = vld [vmem:[%s12969_s8 + $0x300] sm:$0xff]  ;;  %v8296_v52 = vld [vmem:[%s12969_s8 + $0x308] sm:$0xff] }
  0x34   :  { %13151 = vst [vmem:[#allocation108_spill] sm:$0xff] %v8291_v23  ;;  %13152 = vst [vmem:[#allocation109_spill] sm:$0xff] %v8296_v52  ;;  %v8301_v31 = vld [vmem:[%s12969_s8 + $0x310] sm:$0xff]  ;;  %v8306_v60 = vld [vmem:[%s12969_s8 + $0x318] sm:$0xff] }
  0x35   :  { %13153 = vst [vmem:[#allocation110_spill] sm:$0xff] %v8301_v31  ;;  %13154 = vst [vmem:[#allocation111_spill] sm:$0xff] %v8306_v60  ;;  %v8311_v56 = vld [vmem:[%s12969_s8 + $0x320] sm:$0xff]  ;;  %v8316_v23 = vld [vmem:[%s12969_s8 + $0x328] sm:$0xff] }
  0x36   :  { %13155 = vst [vmem:[#allocation112_spill] sm:$0xff] %v8311_v56  ;;  %13156 = vst [vmem:[#allocation113_spill] sm:$0xff] %v8316_v23  ;;  %v8321_v52 = vld [vmem:[%s12969_s8 + $0x330] sm:$0xff]  ;;  %v8326_v31 = vld [vmem:[%s12969_s8 + $0x338] sm:$0xff] }
  0x37   :  { %13157 = vst [vmem:[#allocation114_spill] sm:$0xff] %v8321_v52  ;;  %13158 = vst [vmem:[#allocation115_spill] sm:$0xff] %v8326_v31  ;;  %v8331_v60 = vld [vmem:[%s12969_s8 + $0x340] sm:$0xff]  ;;  %v8336_v56 = vld [vmem:[%s12969_s8 + $0x348] sm:$0xff] }
  0x38   :  { %13159 = vst [vmem:[#allocation116_spill] sm:$0xff] %v8331_v60  ;;  %13160 = vst [vmem:[#allocation117_spill] sm:$0xff] %v8336_v56  ;;  %v8341_v23 = vld [vmem:[%s12969_s8 + $0x350] sm:$0xff]  ;;  %v8346_v52 = vld [vmem:[%s12969_s8 + $0x358] sm:$0xff] }
  0x39   :  { %13161 = vst [vmem:[#allocation118_spill] sm:$0xff] %v8341_v23  ;;  %13162 = vst [vmem:[#allocation119_spill] sm:$0xff] %v8346_v52  ;;  %v8351_v31 = vld [vmem:[%s12969_s8 + $0x360] sm:$0xff]  ;;  %v8356_v60 = vld [vmem:[%s12969_s8 + $0x368] sm:$0xff] }
  0x3a   :  { %13163 = vst [vmem:[#allocation120_spill] sm:$0xff] %v8351_v31  ;;  %13164 = vst [vmem:[#allocation121_spill] sm:$0xff] %v8356_v60  ;;  %v8361_v56 = vld [vmem:[%s12969_s8 + $0x370] sm:$0xff]  ;;  %v8366_v23 = vld [vmem:[%s12969_s8 + $0x378] sm:$0xff] }
  0x3b   :  { %13165 = vst [vmem:[#allocation122_spill] sm:$0xff] %v8361_v56  ;;  %13166 = vst [vmem:[#allocation123_spill] sm:$0xff] %v8366_v23  ;;  %v8371_v52 = vld [vmem:[%s12969_s8 + $0x380] sm:$0xff]  ;;  %v8376_v31 = vld [vmem:[%s12969_s8 + $0x388] sm:$0xff] }
  0x3c   :  { %13167 = vst [vmem:[#allocation124_spill] sm:$0xff] %v8371_v52  ;;  %13168 = vst [vmem:[#allocation125_spill] sm:$0xff] %v8376_v31  ;;  %v8381_v60 = vld [vmem:[%s12969_s8 + $0x390] sm:$0xff]  ;;  %v8386_v56 = vld [vmem:[%s12969_s8 + $0x398] sm:$0xff] }
  0x3d   :  { %13169 = vst [vmem:[#allocation126_spill] sm:$0xff] %v8381_v60  ;;  %13170 = vst [vmem:[#allocation127_spill] sm:$0xff] %v8386_v56  ;;  %v8391_v23 = vld [vmem:[%s12969_s8 + $0x3a0] sm:$0xff]  ;;  %v8396_v52 = vld [vmem:[%s12969_s8 + $0x3a8] sm:$0xff] }
  0x3e   :  { %13171 = vst [vmem:[#allocation128_spill] sm:$0xff] %v8391_v23  ;;  %13172 = vst [vmem:[#allocation129_spill] sm:$0xff] %v8396_v52  ;;  %v8401_v31 = vld [vmem:[%s12969_s8 + $0x3b0] sm:$0xff]  ;;  %v8406_v60 = vld [vmem:[%s12969_s8 + $0x3b8] sm:$0xff] }
  0x3f   :  { %13173 = vst [vmem:[#allocation130_spill] sm:$0xff] %v8401_v31  ;;  %13174 = vst [vmem:[#allocation131_spill] sm:$0xff] %v8406_v60  ;;  %v8411_v56 = vld [vmem:[%s12969_s8 + $0x3c0] sm:$0xff]  ;;  %v8416_v23 = vld [vmem:[%s12969_s8 + $0x3c8] sm:$0xff] }
  0x40   :  { %13175 = vst [vmem:[#allocation132_spill] sm:$0xff] %v8411_v56  ;;  %13176 = vst [vmem:[#allocation133_spill] sm:$0xff] %v8416_v23  ;;  %v8421_v52 = vld [vmem:[%s12969_s8 + $0x3d0] sm:$0xff]  ;;  %v8426_v31 = vld [vmem:[%s12969_s8 + $0x3d8] sm:$0xff] }
  0x41   :  { %13177 = vst [vmem:[#allocation134_spill] sm:$0xff] %v8421_v52  ;;  %13178 = vst [vmem:[#allocation135_spill] sm:$0xff] %v8426_v31  ;;  %v8431_v60 = vld [vmem:[%s12969_s8 + $0x3e0] sm:$0xff]  ;;  %v8436_v56 = vld [vmem:[%s12969_s8 + $0x3e8] sm:$0xff] }
  0x42   :  { %13179 = vst [vmem:[#allocation136_spill] sm:$0xff] %v8431_v60  ;;  %13180 = vst [vmem:[#allocation137_spill] sm:$0xff] %v8436_v56  ;;  %v8441_v23 = vld [vmem:[%s12969_s8 + $0x3f0] sm:$0xff]  ;;  %v8446_v52 = vld [vmem:[%s12969_s8 + $0x3f8] sm:$0xff] }
  0x43   :  { %13181 = vst [vmem:[#allocation138_spill] sm:$0xff] %v8441_v23  ;;  %13182 = vst [vmem:[#allocation139_spill] sm:$0xff] %v8446_v52  ;;  %v8451_v31 = vld [vmem:[%s12969_s8 + $0x400] sm:$0xff]  ;;  %v8456_v60 = vld [vmem:[%s12969_s8 + $0x408] sm:$0xff] }
  0x44   :  { %13183 = vst [vmem:[#allocation140_spill] sm:$0xff] %v8451_v31  ;;  %13184 = vst [vmem:[#allocation141_spill] sm:$0xff] %v8456_v60  ;;  %v8461_v56 = vld [vmem:[%s12969_s8 + $0x410] sm:$0xff]  ;;  %v8466_v23 = vld [vmem:[%s12969_s8 + $0x418] sm:$0xff] }
  0x45   :  { %13185 = vst [vmem:[#allocation142_spill] sm:$0xff] %v8461_v56  ;;  %13186 = vst [vmem:[#allocation143_spill] sm:$0xff] %v8466_v23  ;;  %v8471_v52 = vld [vmem:[%s12969_s8 + $0x420] sm:$0xff]  ;;  %v8476_v31 = vld [vmem:[%s12969_s8 + $0x428] sm:$0xff] }
  0x46   :  { %13187 = vst [vmem:[#allocation144_spill] sm:$0xff] %v8471_v52  ;;  %13188 = vst [vmem:[#allocation145_spill] sm:$0xff] %v8476_v31  ;;  %v8481_v60 = vld [vmem:[%s12969_s8 + $0x430] sm:$0xff]  ;;  %v8486_v56 = vld [vmem:[%s12969_s8 + $0x438] sm:$0xff] }
  0x47   :  { %13189 = vst [vmem:[#allocation146_spill] sm:$0xff] %v8481_v60  ;;  %13190 = vst [vmem:[#allocation147_spill] sm:$0xff] %v8486_v56  ;;  %v8491_v23 = vld [vmem:[%s12969_s8 + $0x440] sm:$0xff]  ;;  %v8496_v52 = vld [vmem:[%s12969_s8 + $0x448] sm:$0xff] }
  0x48   :  { %13191 = vst [vmem:[#allocation148_spill] sm:$0xff] %v8491_v23  ;;  %13192 = vst [vmem:[#allocation149_spill] sm:$0xff] %v8496_v52  ;;  %v8501_v31 = vld [vmem:[%s12969_s8 + $0x450] sm:$0xff]  ;;  %v8506_v60 = vld [vmem:[%s12969_s8 + $0x458] sm:$0xff] }
  0x49   :  { %13193 = vst [vmem:[#allocation150_spill] sm:$0xff] %v8501_v31  ;;  %13194 = vst [vmem:[#allocation151_spill] sm:$0xff] %v8506_v60  ;;  %v8511_v56 = vld [vmem:[%s12969_s8 + $0x460] sm:$0xff]  ;;  %v8516_v23 = vld [vmem:[%s12969_s8 + $0x468] sm:$0xff] }
  0x4a   :  { %13195 = vst [vmem:[#allocation152_spill] sm:$0xff] %v8511_v56  ;;  %13196 = vst [vmem:[#allocation153_spill] sm:$0xff] %v8516_v23  ;;  %v8521_v52 = vld [vmem:[%s12969_s8 + $0x470] sm:$0xff]  ;;  %v8526_v31 = vld [vmem:[%s12969_s8 + $0x478] sm:$0xff] }
  0x4b   :  { %13197 = vst [vmem:[#allocation154_spill] sm:$0xff] %v8521_v52  ;;  %13198 = vst [vmem:[#allocation155_spill] sm:$0xff] %v8526_v31  ;;  %v8531_v60 = vld [vmem:[%s12969_s8 + $0x480] sm:$0xff]  ;;  %v8536_v56 = vld [vmem:[%s12969_s8 + $0x488] sm:$0xff] }
  0x4c   :  { %13199 = vst [vmem:[#allocation156_spill] sm:$0xff] %v8531_v60  ;;  %13200 = vst [vmem:[#allocation157_spill] sm:$0xff] %v8536_v56  ;;  %v8541_v23 = vld [vmem:[%s12969_s8 + $0x490] sm:$0xff]  ;;  %v8546_v52 = vld [vmem:[%s12969_s8 + $0x498] sm:$0xff] }
  0x4d   :  { %13201 = vst [vmem:[#allocation158_spill] sm:$0xff] %v8541_v23  ;;  %13202 = vst [vmem:[#allocation159_spill] sm:$0xff] %v8546_v52  ;;  %v8551_v31 = vld [vmem:[%s12969_s8 + $0x4a0] sm:$0xff]  ;;  %v8556_v60 = vld [vmem:[%s12969_s8 + $0x4a8] sm:$0xff] }
  0x4e   :  { %13203 = vst [vmem:[#allocation160_spill] sm:$0xff] %v8551_v31  ;;  %13204 = vst [vmem:[#allocation161_spill] sm:$0xff] %v8556_v60  ;;  %v8561_v56 = vld [vmem:[%s12969_s8 + $0x4b0] sm:$0xff]  ;;  %v8566_v23 = vld [vmem:[%s12969_s8 + $0x4b8] sm:$0xff] }
  0x4f   :  { %13205 = vst [vmem:[#allocation162_spill] sm:$0xff] %v8561_v56  ;;  %13206 = vst [vmem:[#allocation163_spill] sm:$0xff] %v8566_v23  ;;  %v8571_v52 = vld [vmem:[%s12969_s8 + $0x4c0] sm:$0xff]  ;;  %v8576_v31 = vld [vmem:[%s12969_s8 + $0x4c8] sm:$0xff] }
  0x50   :  { %13207 = vst [vmem:[#allocation164_spill] sm:$0xff] %v8571_v52  ;;  %13208 = vst [vmem:[#allocation165_spill] sm:$0xff] %v8576_v31  ;;  %v8581_v60 = vld [vmem:[%s12969_s8 + $0x4d0] sm:$0xff]  ;;  %v8586_v56 = vld [vmem:[%s12969_s8 + $0x4d8] sm:$0xff] }
  0x51   :  { %13209 = vst [vmem:[#allocation166_spill] sm:$0xff] %v8581_v60  ;;  %13210 = vst [vmem:[#allocation167_spill] sm:$0xff] %v8586_v56  ;;  %v8591_v23 = vld [vmem:[%s12969_s8 + $0x4e0] sm:$0xff]  ;;  %v8596_v52 = vld [vmem:[%s12969_s8 + $0x4e8] sm:$0xff] }
  0x52   :  { %13211 = vst [vmem:[#allocation168_spill] sm:$0xff] %v8591_v23  ;;  %13212 = vst [vmem:[#allocation169_spill] sm:$0xff] %v8596_v52  ;;  %v8601_v31 = vld [vmem:[%s12969_s8 + $0x4f0] sm:$0xff]  ;;  %v8606_v60 = vld [vmem:[%s12969_s8 + $0x4f8] sm:$0xff] }
  0x53   :  { %13213 = vst [vmem:[#allocation170_spill] sm:$0xff] %v8601_v31  ;;  %13214 = vst [vmem:[#allocation171_spill] sm:$0xff] %v8606_v60  ;;  %v8611_v56 = vld [vmem:[%s12969_s8 + $0x500] sm:$0xff]  ;;  %v8616_v23 = vld [vmem:[%s12969_s8 + $0x508] sm:$0xff] }
  0x54   :  { %13215 = vst [vmem:[#allocation172_spill] sm:$0xff] %v8611_v56  ;;  %13216 = vst [vmem:[#allocation173_spill] sm:$0xff] %v8616_v23  ;;  %v8621_v52 = vld [vmem:[%s12969_s8 + $0x510] sm:$0xff]  ;;  %v8626_v31 = vld [vmem:[%s12969_s8 + $0x518] sm:$0xff] }
  0x55   :  { %13217 = vst [vmem:[#allocation174_spill] sm:$0xff] %v8621_v52  ;;  %13218 = vst [vmem:[#allocation175_spill] sm:$0xff] %v8626_v31  ;;  %v8631_v60 = vld [vmem:[%s12969_s8 + $0x520] sm:$0xff]  ;;  %v8636_v56 = vld [vmem:[%s12969_s8 + $0x528] sm:$0xff] }
  0x56   :  { %13219 = vst [vmem:[#allocation176_spill] sm:$0xff] %v8631_v60  ;;  %13220 = vst [vmem:[#allocation177_spill] sm:$0xff] %v8636_v56  ;;  %v8641_v23 = vld [vmem:[%s12969_s8 + $0x530] sm:$0xff]  ;;  %v8646_v52 = vld [vmem:[%s12969_s8 + $0x538] sm:$0xff] }
  0x57   :  { %13221 = vst [vmem:[#allocation178_spill] sm:$0xff] %v8641_v23  ;;  %13222 = vst [vmem:[#allocation179_spill] sm:$0xff] %v8646_v52  ;;  %v8651_v31 = vld [vmem:[%s12969_s8 + $0x540] sm:$0xff]  ;;  %v8656_v60 = vld [vmem:[%s12969_s8 + $0x548] sm:$0xff] }
  0x58   :  { %13223 = vst [vmem:[#allocation180_spill] sm:$0xff] %v8651_v31  ;;  %13224 = vst [vmem:[#allocation181_spill] sm:$0xff] %v8656_v60  ;;  %v8661_v56 = vld [vmem:[%s12969_s8 + $0x550] sm:$0xff]  ;;  %v8666_v23 = vld [vmem:[%s12969_s8 + $0x558] sm:$0xff] }
  0x59   :  { %13225 = vst [vmem:[#allocation182_spill] sm:$0xff] %v8661_v56  ;;  %13226 = vst [vmem:[#allocation183_spill] sm:$0xff] %v8666_v23  ;;  %v8671_v52 = vld [vmem:[%s12969_s8 + $0x560] sm:$0xff]  ;;  %v8676_v31 = vld [vmem:[%s12969_s8 + $0x568] sm:$0xff] }
  0x5a   :  { %13227 = vst [vmem:[#allocation184_spill] sm:$0xff] %v8671_v52  ;;  %13228 = vst [vmem:[#allocation185_spill] sm:$0xff] %v8676_v31  ;;  %v8681_v60 = vld [vmem:[%s12969_s8 + $0x570] sm:$0xff]  ;;  %v8686_v56 = vld [vmem:[%s12969_s8 + $0x578] sm:$0xff] }
  0x5b   :  { %13229 = vst [vmem:[#allocation186_spill] sm:$0xff] %v8681_v60  ;;  %13230 = vst [vmem:[#allocation187_spill] sm:$0xff] %v8686_v56  ;;  %v8691_v23 = vld [vmem:[%s12969_s8 + $0x580] sm:$0xff]  ;;  %v8696_v52 = vld [vmem:[%s12969_s8 + $0x588] sm:$0xff] }
  0x5c   :  { %13231 = vst [vmem:[#allocation188_spill] sm:$0xff] %v8691_v23  ;;  %13232 = vst [vmem:[#allocation189_spill] sm:$0xff] %v8696_v52  ;;  %v8701_v31 = vld [vmem:[%s12969_s8 + $0x590] sm:$0xff]  ;;  %v8706_v60 = vld [vmem:[%s12969_s8 + $0x598] sm:$0xff] }
  0x5d   :  { %13233 = vst [vmem:[#allocation190_spill] sm:$0xff] %v8701_v31  ;;  %13234 = vst [vmem:[#allocation191_spill] sm:$0xff] %v8706_v60  ;;  %v8711_v56 = vld [vmem:[%s12969_s8 + $0x5a0] sm:$0xff]  ;;  %v8716_v23 = vld [vmem:[%s12969_s8 + $0x5a8] sm:$0xff] }
  0x5e   :  { %13235 = vst [vmem:[#allocation192_spill] sm:$0xff] %v8711_v56  ;;  %13236 = vst [vmem:[#allocation193_spill] sm:$0xff] %v8716_v23  ;;  %v8721_v52 = vld [vmem:[%s12969_s8 + $0x5b0] sm:$0xff]  ;;  %v8726_v31 = vld [vmem:[%s12969_s8 + $0x5b8] sm:$0xff] }
  0x5f   :  { %13237 = vst [vmem:[#allocation194_spill] sm:$0xff] %v8721_v52  ;;  %13238 = vst [vmem:[#allocation195_spill] sm:$0xff] %v8726_v31  ;;  %v8731_v60 = vld [vmem:[%s12969_s8 + $0x5c0] sm:$0xff]  ;;  %v8736_v56 = vld [vmem:[%s12969_s8 + $0x5c8] sm:$0xff] }
  0x60   :  { %13239 = vst [vmem:[#allocation196_spill] sm:$0xff] %v8731_v60  ;;  %13240 = vst [vmem:[#allocation197_spill] sm:$0xff] %v8736_v56  ;;  %v8741_v23 = vld [vmem:[%s12969_s8 + $0x5d0] sm:$0xff]  ;;  %v8746_v52 = vld [vmem:[%s12969_s8 + $0x5d8] sm:$0xff] }
  0x61   :  { %13241 = vst [vmem:[#allocation198_spill] sm:$0xff] %v8741_v23  ;;  %13242 = vst [vmem:[#allocation199_spill] sm:$0xff] %v8746_v52  ;;  %v8751_v31 = vld [vmem:[%s12969_s8 + $0x5e0] sm:$0xff]  ;;  %v8756_v60 = vld [vmem:[%s12969_s8 + $0x5e8] sm:$0xff] }
  0x62   :  { %13243 = vst [vmem:[#allocation200_spill] sm:$0xff] %v8751_v31  ;;  %13244 = vst [vmem:[#allocation201_spill] sm:$0xff] %v8756_v60  ;;  %v8761_v56 = vld [vmem:[%s12969_s8 + $0x5f0] sm:$0xff]  ;;  %v8766_v23 = vld [vmem:[%s12969_s8 + $0x5f8] sm:$0xff] }
  0x63   :  { %13245 = vst [vmem:[#allocation202_spill] sm:$0xff] %v8761_v56  ;;  %13246 = vst [vmem:[#allocation203_spill] sm:$0xff] %v8766_v23  ;;  %v8771_v52 = vld [vmem:[%s12969_s8 + $0x600] sm:$0xff]  ;;  %v8776_v31 = vld [vmem:[%s12969_s8 + $0x608] sm:$0xff] }
  0x64   :  { %13247 = vst [vmem:[#allocation204_spill] sm:$0xff] %v8771_v52  ;;  %13248 = vst [vmem:[#allocation205_spill] sm:$0xff] %v8776_v31  ;;  %v8781_v60 = vld [vmem:[%s12969_s8 + $0x610] sm:$0xff]  ;;  %v8786_v56 = vld [vmem:[%s12969_s8 + $0x618] sm:$0xff] }
  0x65   :  { %13249 = vst [vmem:[#allocation206_spill] sm:$0xff] %v8781_v60  ;;  %13250 = vst [vmem:[#allocation207_spill] sm:$0xff] %v8786_v56  ;;  %v8791_v23 = vld [vmem:[%s12969_s8 + $0x620] sm:$0xff]  ;;  %v8796_v52 = vld [vmem:[%s12969_s8 + $0x628] sm:$0xff] }
  0x66   :  { %13251 = vst [vmem:[#allocation208_spill] sm:$0xff] %v8791_v23  ;;  %13252 = vst [vmem:[#allocation209_spill] sm:$0xff] %v8796_v52  ;;  %v8801_v31 = vld [vmem:[%s12969_s8 + $0x630] sm:$0xff]  ;;  %v8806_v60 = vld [vmem:[%s12969_s8 + $0x638] sm:$0xff] }
  0x67   :  { %13253 = vst [vmem:[#allocation210_spill] sm:$0xff] %v8801_v31  ;;  %13254 = vst [vmem:[#allocation211_spill] sm:$0xff] %v8806_v60  ;;  %v8811_v56 = vld [vmem:[%s12969_s8 + $0x640] sm:$0xff]  ;;  %v8816_v23 = vld [vmem:[%s12969_s8 + $0x648] sm:$0xff] }
  0x68   :  { %13255 = vst [vmem:[#allocation212_spill] sm:$0xff] %v8811_v56  ;;  %13256 = vst [vmem:[#allocation213_spill] sm:$0xff] %v8816_v23  ;;  %v8821_v52 = vld [vmem:[%s12969_s8 + $0x650] sm:$0xff]  ;;  %v8826_v31 = vld [vmem:[%s12969_s8 + $0x658] sm:$0xff] }
  0x69   :  { %13257 = vst [vmem:[#allocation214_spill] sm:$0xff] %v8821_v52  ;;  %13258 = vst [vmem:[#allocation215_spill] sm:$0xff] %v8826_v31  ;;  %v8831_v60 = vld [vmem:[%s12969_s8 + $0x660] sm:$0xff]  ;;  %v8836_v56 = vld [vmem:[%s12969_s8 + $0x668] sm:$0xff] }
  0x6a   :  { %13259 = vst [vmem:[#allocation216_spill] sm:$0xff] %v8831_v60  ;;  %13260 = vst [vmem:[#allocation217_spill] sm:$0xff] %v8836_v56  ;;  %v8841_v23 = vld [vmem:[%s12969_s8 + $0x670] sm:$0xff]  ;;  %v8846_v52 = vld [vmem:[%s12969_s8 + $0x678] sm:$0xff] }
  0x6b   :  { %13261 = vst [vmem:[#allocation218_spill] sm:$0xff] %v8841_v23  ;;  %13262 = vst [vmem:[#allocation219_spill] sm:$0xff] %v8846_v52  ;;  %v8851_v31 = vld [vmem:[%s12969_s8 + $0x680] sm:$0xff]  ;;  %v8856_v60 = vld [vmem:[%s12969_s8 + $0x688] sm:$0xff] }
  0x6c   :  { %13263 = vst [vmem:[#allocation220_spill] sm:$0xff] %v8851_v31  ;;  %13264 = vst [vmem:[#allocation221_spill] sm:$0xff] %v8856_v60  ;;  %v8861_v56 = vld [vmem:[%s12969_s8 + $0x690] sm:$0xff]  ;;  %v8866_v23 = vld [vmem:[%s12969_s8 + $0x698] sm:$0xff] }
  0x6d   :  { %13265 = vst [vmem:[#allocation222_spill] sm:$0xff] %v8861_v56  ;;  %13266 = vst [vmem:[#allocation223_spill] sm:$0xff] %v8866_v23  ;;  %v8871_v52 = vld [vmem:[%s12969_s8 + $0x6a0] sm:$0xff]  ;;  %v8876_v31 = vld [vmem:[%s12969_s8 + $0x6a8] sm:$0xff] }
  0x6e   :  { %13267 = vst [vmem:[#allocation224_spill] sm:$0xff] %v8871_v52  ;;  %13268 = vst [vmem:[#allocation225_spill] sm:$0xff] %v8876_v31  ;;  %v8881_v60 = vld [vmem:[%s12969_s8 + $0x6b0] sm:$0xff]  ;;  %v8886_v56 = vld [vmem:[%s12969_s8 + $0x6b8] sm:$0xff] }
  0x6f   :  { %13269 = vst [vmem:[#allocation226_spill] sm:$0xff] %v8881_v60  ;;  %13270 = vst [vmem:[#allocation227_spill] sm:$0xff] %v8886_v56  ;;  %v8891_v23 = vld [vmem:[%s12969_s8 + $0x6c0] sm:$0xff]  ;;  %v8896_v52 = vld [vmem:[%s12969_s8 + $0x6c8] sm:$0xff] }
  0x70   :  { %13271 = vst [vmem:[#allocation228_spill] sm:$0xff] %v8891_v23  ;;  %13272 = vst [vmem:[#allocation229_spill] sm:$0xff] %v8896_v52  ;;  %v8901_v31 = vld [vmem:[%s12969_s8 + $0x6d0] sm:$0xff]  ;;  %v8906_v60 = vld [vmem:[%s12969_s8 + $0x6d8] sm:$0xff] }
  0x71   :  { %13273 = vst [vmem:[#allocation230_spill] sm:$0xff] %v8901_v31  ;;  %13274 = vst [vmem:[#allocation231_spill] sm:$0xff] %v8906_v60  ;;  %v8911_v56 = vld [vmem:[%s12969_s8 + $0x6e0] sm:$0xff]  ;;  %v8916_v23 = vld [vmem:[%s12969_s8 + $0x6e8] sm:$0xff] }
  0x72   :  { %13275 = vst [vmem:[#allocation232_spill] sm:$0xff] %v8911_v56  ;;  %13276 = vst [vmem:[#allocation233_spill] sm:$0xff] %v8916_v23  ;;  %v8921_v52 = vld [vmem:[%s12969_s8 + $0x6f0] sm:$0xff]  ;;  %v8926_v31 = vld [vmem:[%s12969_s8 + $0x6f8] sm:$0xff] }
  0x73   :  { %13277 = vst [vmem:[#allocation234_spill] sm:$0xff] %v8921_v52  ;;  %13278 = vst [vmem:[#allocation235_spill] sm:$0xff] %v8926_v31  ;;  %v8931_v60 = vld [vmem:[%s12969_s8 + $0x700] sm:$0xff]  ;;  %v8936_v56 = vld [vmem:[%s12969_s8 + $0x708] sm:$0xff] }
  0x74   :  { %13279 = vst [vmem:[#allocation236_spill] sm:$0xff] %v8931_v60  ;;  %13280 = vst [vmem:[#allocation237_spill] sm:$0xff] %v8936_v56  ;;  %v8941_v23 = vld [vmem:[%s12969_s8 + $0x710] sm:$0xff]  ;;  %v8946_v52 = vld [vmem:[%s12969_s8 + $0x718] sm:$0xff] }
  0x75   :  { %13281 = vst [vmem:[#allocation238_spill] sm:$0xff] %v8941_v23  ;;  %13282 = vst [vmem:[#allocation239_spill] sm:$0xff] %v8946_v52  ;;  %v8951_v31 = vld [vmem:[%s12969_s8 + $0x720] sm:$0xff]  ;;  %v8956_v60 = vld [vmem:[%s12969_s8 + $0x728] sm:$0xff] }
  0x76   :  { %13283 = vst [vmem:[#allocation240_spill] sm:$0xff] %v8951_v31  ;;  %13284 = vst [vmem:[#allocation241_spill] sm:$0xff] %v8956_v60  ;;  %v8961_v56 = vld [vmem:[%s12969_s8 + $0x730] sm:$0xff]  ;;  %v8966_v23 = vld [vmem:[%s12969_s8 + $0x738] sm:$0xff] }
  0x77   :  { %13285 = vst [vmem:[#allocation242_spill] sm:$0xff] %v8961_v56  ;;  %13286 = vst [vmem:[#allocation243_spill] sm:$0xff] %v8966_v23  ;;  %v8971_v52 = vld [vmem:[%s12969_s8 + $0x740] sm:$0xff]  ;;  %v8976_v31 = vld [vmem:[%s12969_s8 + $0x748] sm:$0xff] }
  0x78   :  { %13287 = vst [vmem:[#allocation244_spill] sm:$0xff] %v8971_v52  ;;  %13288 = vst [vmem:[#allocation245_spill] sm:$0xff] %v8976_v31  ;;  %v8981_v60 = vld [vmem:[%s12969_s8 + $0x750] sm:$0xff]  ;;  %v8986_v56 = vld [vmem:[%s12969_s8 + $0x758] sm:$0xff] }
  0x79   :  { %13289 = vst [vmem:[#allocation246_spill] sm:$0xff] %v8981_v60  ;;  %13290 = vst [vmem:[#allocation247_spill] sm:$0xff] %v8986_v56  ;;  %v8991_v23 = vld [vmem:[%s12969_s8 + $0x760] sm:$0xff]  ;;  %v8996_v52 = vld [vmem:[%s12969_s8 + $0x768] sm:$0xff] }
  0x7a   :  { %13291 = vst [vmem:[#allocation248_spill] sm:$0xff] %v8991_v23  ;;  %13292 = vst [vmem:[#allocation249_spill] sm:$0xff] %v8996_v52  ;;  %v9001_v31 = vld [vmem:[%s12969_s8 + $0x770] sm:$0xff]  ;;  %v9006_v60 = vld [vmem:[%s12969_s8 + $0x778] sm:$0xff] }
  0x7b   :  { %13293 = vst [vmem:[#allocation250_spill] sm:$0xff] %v9001_v31  ;;  %13294 = vst [vmem:[#allocation251_spill] sm:$0xff] %v9006_v60  ;;  %v9011_v56 = vld [vmem:[%s12969_s8 + $0x780] sm:$0xff]  ;;  %v9016_v23 = vld [vmem:[%s12969_s8 + $0x788] sm:$0xff] }
  0x7c   :  { %13295 = vst [vmem:[#allocation252_spill] sm:$0xff] %v9011_v56  ;;  %13296 = vst [vmem:[#allocation253_spill] sm:$0xff] %v9016_v23  ;;  %v9021_v52 = vld [vmem:[%s12969_s8 + $0x790] sm:$0xff]  ;;  %v9026_v31 = vld [vmem:[%s12969_s8 + $0x798] sm:$0xff] }
  0x7d   :  { %13297 = vst [vmem:[#allocation254_spill] sm:$0xff] %v9021_v52  ;;  %13298 = vst [vmem:[#allocation255_spill] sm:$0xff] %v9026_v31  ;;  %v9031_v60 = vld [vmem:[%s12969_s8 + $0x7a0] sm:$0xff]  ;;  %v9036_v56 = vld [vmem:[%s12969_s8 + $0x7a8] sm:$0xff] }
  0x7e   :  { %13299 = vst [vmem:[#allocation256_spill] sm:$0xff] %v9031_v60  ;;  %13300 = vst [vmem:[#allocation257_spill] sm:$0xff] %v9036_v56  ;;  %v9041_v23 = vld [vmem:[%s12969_s8 + $0x7b0] sm:$0xff]  ;;  %v9046_v52 = vld [vmem:[%s12969_s8 + $0x7b8] sm:$0xff] }
  0x7f   :  { %13301 = vst [vmem:[#allocation258_spill] sm:$0xff] %v9041_v23  ;;  %13302 = vst [vmem:[#allocation259_spill] sm:$0xff] %v9046_v52  ;;  %v9051_v31 = vld [vmem:[%s12969_s8 + $0x7c0] sm:$0xff]  ;;  %v9056_v60 = vld [vmem:[%s12969_s8 + $0x7c8] sm:$0xff] }
  0x80   :  { %13303 = vst [vmem:[#allocation260_spill] sm:$0xff] %v9051_v31  ;;  %13304 = vst [vmem:[#allocation261_spill] sm:$0xff] %v9056_v60  ;;  %v9061_v56 = vld [vmem:[%s12969_s8 + $0x7d0] sm:$0xff]  ;;  %v9066_v23 = vld [vmem:[%s12969_s8 + $0x7d8] sm:$0xff] }
  0x81   :  { %13305 = vst [vmem:[#allocation262_spill] sm:$0xff] %v9061_v56  ;;  %13306 = vst [vmem:[#allocation263_spill] sm:$0xff] %v9066_v23  ;;  %v9071_v52 = vld [vmem:[%s12969_s8 + $0x7e0] sm:$0xff]  ;;  %v9076_v31 = vld [vmem:[%s12969_s8 + $0x7e8] sm:$0xff] }
  0x82   :  { %13307 = vst [vmem:[#allocation264_spill] sm:$0xff] %v9071_v52  ;;  %13308 = vst [vmem:[#allocation265_spill] sm:$0xff] %v9076_v31  ;;  %v9081_v60 = vld [vmem:[%s12969_s8 + $0x7f0] sm:$0xff]  ;;  %v9086_v56 = vld [vmem:[%s12969_s8 + $0x7f8] sm:$0xff]  ;;  %v12979_v31 = vmov 0  }
  0x83   :  { %13309 = vst [vmem:[#allocation266_spill] sm:$0xff] %v9081_v60  ;;  %13310 = vst [vmem:[#allocation267_spill] sm:$0xff] %v9086_v56  ;;  %v9091_v23 = vld [vmem:[%s13311_s25 + $0x10] sm:$0xff]  ;;  %v9096_v52 = vld [vmem:[%s13311_s25] sm:$0xff]  ;;  %7238 = vset.pattern.permute.xlu1 %v12979_v31  ;;  %7237 = vset.pattern.permute.xlu0 %v12979_v31 }
  0x84   :  { %683 = vperm.xlu1 %7238, %v9091_v23   ;;  %673 = vperm.xlu0 %7237, %v9096_v52   ;;  %v9105_v56 = vld [vmem:[%s13311_s25 + $0x18] sm:$0xff]  ;;  %v9110_v60 = vld [vmem:[%s13311_s25 + $0x8] sm:$0xff]  ;;  %v9122_v22 = vld [vmem:[%s13311_s25 + $0x20] sm:$0xff] }
  0x85   :  { %v9117_v31 = vld [vmem:[%s13311_s25 + $0x28] sm:$0xff]  ;;  %v9129_v48 = vld [vmem:[%s13311_s25 + $0x38] sm:$0xff]  ;;  %v9134_v61 = vld [vmem:[%s13311_s25 + $0x30] sm:$0xff] }
  0x86   :  { %v9141_v30 = vld [vmem:[%s13311_s25 + $0x48] sm:$0xff]  ;;  %v9146_v21 = vld [vmem:[%s13311_s25 + $0x40] sm:$0xff]  ;;  %v9153_v57 = vld [vmem:[%s13311_s25 + $0x58] sm:$0xff] }
  0x87   :  { %v9158_v63 = vld [vmem:[%s13311_s25 + $0x50] sm:$0xff]  ;;  %v9163_v29 = vld [vmem:[%s13311_s25 + $0x68] sm:$0xff]  ;;  %v9168_v20 = vld [vmem:[%s13311_s25 + $0x60] sm:$0xff] }
  0x88   :  { %688 = vperm.xlu1 %7238, %v9105_v56   ;;  %678 = vperm.xlu0 %7237, %v9110_v60  }
  0x8c   :  { %698 = vperm.xlu1 %7238, %v9117_v31   ;;  %693 = vperm.xlu0 %7237, %v9122_v22  }
  0x90   :  { %708 = vperm.xlu1 %7238, %v9129_v48   ;;  %703 = vperm.xlu0 %7237, %v9134_v61  }
  0x94   :  { %718 = vperm.xlu1 %7238, %v9141_v30   ;;  %713 = vperm.xlu0 %7237, %v9146_v21  }
  0x98   :  { %728 = vperm.xlu1 %7238, %v9153_v57   ;;  %723 = vperm.xlu0 %7237, %v9158_v63  }
  0x99   :  { %604 = vsyncadd [#allocation3], 32768  ;;  %v9177_v49 = vld [vmem:[%s13311_s25 + $0x78] sm:$0xff]  ;;  %v9182_v62 = vld [vmem:[%s13311_s25 + $0x70] sm:$0xff]  ;;  %v12986_v8 = vmov 1   ;;  %vm2364_vm0 = vcmask 523264  }
  0x9a   :  { %v9189_v28 = vld [vmem:[%s13311_s25 + $0x88] sm:$0xff]  ;;  %v9194_v19 = vld [vmem:[%s13311_s25 + $0x80] sm:$0xff]  ;;  %v9201_v58 = vld [vmem:[%s13311_s25 + $0x98] sm:$0xff]  ;;  %vm4123_vm1 = vcmask 130112   ;;  %vm4130_vm2 = vcmask 195712   ;;  %vm4137_vm3 = vcmask 261312  }
  0x9b   :  { %v9206_v53 = vld [vmem:[%s13311_s25 + $0x90] sm:$0xff]  ;;  %v9213_v27 = vld [vmem:[%s13311_s25 + $0xa8] sm:$0xff]  ;;  %v9218_v18 = vld [vmem:[%s13311_s25 + $0xa0] sm:$0xff]  ;;  %vm4144_vm4 = vcmask 326912   ;;  %vm4151_vm5 = vcmask 392512   ;;  %vm4158_vm6 = vcmask 458112  }
  0x9c   :  { %738 = vperm.xlu1 %7238, %v9163_v29   ;;  %733 = vperm.xlu0 %7237, %v9168_v20   ;;  %v9225_v50 = vld [vmem:[%s13311_s25 + $0xb8] sm:$0xff]  ;;  %v9230_v54 = vld [vmem:[%s13311_s25 + $0xb0] sm:$0xff]  ;;  %v9237_v26 = vld [vmem:[%s13311_s25 + $0xc8] sm:$0xff]  ;;  %vm4165_vm7 = vcmask 523712   ;;  %vm4206_vm8 = vcmask 1041409   ;;  %vm4209_vm9 = vcmask 517120  }
  0x9d   :  { %v9242_v17 = vld [vmem:[%s13311_s25 + $0xc0] sm:$0xff]  ;;  %v9249_v59 = vld [vmem:[%s13311_s25 + $0xd8] sm:$0xff]  ;;  %v9254_v55 = vld [vmem:[%s13311_s25 + $0xd0] sm:$0xff] }
  0x9e   :  { %v9261_v25 = vld [vmem:[%s13311_s25 + $0xe8] sm:$0xff]  ;;  %v9266_v16 = vld [vmem:[%s13311_s25 + $0xe0] sm:$0xff]  ;;  %v9273_v51 = vld [vmem:[%s13311_s25 + $0xf8] sm:$0xff] }
  0x9f   :  { %v9278_v39 = vld [vmem:[%s13311_s25 + $0xf0] sm:$0xff]  ;;  %v9285_v24 = vld [vmem:[%s13311_s25 + $0x108] sm:$0xff]  ;;  %v9290_v7 = vld [vmem:[%s13311_s25 + $0x100] sm:$0xff] }
  0xa0   :  { %748 = vperm.xlu1 %7238, %v9177_v49   ;;  %743 = vperm.xlu0 %7237, %v9182_v62   ;;  %v9297_v47 = vld [vmem:[%s13311_s25 + $0x118] sm:$0xff]  ;;  %v9302_v38 = vld [vmem:[%s13311_s25 + $0x110] sm:$0xff]  ;;  %v9309_v15 = vld [vmem:[%s13311_s25 + $0x128] sm:$0xff] }
  0xa1   :  { %v9314_v6 = vld [vmem:[%s13311_s25 + $0x120] sm:$0xff]  ;;  %v9321_v46 = vld [vmem:[%s13311_s25 + $0x138] sm:$0xff]  ;;  %v9326_v37 = vld [vmem:[%s13311_s25 + $0x130] sm:$0xff] }
  0xa2   :  { %v9333_v14 = vld [vmem:[%s13311_s25 + $0x148] sm:$0xff]  ;;  %v9338_v5 = vld [vmem:[%s13311_s25 + $0x140] sm:$0xff]  ;;  %v9345_v45 = vld [vmem:[%s13311_s25 + $0x158] sm:$0xff] }
  0xa3   :  { %v9350_v36 = vld [vmem:[%s13311_s25 + $0x150] sm:$0xff]  ;;  %v9357_v13 = vld [vmem:[%s13311_s25 + $0x168] sm:$0xff]  ;;  %v9362_v4 = vld [vmem:[%s13311_s25 + $0x160] sm:$0xff] }
  0xa4   :  { %758 = vperm.xlu1 %7238, %v9189_v28   ;;  %753 = vperm.xlu0 %7237, %v9194_v19   ;;  %13312 = vst [vmem:[#allocation268_spill] sm:$0xff] %v9350_v36  ;;  %v9369_v44 = vld [vmem:[%s13311_s25 + $0x178] sm:$0xff]  ;;  %v9374_v35 = vld [vmem:[%s13311_s25 + $0x170] sm:$0xff]  ;;  %v9381_v12 = vld [vmem:[%s13311_s25 + $0x188] sm:$0xff] }
  0xa5   :  { %v9386_v3 = vld [vmem:[%s13311_s25 + $0x180] sm:$0xff]  ;;  %v9393_v43 = vld [vmem:[%s13311_s25 + $0x198] sm:$0xff]  ;;  %v655_v34 = vld [vmem:[%s13311_s25 + $0x190] sm:$0xff] }
  0xa6   :  { %v9402_v11 = vld [vmem:[%s13311_s25 + $0x1a8] sm:$0xff]  ;;  %v9407_v2 = vld [vmem:[%s13311_s25 + $0x1a0] sm:$0xff]  ;;  %v9414_v42 = vld [vmem:[%s13311_s25 + $0x1b8] sm:$0xff] }
  0xa7   :  { %v9423_v33 = vld [vmem:[%s13311_s25 + $0x1c8] sm:$0xff]  ;;  %v9428_v10 = vld [vmem:[%s13311_s25 + $0x1c0] sm:$0xff]  ;;  %v9435_v1 = vld [vmem:[%s13311_s25 + $0x1d8] sm:$0xff] }
  0xa8   :  { %768 = vperm.xlu1 %7238, %v9201_v58   ;;  %763 = vperm.xlu0 %7237, %v9206_v53   ;;  %13313 = vst [vmem:[#allocation269_spill] sm:$0xff] %v9428_v10  ;;  %13314 = vst [vmem:[#allocation270_spill] sm:$0xff] %v9435_v1  ;;  %v9444_v41 = vld [vmem:[%s13311_s25 + $0x1e8] sm:$0xff]  ;;  %v9449_v32 = vld [vmem:[%s13311_s25 + $0x1e0] sm:$0xff] }
  0xa9   :  { %13315 = vst [vmem:[#allocation271_spill] sm:$0xff] %v9444_v41  ;;  %v9456_v9 = vld [vmem:[%s13311_s25 + $0x1f8] sm:$0xff] }
  0xac   :  { %778 = vperm.xlu1 %7238, %v9213_v27   ;;  %773 = vperm.xlu0 %7237, %v9218_v18  }
  0xb0   :  { %788 = vperm.xlu1 %7238, %v9225_v50   ;;  %783 = vperm.xlu0 %7237, %v9230_v54  }
  0xb4   :  { %798 = vperm.xlu1 %7238, %v9237_v26   ;;  %793 = vperm.xlu0 %7237, %v9242_v17  }
  0xb8   :  { %808 = vperm.xlu1 %7238, %v9249_v59   ;;  %803 = vperm.xlu0 %7237, %v9254_v55  }
  0xbc   :  { %818 = vperm.xlu1 %7238, %v9261_v25   ;;  %813 = vperm.xlu0 %7237, %v9266_v16  }
  0xc0   :  { %828 = vperm.xlu1 %7238, %v9273_v51   ;;  %823 = vperm.xlu0 %7237, %v9278_v39  }
  0xc4   :  { %838 = vperm.xlu1 %7238, %v9285_v24   ;;  %833 = vperm.xlu0 %7237, %v9290_v7  }
  0xc8   :  { %848 = vperm.xlu1 %7238, %v9297_v47   ;;  %843 = vperm.xlu0 %7237, %v9302_v38  }
  0xcc   :  { %858 = vperm.xlu1 %7238, %v9309_v15   ;;  %853 = vperm.xlu0 %7237, %v9314_v6  }
  0xd0   :  { %868 = vperm.xlu1 %7238, %v9321_v46   ;;  %863 = vperm.xlu0 %7237, %v9326_v37  }
  0xd4   :  { %878 = vperm.xlu1 %7238, %v9333_v14   ;;  %873 = vperm.xlu0 %7237, %v9338_v5  }
  0xd8   :  { %888 = vperm.xlu1 %7238, %v9345_v45   ;;  %883 = vperm.xlu0 %7237, %v9350_v36  }
  0xdc   :  { %898 = vperm.xlu1 %7238, %v9357_v13   ;;  %893 = vperm.xlu0 %7237, %v9362_v4  }
  0xe0   :  { %908 = vperm.xlu1 %7238, %v9369_v44   ;;  %903 = vperm.xlu0 %7237, %v9374_v35  }
  0xe4   :  { %918 = vperm.xlu1 %7238, %v9381_v12   ;;  %913 = vperm.xlu0 %7237, %v9386_v3  }
  0xe8   :  { %928 = vperm.xlu1 %7238, %v9393_v43   ;;  %923 = vperm.xlu0 %7237, %v655_v34   ;;  %v659_v34 = vld [vmem:[%s13311_s25 + $0x1b0] sm:$0xff] }
  0xec   :  { %938 = vperm.xlu1 %7238, %v9402_v11   ;;  %933 = vperm.xlu0 %7237, %v9407_v2  }
  0xf0   :  { %948 = vperm.xlu1 %7238, %v9414_v42   ;;  %943 = vperm.xlu0 %7237, %v659_v34   ;;  %v663_v34 = vld [vmem:[%s13311_s25 + $0x1d0] sm:$0xff] }
  0xf4   :  { %958 = vperm.xlu1 %7238, %v9423_v33   ;;  %953 = vperm.xlu0 %7237, %v9428_v10  }
  0xf8   :  { %968 = vperm.xlu1 %7238, %v9435_v1   ;;  %963 = vperm.xlu0 %7237, %v663_v34   ;;  %v667_v34 = vld [vmem:[%s13311_s25 + $0x1f0] sm:$0xff] }
  0xfc   :  { %978 = vperm.xlu1 %7238, %v9444_v41   ;;  %973 = vperm.xlu0 %7237, %v9449_v32   ;;  %v12984_v41 = vmov 3  }
 0x100   :  { %988 = vperm.xlu1 %7238, %v9456_v9   ;;  %983 = vperm.xlu0 %7237, %v667_v34  }
 0x103   :  { %v9462_v40 = vpop.permute.xlu1 %683  ;;  %v9464_v0 = vpop.permute.xlu0 %673 }
 0x104   :  { %13316 = vst [vmem:[#allocation272_spill] sm:$0xff] %v9462_v40  ;;  %13317 = vst [vmem:[#allocation273_spill] sm:$0xff] %v9464_v0  ;;  %7239 = vset.pattern.permute.xlu1 %v12986_v8  ;;  %7242 = vset.pattern.permute.xlu0 %v12984_v41 }
 0x105   :  { %1134 = vperm.xlu1 %7239, %v9110_v60   ;;  %1910 = vperm.xlu0 %7242, %v9110_v60  }
 0x107   :  { %v9470_v1 = vpop.permute.xlu1 %688  ;;  %v9472_v10 = vpop.permute.xlu0 %678 }
 0x108   :  { %13318 = vst [vmem:[#allocation274_spill] sm:$0xff] %v9470_v1  ;;  %13319 = vst [vmem:[#allocation275_spill] sm:$0xff] %v9472_v10 }
 0x109   :  { %1138 = vperm.xlu1 %7239, %v9091_v23   ;;  %1926 = vperm.xlu0 %7242, %v9117_v31  }
 0x10b   :  { %v9476_v34 = vpop.permute.xlu1 %698  ;;  %v9478_v0 = vpop.permute.xlu0 %693 }
 0x10c   :  { %13320 = vst [vmem:[#allocation276_spill] sm:$0xff] %v9476_v34  ;;  %13321 = vst [vmem:[#allocation277_spill] sm:$0xff] %v9478_v0 }
 0x10d   :  { %1146 = vperm.xlu1 %7239, %v9122_v22   ;;  %1942 = vperm.xlu0 %7242, %v9141_v30  }
 0x10f   :  { %v9482_v41 = vpop.permute.xlu1 %708  ;;  %v9484_v8 = vpop.permute.xlu0 %703 }
 0x110   :  { %13322 = vst [vmem:[#allocation278_spill] sm:$0xff] %v9482_v41  ;;  %13323 = vst [vmem:[#allocation279_spill] sm:$0xff] %v9484_v8 }
 0x111   :  { %1154 = vperm.xlu1 %7239, %v9134_v61   ;;  %1958 = vperm.xlu0 %7242, %v9163_v29  }
 0x113   :  { %v9488_v1 = vpop.permute.xlu1 %718  ;;  %v9490_v40 = vpop.permute.xlu0 %713 }
 0x114   :  { %13324 = vst [vmem:[#allocation280_spill] sm:$0xff] %v9488_v1  ;;  %13325 = vst [vmem:[#allocation281_spill] sm:$0xff] %v9490_v40 }
 0x115   :  { %1162 = vperm.xlu1 %7239, %v9146_v21   ;;  %1974 = vperm.xlu0 %7242, %v9189_v28  }
 0x117   :  { %v9494_v0 = vpop.permute.xlu1 %728  ;;  %v9496_v34 = vpop.permute.xlu0 %723 }
 0x118   :  { %13326 = vst [vmem:[#allocation282_spill] sm:$0xff] %v9494_v0  ;;  %13327 = vst [vmem:[#allocation283_spill] sm:$0xff] %v9496_v34 }
 0x119   :  { %1170 = vperm.xlu1 %7239, %v9158_v63   ;;  %1990 = vperm.xlu0 %7242, %v9213_v27  }
 0x11b   :  { %v9500_v8 = vpop.permute.xlu1 %738  ;;  %v9502_v41 = vpop.permute.xlu0 %733 }
 0x11c   :  { %13328 = vst [vmem:[#allocation284_spill] sm:$0xff] %v9500_v8  ;;  %13329 = vst [vmem:[#allocation285_spill] sm:$0xff] %v9502_v41 }
 0x11d   :  { %1178 = vperm.xlu1 %7239, %v9168_v20   ;;  %2006 = vperm.xlu0 %7242, %v9237_v26  }
 0x11f   :  { %v9506_v40 = vpop.permute.xlu1 %748  ;;  %v9508_v1 = vpop.permute.xlu0 %743 }
 0x120   :  { %13330 = vst [vmem:[#allocation286_spill] sm:$0xff] %v9506_v40  ;;  %13331 = vst [vmem:[#allocation287_spill] sm:$0xff] %v9508_v1 }
 0x121   :  { %1186 = vperm.xlu1 %7239, %v9182_v62   ;;  %2022 = vperm.xlu0 %7242, %v9261_v25  }
 0x123   :  { %v9512_v34 = vpop.permute.xlu1 %758  ;;  %v9514_v0 = vpop.permute.xlu0 %753 }
 0x124   :  { %13332 = vst [vmem:[#allocation288_spill] sm:$0xff] %v9512_v34  ;;  %13333 = vst [vmem:[#allocation289_spill] sm:$0xff] %v9514_v0 }
 0x125   :  { %1194 = vperm.xlu1 %7239, %v9194_v19   ;;  %2038 = vperm.xlu0 %7242, %v9285_v24  }
 0x127   :  { %v9518_v41 = vpop.permute.xlu1 %768  ;;  %v9520_v8 = vpop.permute.xlu0 %763 }
 0x128   :  { %13334 = vst [vmem:[#allocation290_spill] sm:$0xff] %v9518_v41  ;;  %13335 = vst [vmem:[#allocation291_spill] sm:$0xff] %v9520_v8 }
 0x129   :  { %1202 = vperm.xlu1 %7239, %v9206_v53   ;;  %2054 = vperm.xlu0 %7242, %v9309_v15  }
 0x12b   :  { %v9524_v1 = vpop.permute.xlu1 %778  ;;  %v9526_v40 = vpop.permute.xlu0 %773 }
 0x12c   :  { %13336 = vst [vmem:[#allocation292_spill] sm:$0xff] %v9524_v1  ;;  %13337 = vst [vmem:[#allocation293_spill] sm:$0xff] %v9526_v40 }
 0x12d   :  { %1210 = vperm.xlu1 %7239, %v9218_v18   ;;  %2070 = vperm.xlu0 %7242, %v9333_v14  }
 0x12f   :  { %v9530_v0 = vpop.permute.xlu1 %788  ;;  %v9532_v34 = vpop.permute.xlu0 %783 }
 0x130   :  { %13338 = vst [vmem:[#allocation294_spill] sm:$0xff] %v9530_v0  ;;  %13339 = vst [vmem:[#allocation295_spill] sm:$0xff] %v9532_v34 }
 0x131   :  { %1218 = vperm.xlu1 %7239, %v9230_v54   ;;  %2086 = vperm.xlu0 %7242, %v9357_v13  }
 0x133   :  { %v9536_v8 = vpop.permute.xlu1 %798  ;;  %v9538_v41 = vpop.permute.xlu0 %793 }
 0x134   :  { %13340 = vst [vmem:[#allocation296_spill] sm:$0xff] %v9536_v8  ;;  %13341 = vst [vmem:[#allocation297_spill] sm:$0xff] %v9538_v41 }
 0x135   :  { %1226 = vperm.xlu1 %7239, %v9242_v17   ;;  %2102 = vperm.xlu0 %7242, %v9381_v12  }
 0x137   :  { %v9542_v40 = vpop.permute.xlu1 %808  ;;  %v9544_v1 = vpop.permute.xlu0 %803 }
 0x138   :  { %13342 = vst [vmem:[#allocation298_spill] sm:$0xff] %v9542_v40  ;;  %13343 = vst [vmem:[#allocation299_spill] sm:$0xff] %v9544_v1 }
 0x139   :  { %1234 = vperm.xlu1 %7239, %v9254_v55   ;;  %2114 = vperm.xlu0 %7242, %v9407_v2  }
 0x13b   :  { %v9548_v34 = vpop.permute.xlu1 %818  ;;  %v9550_v0 = vpop.permute.xlu0 %813 }
 0x13c   :  { %13344 = vst [vmem:[#allocation300_spill] sm:$0xff] %v9548_v34  ;;  %13345 = vst [vmem:[#allocation301_spill] sm:$0xff] %v9550_v0  ;;  %v13350_v34 = vmov 1  }
 0x13d   :  { %1242 = vperm.xlu1 %7239, %v9266_v16   ;;  %2126 = vperm.xlu0 %7242, %v9414_v42  }
 0x13f   :  { %v9554_v41 = vpop.permute.xlu1 %828  ;;  %v9556_v8 = vpop.permute.xlu0 %823 }
 0x140   :  { %13346 = vst [vmem:[#allocation302_spill] sm:$0xff] %v9554_v41  ;;  %13347 = vst [vmem:[#allocation303_spill] sm:$0xff] %v9556_v8 }
 0x141   :  { %1250 = vperm.xlu1 %7239, %v9278_v39   ;;  %2134 = vperm.xlu0 %7242, %v9423_v33  }
 0x143   :  { %v9560_v1 = vpop.permute.xlu1 %838  ;;  %v9562_v40 = vpop.permute.xlu0 %833 }
 0x144   :  { %13348 = vst [vmem:[#allocation304_spill] sm:$0xff] %v9560_v1  ;;  %13349 = vst [vmem:[#allocation305_spill] sm:$0xff] %v9562_v40 }
 0x145   :  { %1258 = vperm.xlu1 %7239, %v9290_v7   ;;  %7274 = vset.pattern.permute.xlu0 %v13350_v34  ;;  %v12988_v34 = vmov 2  }
 0x146   :  { %1130 = vperm.xlu0 %7274, %v9096_v52  }
 0x147   :  { %v9567_v0 = vpop.permute.xlu1 %848  ;;  %v9569_v10 = vpop.permute.xlu0 %843 }
 0x148   :  { %13351 = vst [vmem:[#allocation306_spill] sm:$0xff] %v9567_v0  ;;  %13352 = vst [vmem:[#allocation307_spill] sm:$0xff] %v9569_v10 }
 0x149   :  { %1266 = vperm.xlu1 %7239, %v9302_v38  }
 0x14a   :  { %1142 = vperm.xlu0 %7274, %v9105_v56  }
 0x14b   :  { %v9573_v8 = vpop.permute.xlu1 %858  ;;  %v9575_v41 = vpop.permute.xlu0 %853 }
 0x14c   :  { %13353 = vst [vmem:[#allocation308_spill] sm:$0xff] %v9573_v8  ;;  %13354 = vst [vmem:[#allocation309_spill] sm:$0xff] %v9575_v41 }
 0x14d   :  { %1274 = vperm.xlu1 %7239, %v9314_v6  }
 0x14e   :  { %1150 = vperm.xlu0 %7274, %v9117_v31  }
 0x14f   :  { %v9579_v40 = vpop.permute.xlu1 %868  ;;  %v9581_v1 = vpop.permute.xlu0 %863 }
 0x150   :  { %13355 = vst [vmem:[#allocation310_spill] sm:$0xff] %v9579_v40  ;;  %13356 = vst [vmem:[#allocation311_spill] sm:$0xff] %v9581_v1 }
 0x151   :  { %1282 = vperm.xlu1 %7239, %v9326_v37  }
 0x152   :  { %1158 = vperm.xlu0 %7274, %v9129_v48  }
 0x153   :  { %v9585_v10 = vpop.permute.xlu1 %878  ;;  %v9587_v0 = vpop.permute.xlu0 %873 }
 0x154   :  { %13357 = vst [vmem:[#allocation312_spill] sm:$0xff] %v9585_v10  ;;  %13358 = vst [vmem:[#allocation313_spill] sm:$0xff] %v9587_v0 }
 0x155   :  { %1290 = vperm.xlu1 %7239, %v9338_v5  }
 0x156   :  { %1166 = vperm.xlu0 %7274, %v9141_v30  }
 0x157   :  { %v9591_v41 = vpop.permute.xlu1 %888  ;;  %v9593_v8 = vpop.permute.xlu0 %883 }
 0x158   :  { %13359 = vst [vmem:[#allocation314_spill] sm:$0xff] %v9591_v41  ;;  %13360 = vst [vmem:[#allocation315_spill] sm:$0xff] %v9593_v8 }
 0x159   :  { %1298 = vperm.xlu1 %7239, %v9350_v36  }
 0x15a   :  { %1174 = vperm.xlu0 %7274, %v9153_v57  }
 0x15b   :  { %v9597_v1 = vpop.permute.xlu1 %898  ;;  %v9599_v40 = vpop.permute.xlu0 %893 }
 0x15c   :  { %13361 = vst [vmem:[#allocation316_spill] sm:$0xff] %v9597_v1  ;;  %13362 = vst [vmem:[#allocation317_spill] sm:$0xff] %v9599_v40 }
 0x15d   :  { %1306 = vperm.xlu1 %7239, %v9362_v4  }
 0x15e   :  { %1182 = vperm.xlu0 %7274, %v9163_v29  }
 0x15f   :  { %v9603_v0 = vpop.permute.xlu1 %908  ;;  %v9605_v10 = vpop.permute.xlu0 %903 }
 0x160   :  { %13363 = vst [vmem:[#allocation318_spill] sm:$0xff] %v9603_v0  ;;  %13364 = vst [vmem:[#allocation319_spill] sm:$0xff] %v9605_v10 }
 0x161   :  { %1314 = vperm.xlu1 %7239, %v9374_v35  }
 0x162   :  { %1190 = vperm.xlu0 %7274, %v9177_v49  }
 0x163   :  { %v9609_v8 = vpop.permute.xlu1 %918  ;;  %v9611_v41 = vpop.permute.xlu0 %913 }
 0x164   :  { %13365 = vst [vmem:[#allocation320_spill] sm:$0xff] %v9609_v8  ;;  %13366 = vst [vmem:[#allocation321_spill] sm:$0xff] %v9611_v41 }
 0x165   :  { %1322 = vperm.xlu1 %7239, %v9386_v3  }
 0x166   :  { %1198 = vperm.xlu0 %7274, %v9189_v28  }
 0x167   :  { %v9615_v40 = vpop.permute.xlu1 %928  ;;  %v9617_v1 = vpop.permute.xlu0 %923 }
 0x168   :  { %13367 = vst [vmem:[#allocation322_spill] sm:$0xff] %v9615_v40  ;;  %13368 = vst [vmem:[#allocation323_spill] sm:$0xff] %v9617_v1  ;;  %v13373_v1 = vmov 3  }
 0x169   :  { %7240 = vset.pattern.permute.xlu1 %v12988_v34 }
 0x16a   :  { %1522 = vperm.xlu1 %7240, %v9110_v60   ;;  %1206 = vperm.xlu0 %7274, %v9201_v58  }
 0x16b   :  { %v9622_v35 = vpop.permute.xlu1 %938  ;;  %v9624_v8 = vpop.permute.xlu0 %933 }
 0x16c   :  { %13369 = vst [vmem:[#allocation324_spill] sm:$0xff] %v9622_v35  ;;  %13370 = vst [vmem:[#allocation325_spill] sm:$0xff] %v9624_v8 }
 0x16e   :  { %1526 = vperm.xlu1 %7240, %v9091_v23   ;;  %1214 = vperm.xlu0 %7274, %v9213_v27  }
 0x16f   :  { %v9628_v41 = vpop.permute.xlu1 %948  ;;  %v9630_v40 = vpop.permute.xlu0 %943 }
 0x170   :  { %13371 = vst [vmem:[#allocation326_spill] sm:$0xff] %v9628_v41  ;;  %13372 = vst [vmem:[#allocation327_spill] sm:$0xff] %v9630_v40 }
 0x172   :  { %7241 = vset.pattern.permute.xlu1 %v13373_v1  ;;  %1222 = vperm.xlu0 %7274, %v9225_v50  }
 0x173   :  { %v9634_v34 = vpop.permute.xlu1 %958  ;;  %1906 = vperm.xlu1 %7241, %v9096_v52   ;;  %v9637_v60 = vpop.permute.xlu0 %953 }
 0x174   :  { %13374 = vst [vmem:[#allocation328_spill] sm:$0xff] %v9634_v34  ;;  %13375 = vst [vmem:[#allocation329_spill] sm:$0xff] %v9637_v60  ;;  %v13381_v60 = vmov 2  }
 0x176   :  { %1230 = vperm.xlu0 %7274, %v9237_v26  }
 0x177   :  { %v9640_v8 = vpop.permute.xlu1 %968  ;;  %1914 = vperm.xlu1 %7241, %v9091_v23   ;;  %v9643_v35 = vpop.permute.xlu0 %963 }
 0x178   :  { %13376 = vst [vmem:[#allocation330_spill] sm:$0xff] %v9640_v8  ;;  %13377 = vst [vmem:[#allocation331_spill] sm:$0xff] %v9643_v35 }
 0x17a   :  { %1238 = vperm.xlu0 %7274, %v9249_v59  }
 0x17b   :  { %v9646_v40 = vpop.permute.xlu1 %978  ;;  %1918 = vperm.xlu1 %7241, %v9105_v56   ;;  %v9649_v41 = vpop.permute.xlu0 %973 }
 0x17c   :  { %13378 = vst [vmem:[#allocation332_spill] sm:$0xff] %v9646_v40  ;;  %13379 = vst [vmem:[#allocation333_spill] sm:$0xff] %v9649_v41 }
 0x17e   :  { %1246 = vperm.xlu0 %7274, %v9261_v25  }
 0x17f   :  { %v9652_v34 = vpop.permute.xlu1 %988  ;;  %7243 = vset.pattern.permute.xlu1 %v13381_v60  ;;  %v9655_v10 = vpop.permute.xlu0 %983 }
 0x180   :  { %13380 = vst [vmem:[#allocation334_spill] sm:$0xff] %v9652_v34  ;;  %13382 = vst [vmem:[#allocation335_spill] sm:$0xff] %v9655_v10  ;;  %1538 = vperm.xlu1 %7243, %v9117_v31  }
 0x182   :  { %1254 = vperm.xlu0 %7274, %v9273_v51  }
 0x184   :  { %v9659_v23 = vpop.permute.xlu1 %1134  ;;  %1542 = vperm.xlu1 %7243, %v9134_v61   ;;  %v9662_v40 = vpop.permute.xlu0 %1910 }
 0x186   :  { %1262 = vperm.xlu0 %7274, %v9285_v24  }
 0x188   :  { %v9665_v41 = vpop.permute.xlu1 %1138  ;;  %7244 = vset.pattern.permute.xlu1 %v13373_v1  ;;  %v9668_v34 = vpop.permute.xlu0 %1926 }
 0x189   :  { %1922 = vperm.xlu1 %7244, %v9122_v22  }
 0x18a   :  { %1270 = vperm.xlu0 %7274, %v9297_v47  }
 0x18c   :  { %v9672_v31 = vpop.permute.xlu1 %1146  ;;  %v9674_v10 = vpop.permute.xlu0 %1942 }
 0x18d   :  { %13383 = vst [vmem:[#allocation336_spill] sm:$0xff] %v9674_v10  ;;  %1930 = vperm.xlu1 %7244, %v9134_v61  }
 0x18e   :  { %1278 = vperm.xlu0 %7274, %v9309_v15  }
 0x190   :  { %v9678_v35 = vpop.permute.xlu1 %1154  ;;  %v9680_v8 = vpop.permute.xlu0 %1958 }
 0x191   :  { %13384 = vst [vmem:[#allocation337_spill] sm:$0xff] %v9678_v35  ;;  %13385 = vst [vmem:[#allocation338_spill] sm:$0xff] %v9680_v8  ;;  %1934 = vperm.xlu1 %7244, %v9129_v48  }
 0x192   :  { %1286 = vperm.xlu0 %7274, %v9321_v46  }
 0x194   :  { %v9684_v0 = vpop.permute.xlu1 %1162  ;;  %v9686_v36 = vpop.permute.xlu0 %1974 }
 0x195   :  { %13386 = vst [vmem:[#allocation339_spill] sm:$0xff] %v9686_v36  ;;  %7245 = vset.pattern.permute.xlu1 %v13381_v60 }
 0x196   :  { %1554 = vperm.xlu1 %7245, %v9141_v30   ;;  %1294 = vperm.xlu0 %7274, %v9333_v14  }
 0x198   :  { %v9691_v61 = vpop.permute.xlu1 %1170  ;;  %v9693_v10 = vpop.permute.xlu0 %1990 }
 0x199   :  { %13387 = vst [vmem:[#allocation340_spill] sm:$0xff] %v9691_v61  ;;  %13388 = vst [vmem:[#allocation341_spill] sm:$0xff] %v9693_v10 }
 0x19a   :  { %1558 = vperm.xlu1 %7245, %v9158_v63   ;;  %1302 = vperm.xlu0 %7274, %v9345_v45  }
 0x19c   :  { %v9697_v8 = vpop.permute.xlu1 %1178  ;;  %v9699_v35 = vpop.permute.xlu0 %2006 }
 0x19d   :  { %13389 = vst [vmem:[#allocation342_spill] sm:$0xff] %v9699_v35 }
 0x19e   :  { %7246 = vset.pattern.permute.xlu1 %v13373_v1  ;;  %1310 = vperm.xlu0 %7274, %v9357_v13  }
 0x19f   :  { %1938 = vperm.xlu1 %7246, %v9146_v21  }
 0x1a0   :  { %v9704_v30 = vpop.permute.xlu1 %1186  ;;  %v9706_v36 = vpop.permute.xlu0 %2022 }
 0x1a1   :  { %13390 = vst [vmem:[#allocation343_spill] sm:$0xff] %v9706_v36 }
 0x1a2   :  { %1318 = vperm.xlu0 %7274, %v9369_v44  }
 0x1a3   :  { %1946 = vperm.xlu1 %7246, %v9158_v63  }
 0x1a4   :  { %v9710_v10 = vpop.permute.xlu1 %1194  ;;  %v9712_v61 = vpop.permute.xlu0 %2038 }
 0x1a5   :  { %13391 = vst [vmem:[#allocation344_spill] sm:$0xff] %v9710_v10  ;;  %13392 = vst [vmem:[#allocation345_spill] sm:$0xff] %v9712_v61 }
 0x1a6   :  { %1326 = vperm.xlu0 %7274, %v9381_v12  }
 0x1a7   :  { %1950 = vperm.xlu1 %7246, %v9153_v57  }
 0x1a8   :  { %v9716_v35 = vpop.permute.xlu1 %1202  ;;  %v9718_v13 = vpop.permute.xlu0 %2054 }
 0x1a9   :  { %13393 = vst [vmem:[#allocation346_spill] sm:$0xff] %v9716_v35  ;;  %13394 = vst [vmem:[#allocation347_spill] sm:$0xff] %v9718_v13 }
 0x1aa   :  { %1338 = vperm.xlu0 %7274, %v9407_v2  }
 0x1ab   :  { %7247 = vset.pattern.permute.xlu1 %v13381_v60 }
 0x1ac   :  { %v9722_v36 = vpop.permute.xlu1 %1210  ;;  %1570 = vperm.xlu1 %7247, %v9163_v29   ;;  %v9725_v63 = vpop.permute.xlu0 %2070 }
 0x1ad   :  { %13395 = vst [vmem:[#allocation348_spill] sm:$0xff] %v9722_v36  ;;  %13396 = vst [vmem:[#allocation349_spill] sm:$0xff] %v9725_v63 }
 0x1ae   :  { %1350 = vperm.xlu0 %7274, %v9414_v42  }
 0x1b0   :  { %v9728_v61 = vpop.permute.xlu1 %1218  ;;  %1574 = vperm.xlu1 %7247, %v9182_v62   ;;  %v9731_v12 = vpop.permute.xlu0 %2086 }
 0x1b1   :  { %13397 = vst [vmem:[#allocation350_spill] sm:$0xff] %v9728_v61  ;;  %13398 = vst [vmem:[#allocation351_spill] sm:$0xff] %v9731_v12  ;;  %v13447_v61 = vld [vmem:[#allocation276_spill] sm:$0xff] }
 0x1b2   :  { %1358 = vperm.xlu0 %7274, %v9423_v33   ;;  %v7280_v33 = vld [vmem:[%s12966_s5] sm:$0xff]  }
 0x1b3   :  { %7081 = vmatprep.subr.bf16.mxu0 %v7280_v33 }
 0x1b4   :  { %v9734_v13 = vpop.permute.xlu1 %1226  ;;  %7248 = vset.pattern.permute.xlu1 %v13373_v1  ;;  %v9737_v2 = vpop.permute.xlu0 %2102  ;;  %7082 = vmatpush3.bf16.msra.mxu0 %v7280_v33  ;;  %v7282_v33 = vld [vmem:[%s12966_s5 + $0x10] sm:$0xff]  }
 0x1b5   :  { %13399 = vst [vmem:[#allocation352_spill] sm:$0xff] %v9734_v13  ;;  %13400 = vst [vmem:[#allocation353_spill] sm:$0xff] %v9737_v2  ;;  %1954 = vperm.xlu1 %7248, %v9168_v20  }
 0x1b6   :  { %1370 = vperm.xlu0 %7274, %v9449_v32  }
 0x1b8   :  { %v9741_v29 = vpop.permute.xlu1 %1234  ;;  %v9743_v42 = vpop.permute.xlu0 %2114 }
 0x1b9   :  { %13401 = vst [vmem:[#allocation354_spill] sm:$0xff] %v9741_v29  ;;  %13402 = vst [vmem:[#allocation355_spill] sm:$0xff] %v9743_v42  ;;  %1962 = vperm.xlu1 %7248, %v9182_v62   ;;  %v7281_v42 = vld [vmem:[%s12966_s5 + $0x8] sm:$0xff]  }
 0x1ba   :  { %1382 = vperm.xlu0 %7274, %v9456_v9   ;;  %7083 = vmatprep.subr.bf16.mxu0 %v7281_v42 }
 0x1bb   :  { %7084 = vmatpush3.bf16.msra.mxu0 %v7281_v42  ;;  %v7283_v42 = vld [vmem:[%s12966_s5 + $0x18] sm:$0xff]  }
 0x1bc   :  { %v9750_v12 = vpop.permute.xlu1 %1242  ;;  %v9752_v2 = vpop.permute.xlu0 %2126  ;;  %7085 = vmatprep.subr.bf16.mxu0 %v7282_v33 }
 0x1bd   :  { %13403 = vst [vmem:[#allocation356_spill] sm:$0xff] %v9750_v12  ;;  %13404 = vst [vmem:[#allocation357_spill] sm:$0xff] %v9752_v2  ;;  %1966 = vperm.xlu1 %7248, %v9177_v49  }
 0x1be   :  { %7276 = vset.pattern.permute.xlu0 %v13381_v60 }
 0x1bf   :  { %1518 = vperm.xlu0 %7276, %v9096_v52   ;;  %7086 = vmatpush3.bf16.msra.mxu0 %v7282_v33 }
 0x1c0   :  { %v9760_v62 = vpop.permute.xlu1 %1250  ;;  %v9762_v63 = vpop.permute.xlu0 %2134  ;;  %7087 = vmatprep.subr.bf16.mxu0 %v7283_v42 }
 0x1c1   :  { %13405 = vst [vmem:[#allocation358_spill] sm:$0xff] %v9760_v62  ;;  %13406 = vst [vmem:[#allocation359_spill] sm:$0xff] %v9762_v63  ;;  %7249 = vset.pattern.permute.xlu1 %v13381_v60 }
 0x1c2   :  { %1586 = vperm.xlu1 %7249, %v9189_v28  }
 0x1c3   :  { %1530 = vperm.xlu0 %7276, %v9105_v56   ;;  %7088 = vmatpush3.bf16.msra.mxu0 %v7283_v42 }
 0x1c4   :  { %v9770_v2 = vpop.permute.xlu1 %1258 }
 0x1c5   :  { %13407 = vst [vmem:[#allocation360_spill] sm:$0xff] %v9770_v2  ;;  %v9772_v52 = vpop.permute.xlu0 %1130 }
 0x1c6   :  { %1590 = vperm.xlu1 %7249, %v9206_v53  }
 0x1c7   :  { %1534 = vperm.xlu0 %7276, %v9122_v22  }
 0x1c8   :  { %v9779_v63 = vpop.permute.xlu1 %1266 }
 0x1c9   :  { %13408 = vst [vmem:[#allocation361_spill] sm:$0xff] %v9779_v63  ;;  %v9781_v28 = vpop.permute.xlu0 %1142 }
 0x1ca   :  { %7250 = vset.pattern.permute.xlu1 %v13373_v1 }
 0x1cb   :  { %1970 = vperm.xlu1 %7250, %v9194_v19   ;;  %1546 = vperm.xlu0 %7276, %v9129_v48  }
 0x1cc   :  { %v9786_v56 = vpop.permute.xlu1 %1274 }
 0x1cd   :  { %13409 = vst [vmem:[#allocation362_spill] sm:$0xff] %v9786_v56  ;;  %v9788_v33 = vpop.permute.xlu0 %1150 }
 0x1cf   :  { %1978 = vperm.xlu1 %7250, %v9206_v53   ;;  %1550 = vperm.xlu0 %7276, %v9146_v21  }
 0x1d0   :  { %v9792_v22 = vpop.permute.xlu1 %1282 }
 0x1d1   :  { %13410 = vst [vmem:[#allocation363_spill] sm:$0xff] %v9792_v22  ;;  %v9794_v63 = vpop.permute.xlu0 %1158 }
 0x1d3   :  { %1982 = vperm.xlu1 %7250, %v9201_v58   ;;  %1562 = vperm.xlu0 %7276, %v9153_v57  }
 0x1d4   :  { %v9798_v42 = vpop.permute.xlu1 %1290 }
 0x1d5   :  { %13411 = vst [vmem:[#allocation364_spill] sm:$0xff] %v9798_v42  ;;  %v9800_v2 = vpop.permute.xlu0 %1166 }
 0x1d7   :  { %7251 = vset.pattern.permute.xlu1 %v13381_v60  ;;  %1566 = vperm.xlu0 %7276, %v9168_v20  }
 0x1d8   :  { %v9804_v48 = vpop.permute.xlu1 %1298  ;;  %1602 = vperm.xlu1 %7251, %v9213_v27  }
 0x1d9   :  { %13412 = vst [vmem:[#allocation365_spill] sm:$0xff] %v9804_v48  ;;  %v9807_v21 = vpop.permute.xlu0 %1174 }
 0x1db   :  { %1578 = vperm.xlu0 %7276, %v9177_v49  }
 0x1dc   :  { %v9810_v53 = vpop.permute.xlu1 %1306  ;;  %1606 = vperm.xlu1 %7251, %v9230_v54  }
 0x1dd   :  { %13413 = vst [vmem:[#allocation366_spill] sm:$0xff] %v9810_v53  ;;  %v9813_v57 = vpop.permute.xlu0 %1182 }
 0x1df   :  { %1582 = vperm.xlu0 %7276, %v9194_v19  }
 0x1e0   :  { %v9816_v42 = vpop.permute.xlu1 %1314  ;;  %7252 = vset.pattern.permute.xlu1 %v13373_v1 }
 0x1e1   :  { %13414 = vst [vmem:[#allocation367_spill] sm:$0xff] %v9816_v42  ;;  %1986 = vperm.xlu1 %7252, %v9218_v18   ;;  %v9820_v20 = vpop.permute.xlu0 %1190 }
 0x1e3   :  { %1594 = vperm.xlu0 %7276, %v9201_v58  }
 0x1e4   :  { %v9823_v27 = vpop.permute.xlu1 %1322 }
 0x1e5   :  { %13415 = vst [vmem:[#allocation368_spill] sm:$0xff] %v9823_v27  ;;  %1994 = vperm.xlu1 %7252, %v9230_v54   ;;  %v9826_v49 = vpop.permute.xlu0 %1198 }
 0x1e7   :  { %1598 = vperm.xlu0 %7276, %v9218_v18  }
 0x1e9   :  { %v9829_v53 = vpop.permute.xlu1 %1522  ;;  %1998 = vperm.xlu1 %7252, %v9225_v50   ;;  %v9832_v19 = vpop.permute.xlu0 %1206 }
 0x1ea   :  { %13416 = vst [vmem:[#allocation369_spill] sm:$0xff] %v9832_v19 }
 0x1eb   :  { %1610 = vperm.xlu0 %7276, %v9225_v50  }
 0x1ed   :  { %v9835_v42 = vpop.permute.xlu1 %1526  ;;  %7253 = vset.pattern.permute.xlu1 %v13381_v60  ;;  %v9838_v58 = vpop.permute.xlu0 %1214 }
 0x1ee   :  { %13417 = vst [vmem:[#allocation370_spill] sm:$0xff] %v9838_v58  ;;  %1618 = vperm.xlu1 %7253, %v9237_v26  }
 0x1ef   :  { %1614 = vperm.xlu0 %7276, %v9242_v17  }
 0x1f1   :  { %v9842_v54 = vpop.permute.xlu0 %1222 }
 0x1f2   :  { %13418 = vst [vmem:[#allocation371_spill] sm:$0xff] %v9842_v54  ;;  %1622 = vperm.xlu1 %7253, %v9254_v55   ;;  %v9845_v18 = vpop.permute.xlu1 %1906 }
 0x1f3   :  { %1626 = vperm.xlu0 %7276, %v9249_v59  }
 0x1f5   :  { %v9848_v27 = vpop.permute.xlu0 %1230 }
 0x1f6   :  { %13419 = vst [vmem:[#allocation372_spill] sm:$0xff] %v9848_v27  ;;  %7254 = vset.pattern.permute.xlu1 %v13373_v1  ;;  %v9851_v50 = vpop.permute.xlu1 %1914 }
 0x1f7   :  { %2002 = vperm.xlu1 %7254, %v9242_v17   ;;  %1630 = vperm.xlu0 %7276, %v9266_v16  }
 0x1f9   :  { %v9855_v26 = vpop.permute.xlu0 %1238 }
 0x1fa   :  { %13420 = vst [vmem:[#allocation373_spill] sm:$0xff] %v9855_v26  ;;  %v9857_v48 = vpop.permute.xlu1 %1918 }
 0x1fb   :  { %2010 = vperm.xlu1 %7254, %v9254_v55   ;;  %1642 = vperm.xlu0 %7276, %v9273_v51  }
 0x1fd   :  { %v9861_v22 = vpop.permute.xlu0 %1246 }
 0x1fe   :  { %13421 = vst [vmem:[#allocation374_spill] sm:$0xff] %v9861_v22 }
 0x1ff   :  { %2014 = vperm.xlu1 %7254, %v9249_v59   ;;  %v9864_v56 = vpop.permute.xlu1 %1538  ;;  %1646 = vperm.xlu0 %7276, %v9290_v7  }
 0x201   :  { %v9867_v62 = vpop.permute.xlu0 %1254 }
 0x202   :  { %13422 = vst [vmem:[#allocation375_spill] sm:$0xff] %v9867_v62 }
 0x203   :  { %7255 = vset.pattern.permute.xlu1 %v13381_v60  ;;  %v9870_v17 = vpop.permute.xlu1 %1542  ;;  %1658 = vperm.xlu0 %7276, %v9297_v47  }
 0x204   :  { %1634 = vperm.xlu1 %7255, %v9261_v25  }
 0x205   :  { %v9874_v55 = vpop.permute.xlu0 %1262 }
 0x206   :  { %13423 = vst [vmem:[#allocation376_spill] sm:$0xff] %v9874_v55 }
 0x207   :  { %1662 = vperm.xlu0 %7276, %v9314_v6  }
 0x208   :  { %1638 = vperm.xlu1 %7255, %v9278_v39   ;;  %v9878_v59 = vpop.permute.xlu1 %1922 }
 0x209   :  { %v9880_v12 = vpop.permute.xlu0 %1270 }
 0x20a   :  { %13424 = vst [vmem:[#allocation377_spill] sm:$0xff] %v9880_v12 }
 0x20b   :  { %1674 = vperm.xlu0 %7276, %v9321_v46  }
 0x20c   :  { %7256 = vset.pattern.permute.xlu1 %v13373_v1  ;;  %v9884_v62 = vpop.permute.xlu1 %1930 }
 0x20d   :  { %2018 = vperm.xlu1 %7256, %v9266_v16   ;;  %v9887_v22 = vpop.permute.xlu0 %1278 }
 0x20e   :  { %13425 = vst [vmem:[#allocation378_spill] sm:$0xff] %v9887_v22 }
 0x20f   :  { %1678 = vperm.xlu0 %7276, %v9338_v5  }
 0x210   :  { %v9890_v25 = vpop.permute.xlu1 %1934 }
 0x211   :  { %2026 = vperm.xlu1 %7256, %v9278_v39   ;;  %v9893_v55 = vpop.permute.xlu0 %1286 }
 0x212   :  { %13426 = vst [vmem:[#allocation379_spill] sm:$0xff] %v9893_v55  ;;  %v13440_v55 = vld [vmem:[#allocation275_spill] sm:$0xff] }
 0x213   :  { %1690 = vperm.xlu0 %7276, %v9345_v45  }
 0x215   :  { %2030 = vperm.xlu1 %7256, %v9273_v51   ;;  %v9897_v12 = vpop.permute.xlu1 %1554  ;;  %v9899_v26 = vpop.permute.xlu0 %1294 }
 0x216   :  { %13427 = vst [vmem:[#allocation380_spill] sm:$0xff] %v9899_v26  ;;  %v13439_v26 = vld [vmem:[#allocation271_spill] sm:$0xff] }
 0x217   :  { %1694 = vperm.xlu0 %7276, %v9362_v4  }
 0x219   :  { %7257 = vset.pattern.permute.xlu1 %v13381_v60  ;;  %v9903_v16 = vpop.permute.xlu1 %1558  ;;  %v9905_v5 = vpop.permute.xlu0 %1302 }
 0x21a   :  { %13428 = vst [vmem:[#allocation381_spill] sm:$0xff] %v9905_v5  ;;  %1650 = vperm.xlu1 %7257, %v9285_v24  }
 0x21b   :  { %1706 = vperm.xlu0 %7276, %v9369_v44   ;;  %v12991_v44 = vlaneseq }
 0x21d   :  { %v9909_v39 = vpop.permute.xlu0 %1310 }
 0x21e   :  { %13429 = vst [vmem:[#allocation382_spill] sm:$0xff] %v9909_v39  ;;  %1654 = vperm.xlu1 %7257, %v9302_v38   ;;  %v9912_v45 = vpop.permute.xlu1 %1938 }
 0x21f   :  { %1710 = vperm.xlu0 %7276, %v9386_v3  }
 0x221   :  { %v9915_v51 = vpop.permute.xlu0 %1318 }
 0x222   :  { %13430 = vst [vmem:[#allocation383_spill] sm:$0xff] %v9915_v51  ;;  %7258 = vset.pattern.permute.xlu1 %v13373_v1  ;;  %v9918_v4 = vpop.permute.xlu1 %1946  ;;  %v9931_v51 = vshrl.u32 %v12991_v44, 7  ;;  %v13437_v44 = vld [vmem:[#allocation270_spill] sm:$0xff] }
 0x223   :  { %2034 = vperm.xlu1 %7258, %v9290_v7   ;;  %1722 = vperm.xlu0 %7276, %v9393_v43   ;;  %v13434_v7 = vld [vmem:[#allocation269_spill] sm:$0xff] }
 0x224   :  { %13433 = vst [vmem:[#allocation386_spill] sm:$0xff] %v9931_v51 }
 0x225   :  { %v9922_v24 = vpop.permute.xlu0 %1326 }
 0x226   :  { %13431 = vst [vmem:[#allocation384_spill] sm:$0xff] %v9922_v24  ;;  %v9924_v39 = vpop.permute.xlu1 %1950  ;;  %v993_v24 = vsub.s32 0, %v9931_v51 }
 0x227   :  { %2042 = vperm.xlu1 %7258, %v9302_v38   ;;  %1730 = vperm.xlu0 %7276, %v9402_v11   ;;  %v669_v38 = vld [vmem:[%s12964_s3] sm:$0xf] }
 0x229   :  { %v9928_v3 = vpop.permute.xlu0 %1338 }
 0x22a   :  { %13432 = vst [vmem:[#allocation385_spill] sm:$0xff] %v9928_v3 }
 0x22b   :  { %2046 = vperm.xlu1 %7258, %v9297_v47   ;;  %v9934_v5 = vpop.permute.xlu1 %1570  ;;  %1742 = vperm.xlu0 %7276, %v13434_v7   ;;  %v1387_v47 = vsub.s32 1, %v9931_v51  ;;  %v9951_v7 = vrot.slane %v669_v38, %v993_v24  ;;  %v2163_v24 = vsub.s32 3, %v9931_v51 }
 0x22d   :  { %v9937_v43 = vpop.permute.xlu0 %1350  ;;  %v996_v22 = vmul.f32 %v9951_v7, %v13440_v55  ;;  %v9957_v29 = vrot.slane %v669_v38, %v1387_v47  ;;  %v13444_v55 = vld [vmem:[#allocation273_spill] sm:$0xff]  ;;  %v1000_v36 = vmul.f32 %v9951_v7, %v13447_v61  ;;  %v9994_v19 = vrot.slane %v669_v38, %v2163_v24  ;;  %v13451_v61 = vld [vmem:[#allocation279_spill] sm:$0xff]  ;;  %v13454_v24 = vld [vmem:[#allocation282_spill] sm:$0xff] }
 0x22e   :  { %13435 = vst [vmem:[#allocation269_spill] sm:$0xff] %v9937_v43  ;;  %v1775_v43 = vsub.s32 2, %v9931_v51  ;;  %v995_v47 = vmul.f32 %v9951_v7, %v13444_v55  ;;  %v13448_v55 = vld [vmem:[#allocation277_spill] sm:$0xff]  ;;  %v1001_v10 = vmul.f32 %v9951_v7, %v13451_v61 }
 0x22f   :  { %7259 = vset.pattern.permute.xlu1 %v13381_v60  ;;  %v9944_v11 = vpop.permute.xlu1 %1574  ;;  %1754 = vperm.xlu0 %7276, %v13437_v44   ;;  %v999_v58 = vmul.f32 %v9951_v7, %v13448_v55  ;;  %v13452_v55 = vld [vmem:[#allocation280_spill] sm:$0xff] }
 0x230   :  { %13436 = vst [vmem:[#allocation387_spill] sm:$0xff] %v9944_v11  ;;  %1666 = vperm.xlu1 %7259, %v9309_v15   ;;  %v13443_v15 = vld [vmem:[#allocation272_spill] sm:$0xff]  ;;  %v9967_v27 = vrot.slane %v669_v38, %v1775_v43  ;;  %v13446_v43 = vld [vmem:[#allocation274_spill] sm:$0xff]  ;;  %v13455_v11 = vld [vmem:[#allocation283_spill] sm:$0xff] }
 0x231   :  { %v9949_v3 = vpop.permute.xlu0 %1358  ;;  %v998_v51 = vmul.f32 %v9951_v7, %v13446_v43  ;;  %v13450_v43 = vld [vmem:[#allocation278_spill] sm:$0xff] }
 0x232   :  { %13438 = vst [vmem:[#allocation270_spill] sm:$0xff] %v9949_v3  ;;  %v997_v3 = vmul.f32 %v9951_v7, %v13443_v15 }
 0x233   :  { %1762 = vperm.xlu0 %7276, %v13439_v26   ;;  %v9972_v26 = vld [vmem:[%s12965_s4] ss:$0 sm:$0xff] }
 0x234   :  { %1670 = vperm.xlu1 %7259, %v9326_v37   ;;  %v9960_v44 = vpop.permute.xlu1 %1954  ;;  %v1066_v54 = vadd.f32 %v9972_v26, %v996_v22  ;;  %v1065_v35 = vadd.f32 %v9972_v26, %v995_v47  ;;  %v1070_v61 = vadd.f32 %v9972_v26, %v1000_v36 }
 0x235   :  { %13441 = vst [vmem:[#allocation271_spill] sm:$0xff] %v9960_v44  ;;  %v9962_v13 = vpop.permute.xlu0 %1370 }
 0x236   :  { %13442 = vst [vmem:[#allocation275_spill] sm:$0xff] %v9962_v13  ;;  %v1390_v13 = vmul.f32 %v9957_v29, %v9659_v23  ;;  %v1067_v23 = vadd.f32 %v9972_v26, %v997_v3  ;;  %v13453_v3 = vld [vmem:[#allocation281_spill] sm:$0xff] }
 0x237   :  { %7278 = vset.pattern.permute.xlu0 %v13373_v1  ;;  %v1003_v38 = vmul.f32 %v9951_v7, %v13453_v3  ;;  %v2166_v3 = vmul.f32 %v9994_v19, %v9662_v40 }
 0x238   :  { %7260 = vset.pattern.permute.xlu1 %v13373_v1  ;;  %v9981_v15 = vpop.permute.xlu1 %1962  ;;  %2146 = vperm.xlu0 %7278, %v9449_v32   ;;  %v1778_v32 = vmul.f32 %v9967_v27, %v9829_v53  ;;  %v1006_v53 = vmul.f32 %v9951_v7, %v13454_v24  ;;  %v1454_v44 = vadd.f32 %v1390_v13, %v1066_v54 }
 0x239   :  { %13445 = vst [vmem:[#allocation272_spill] sm:$0xff] %v9981_v15  ;;  %2050 = vperm.xlu1 %7260, %v9314_v6   ;;  %v9991_v22 = vpop.permute.xlu0 %1382  ;;  %v1002_v15 = vmul.f32 %v9951_v7, %v13450_v43  ;;  %v1389_v6 = vmul.f32 %v9957_v29, %v9772_v52  ;;  %v1068_v43 = vadd.f32 %v9972_v26, %v998_v51 }
 0x23a   :  { %13449 = vst [vmem:[#allocation273_spill] sm:$0xff] %v9991_v22  ;;  %v1004_v22 = vmul.f32 %v9951_v7, %v13452_v55  ;;  %v1069_v52 = vadd.f32 %v9972_v26, %v999_v58  ;;  %v1005_v55 = vmul.f32 %v9951_v7, %v13455_v11  ;;  %v1391_v13 = vmul.f32 %v9957_v29, %v9665_v41 }
 0x23b   :  { %v1842_v54 = vadd.f32 %v1778_v32, %v1454_v44  ;;  %v1072_v36 = vadd.f32 %v9972_v26, %v1002_v15  ;;  %v1071_v58 = vadd.f32 %v9972_v26, %v1001_v10  ;;  %v1453_v24 = vadd.f32 %v1389_v6, %v1065_v35 }
 0x23c   :  { %v10011_v47 = vpop.permute.xlu1 %1966  ;;  %2158 = vperm.xlu0 %7278, %v9456_v9   ;;  %v1392_v9 = vmul.f32 %v9957_v29, %v9781_v28  ;;  %v10033_v40 = vadd.f32 %v9972_v26, %v1003_v38  ;;  %v10036_v41 = vadd.f32 %v9972_v26, %v1006_v53  ;;  %v1394_v28 = vmul.f32 %v9957_v29, %v9788_v33 }
 0x23d   :  { %2058 = vperm.xlu1 %7260, %v9326_v37   ;;  %v10030_v37 = vadd.f32 %v9972_v26, %v1004_v22  ;;  %v10041_v44 = vadd.f32 %v9972_v26, %v1005_v55  ;;  %v1779_v10 = vmul.f32 %v9967_v27, %v9835_v42  ;;  %v2165_v35 = vmul.f32 %v9994_v19, %v9845_v18 }
 0x23e   :  { %v1519_v51 = vpop.permute.xlu0 %1518  ;;  %v1455_v32 = vadd.f32 %v1391_v13, %v1067_v23  ;;  %v1393_v6 = vmul.f32 %v9957_v29, %v9672_v31  ;;  %v1456_v38 = vadd.f32 %v1392_v9, %v1068_v43  ;;  %v2230_v53 = vadd.f32 %v2166_v3, %v1842_v54 }
 0x23f   :  { %v1777_v11 = vmul.f32 %v9967_v27, %v1519_v51  ;;  %v2167_v55 = vmul.f32 %v9994_v19, %v9851_v50  ;;  %v1782_v42 = vmul.f32 %v9967_v27, %v9864_v56  ;;  %v1458_v13 = vadd.f32 %v1394_v28, %v1070_v61 }
 0x240   :  { %v1843_v31 = vadd.f32 %v1779_v10, %v1455_v32  ;;  %v2168_v43 = vmul.f32 %v9994_v19, %v9857_v48  ;;  %v2170_v9 = vmul.f32 %v9994_v19, %v9668_v34  ;;  %v1457_v54 = vadd.f32 %v1393_v6, %v1069_v52  ;;  %v13459_v6 = vld [vmem:[#allocation286_spill] sm:$0xff] }
 0x241   :  { %v1841_v15 = vadd.f32 %v1777_v11, %v1453_v24  ;;  %2062 = vperm.xlu1 %7260, %v9321_v46   ;;  %v10048_v22 = vpop.permute.xlu1 %1586  ;;  %v13456_v24 = vld [vmem:[#allocation284_spill] sm:$0xff]  ;;  %v13457_v11 = vld [vmem:[#allocation285_spill] sm:$0xff]  ;;  %v1396_v61 = vmul.f32 %v9957_v29, %v9794_v63  ;;  %v1846_v10 = vadd.f32 %v1782_v42, %v1458_v13  ;;  %v1010_v63 = vmul.f32 %v9951_v7, %v13459_v6 }
 0x242   :  { %v1531_v33 = vpop.permute.xlu0 %1530  ;;  %v1008_v46 = vmul.f32 %v9951_v7, %v13456_v24  ;;  %v1007_v23 = vmul.f32 %v9951_v7, %v13457_v11  ;;  %v2231_v28 = vadd.f32 %v2167_v55, %v1843_v31  ;;  %v13460_v11 = vld [vmem:[#allocation268_spill] sm:$0xff] }
 0x243   :  { %v1780_v18 = vmul.f32 %v9967_v27, %v1531_v33  ;;  %v2229_v51 = vadd.f32 %v2165_v35, %v1841_v15  ;;  %v13458_v35 = vld [vmem:[#allocation337_spill] sm:$0xff]  ;;  %v1783_v33 = vmul.f32 %v9967_v27, %v9870_v17  ;;  %v1460_v24 = vadd.f32 %v1396_v61, %v1072_v36  ;;  %v13461_v36 = vld [vmem:[#allocation287_spill] sm:$0xff] }
 0x244   :  { %v1395_v15 = vmul.f32 %v9957_v29, %v13458_v35  ;;  %v10079_v34 = vadd.f32 %v9972_v26, %v1008_v46  ;;  %v10082_v52 = vadd.f32 %v9972_v26, %v1007_v23  ;;  %v1786_v46 = vmul.f32 %v9967_v27, %v9897_v12 }
 0x245   :  { %v1844_v3 = vadd.f32 %v1780_v18, %v1456_v38  ;;  %7261 = vset.pattern.permute.xlu1 %v13381_v60  ;;  %v10064_v50 = vpop.permute.xlu1 %1590  ;;  %v10066_v56 = vpack.c.bf16 %v2230_v53, %v2229_v51  ;;  %v2169_v53 = vmul.f32 %v9994_v19, %v9878_v59  ;;  %v1397_v51 = vmul.f32 %v9957_v29, %v9684_v0 }
 0x246   :  { %1682 = vperm.xlu1 %7261, %v9333_v14   ;;  %v1535_v48 = vpop.permute.xlu0 %1534  ;;  %v1398_v14 = vmul.f32 %v9957_v29, %v9800_v2  ;;  %v1459_v18 = vadd.f32 %v1395_v15, %v1071_v58  ;;  %v2234_v17 = vadd.f32 %v2170_v9, %v1846_v10  ;;  %v2171_v59 = vmul.f32 %v9994_v19, %v9884_v62  ;;  %v13462_v58 = vld [vmem:[#allocation340_spill] sm:$0xff] }
 0x247   :  { %v2232_v32 = vadd.f32 %v2168_v43, %v1844_v3  ;;  %v1781_v38 = vmul.f32 %v9967_v27, %v1535_v48  ;;  %7089 = vmatprep.mubr.msk.bf16.mxu0 %vm2364_vm0, %v10066_v56  ;;  %v10107_v0 = vadd.f32 %v9972_v26, %v1010_v63  ;;  %v1009_v12 = vmul.f32 %v9951_v7, %v13461_v36  ;;  %v13463_v15 = vld [vmem:[#allocation336_spill] sm:$0xff]  ;;  %v7574_v63 = vld [vmem:[%s13311_s25 + $0x140] sm:$0xff] }
 0x248   :  { %v1399_v43 = vmul.f32 %v9957_v29, %v13462_v58  ;;  %v1462_v3 = vadd.f32 %v1398_v14, %v10030_v37  ;;  %v1847_v9 = vadd.f32 %v1783_v33, %v1459_v18  ;;  %v2172_v62 = vmul.f32 %v9994_v19, %v9890_v25 }
 0x249   :  { %v1845_v55 = vadd.f32 %v1781_v38, %v1457_v54  ;;  %v10092_v42 = vpack.c.bf16 %v2232_v32, %v2231_v28  ;;  %v2174_v61 = vmul.f32 %v9994_v19, %v13463_v15  ;;  %v1461_v48 = vadd.f32 %v1397_v51, %v10033_v40  ;;  %v13464_v40 = vld [vmem:[#allocation288_spill] sm:$0xff] }
 0x24a   :  { %1686 = vperm.xlu1 %7261, %v13460_v11   ;;  %v10099_v2 = vpop.permute.xlu1 %1970  ;;  %v1547_v23 = vpop.permute.xlu0 %1546  ;;  %v1400_v28 = vmul.f32 %v9957_v29, %v9807_v21  ;;  %v1850_v10 = vadd.f32 %v1786_v46, %v1462_v3  ;;  %v2235_v38 = vadd.f32 %v2171_v59, %v1847_v9  ;;  %v1079_v21 = vadd.f32 %v9972_v26, %v1009_v12  ;;  %v13466_v3 = vld [vmem:[#allocation290_spill] sm:$0xff] }
 0x24b   :  { %v2233_v13 = vadd.f32 %v2169_v53, %v1845_v55  ;;  %v1784_v31 = vmul.f32 %v9967_v27, %v1547_v23  ;;  %7090 = vmatmul.mubr.msk.bf16.vlgmr.msra.gmra.mrb[0].mxu0 %vm2364_vm0, %v10092_v42  ;;  %v1012_v14 = vmul.f32 %v9951_v7, %v13464_v40  ;;  %v1463_v33 = vadd.f32 %v1399_v43, %v10041_v44  ;;  %v13470_v40 = vld [vmem:[#allocation271_spill] sm:$0xff] }
 0x24c   :  { %v1402_v53 = vmul.f32 %v9957_v29, %v9813_v57  ;;  %v1787_v55 = vmul.f32 %v9967_v27, %v9903_v16  ;;  %v2173_v18 = vmul.f32 %v9994_v19, %v9912_v45  ;;  %v1401_v46 = vmul.f32 %v9957_v29, %v9697_v8 }
 0x24d   :  { %v1848_v54 = vadd.f32 %v1784_v31, %v1460_v24  ;;  %v10116_v35 = vpack.c.bf16 %v2234_v17, %v2233_v13  ;;  %v1464_v11 = vadd.f32 %v1400_v28, %v10036_v41  ;;  %v2238_v23 = vadd.f32 %v2174_v61, %v1850_v10  ;;  %v7575_v13 = vld [vmem:[%s13311_s25 + $0x150] sm:$0xff]  ;;  %v13467_v10 = vld [vmem:[#allocation291_spill] sm:$0xff] }
 0x24e   :  { %7262 = vset.pattern.permute.xlu1 %v13373_v1  ;;  %v10124_v32 = vpop.permute.xlu1 %1978  ;;  %v1551_v37 = vpop.permute.xlu0 %1550  ;;  %v1790_v44 = vmul.f32 %v9967_v27, %v9934_v5  ;;  %v2175_v16 = vmul.f32 %v9994_v19, %v9918_v4  ;;  %v1082_v8 = vadd.f32 %v9972_v26, %v1012_v14  ;;  %v13465_v5 = vld [vmem:[#allocation289_spill] sm:$0xff]  ;;  %v1403_v31 = vmul.f32 %v9957_v29, %v9704_v30 }
 0x24f   :  { %v2236_v6 = vadd.f32 %v2172_v62, %v1848_v54  ;;  %v1785_v25 = vmul.f32 %v9967_v27, %v1551_v37  ;;  %2066 = vperm.xlu1 %7262, %v7574_v63   ;;  %7093 = vmatprep.mubr.msk.bf16.mxu0 %vm2364_vm0, %v10116_v35  ;;  %v1011_v41 = vmul.f32 %v9951_v7, %v13465_v5  ;;  %v13468_v37 = vld [vmem:[#allocation338_spill] sm:$0xff] }
 0x250   :  { %v1466_v4 = vadd.f32 %v1402_v53, %v10079_v34  ;;  %v1851_v36 = vadd.f32 %v1787_v55, %v1463_v33  ;;  %v2176_v12 = vmul.f32 %v9994_v19, %v9924_v39  ;;  %v1014_v9 = vmul.f32 %v9951_v7, %v13466_v3  ;;  %v7576_v39 = vld [vmem:[%s13311_s25 + $0x158] sm:$0xff]  ;;  %v13471_v55 = vld [vmem:[#allocation344_spill] sm:$0xff] }
 0x251   :  { %v1849_v51 = vadd.f32 %v1785_v25, %v1461_v48  ;;  %v10142_v24 = vpack.c.bf16 %v2236_v6, %v2235_v38  ;;  %v1465_v62 = vadd.f32 %v1401_v46, %v10082_v52  ;;  %v1404_v54 = vmul.f32 %v9957_v29, %v9820_v20  ;;  %v13469_v25 = vld [vmem:[#allocation387_spill] sm:$0xff]  ;;  %v13474_v3 = vld [vmem:[#allocation346_spill] sm:$0xff] }
 0x252   :  { %v10149_v17 = vpop.permute.xlu1 %1982  ;;  %v1563_v57 = vpop.permute.xlu0 %1562  ;;  %v1854_v15 = vadd.f32 %v1790_v44, %v1466_v4  ;;  %v2239_v30 = vadd.f32 %v2175_v16, %v1851_v36  ;;  %v1013_v52 = vmul.f32 %v9951_v7, %v13467_v10  ;;  %v2178_v20 = vmul.f32 %v9994_v19, %v13468_v37  ;;  %v13477_v10 = vld [vmem:[#allocation339_spill] sm:$0xff]  ;;  %v13478_v37 = vld [vmem:[#allocation370_spill] sm:$0xff] }
 0x253   :  { %v2237_v59 = vadd.f32 %v2173_v18, %v1849_v51  ;;  %v1788_v45 = vmul.f32 %v9967_v27, %v1563_v57  ;;  %2074 = vperm.xlu1 %7262, %v7575_v13   ;;  %7094 = vmatmul.mubr.msk.bf16.gmra.mrb[4].mxu0 %vm2364_vm0, %v10142_v24  ;;  %v1467_v38 = vadd.f32 %v1403_v31, %v1079_v21 }
 0x254   :  { %v1406_v6 = vmul.f32 %v9957_v29, %v9826_v49  ;;  %v1791_v63 = vmul.f32 %v9967_v27, %v13469_v25  ;;  %v2177_v14 = vmul.f32 %v9994_v19, %v13470_v40  ;;  %v1405_v18 = vmul.f32 %v9957_v29, %v13471_v55  ;;  %v13479_v55 = vld [vmem:[#allocation348_spill] sm:$0xff] }
 0x255   :  { %v1852_v58 = vadd.f32 %v1788_v45, %v1464_v11  ;;  %v10167_v43 = vpack.c.bf16 %v2238_v23, %v2237_v59  ;;  %v1468_v51 = vadd.f32 %v1404_v54, %v10107_v0  ;;  %v2242_v46 = vadd.f32 %v2178_v20, %v1854_v15  ;;  %v13472_v11 = vld [vmem:[#allocation272_spill] sm:$0xff] }
 0x256   :  { %v1567_v61 = vpop.permute.xlu0 %1566  ;;  %v2179_v21 = vmul.f32 %v9994_v19, %v13472_v11  ;;  %v1794_v49 = vmul.f32 %v9967_v27, %v10048_v22  ;;  %v1081_v0 = vadd.f32 %v9972_v26, %v1011_v41  ;;  %v1084_v59 = vadd.f32 %v9972_v26, %v1014_v9  ;;  %v13473_v45 = vld [vmem:[#allocation292_spill] sm:$0xff] }
 0x257   :  { %v2240_v48 = vadd.f32 %v2176_v12, %v1852_v58  ;;  %v1789_v34 = vmul.f32 %v9967_v27, %v1567_v61  ;;  %2078 = vperm.xlu1 %7262, %v7576_v39   ;;  %v1603_v28 = vpop.permute.xlu1 %1602  ;;  %7097 = vmatprep.mubr.msk.bf16.mxu0 %vm2364_vm0, %v10167_v43  ;;  %v1016_v13 = vmul.f32 %v9951_v7, %v13473_v45  ;;  %v7577_v22 = vld [vmem:[%s13311_s25 + $0x168] sm:$0xff] }
 0x258   :  { %v1470_v5 = vadd.f32 %v1406_v6, %v1082_v8  ;;  %v1855_v31 = vadd.f32 %v1791_v63, %v1467_v38  ;;  %v2180_v4 = vmul.f32 %v9994_v19, %v10011_v47  ;;  %v1083_v41 = vadd.f32 %v9972_v26, %v1013_v52  ;;  %v7578_v38 = vld [vmem:[%s13311_s25 + $0x170] sm:$0xff] }
 0x259   :  { %v1853_v33 = vadd.f32 %v1789_v34, %v1465_v62  ;;  %v10190_v53 = vpack.c.bf16 %v2240_v48, %v2239_v30  ;;  %v1469_v58 = vadd.f32 %v1405_v18, %v1081_v0  ;;  %v1407_v9 = vmul.f32 %v9957_v29, %v13474_v3  ;;  %v13475_v62 = vld [vmem:[#allocation369_spill] sm:$0xff]  ;;  %v13481_v0 = vld [vmem:[#allocation295_spill] sm:$0xff] }
 0x25a   :  { %v1579_v23 = vpop.permute.xlu0 %1578  ;;  %v1408_v8 = vmul.f32 %v9957_v29, %v13475_v62  ;;  %v2243_v15 = vadd.f32 %v2179_v21, %v1855_v31  ;;  %v1858_v61 = vadd.f32 %v1794_v49, %v1470_v5  ;;  %v1086_v47 = vadd.f32 %v9972_v26, %v1016_v13  ;;  %v13476_v34 = vld [vmem:[#allocation293_spill] sm:$0xff] }
 0x25b   :  { %v2241_v44 = vadd.f32 %v2177_v14, %v1853_v33  ;;  %v1792_v57 = vmul.f32 %v9967_v27, %v1579_v23  ;;  %7263 = vset.pattern.permute.xlu1 %v13381_v60  ;;  %v10201_v16 = vpop.permute.xlu1 %1606  ;;  %7098 = vmatmul.mubr.msk.bf16.gmra.mrb[8].mxu0 %vm2364_vm0, %v10190_v53  ;;  %v1015_v39 = vmul.f32 %v9951_v7, %v13476_v34 }
 0x25c   :  { %1698 = vperm.xlu1 %7263, %v7577_v22   ;;  %v2182_v52 = vmul.f32 %v9994_v19, %v13477_v10  ;;  %v1410_v20 = vmul.f32 %v9957_v29, %v13478_v37  ;;  %v1795_v25 = vmul.f32 %v9967_v27, %v10064_v50  ;;  %v2181_v63 = vmul.f32 %v9994_v19, %v10099_v2  ;;  %v7579_v22 = vld [vmem:[%s13311_s25 + $0x160] sm:$0xff] }
 0x25d   :  { %v1856_v36 = vadd.f32 %v1792_v57, %v1468_v51  ;;  %v10214_v12 = vpack.c.bf16 %v2242_v46, %v2241_v44  ;;  %v1471_v33 = vadd.f32 %v1407_v9, %v1083_v41  ;;  %v1409_v18 = vmul.f32 %v9957_v29, %v13479_v55  ;;  %v13480_v44 = vld [vmem:[#allocation294_spill] sm:$0xff] }
 0x25e   :  { %v1583_v54 = vpop.permute.xlu0 %1582  ;;  %v1472_v51 = vadd.f32 %v1408_v8, %v1084_v59  ;;  %v1798_v46 = vmul.f32 %v9967_v27, %v1603_v28  ;;  %v2246_v21 = vadd.f32 %v2182_v52, %v1858_v61  ;;  %v2183_v23 = vmul.f32 %v9994_v19, %v10124_v32 }
 0x25f   :  { %v2244_v30 = vadd.f32 %v2180_v4, %v1856_v36  ;;  %v1793_v48 = vmul.f32 %v9967_v27, %v1583_v54  ;;  %7101 = vmatprep.mubr.msk.bf16.mxu0 %vm2364_vm0, %v10214_v12  ;;  %v1085_v2 = vadd.f32 %v9972_v26, %v1015_v39  ;;  %v1018_v57 = vmul.f32 %v9951_v7, %v13480_v44  ;;  %v13482_v36 = vld [vmem:[#allocation350_spill] sm:$0xff] }
 0x260   :  { %1702 = vperm.xlu1 %7263, %v7578_v38   ;;  %v1987_v6 = vpop.permute.xlu1 %1986  ;;  %v1017_v59 = vmul.f32 %v9951_v7, %v13481_v0  ;;  %v1474_v28 = vadd.f32 %v1410_v20, %v1086_v47  ;;  %v1859_v13 = vadd.f32 %v1795_v25, %v1471_v33  ;;  %v2184_v32 = vmul.f32 %v9994_v19, %v10149_v17  ;;  %v13488_v0 = vld [vmem:[#allocation352_spill] sm:$0xff] }
 0x261   :  { %v1857_v40 = vadd.f32 %v1793_v48, %v1469_v58  ;;  %v10238_v14 = vpack.c.bf16 %v2244_v30, %v2243_v15  ;;  %v1473_v4 = vadd.f32 %v1409_v18, %v1085_v2  ;;  %v1411_v41 = vmul.f32 %v9957_v29, %v13482_v36  ;;  %v13483_v58 = vld [vmem:[#allocation371_spill] sm:$0xff]  ;;  %v13484_v30 = vld [vmem:[#allocation341_spill] sm:$0xff] }
 0x262   :  { %v1595_v11 = vpop.permute.xlu0 %1594  ;;  %v1412_v3 = vmul.f32 %v9957_v29, %v13483_v58  ;;  %v1862_v9 = vadd.f32 %v1798_v46, %v1474_v28  ;;  %v2247_v8 = vadd.f32 %v2183_v23, %v1859_v13  ;;  %v1088_v15 = vadd.f32 %v9972_v26, %v1018_v57 }
 0x263   :  { %v2245_v49 = vadd.f32 %v2181_v63, %v1857_v40  ;;  %v1796_v50 = vmul.f32 %v9967_v27, %v1595_v11  ;;  %7102 = vmatmul.mubr.msk.bf16.gmra.mrb[12].mxu0 %vm2364_vm0, %v10238_v14  ;;  %v1087_v61 = vadd.f32 %v9972_v26, %v1017_v59  ;;  %v2186_v48 = vmul.f32 %v9994_v19, %v13484_v30  ;;  %v13493_v30 = vld [vmem:[#allocation354_spill] sm:$0xff] }
 0x264   :  { %7264 = vset.pattern.permute.xlu1 %v13373_v1  ;;  %v1995_v45 = vpop.permute.xlu1 %1994  ;;  %v1799_v34 = vmul.f32 %v9967_v27, %v10201_v16  ;;  %v2185_v39 = vmul.f32 %v9994_v19, %v1987_v6  ;;  %v1476_v20 = vadd.f32 %v1412_v3, %v1088_v15  ;;  %v1413_v59 = vmul.f32 %v9957_v29, %v13488_v0  ;;  %v7582_v3 = vld [vmem:[%s13311_s25 + $0x198] sm:$0xff] }
 0x265   :  { %v1860_v5 = vadd.f32 %v1796_v50, %v1472_v51  ;;  %2082 = vperm.xlu1 %7264, %v7579_v22   ;;  %v2301_v31 = vpack.c.bf16 %v2246_v21, %v2245_v49  ;;  %v1475_v37 = vadd.f32 %v1411_v41, %v1087_v61  ;;  %v2250_v25 = vadd.f32 %v2186_v48, %v1862_v9  ;;  %v7580_v51 = vld [vmem:[%s13311_s25 + $0x178] sm:$0xff]  ;;  %v13487_v49 = vld [vmem:[#allocation372_spill] sm:$0xff] }
 0x266   :  { %v1599_v62 = vpop.permute.xlu0 %1598  ;;  %v2187_v40 = vmul.f32 %v9994_v19, %v1995_v45  ;;  %v13486_v21 = vld [vmem:[#allocation297_spill] sm:$0xff]  ;;  %v1414_v50 = vmul.f32 %v9957_v29, %v13487_v49  ;;  %v13489_v45 = vmov 1   ;;  %v13490_v41 = vld [vmem:[#allocation298_spill] sm:$0xff]  ;;  %v1415_v48 = vmul.f32 %v9957_v29, %v13493_v30 }
 0x267   :  { %v2248_v54 = vadd.f32 %v2184_v32, %v1860_v5  ;;  %v1797_v17 = vmul.f32 %v9967_v27, %v1599_v62  ;;  %7105 = vmatprep.mubr.msk.bf16.mxu0 %vm2364_vm0, %v2301_v31  ;;  %6623 = vmatprep.subr.bf16.mxu1 %v2301_v31  ;;  %v1863_v6 = vadd.f32 %v1799_v34, %v1475_v37  ;;  %v7581_v5 = vld [vmem:[%s13311_s25 + $0x190] sm:$0xff]  ;;  %v13491_v62 = vld [vmem:[#allocation299_spill] sm:$0xff] }
 0x268   :  { %v1999_v47 = vpop.permute.xlu1 %1998  ;;  %6624 = vmatpush3.bf16.msra.mxu1 %v10066_v56  ;;  %v13485_v56 = vld [vmem:[#allocation296_spill] sm:$0xff]  ;;  %v1019_v23 = vmul.f32 %v9951_v7, %v13486_v21  ;;  %v1022_v58 = vmul.f32 %v9951_v7, %v13490_v41 }
 0x269   :  { %v1861_v10 = vadd.f32 %v1797_v17, %v1473_v4  ;;  %2090 = vperm.xlu1 %7264, %v7578_v38   ;;  %v2302_v52 = vpack.c.bf16 %v2248_v54, %v2247_v8  ;;  %v1020_v16 = vmul.f32 %v9951_v7, %v13485_v56  ;;  %v2188_v38 = vmul.f32 %v9994_v19, %v1999_v47  ;;  %v13492_v54 = vld [vmem:[#allocation342_spill] sm:$0xff]  ;;  %v13494_v47 = vld [vmem:[#allocation373_spill] sm:$0xff]  ;;  %v13495_v21 = vld [vmem:[#allocation300_spill] sm:$0xff] }
 0x26a   :  { %v1611_v63 = vpop.permute.xlu0 %1610  ;;  %v2251_v2 = vadd.f32 %v2187_v40, %v1863_v6  ;;  %v1089_v22 = vadd.f32 %v9972_v26, %v1019_v23  ;;  %v1021_v8 = vmul.f32 %v9951_v7, %v13491_v62  ;;  %v2190_v17 = vmul.f32 %v9994_v19, %v13492_v54  ;;  %v13500_v62 = vld [vmem:[#allocation303_spill] sm:$0xff] }
 0x26b   :  { %v2249_v33 = vadd.f32 %v2185_v39, %v1861_v10  ;;  %v1800_v55 = vmul.f32 %v9967_v27, %v1611_v63  ;;  %7106 = vmatmul.mubr.msk.bf16.gmra.mrb[16].mxu0 %vm2364_vm0, %v2302_v52  ;;  %6625 = vmatprep.subr.bf16.mxu1 %v2302_v52  ;;  %v1090_v57 = vadd.f32 %v9972_v26, %v1020_v16  ;;  %v13501_v54 = vld [vmem:[#allocation343_spill] sm:$0xff] }
 0x26c   :  { %6626 = vmatpush3.bf16.msra.mxu1 %v10092_v42  ;;  %v1477_v4 = vadd.f32 %v1413_v59, %v1089_v22  ;;  %v1416_v34 = vmul.f32 %v9957_v29, %v13494_v47  ;;  %v1092_v52 = vadd.f32 %v9972_v26, %v1022_v58  ;;  %v1024_v23 = vmul.f32 %v9951_v7, %v13495_v21  ;;  %v13499_v58 = vld [vmem:[#allocation302_spill] sm:$0xff] }
 0x26d   :  { %v1864_v18 = vadd.f32 %v1800_v55, %v1476_v20  ;;  %2094 = vperm.xlu1 %7264, %v7580_v51   ;;  %v1619_v46 = vpop.permute.xlu1 %1618  ;;  %v2303_v11 = vpack.c.bf16 %v2250_v25, %v2249_v33  ;;  %v1478_v31 = vadd.f32 %v1414_v50, %v1090_v57  ;;  %v1091_v20 = vadd.f32 %v9972_v26, %v1021_v8  ;;  %v7583_v33 = vld [vmem:[%s13311_s25 + $0x188] sm:$0xff] }
 0x26e   :  { %v1615_v42 = vpop.permute.xlu0 %1614  ;;  %v1802_v28 = vmul.f32 %v9967_v27, %v1619_v46  ;;  %v1480_v56 = vadd.f32 %v1416_v34, %v1092_v52  ;;  %v1094_v59 = vadd.f32 %v9972_v26, %v1024_v23  ;;  %v1025_v8 = vmul.f32 %v9951_v7, %v13500_v62  ;;  %v13510_v62 = vld [vmem:[#allocation345_spill] sm:$0xff] }
 0x26f   :  { %v2252_v44 = vadd.f32 %v2188_v38, %v1864_v18  ;;  %7109 = vmatprep.mubr.msk.bf16.mxu0 %vm2364_vm0, %v2303_v11  ;;  %6627 = vmatprep.subr.bf16.mxu1 %v2303_v11  ;;  %v1479_v55 = vadd.f32 %v1415_v48, %v1091_v20  ;;  %v13503_v48 = vld [vmem:[#allocation375_spill] sm:$0xff] }
 0x270   :  { %6628 = vmatpush3.bf16.msra.mxu1 %v10116_v35  ;;  %v1801_v35 = vmul.f32 %v9967_v27, %v1615_v42  ;;  %v1866_v36 = vadd.f32 %v1802_v28, %v1478_v31  ;;  %v13497_v42 = vld [vmem:[#allocation374_spill] sm:$0xff]  ;;  %v13498_v28 = vld [vmem:[#allocation356_spill] sm:$0xff]  ;;  %v1420_v47 = vmul.f32 %v9957_v29, %v13503_v48  ;;  %v1095_v52 = vadd.f32 %v9972_v26, %v1025_v8 }
 0x271   :  { %7265 = vset.pattern.permute.xlu1 %v13489_v45  ;;  %v1623_v13 = vpop.permute.xlu1 %1622  ;;  %v2304_v32 = vpack.c.bf16 %v2252_v44, %v2251_v2  ;;  %v7584_v2 = vld [vmem:[%s13311_s25 + $0x180] sm:$0xff]  ;;  %v1418_v57 = vmul.f32 %v9957_v29, %v13497_v42  ;;  %v2198_v8 = vmul.f32 %v9994_v19, %v13510_v62 }
 0x272   :  { %1330 = vperm.xlu1 %7265, %v7581_v5   ;;  %v1865_v15 = vadd.f32 %v1801_v35, %v1477_v4  ;;  %v1627_v61 = vpop.permute.xlu0 %1626  ;;  %v2254_v39 = vadd.f32 %v2190_v17, %v1866_v36  ;;  %v1803_v25 = vmul.f32 %v9967_v27, %v1623_v13  ;;  %v1417_v13 = vmul.f32 %v9957_v29, %v13498_v28 }
 0x273   :  { %7110 = vmatmul.mubr.msk.bf16.gmra.mrb[20].mxu0 %vm2364_vm0, %v2304_v32  ;;  %6629 = vmatprep.subr.bf16.mxu1 %v2304_v32  ;;  %v1804_v63 = vmul.f32 %v9967_v27, %v1627_v61  ;;  %v1482_v35 = vadd.f32 %v1418_v57, %v1094_v59  ;;  %v2194_v17 = vmul.f32 %v9994_v19, %v13501_v54  ;;  %v13502_v61 = vld [vmem:[#allocation358_spill] sm:$0xff] }
 0x274   :  { %6630 = vmatpush3.bf16.msra.mxu1 %v10142_v24  ;;  %v1867_v38 = vadd.f32 %v1803_v25, %v1479_v55  ;;  %v1419_v30 = vmul.f32 %v9957_v29, %v13502_v61  ;;  %v13512_v61 = vld [vmem:[#allocation377_spill] sm:$0xff] }
 0x275   :  { %v1868_v18 = vadd.f32 %v1804_v63, %v1480_v56  ;;  %v7585_v63 = vld [vmem:[%s13311_s25 + $0x1a8] sm:$0xff] }
 0x276   :  { %1334 = vperm.xlu1 %7265, %v7582_v3   ;;  %v2003_v9 = vpop.permute.xlu1 %2002  ;;  %v1631_v0 = vpop.permute.xlu0 %1630 }
 0x277   :  { %v2189_v24 = vmul.f32 %v9994_v19, %v2003_v9  ;;  %v1805_v4 = vmul.f32 %v9967_v27, %v1631_v0  ;;  %v1026_v9 = vmul.f32 %v9951_v7, %v13499_v58  ;;  %v13507_v0 = vld [vmem:[#allocation360_spill] sm:$0xff] }
 0x278   :  { %v1421_v59 = vmul.f32 %v9957_v29, %v13507_v0  ;;  %v7590_v0 = vld [vmem:[%s13311_s25 + $0x1d0] sm:$0xff] }
 0x279   :  { %v2253_v10 = vadd.f32 %v2189_v24, %v1865_v15 }
 0x27a   :  { %7266 = vset.pattern.permute.xlu1 %v13381_v60  ;;  %v2011_v37 = vpop.permute.xlu1 %2010  ;;  %v1643_v24 = vpop.permute.xlu0 %1642 }
 0x27b   :  { %v2305_v40 = vpack.c.bf16 %v2254_v39, %v2253_v10  ;;  %1714 = vperm.xlu1 %7266, %v7583_v33   ;;  %v2191_v16 = vmul.f32 %v9994_v19, %v2011_v37  ;;  %v1808_v37 = vmul.f32 %v9967_v27, %v1643_v24 }
 0x27d   :  { %7113 = vmatprep.mubr.msk.bf16.mxu0 %vm2364_vm0, %v2305_v40  ;;  %6631 = vmatprep.subr.bf16.mxu1 %v2305_v40  ;;  %v2255_v46 = vadd.f32 %v2191_v16, %v1867_v38  ;;  %v1483_v40 = vadd.f32 %v1419_v30, %v1095_v52  ;;  %v1424_v30 = vmul.f32 %v9957_v29, %v13512_v61 }
 0x27e   :  { %v2015_v6 = vpop.permute.xlu1 %2014  ;;  %6632 = vmatpush3.bf16.msra.mxu1 %v10167_v43  ;;  %v13496_v43 = vld [vmem:[#allocation301_spill] sm:$0xff]  ;;  %v1647_v42 = vpop.permute.xlu0 %1646 }
 0x27f   :  { %v2192_v51 = vmul.f32 %v9994_v19, %v2015_v6  ;;  %1718 = vperm.xlu1 %7266, %v7581_v5   ;;  %v1023_v44 = vmul.f32 %v9951_v7, %v13496_v43  ;;  %v13506_v43 = vld [vmem:[#allocation376_spill] sm:$0xff] }
 0x281   :  { %v2256_v11 = vadd.f32 %v2192_v51, %v1868_v18  ;;  %v1093_v31 = vadd.f32 %v9972_v26, %v1023_v44  ;;  %v7586_v18 = vld [vmem:[%s13311_s25 + $0x1b0] sm:$0xff]  ;;  %v1422_v44 = vmul.f32 %v9957_v29, %v13506_v43  ;;  %v13518_v43 = vld [vmem:[#allocation362_spill] sm:$0xff] }
 0x283   :  { %v2306_v49 = vpack.c.bf16 %v2256_v11, %v2255_v46  ;;  %7267 = vset.pattern.permute.xlu1 %v13373_v1  ;;  %v1635_v50 = vpop.permute.xlu1 %1634  ;;  %v1481_v36 = vadd.f32 %v1417_v13, %v1093_v31  ;;  %v13504_v11 = vld [vmem:[#allocation304_spill] sm:$0xff]  ;;  %v1809_v31 = vmul.f32 %v9967_v27, %v1647_v42 }
 0x284   :  { %2098 = vperm.xlu1 %7267, %v7584_v2   ;;  %v1806_v32 = vmul.f32 %v9967_v27, %v1635_v50  ;;  %v1028_v21 = vmul.f32 %v9951_v7, %v13504_v11  ;;  %v13505_v50 = vld [vmem:[#allocation305_spill] sm:$0xff] }
 0x285   :  { %7114 = vmatmul.mubr.msk.bf16.gmra.mrb[24].mxu0 %vm2364_vm0, %v2306_v49  ;;  %6633 = vmatprep.subr.bf16.mxu1 %v2306_v49  ;;  %v1869_v15 = vadd.f32 %v1805_v4, %v1481_v36  ;;  %v1027_v2 = vmul.f32 %v9951_v7, %v13505_v50  ;;  %v13508_v36 = vld [vmem:[#allocation306_spill] sm:$0xff] }
 0x286   :  { %6634 = vmatpush3.bf16.msra.mxu1 %v10190_v53  ;;  %v1870_v41 = vadd.f32 %v1806_v32, %v1482_v35  ;;  %v1098_v57 = vadd.f32 %v9972_v26, %v1028_v21  ;;  %v7589_v21 = vld [vmem:[%s13311_s25 + $0x1c0] sm:$0xff] }
 0x287   :  { %v1639_v22 = vpop.permute.xlu1 %1638  ;;  %v1097_v32 = vadd.f32 %v9972_v26, %v1027_v2 }
 0x288   :  { %2106 = vperm.xlu1 %7267, %v7581_v5   ;;  %v2258_v34 = vadd.f32 %v2194_v17, %v1870_v41  ;;  %v1807_v20 = vmul.f32 %v9967_v27, %v1639_v22  ;;  %v1486_v22 = vadd.f32 %v1422_v44, %v1098_v57  ;;  %v1030_v41 = vmul.f32 %v9951_v7, %v13508_v36 }
 0x289   :  { %v1485_v35 = vadd.f32 %v1421_v59, %v1097_v32  ;;  %v1425_v44 = vmul.f32 %v9957_v29, %v13518_v43  ;;  %v13529_v43 = vld [vmem:[#allocation364_spill] sm:$0xff] }
 0x28a   :  { %v1871_v6 = vadd.f32 %v1807_v20, %v1483_v40 }
 0x28b   :  { %v1873_v54 = vadd.f32 %v1809_v31, %v1485_v35  ;;  %v13519_v31 = vld [vmem:[#allocation310_spill] sm:$0xff] }
 0x28c   :  { %2110 = vperm.xlu1 %7267, %v7582_v3   ;;  %v2019_v53 = vpop.permute.xlu1 %2018  ;;  %v1096_v3 = vadd.f32 %v9972_v26, %v1026_v9  ;;  %v13509_v9 = vld [vmem:[#allocation307_spill] sm:$0xff]  ;;  %v1034_v35 = vmul.f32 %v9951_v7, %v13519_v31 }
 0x28d   :  { %v2193_v5 = vmul.f32 %v9994_v19, %v2019_v53  ;;  %v1029_v53 = vmul.f32 %v9951_v7, %v13509_v9 }
 0x28e   :  { %v1484_v33 = vadd.f32 %v1420_v47, %v1096_v3 }
 0x28f   :  { %v2257_v39 = vadd.f32 %v2193_v5, %v1869_v15  ;;  %v1659_v15 = vpop.permute.xlu0 %1658  ;;  %v13511_v5 = vld [vmem:[#allocation361_spill] sm:$0xff]  ;;  %v1099_v3 = vadd.f32 %v9972_v26, %v1029_v53 }
 0x290   :  { %7268 = vset.pattern.permute.xlu1 %v13489_v45  ;;  %v2027_v10 = vpop.permute.xlu1 %2026  ;;  %v1872_v16 = vadd.f32 %v1808_v37, %v1484_v33  ;;  %v1423_v24 = vmul.f32 %v9957_v29, %v13511_v5 }
 0x291   :  { %v2307_v25 = vpack.c.bf16 %v2258_v34, %v2257_v39  ;;  %1342 = vperm.xlu1 %7268, %v7585_v63   ;;  %v2195_v55 = vmul.f32 %v9994_v19, %v2027_v10  ;;  %v1100_v34 = vadd.f32 %v9972_v26, %v1030_v41  ;;  %v1812_v10 = vmul.f32 %v9967_v27, %v1659_v15  ;;  %v13520_v41 = vld [vmem:[#allocation311_spill] sm:$0xff] }
 0x292   :  { %v1487_v20 = vadd.f32 %v1423_v24, %v1099_v3  ;;  %v13523_v15 = vld [vmem:[#allocation379_spill] sm:$0xff] }
 0x293   :  { %7117 = vmatprep.mubr.msk.bf16.mxu0 %vm2364_vm0, %v2307_v25  ;;  %6635 = vmatprep.subr.bf16.mxu1 %v2307_v25  ;;  %v2259_v51 = vadd.f32 %v2195_v55, %v1871_v6  ;;  %v1488_v25 = vadd.f32 %v1424_v30, %v1100_v34  ;;  %v1663_v50 = vpop.permute.xlu0 %1662  ;;  %v1428_v5 = vmul.f32 %v9957_v29, %v13523_v15 }
 0x294   :  { %v2031_v56 = vpop.permute.xlu1 %2030  ;;  %6636 = vmatpush3.bf16.msra.mxu1 %v10214_v12  ;;  %v7587_v12 = vld [vmem:[%s13311_s25 + $0x1a0] sm:$0xff]  ;;  %v1104_v30 = vadd.f32 %v9972_v26, %v1034_v35 }
 0x295   :  { %v2196_v38 = vmul.f32 %v9994_v19, %v2031_v56  ;;  %1346 = vperm.xlu1 %7268, %v7586_v18   ;;  %v1876_v55 = vadd.f32 %v1812_v10, %v1488_v25  ;;  %v7592_v10 = vld [vmem:[%s13311_s25 + $0x1c8] sm:$0xff] }
 0x297   :  { %v2260_v46 = vadd.f32 %v2196_v38, %v1872_v16 }
 0x299   :  { %v2308_v23 = vpack.c.bf16 %v2260_v46, %v2259_v51  ;;  %7269 = vset.pattern.permute.xlu1 %v13381_v60  ;;  %v1651_v49 = vpop.permute.xlu1 %1650  ;;  %v13514_v51 = vld [vmem:[#allocation308_spill] sm:$0xff] }
 0x29a   :  { %1726 = vperm.xlu1 %7269, %v7587_v12   ;;  %v1810_v28 = vmul.f32 %v9967_v27, %v1651_v49  ;;  %v1032_v46 = vmul.f32 %v9951_v7, %v13514_v51  ;;  %v13517_v12 = vld [vmem:[#allocation378_spill] sm:$0xff] }
 0x29b   :  { %7118 = vmatmul.mubr.msk.bf16.gmra.mrb[28].mxu0 %vm2364_vm0, %v2308_v23  ;;  %6637 = vmatprep.subr.bf16.mxu1 %v2308_v23  ;;  %v13516_v23 = vld [vmem:[#allocation309_spill] sm:$0xff] }
 0x29c   :  { %6638 = vmatpush3.bf16.msra.mxu1 %v10238_v14  ;;  %v1874_v4 = vadd.f32 %v1810_v28, %v1486_v22  ;;  %v7588_v14 = vld [vmem:[%s13311_s25 + $0x1b8] sm:$0xff]  ;;  %v1031_v49 = vmul.f32 %v9951_v7, %v13516_v23  ;;  %v1102_v2 = vadd.f32 %v9972_v26, %v1032_v46 }
 0x29d   :  { %v1655_v13 = vpop.permute.xlu1 %1654  ;;  %v13527_v23 = vld [vmem:[#allocation313_spill] sm:$0xff] }
 0x29e   :  { %1734 = vperm.xlu1 %7269, %v7586_v18   ;;  %v2262_v48 = vadd.f32 %v2198_v8, %v1874_v4  ;;  %v1811_v52 = vmul.f32 %v9967_v27, %v1655_v13  ;;  %v1101_v59 = vadd.f32 %v9972_v26, %v1031_v49  ;;  %v1813_v13 = vmul.f32 %v9967_v27, %v1663_v50  ;;  %v7591_v4 = vld [vmem:[%s13311_s25 + $0x1d8] sm:$0xff]  ;;  %v1675_v8 = vpop.permute.xlu0 %1674 }
 0x29f   :  { %v1816_v34 = vmul.f32 %v9967_v27, %v1675_v8  ;;  %v1035_v49 = vmul.f32 %v9951_v7, %v13527_v23 }
 0x2a0   :  { %v1875_v56 = vadd.f32 %v1811_v52, %v1487_v20  ;;  %v1489_v32 = vadd.f32 %v1425_v44, %v1101_v59  ;;  %v1492_v20 = vadd.f32 %v1428_v5, %v1104_v30  ;;  %v1429_v44 = vmul.f32 %v9957_v29, %v13529_v43 }
 0x2a2   :  { %1738 = vperm.xlu1 %7269, %v7588_v14   ;;  %v2035_v58 = vpop.permute.xlu1 %2034  ;;  %v1033_v14 = vmul.f32 %v9951_v7, %v13520_v41  ;;  %v1877_v53 = vadd.f32 %v1813_v13, %v1489_v32  ;;  %v1679_v50 = vpop.permute.xlu0 %1678 }
 0x2a3   :  { %v2197_v17 = vmul.f32 %v9994_v19, %v2035_v58  ;;  %v13521_v58 = vld [vmem:[#allocation347_spill] sm:$0xff] }
 0x2a4   :  { %v2202_v9 = vmul.f32 %v9994_v19, %v13521_v58 }
 0x2a5   :  { %v2261_v47 = vadd.f32 %v2197_v17, %v1873_v54  ;;  %v13522_v54 = vld [vmem:[#allocation363_spill] sm:$0xff] }
 0x2a6   :  { %7270 = vset.pattern.permute.xlu1 %v13373_v1  ;;  %v2043_v39 = vpop.permute.xlu1 %2042  ;;  %v1427_v17 = vmul.f32 %v9957_v29, %v13522_v54  ;;  %v13534_v54 = vld [vmem:[#allocation381_spill] sm:$0xff] }
 0x2a7   :  { %v10408_v37 = vpack.c.bf16 %v2262_v48, %v2261_v47  ;;  %2118 = vperm.xlu1 %7270, %v7585_v63   ;;  %v2199_v40 = vmul.f32 %v9994_v19, %v2043_v39  ;;  %v1103_v47 = vadd.f32 %v9972_v26, %v1033_v14  ;;  %v13532_v14 = vld [vmem:[#allocation349_spill] sm:$0xff] }
 0x2a8   :  { %v2206_v58 = vmul.f32 %v9994_v19, %v13532_v14  ;;  %v13543_v14 = vld [vmem:[#allocation351_spill] sm:$0xff] }
 0x2a9   :  { %13513 = vst [vmem:[#allocation274_spill] sm:$0xff] %v10408_v37  ;;  %7121 = vmatprep.mubr.msk.bf16.mxu0 %vm2364_vm0, %v10408_v37  ;;  %v2263_v6 = vadd.f32 %v2199_v40, %v1875_v56  ;;  %v1491_v52 = vadd.f32 %v1427_v17, %v1103_v47  ;;  %v1432_v17 = vmul.f32 %v9957_v29, %v13534_v54  ;;  %v13545_v54 = vld [vmem:[#allocation383_spill] sm:$0xff] }
 0x2aa   :  { %v2047_v33 = vpop.permute.xlu1 %2046 }
 0x2ab   :  { %v2200_v16 = vmul.f32 %v9994_v19, %v2047_v33  ;;  %2122 = vperm.xlu1 %7270, %v7586_v18   ;;  %v1426_v18 = vmul.f32 %v9957_v29, %v13517_v12  ;;  %v1880_v33 = vadd.f32 %v1816_v34, %v1492_v20  ;;  %v13528_v12 = vld [vmem:[#allocation380_spill] sm:$0xff] }
 0x2ac   :  { %v7593_v34 = vld [vmem:[%s13311_s25 + $0x1e8] sm:$0xff] }
 0x2ad   :  { %v2264_v38 = vadd.f32 %v2200_v16, %v1876_v55  ;;  %v1490_v28 = vadd.f32 %v1426_v18, %v1102_v2  ;;  %v1430_v18 = vmul.f32 %v9957_v29, %v13528_v12 }
 0x2af   :  { %v10416_v11 = vpack.c.bf16 %v2264_v38, %v2263_v6  ;;  %7271 = vset.pattern.permute.xlu1 %v13489_v45  ;;  %v1667_v63 = vpop.permute.xlu1 %1666  ;;  %v13525_v38 = vld [vmem:[#allocation312_spill] sm:$0xff] }
 0x2b0   :  { %1354 = vperm.xlu1 %7271, %v7589_v21   ;;  %v1814_v42 = vmul.f32 %v9967_v27, %v1667_v63  ;;  %v1036_v51 = vmul.f32 %v9951_v7, %v13525_v38 }
 0x2b1   :  { %13515 = vst [vmem:[#allocation276_spill] sm:$0xff] %v10416_v11  ;;  %7122 = vmatmul.mubr.msk.bf16.gmra.mrb[32].mxu0 %vm2364_vm0, %v10416_v11 }
 0x2b2   :  { %v1878_v22 = vadd.f32 %v1814_v42, %v1490_v28  ;;  %v1106_v2 = vadd.f32 %v9972_v26, %v1036_v51  ;;  %v1817_v28 = vmul.f32 %v9967_v27, %v1679_v50  ;;  %v7595_v51 = vld [vmem:[%s13311_s25 + $0x1e0] sm:$0xff] }
 0x2b3   :  { %v1671_v57 = vpop.permute.xlu1 %1670 }
 0x2b4   :  { %1362 = vperm.xlu1 %7271, %v7590_v0   ;;  %v2266_v24 = vadd.f32 %v2202_v9, %v1878_v22  ;;  %v1815_v39 = vmul.f32 %v9967_v27, %v1671_v57  ;;  %v1494_v59 = vadd.f32 %v1430_v18, %v1106_v2  ;;  %v13530_v22 = vld [vmem:[#allocation314_spill] sm:$0xff] }
 0x2b5   :  { %v1038_v31 = vmul.f32 %v9951_v7, %v13530_v22  ;;  %v13540_v2 = vld [vmem:[#allocation366_spill] sm:$0xff] }
 0x2b6   :  { %v1879_v55 = vadd.f32 %v1815_v39, %v1491_v52  ;;  %v1433_v43 = vmul.f32 %v9957_v29, %v13540_v2  ;;  %v13551_v2 = vld [vmem:[#allocation368_spill] sm:$0xff] }
 0x2b8   :  { %1366 = vperm.xlu1 %7271, %v7591_v4   ;;  %v2051_v36 = vpop.permute.xlu1 %2050 }
 0x2b9   :  { %v2201_v62 = vmul.f32 %v9994_v19, %v2051_v36  ;;  %v13531_v36 = vld [vmem:[#allocation315_spill] sm:$0xff] }
 0x2ba   :  { %v1037_v41 = vmul.f32 %v9951_v7, %v13531_v36  ;;  %v13542_v36 = vld [vmem:[#allocation319_spill] sm:$0xff] }
 0x2bb   :  { %v2265_v61 = vadd.f32 %v2201_v62, %v1877_v53  ;;  %v1691_v53 = vpop.permute.xlu0 %1690  ;;  %v13533_v62 = vld [vmem:[#allocation365_spill] sm:$0xff] }
 0x2bc   :  { %7272 = vset.pattern.permute.xlu1 %v13381_v60  ;;  %v2059_v48 = vpop.permute.xlu1 %2058  ;;  %v1431_v8 = vmul.f32 %v9957_v29, %v13533_v62  ;;  %v1820_v30 = vmul.f32 %v9967_v27, %v1691_v53  ;;  %v13544_v62 = vld [vmem:[#allocation367_spill] sm:$0xff] }
 0x2bd   :  { %v10456_v3 = vpack.c.bf16 %v2266_v24, %v2265_v61  ;;  %1746 = vperm.xlu1 %7272, %v7592_v10   ;;  %v2203_v25 = vmul.f32 %v9994_v19, %v2059_v48  ;;  %v1107_v61 = vadd.f32 %v9972_v26, %v1037_v41  ;;  %v1041_v41 = vmul.f32 %v9951_v7, %v13542_v36 }
 0x2bf   :  { %13524 = vst [vmem:[#allocation277_spill] sm:$0xff] %v10456_v3  ;;  %7125 = vmatprep.mubr.msk.bf16.mxu0 %vm2364_vm0, %v10456_v3  ;;  %v2267_v16 = vadd.f32 %v2203_v25, %v1879_v55  ;;  %v1495_v39 = vadd.f32 %v1431_v8, %v1107_v61  ;;  %v1695_v18 = vpop.permute.xlu0 %1694  ;;  %v1435_v8 = vmul.f32 %v9957_v29, %v13544_v62 }
 0x2c0   :  { %v2063_v40 = vpop.permute.xlu1 %2062 }
 0x2c1   :  { %v2204_v56 = vmul.f32 %v9994_v19, %v2063_v40  ;;  %1750 = vperm.xlu1 %7272, %v7590_v0   ;;  %v7594_v40 = vld [vmem:[%s13311_s25 + $0x1f0] sm:$0xff] }
 0x2c3   :  { %v2268_v6 = vadd.f32 %v2204_v56, %v1880_v33  ;;  %v13536_v56 = vld [vmem:[#allocation316_spill] sm:$0xff]  ;;  %v1707_v53 = vpop.permute.xlu0 %1706 }
 0x2c5   :  { %v10467_v46 = vpack.c.bf16 %v2268_v6, %v2267_v16  ;;  %7273 = vset.pattern.permute.xlu1 %v13373_v1  ;;  %v1683_v63 = vpop.permute.xlu1 %1682  ;;  %v1040_v16 = vmul.f32 %v9951_v7, %v13536_v56 }
 0x2c6   :  { %2130 = vperm.xlu1 %7273, %v7589_v21   ;;  %v1818_v42 = vmul.f32 %v9967_v27, %v1683_v63  ;;  %v1105_v21 = vadd.f32 %v9972_v26, %v1035_v49  ;;  %v13538_v63 = vld [vmem:[#allocation317_spill] sm:$0xff]  ;;  %v13539_v49 = vld [vmem:[#allocation382_spill] sm:$0xff] }
 0x2c7   :  { %13526 = vst [vmem:[#allocation278_spill] sm:$0xff] %v10467_v46  ;;  %7126 = vmatmul.mubr.msk.bf16.gmra.mrb[36].mxu0 %vm2364_vm0, %v10467_v46  ;;  %v1039_v23 = vmul.f32 %v9951_v7, %v13538_v63  ;;  %v1434_v12 = vmul.f32 %v9957_v29, %v13539_v49 }
 0x2c8   :  { %v1493_v13 = vadd.f32 %v1429_v44, %v1105_v21  ;;  %v1882_v32 = vadd.f32 %v1818_v42, %v1494_v59  ;;  %v1821_v59 = vmul.f32 %v9967_v27, %v1695_v18 }
 0x2c9   :  { %v1687_v57 = vpop.permute.xlu1 %1686 }
 0x2ca   :  { %2138 = vperm.xlu1 %7273, %v7590_v0   ;;  %v1881_v9 = vadd.f32 %v1817_v28, %v1493_v13  ;;  %v2270_v15 = vadd.f32 %v2206_v58, %v1882_v32  ;;  %v1819_v48 = vmul.f32 %v9967_v27, %v1687_v57  ;;  %v13541_v32 = vld [vmem:[#allocation318_spill] sm:$0xff]  ;;  %v2210_v58 = vmul.f32 %v9994_v19, %v13543_v14 }
 0x2cb   :  { %v1042_v22 = vmul.f32 %v9951_v7, %v13541_v32 }
 0x2cc   :  { %v1883_v20 = vadd.f32 %v1819_v48, %v1495_v39 }
 0x2ce   :  { %2142 = vperm.xlu1 %7273, %v7591_v4   ;;  %v2067_v35 = vpop.permute.xlu1 %2066  ;;  %v1108_v4 = vadd.f32 %v9972_v26, %v1038_v31  ;;  %v7597_v31 = vld [vmem:[%s13311_s25 + $0x1f8] sm:$0xff] }
 0x2cf   :  { %v2205_v0 = vmul.f32 %v9994_v19, %v2067_v35 }
 0x2d0   :  { %v1496_v10 = vadd.f32 %v1432_v17, %v1108_v4  ;;  %v1436_v17 = vmul.f32 %v9957_v29, %v13545_v54 }
 0x2d1   :  { %v2269_v5 = vadd.f32 %v2205_v0, %v1881_v9 }
 0x2d2   :  { %7275 = vset.pattern.permute.xlu1 %v13489_v45  ;;  %v2075_v24 = vpop.permute.xlu1 %2074  ;;  %v1884_v26 = vadd.f32 %v1820_v30, %v1496_v10  ;;  %v1824_v30 = vmul.f32 %v9967_v27, %v1707_v53 }
 0x2d3   :  { %v10498_v47 = vpack.c.bf16 %v2270_v15, %v2269_v5  ;;  %1374 = vperm.xlu1 %7275, %v7593_v34   ;;  %v2207_v52 = vmul.f32 %v9994_v19, %v2075_v24 }
 0x2d5   :  { %13535 = vst [vmem:[#allocation279_spill] sm:$0xff] %v10498_v47  ;;  %7129 = vmatprep.mubr.msk.bf16.mxu0 %vm2364_vm0, %v10498_v47  ;;  %v2271_v33 = vadd.f32 %v2207_v52, %v1883_v20 }
 0x2d6   :  { %v2079_v45 = vpop.permute.xlu1 %2078 }
 0x2d7   :  { %v2208_v25 = vmul.f32 %v9994_v19, %v2079_v45  ;;  %1378 = vperm.xlu1 %7275, %v7594_v40  }
 0x2d9   :  { %v2272_v55 = vadd.f32 %v2208_v25, %v1884_v26 }
 0x2db   :  { %v10512_v6 = vpack.c.bf16 %v2272_v55, %v2271_v33  ;;  %7277 = vset.pattern.permute.xlu1 %v13381_v60  ;;  %v1699_v38 = vpop.permute.xlu1 %1698  ;;  %v10527_v60 = vld [vmem:[%s12965_s4] ss:$0 sm:$0xff] }
 0x2dc   :  { %1758 = vperm.xlu1 %7277, %v7595_v51   ;;  %v1110_v50 = vadd.f32 %v10527_v60, %v1040_v16  ;;  %v1822_v44 = vmul.f32 %v9967_v27, %v1699_v38  ;;  %v1109_v57 = vadd.f32 %v10527_v60, %v1039_v23  ;;  %v1112_v4 = vadd.f32 %v10527_v60, %v1042_v22  ;;  %v13548_v38 = vld [vmem:[#allocation320_spill] sm:$0xff]  ;;  %v13549_v23 = vld [vmem:[#allocation321_spill] sm:$0xff] }
 0x2dd   :  { %13537 = vst [vmem:[#allocation280_spill] sm:$0xff] %v10512_v6  ;;  %7130 = vmatmul.mubr.msk.bf16.gmra.mrb[40].mxu0 %vm2364_vm0, %v10512_v6  ;;  %v1111_v61 = vadd.f32 %v10527_v60, %v1041_v41  ;;  %v1044_v51 = vmul.f32 %v9951_v7, %v13548_v38  ;;  %v1043_v49 = vmul.f32 %v9951_v7, %v13549_v23  ;;  %v13554_v41 = vld [vmem:[#allocation353_spill] sm:$0xff]  ;;  %v13556_v38 = vld [vmem:[#allocation324_spill] sm:$0xff] }
 0x2de   :  { %v1498_v21 = vadd.f32 %v1434_v12, %v1110_v50  ;;  %v1497_v28 = vadd.f32 %v1433_v43, %v1109_v57  ;;  %v1500_v52 = vadd.f32 %v1436_v17, %v1112_v4  ;;  %v13550_v12 = vld [vmem:[#allocation384_spill] sm:$0xff]  ;;  %v1437_v43 = vmul.f32 %v9957_v29, %v13551_v2 }
 0x2df   :  { %v1703_v42 = vpop.permute.xlu1 %1702  ;;  %v1499_v10 = vadd.f32 %v1435_v8, %v1111_v61  ;;  %v1438_v18 = vmul.f32 %v9957_v29, %v13550_v12  ;;  %v1114_v50 = vadd.f32 %v10527_v60, %v1044_v51  ;;  %v1113_v57 = vadd.f32 %v10527_v60, %v1043_v49 }
 0x2e0   :  { %1766 = vperm.xlu1 %7277, %v7594_v40   ;;  %v1886_v13 = vadd.f32 %v1822_v44, %v1498_v21  ;;  %v1885_v9 = vadd.f32 %v1821_v59, %v1497_v28  ;;  %v1823_v48 = vmul.f32 %v9967_v27, %v1703_v42  ;;  %v1888_v20 = vadd.f32 %v1824_v30, %v1500_v52  ;;  %v13552_v28 = vld [vmem:[#allocation322_spill] sm:$0xff] }
 0x2e1   :  { %v1502_v21 = vadd.f32 %v1438_v18, %v1114_v50  ;;  %v1501_v32 = vadd.f32 %v1437_v43, %v1113_v57  ;;  %v2214_v14 = vmul.f32 %v9994_v19, %v13554_v41  ;;  %v1048_v51 = vmul.f32 %v9951_v7, %v13556_v38  ;;  %v13558_v18 = vld [vmem:[#allocation385_spill] sm:$0xff]  ;;  %v13559_v43 = vld [vmem:[#allocation326_spill] sm:$0xff] }
 0x2e2   :  { %v2274_v15 = vadd.f32 %v2210_v58, %v1886_v13  ;;  %v1046_v13 = vmul.f32 %v9951_v7, %v13552_v28 }
 0x2e3   :  { %v1118_v57 = vadd.f32 %v10527_v60, %v1048_v51 }
 0x2e4   :  { %1770 = vperm.xlu1 %7277, %v7597_v31   ;;  %v2083_v35 = vpop.permute.xlu1 %2082  ;;  %v13553_v31 = vld [vmem:[#allocation323_spill] sm:$0xff]  ;;  %v1116_v53 = vadd.f32 %v10527_v60, %v1046_v13 }
 0x2e5   :  { %v2209_v0 = vmul.f32 %v9994_v19, %v2083_v35  ;;  %v1045_v35 = vmul.f32 %v9951_v7, %v13553_v31 }
 0x2e7   :  { %v2273_v5 = vadd.f32 %v2209_v0, %v1885_v9 }
 0x2e8   :  { %7279 = vset.pattern.permute.xlu1 %v13373_v1  ;;  %v2091_v24 = vpop.permute.xlu1 %2090  ;;  %v1887_v1 = vadd.f32 %v1823_v48, %v1499_v10 }
 0x2e9   :  { %v10554_v39 = vpack.c.bf16 %v2274_v15, %v2273_v5  ;;  %2150 = vperm.xlu1 %7279, %v7593_v34   ;;  %v2211_v45 = vmul.f32 %v9994_v19, %v2091_v24  ;;  %v1115_v15 = vadd.f32 %v10527_v60, %v1045_v35  ;;  %v13561_v35 = vld [vmem:[#allocation269_spill] sm:$0xff] }
 0x2eb   :  { %13546 = vst [vmem:[#allocation281_spill] sm:$0xff] %v10554_v39  ;;  %7133 = vmatprep.mubr.msk.bf16.mxu0 %vm2364_vm0, %v10554_v39  ;;  %v2275_v33 = vadd.f32 %v2211_v45, %v1887_v1 }
 0x2ec   :  { %v2095_v26 = vpop.permute.xlu1 %2094 }
 0x2ed   :  { %v2212_v25 = vmul.f32 %v9994_v19, %v2095_v26  ;;  %2154 = vperm.xlu1 %7279, %v7594_v40   ;;  %v1711_v40 = vpop.permute.xlu0 %1710 }
 0x2ee   :  { %v1825_v59 = vmul.f32 %v9967_v27, %v1711_v40  ;;  %v1441_v40 = vmul.f32 %v9957_v29, %v13558_v18 }
 0x2ef   :  { %v2276_v55 = vadd.f32 %v2212_v25, %v1888_v20 }
 0x2f0   :  { %v1889_v58 = vadd.f32 %v1825_v59, %v1501_v32  ;;  %v13560_v32 = vld [vmem:[#allocation327_spill] sm:$0xff] }
 0x2f1   :  { %v10560_v56 = vpack.c.bf16 %v2276_v55, %v2275_v33  ;;  %v1331_v16 = vpop.permute.xlu1 %1330  ;;  %v1723_v61 = vpop.permute.xlu0 %1722 }
 0x2f2   :  { %v1439_v62 = vmul.f32 %v9957_v29, %v1331_v16  ;;  %v1828_v30 = vmul.f32 %v9967_v27, %v1723_v61 }
 0x2f3   :  { %13547 = vst [vmem:[#allocation282_spill] sm:$0xff] %v10560_v56  ;;  %7134 = vmatmul.mubr.msk.bf16.gmra.mrb[44].mxu0 %vm2364_vm0, %v10560_v56 }
 0x2f4   :  { %v1503_v48 = vadd.f32 %v1439_v62, %v1115_v15 }
 0x2f5   :  { %v1335_v34 = vpop.permute.xlu1 %1334 }
 0x2f6   :  { %v1440_v9 = vmul.f32 %v9957_v29, %v1335_v34 }
 0x2f8   :  { %v1504_v5 = vadd.f32 %v1440_v9, %v1116_v53 }
 0x2fa   :  { %v1715_v63 = vpop.permute.xlu1 %1714  ;;  %v1892_v26 = vadd.f32 %v1828_v30, %v1504_v5 }
 0x2fb   :  { %v1826_v44 = vmul.f32 %v9967_v27, %v1715_v63  ;;  %v13557_v63 = vld [vmem:[#allocation325_spill] sm:$0xff] }
 0x2fc   :  { %v1047_v23 = vmul.f32 %v9951_v7, %v13557_v63 }
 0x2fd   :  { %v1890_v22 = vadd.f32 %v1826_v44, %v1502_v21  ;;  %v1050_v44 = vmul.f32 %v9951_v7, %v13559_v43 }
 0x2fe   :  { %v1719_v42 = vpop.permute.xlu1 %1718  ;;  %v1117_v21 = vadd.f32 %v10527_v60, %v1047_v23 }
 0x2ff   :  { %v2278_v8 = vadd.f32 %v2214_v14, %v1890_v22  ;;  %v1827_v4 = vmul.f32 %v9967_v27, %v1719_v42  ;;  %v1049_v22 = vmul.f32 %v9951_v7, %v13560_v32  ;;  %v1120_v14 = vadd.f32 %v10527_v60, %v1050_v44 }
 0x300   :  { %v1505_v31 = vadd.f32 %v1441_v40, %v1117_v21 }
 0x301   :  { %v1891_v45 = vadd.f32 %v1827_v4, %v1503_v48 }
 0x303   :  { %v2099_v36 = vpop.permute.xlu1 %2098 }
 0x304   :  { %v2213_v0 = vmul.f32 %v9994_v19, %v2099_v36  ;;  %v1444_v36 = vmul.f32 %v9957_v29, %v13561_v35 }
 0x306   :  { %v2277_v54 = vadd.f32 %v2213_v0, %v1889_v58  ;;  %v1731_v58 = vpop.permute.xlu0 %1730  ;;  %v1508_v4 = vadd.f32 %v1444_v36, %v1120_v14  ;;  %v13567_v36 = vld [vmem:[#allocation329_spill] sm:$0xff] }
 0x307   :  { %v2107_v17 = vpop.permute.xlu1 %2106  ;;  %v1830_v9 = vmul.f32 %v9967_v27, %v1731_v58  ;;  %v13568_v58 = vld [vmem:[#allocation270_spill] sm:$0xff] }
 0x308   :  { %v2317_v24 = vpack.c.bf16 %v2278_v8, %v2277_v54  ;;  %v2215_v10 = vmul.f32 %v9994_v19, %v2107_v17  ;;  %v1119_v8 = vadd.f32 %v10527_v60, %v1049_v22  ;;  %v13562_v54 = vld [vmem:[#allocation355_spill] sm:$0xff] }
 0x309   :  { %v2217_v17 = vmul.f32 %v9994_v19, %v13562_v54 }
 0x30a   :  { %7137 = vmatprep.mubr.msk.bf16.mxu0 %vm2364_vm0, %v2317_v24  ;;  %6663 = vmatprep.subr.bf16.mxu1 %v2317_v24  ;;  %v2279_v1 = vadd.f32 %v2215_v10, %v1891_v45 }
 0x30b   :  { %v2111_v52 = vpop.permute.xlu1 %2110 }
 0x30c   :  { %v2216_v20 = vmul.f32 %v9994_v19, %v2111_v52 }
 0x30e   :  { %v2280_v25 = vadd.f32 %v2216_v20, %v1892_v26 }
 0x310   :  { %v10592_v33 = vpack.c.bf16 %v2280_v25, %v2279_v1  ;;  %v1343_v55 = vpop.permute.xlu1 %1342 }
 0x311   :  { %v1442_v50 = vmul.f32 %v9957_v29, %v1343_v55  ;;  %v13563_v55 = vld [vmem:[#allocation357_spill] sm:$0xff] }
 0x312   :  { %13555 = vst [vmem:[#allocation283_spill] sm:$0xff] %v10592_v33  ;;  %7138 = vmatmul.mubr.msk.bf16.gmra.mrb[48].mxu0 %vm2364_vm0, %v10592_v33 }
 0x313   :  { %v1506_v41 = vadd.f32 %v1442_v50, %v1118_v57 }
 0x314   :  { %v1347_v16 = vpop.permute.xlu1 %1346 }
 0x315   :  { %v1443_v0 = vmul.f32 %v9957_v29, %v1347_v16  ;;  %v1894_v61 = vadd.f32 %v1830_v9, %v1506_v41  ;;  %v2220_v16 = vmul.f32 %v9994_v19, %v13563_v55  ;;  %v1051_v41 = vmul.f32 %v9951_v7, %v13567_v36  ;;  %v13569_v55 = vld [vmem:[#allocation330_spill] sm:$0xff] }
 0x316   :  { %v1446_v9 = vmul.f32 %v9957_v29, %v13568_v58 }
 0x317   :  { %v1507_v52 = vadd.f32 %v1443_v0, %v1119_v8 }
 0x319   :  { %v1727_v34 = vpop.permute.xlu1 %1726 }
 0x31a   :  { %v1829_v59 = vmul.f32 %v9967_v27, %v1727_v34 }
 0x31c   :  { %v1893_v53 = vadd.f32 %v1829_v59, %v1505_v31  ;;  %v13566_v31 = vld [vmem:[#allocation328_spill] sm:$0xff] }
 0x31d   :  { %v1735_v49 = vpop.permute.xlu1 %1734  ;;  %v1052_v35 = vmul.f32 %v9951_v7, %v13566_v31 }
 0x31e   :  { %v10600_v12 = vpop.f32.mrb[0].mxu0  ;;  %v1831_v24 = vmul.f32 %v9967_v27, %v1735_v49  ;;  %v2281_v45 = vadd.f32 %v2217_v17, %v1893_v53  ;;  %v1121_v17 = vadd.f32 %v10527_v60, %v1051_v41 }
 0x31f   :  { %v10605_v2 = vpop.f32.mrb[1].mxu0  ;;  %v1122_v54 = vadd.f32 %v10527_v60, %v1052_v35  ;;  %v13571_v35 = vld [vmem:[#allocation359_spill] sm:$0xff] }
 0x320   :  { %v10609_v42 = vpop.f32.mrb[2].mxu0  ;;  %v1895_v34 = vadd.f32 %v1831_v24, %v1507_v52  ;;  %v2222_v36 = vmul.f32 %v9994_v19, %v13571_v35 }
 0x321   :  { %v1739_v28 = vpop.permute.xlu1 %1738  ;;  %v2498_v13 = vpop.f32.mrb[3].mxu0 }
 0x322   :  { %v1832_v62 = vmul.f32 %v9967_v27, %v1739_v28 }
 0x324   :  { %v1896_v26 = vadd.f32 %v1832_v62, %v1508_v4  ;;  %v10672_v62 = vld [vmem:[%s12967_s6] ss:$0 sm:$0xff] }
 0x326   :  { %v2119_v15 = vpop.permute.xlu1 %2118  ;;  %v10625_v5 = vpop.f32.mrb[4].mxu0  ;;  %v2284_v63 = vadd.f32 %v2220_v16, %v1896_v26  ;;  %v1054_v16 = vmul.f32 %v9951_v7, %v13569_v55  ;;  %v10718_v55 = vadd.f32 %v10609_v42, %v10672_v62 }
 0x327   :  { %v2218_v30 = vmul.f32 %v9994_v19, %v2119_v15  ;;  %v10629_v48 = vpop.f32.mrb[5].mxu0 }
 0x328   :  { %v10631_v10 = vpop.f32.mrb[6].mxu0 }
 0x329   :  { %v2282_v20 = vadd.f32 %v2218_v30, %v1894_v61  ;;  %v10633_v1 = vpop.f32.mrb[7].mxu0  ;;  %v10681_v30 = vadd.f32 %v10672_v62, %v2498_v13 }
 0x32a   :  { %v2123_v25 = vpop.permute.xlu1 %2122 }
 0x32b   :  { %v10637_v38 = vpack.c.bf16 %v2282_v20, %v2281_v45  ;;  %v2219_v51 = vmul.f32 %v9994_v19, %v2123_v25  ;;  %v1510_v45 = vadd.f32 %v1446_v9, %v1122_v54  ;;  %v1124_v54 = vadd.f32 %v10527_v60, %v1054_v16 }
 0x32d   :  { %13564 = vst [vmem:[#allocation284_spill] sm:$0xff] %v10637_v38  ;;  %v2283_v23 = vadd.f32 %v2219_v51, %v1895_v34  ;;  %7141 = vmatprep.mubr.msk.bf16.mxu0 %vm2364_vm0, %v10637_v38  ;;  %v1743_v34 = vpop.permute.xlu0 %1742  ;;  %v10692_v51 = vadd.f32 %v10672_v62, %v10605_v2 }
 0x32e   :  { %v10642_v49 = vpop.f32.mrb[8].mxu0  ;;  %v1833_v13 = vmul.f32 %v9967_v27, %v1743_v34 }
 0x32f   :  { %v10644_v18 = vpack.c.bf16 %v2284_v63, %v2283_v23  ;;  %v1355_v40 = vpop.permute.xlu1 %1354  ;;  %v10646_v50 = vpop.f32.mrb[9].mxu0 }
 0x330   :  { %v10648_v43 = vpop.f32.mrb[10].mxu0  ;;  %v1445_v0 = vmul.f32 %v9957_v29, %v1355_v40  ;;  %v13570_v40 = vld [vmem:[#allocation331_spill] sm:$0xff] }
 0x331   :  { %13565 = vst [vmem:[#allocation285_spill] sm:$0xff] %v10644_v18  ;;  %v10650_v44 = vpop.f32.mrb[11].mxu0  ;;  %7142 = vmatmul.mubr.msk.bf16.gmra.mrb[52].mxu0 %vm2364_vm0, %v10644_v18  ;;  %v1053_v31 = vmul.f32 %v9951_v7, %v13570_v40 }
 0x332   :  { %v1509_v26 = vadd.f32 %v1445_v0, %v1121_v17 }
 0x333   :  { %v1363_v57 = vpop.permute.xlu1 %1362 }
 0x334   :  { %v1897_v9 = vadd.f32 %v1833_v13, %v1509_v26  ;;  %v1123_v26 = vadd.f32 %v10527_v60, %v1053_v31  ;;  %v1755_v13 = vpop.permute.xlu0 %1754  ;;  %v10728_v31 = vadd.f32 %v10600_v12, %v10672_v62 }
 0x336   :  { %v10654_v21 = vpop.f32.mrb[12].mxu0 }
 0x337   :  { %v1367_v59 = vpop.permute.xlu1 %1366  ;;  %v10656_v28 = vpop.f32.mrb[13].mxu0 }
 0x338   :  { %v10658_v32 = vpop.f32.mrb[14].mxu0  ;;  %v1448_v2 = vmul.f32 %v9957_v29, %v1367_v59 }
 0x339   :  { %v10660_v22 = vpop.f32.mrb[15].mxu0 }
 0x33c   :  { %v1747_v14 = vpop.permute.xlu1 %1746 }
 0x33d   :  { %v1834_v15 = vmul.f32 %v9967_v27, %v1747_v14  ;;  %v2753_v14 = vsel %vm2364_vm0, %v10681_v30, -inf }
 0x33e   :  { %v7107_v53 = vpop.f32.mrb[16].mxu0 }
 0x33f   :  { %v2559_v8 = vpop.f32.mrb[17].mxu0  ;;  %v1898_v63 = vadd.f32 %v1834_v15, %v1510_v45  ;;  %v2750_v15 = vsel %vm2364_vm0, %v10692_v51, -inf }
 0x340   :  { %v10678_v4 = vadd.f32 %v10672_v62, %v2559_v8  ;;  %v1751_v24 = vpop.permute.xlu1 %1750  ;;  %v7108_v61 = vpop.f32.mrb[18].mxu0 }
 0x341   :  { %v2562_v52 = vpop.f32.mrb[19].mxu0  ;;  %v10705_v58 = vadd.f32 %v7108_v61, %v10672_v62  ;;  %v2286_v45 = vadd.f32 %v2222_v36, %v1898_v63  ;;  %v1835_v40 = vmul.f32 %v9967_v27, %v1751_v24  ;;  %v1836_v63 = vmul.f32 %v9967_v27, %v1755_v13 }
 0x342   :  { %v10684_v20 = vadd.f32 %v10672_v62, %v2562_v52  ;;  %v2798_v25 = vsel %vm2364_vm0, %v10678_v4, -inf  ;;  %v1447_v52 = vmul.f32 %v9957_v29, %v1363_v57 }
 0x343   :  { %2799 = vmax.xlane.f32.xlu1 %v2798_v25  ;;  %v10713_v25 = vadd.f32 %v7107_v53, %v10672_v62  ;;  %v2807_v53 = vsel %vm2364_vm0, %v10705_v58, -inf }
 0x344   :  { %v2801_v23 = vsel %vm2364_vm0, %v10684_v20, -inf  ;;  %v1511_v42 = vadd.f32 %v1447_v52, %v1123_v26  ;;  %v2756_v52 = vsel %vm2364_vm0, %v10728_v31, -inf }
 0x345   :  { %v2131_v41 = vpop.permute.xlu1 %2130  ;;  %2802 = vmax.xlane.f32.xlu0 %v2801_v23  ;;  %v1512_v23 = vadd.f32 %v1448_v2, %v1124_v54  ;;  %v2804_v24 = vsel %vm2364_vm0, %v10713_v25, -inf }
 0x346   :  { %v2221_v0 = vmul.f32 %v9994_v19, %v2131_v41  ;;  %v7111_v8 = vpop.f32.mrb[20].mxu0  ;;  %v2759_v41 = vsel %vm2364_vm0, %v10718_v55, -inf }
 0x347   :  { %2754 = vmax.xlane.f32.xlu1 %v2753_v14  ;;  %v2575_v17 = vpop.f32.mrb[21].mxu0  ;;  %v1899_v14 = vadd.f32 %v1835_v40, %v1511_v42  ;;  %v1900_v12 = vadd.f32 %v1836_v63, %v1512_v23  ;;  %v10768_v40 = vadd.f32 %v7111_v8, %v10672_v62  ;;  %v10774_v42 = vadd.f32 %v10631_v10, %v10672_v62 }
 0x348   :  { %v2285_v59 = vadd.f32 %v2221_v0, %v1897_v9  ;;  %v7112_v61 = vpop.f32.mrb[22].mxu0  ;;  %v10742_v0 = vadd.f32 %v10672_v62, %v2575_v17  ;;  %v10756_v17 = vadd.f32 %v10672_v62, %v10629_v48  ;;  %v10780_v8 = vadd.f32 %v10625_v5, %v10672_v62 }
 0x349   :  { %v2139_v16 = vpop.permute.xlu1 %2138  ;;  %2751 = vmax.xlane.f32.xlu0 %v2750_v15  ;;  %v2578_v34 = vpop.f32.mrb[23].mxu0  ;;  %v2771_v10 = vsel %vm2364_vm0, %v10774_v42, -inf }
 0x34a   :  { %v10721_v57 = vpack.c.bf16 %v2286_v45, %v2285_v59  ;;  %v2223_v35 = vmul.f32 %v9994_v19, %v2139_v16  ;;  %v10738_v2 = vadd.f32 %v10672_v62, %v2578_v34  ;;  %v10748_v45 = vadd.f32 %v10672_v62, %v10633_v1 }
 0x34b   :  { %2808 = vmax.xlane.f32.xlu1 %v2807_v53  ;;  %v2810_v34 = vsel %vm2364_vm0, %v10742_v0, -inf  ;;  %v10763_v1 = vadd.f32 %v7112_v61, %v10672_v62  ;;  %v2762_v53 = vsel %vm2364_vm0, %v10756_v17, -inf }
 0x34c   :  { %13572 = vst [vmem:[#allocation337_spill] sm:$0xff] %v10721_v57  ;;  %7145 = vmatprep.mubr.msk.bf16.mxu0 %vm2364_vm0, %v10721_v57  ;;  %v2287_v54 = vadd.f32 %v2223_v35, %v1899_v14  ;;  %v2813_v16 = vsel %vm2364_vm0, %v10738_v2, -inf  ;;  %v2765_v23 = vsel %vm2364_vm0, %v10748_v45, -inf }
 0x34d   :  { %v2143_v36 = vpop.permute.xlu1 %2142  ;;  %2805 = vmax.xlane.f32.xlu0 %v2804_v24  ;;  %v2819_v35 = vsel %vm2364_vm0, %v10763_v1, -inf }
 0x34e   :  { %v2224_v9 = vmul.f32 %v9994_v19, %v2143_v36 }
 0x34f   :  { %2760 = vmax.xlane.f32.xlu1 %v2759_v41  ;;  %v2816_v41 = vsel %vm2364_vm0, %v10768_v40, -inf }
 0x350   :  { %v2288_v15 = vadd.f32 %v2224_v9, %v1900_v12  ;;  %v13574_v12 = vld [vmem:[#allocation332_spill] sm:$0xff] }
 0x351   :  { %2757 = vmax.xlane.f32.xlu0 %v2756_v52  ;;  %v1056_v9 = vmul.f32 %v9951_v7, %v13574_v12  ;;  %v1763_v52 = vpop.permute.xlu0 %1762  ;;  %v10805_v12 = vadd.f32 %v10672_v62, %v10650_v44 }
 0x352   :  { %v10750_v59 = vpack.c.bf16 %v2288_v15, %v2287_v54  ;;  %v1375_v26 = vpop.permute.xlu1 %1374  ;;  %v13575_v54 = vld [vmem:[#allocation333_spill] sm:$0xff] }
 0x353   :  { %2814 = vmax.xlane.f32.xlu1 %v2813_v16  ;;  %v1055_v15 = vmul.f32 %v9951_v7, %v13575_v54 }
 0x354   :  { %13573 = vst [vmem:[#allocation286_spill] sm:$0xff] %v10750_v59  ;;  %7146 = vmatmul.mubr.msk.bf16.gmra.mrb[56].mxu0 %vm2364_vm0, %v10750_v59  ;;  %v13579_v59 = vld [vmem:[#allocation273_spill] sm:$0xff] }
 0x355   :  { %2811 = vmax.xlane.f32.xlu0 %v2810_v34  ;;  %v2768_v34 = vsel %vm2364_vm0, %v10780_v8, -inf  ;;  %v1125_v54 = vadd.f32 %v10527_v60, %v1055_v15 }
 0x356   :  { %v1379_v13 = vpop.permute.xlu1 %1378 }
 0x357   :  { %2766 = vmax.xlane.f32.xlu1 %v2765_v23  ;;  %v13576_v23 = vld [vmem:[#allocation275_spill] sm:$0xff] }
 0x358   :  { %v7115_v48 = vpop.f32.mrb[24].mxu0 }
 0x359   :  { %2763 = vmax.xlane.f32.xlu0 %v2762_v53  ;;  %v2591_v63 = vpop.f32.mrb[25].mxu0  ;;  %v1449_v53 = vmul.f32 %v9957_v29, %v13576_v23  ;;  %v2147_v23 = vpop.permute.xlu0 %2146 }
 0x35a   :  { %v7116_v61 = vpop.f32.mrb[26].mxu0  ;;  %v10794_v5 = vadd.f32 %v10672_v62, %v2591_v63 }
 0x35b   :  { %v1759_v24 = vpop.permute.xlu1 %1758  ;;  %2820 = vmax.xlane.f32.xlu1 %v2819_v35  ;;  %v2594_v36 = vpop.f32.mrb[27].mxu0  ;;  %v1450_v35 = vmul.f32 %v9957_v29, %v1375_v26  ;;  %v13578_v26 = vld [vmem:[#allocation335_spill] sm:$0xff]  ;;  %v1513_v6 = vadd.f32 %v1449_v53, %v1125_v54  ;;  %v10825_v47 = vadd.f32 %v7116_v61, %v10672_v62  ;;  %v2225_v53 = vmul.f32 %v9994_v19, %v2147_v23 }
 0x35c   :  { %v10785_v14 = vadd.f32 %v10672_v62, %v2594_v36  ;;  %v13577_v36 = vld [vmem:[#allocation334_spill] sm:$0xff]  ;;  %v1837_v56 = vmul.f32 %v9967_v27, %v1759_v24  ;;  %v2822_v44 = vsel %vm2364_vm0, %v10794_v5, -inf }
 0x35d   :  { %2817 = vmax.xlane.f32.xlu0 %v2816_v41  ;;  %v1058_v41 = vmul.f32 %v9951_v7, %v13577_v36  ;;  %v10816_v36 = vadd.f32 %v10672_v62, %v10646_v50  ;;  %v1451_v50 = vmul.f32 %v9957_v29, %v1379_v13 }
 0x35e   :  { %v2825_v63 = vsel %vm2364_vm0, %v10785_v14, -inf }
 0x35f   :  { %v1767_v16 = vpop.permute.xlu1 %1766  ;;  %2772 = vmax.xlane.f32.xlu1 %v2771_v10  ;;  %v1126_v10 = vadd.f32 %v10527_v60, %v1056_v9  ;;  %v1452_v9 = vmul.f32 %v9957_v29, %v13579_v59  ;;  %v1128_v24 = vadd.f32 %v10527_v60, %v1058_v41  ;;  %v2159_v59 = vpop.permute.xlu0 %2158  ;;  %v10834_v41 = vadd.f32 %v7115_v48, %v10672_v62 }
 0x360   :  { %v2774_v61 = vsel %vm2364_vm0, %v10816_v36, -inf }
 0x361   :  { %2769 = vmax.xlane.f32.xlu0 %v2768_v34  ;;  %v1057_v34 = vmul.f32 %v9951_v7, %v13578_v26  ;;  %v1514_v15 = vadd.f32 %v1450_v35, %v1126_v10  ;;  %v2777_v7 = vsel %vm2364_vm0, %v10805_v12, -inf  ;;  %v1901_v26 = vadd.f32 %v1837_v56, %v1513_v6 }
 0x362   :  { %v1516_v10 = vadd.f32 %v1452_v9, %v1128_v24  ;;  %v2831_v56 = vsel %vm2364_vm0, %v10825_v47, -inf  ;;  %v2828_v9 = vsel %vm2364_vm0, %v10834_v41, -inf }
 0x363   :  { %v1771_v39 = vpop.permute.xlu1 %1770  ;;  %2826 = vmax.xlane.f32.xlu1 %v2825_v63  ;;  %v1838_v63 = vmul.f32 %v9967_v27, %v1763_v52  ;;  %v1127_v35 = vadd.f32 %v10527_v60, %v1057_v34  ;;  %v2228_v60 = vmul.f32 %v9994_v19, %v2159_v59  ;;  %v2289_v48 = vadd.f32 %v2225_v53, %v1901_v26 }
 0x364   :  { %v1840_v54 = vmul.f32 %v9967_v27, %v1771_v39  ;;  %v10842_v39 = vadd.f32 %v10648_v43, %v10672_v62 }
 0x365   :  { %2823 = vmax.xlane.f32.xlu0 %v2822_v44  ;;  %v1839_v44 = vmul.f32 %v9967_v27, %v1767_v16  ;;  %v1902_v29 = vadd.f32 %v1838_v63, %v1514_v15  ;;  %v1515_v13 = vadd.f32 %v1451_v50, %v1127_v35  ;;  %v10849_v27 = vadd.f32 %v10642_v49, %v10672_v62 }
 0x366   :  { %v1904_v23 = vadd.f32 %v1840_v54, %v1516_v10  ;;  %v10878_v10 = vadd.f32 %v10672_v62, %v10660_v22 }
 0x367   :  { %2778 = vmax.xlane.f32.xlu1 %v2777_v7  ;;  %v1903_v43 = vadd.f32 %v1839_v44, %v1515_v13  ;;  %v2783_v7 = vsel %vm2364_vm0, %v10842_v39, -inf  ;;  %v2780_v59 = vsel %vm2364_vm0, %v10849_v27, -inf  ;;  %v10900_v13 = vadd.f32 %v10658_v32, %v10672_v62 }
 0x368   :  { %v2151_v52 = vpop.permute.xlu1 %2150  ;;  %v2292_v50 = vadd.f32 %v2228_v60, %v1904_v23 }
 0x369   :  { %v2226_v6 = vmul.f32 %v9994_v19, %v2151_v52  ;;  %2775 = vmax.xlane.f32.xlu0 %v2774_v61  ;;  %v10874_v61 = vadd.f32 %v10672_v62, %v10656_v28  ;;  %v2789_v28 = vsel %vm2364_vm0, %v10878_v10, -inf }
 0x36b   :  { %v2290_v34 = vadd.f32 %v2226_v6, %v1902_v29  ;;  %2832 = vmax.xlane.f32.xlu1 %v2831_v56  ;;  %v2786_v22 = vsel %vm2364_vm0, %v10874_v61, -inf  ;;  %v10896_v56 = vadd.f32 %v10654_v21, %v10672_v62 }
 0x36c   :  { %v2155_v16 = vpop.permute.xlu1 %2154 }
 0x36d   :  { %v10853_v15 = vpack.c.bf16 %v2290_v34, %v2289_v48  ;;  %v2227_v24 = vmul.f32 %v9994_v19, %v2155_v16  ;;  %2829 = vmax.xlane.f32.xlu0 %v2828_v9  ;;  %v2795_v34 = vsel %vm2364_vm0, %v10900_v13, -inf  ;;  %v2792_v16 = vsel %vm2364_vm0, %v10896_v56, -inf }
 0x36e   :  { %v7119_v63 = vpop.f32.mrb[28].mxu0 }
 0x36f   :  { %13580 = vst [vmem:[#allocation268_spill] sm:$0xff] %v10853_v15  ;;  %v2291_v26 = vadd.f32 %v2227_v24, %v1903_v43  ;;  %2784 = vmax.xlane.f32.xlu1 %v2783_v7  ;;  %v2607_v53 = vpop.f32.mrb[29].mxu0  ;;  %7149 = vmatprep.mubr.msk.bf16.mxu0 %vm2364_vm0, %v10853_v15  ;;  %v10885_v6 = vadd.f32 %v7119_v63, %v10672_v62 }
 0x370   :  { %v10861_v49 = vadd.f32 %v10672_v62, %v2607_v53  ;;  %v7120_v54 = vpop.f32.mrb[30].mxu0 }
 0x371   :  { %v10865_v19 = vpack.c.bf16 %v2292_v50, %v2291_v26  ;;  %2781 = vmax.xlane.f32.xlu0 %v2780_v59  ;;  %v2610_v35 = vpop.f32.mrb[31].mxu0  ;;  %v10888_v60 = vadd.f32 %v7120_v54, %v10672_v62  ;;  %v2840_v23 = vsel %vm2364_vm0, %v10885_v6, -inf }
 0x372   :  { %v10868_v52 = vadd.f32 %v10672_v62, %v2610_v35  ;;  %v2834_v29 = vsel %vm2364_vm0, %v10861_v49, -inf }
 0x373   :  { %13581 = vst [vmem:[#allocation287_spill] sm:$0xff] %v10865_v19  ;;  %7150 = vmatmul.mubr.msk.bf16.gmra.mrb[60].mxu0 %vm2364_vm0, %v10865_v19  ;;  %v2843_v48 = vsel %vm2364_vm0, %v10888_v60, -inf }
 0x374   :  { %v2837_v44 = vsel %vm2364_vm0, %v10868_v52, -inf }
 0x375   :  { %2838 = vmax.xlane.f32.xlu1 %v2837_v44  ;;  %2835 = vmax.xlane.f32.xlu0 %v2834_v29 }
 0x379   :  { %2790 = vmax.xlane.f32.xlu1 %v2789_v28  ;;  %2787 = vmax.xlane.f32.xlu0 %v2786_v22 }
 0x37d   :  { %2844 = vmax.xlane.f32.xlu1 %v2843_v48  ;;  %2841 = vmax.xlane.f32.xlu0 %v2840_v23 }
 0x381   :  { %2796 = vmax.xlane.f32.xlu1 %v2795_v34  ;;  %2793 = vmax.xlane.f32.xlu0 %v2792_v16 }
 0x384   :  { %v7123_v21 = vpop.f32.mrb[32].mxu0 }
 0x385   :  { %v2623_v9 = vpop.f32.mrb[33].mxu0 }
 0x386   :  { %v7124_v32 = vpop.f32.mrb[34].mxu0  ;;  %v10933_v15 = vadd.f32 %v10672_v62, %v2623_v9 }
 0x387   :  { %v2626_v43 = vpop.f32.mrb[35].mxu0 }
 0x388   :  { %13582 = vst [vmem:[#allocation340_spill] sm:$0xff] %v10933_v15  ;;  %v10938_v46 = vadd.f32 %v10672_v62, %v2626_v43  ;;  %v10958_v43 = vadd.f32 %v7124_v32, %v10672_v62 }
 0x38a   :  { %13583 = vst [vmem:[#allocation336_spill] sm:$0xff] %v10938_v46  ;;  %v2849_v3 = vsel %vm2364_vm0, %v10938_v46, -inf  ;;  %13587 = vst [vmem:[#allocation291_spill] sm:$0xff] %v10958_v43 }
 0x39a   :  { %v7127_v24 = vpop.f32.mrb[36].mxu0 }
 0x39b   :  { %v2639_v63 = vpop.f32.mrb[37].mxu0 }
 0x39c   :  { %v7128_v7 = vpop.f32.mrb[38].mxu0 }
 0x39d   :  { %v2642_v50 = vpop.f32.mrb[39].mxu0 }
 0x39e   :  { %v10978_v33 = vadd.f32 %v10672_v62, %v2642_v50  ;;  %v10993_v50 = vadd.f32 %v7127_v24, %v10672_v62 }
 0x3a0   :  { %13591 = vst [vmem:[#allocation344_spill] sm:$0xff] %v10978_v33  ;;  %13594 = vst [vmem:[#allocation346_spill] sm:$0xff] %v10993_v50 }
 0x3b0   :  { %v10910_v26 = vpop.f32.mrb[40].mxu0 }
 0x3b1   :  { %v10912_v53 = vpop.f32.mrb[41].mxu0 }
 0x3b2   :  { %v10914_v54 = vpop.f32.mrb[42].mxu0 }
 0x3b3   :  { %v10916_v59 = vpop.f32.mrb[43].mxu0 }
 0x3c6   :  { %v10918_v35 = vpop.f32.mrb[44].mxu0 }
 0x3c7   :  { %v10920_v44 = vpop.f32.mrb[45].mxu0 }
 0x3c8   :  { %v10922_v29 = vpop.f32.mrb[46].mxu0 }
 0x3c9   :  { %v10924_v28 = vpop.f32.mrb[47].mxu0 }
 0x3d0   :  { %v2800_v37 = vpop.xlane.xlu1 %2799 }
 0x3d2   :  { %v2803_v24 = vpop.xlane.xlu0 %2802 }
 0x3e5   :  { %v7139_v22 = vpop.f32.mrb[48].mxu0 }
 0x3e6   :  { %v2687_v48 = vpop.f32.mrb[49].mxu0 }
 0x3e7   :  { %v10927_v23 = vadd.f32 %v10672_v62, %v2687_v48  ;;  %v7140_v34 = vpop.f32.mrb[50].mxu0  ;;  %v10943_v48 = vadd.f32 %v7139_v22, %v10672_v62 }
 0x3e8   :  { %v2690_v16 = vpop.f32.mrb[51].mxu0  ;;  %v10948_v9 = vadd.f32 %v7140_v34, %v10672_v62 }
 0x3e9   :  { %v10930_v19 = vadd.f32 %v10672_v62, %v2690_v16  ;;  %v2894_v57 = vsel %vm2364_vm0, %v10927_v23, -inf  ;;  %13584 = vst [vmem:[#allocation288_spill] sm:$0xff] %v10943_v48  ;;  %v2846_v16 = vsel %vm2364_vm0, %v10933_v15, -inf  ;;  %v11082_v15 = vadd.f32 %v10672_v62, %v10920_v44 }
 0x3ea   :  { %2895 = vmax.xlane.f32.xlu0 %v2894_v57  ;;  %13585 = vst [vmem:[#allocation289_spill] sm:$0xff] %v10948_v9  ;;  %v10953_v57 = vadd.f32 %v7123_v21, %v10672_v62  ;;  %v2903_v22 = vsel %vm2364_vm0, %v10948_v9, -inf }
 0x3eb   :  { %v2897_v18 = vsel %vm2364_vm0, %v10930_v19, -inf }
 0x3ec   :  { %2898 = vmax.xlane.f32.xlu1 %v2897_v18  ;;  %13586 = vst [vmem:[#allocation290_spill] sm:$0xff] %v10953_v57  ;;  %v2900_v18 = vsel %vm2364_vm0, %v10943_v48, -inf  ;;  %v2852_v34 = vsel %vm2364_vm0, %v10953_v57, -inf }
 0x3ee   :  { %2847 = vmax.xlane.f32.xlu0 %v2846_v16 }
 0x3f0   :  { %2850 = vmax.xlane.f32.xlu1 %v2849_v3  ;;  %v2855_v3 = vsel %vm2364_vm0, %v10958_v43, -inf }
 0x3f2   :  { %2901 = vmax.xlane.f32.xlu0 %v2900_v18  ;;  %v10970_v18 = vadd.f32 %v10672_v62, %v2639_v63 }
 0x3f4   :  { %2904 = vmax.xlane.f32.xlu1 %v2903_v22  ;;  %13589 = vst [vmem:[#allocation387_spill] sm:$0xff] %v10970_v18  ;;  %v2858_v63 = vsel %vm2364_vm0, %v10970_v18, -inf }
 0x3f6   :  { %2853 = vmax.xlane.f32.xlu0 %v2852_v34 }
 0x3f8   :  { %2856 = vmax.xlane.f32.xlu1 %v2855_v3 }
 0x404   :  { %v7143_v21 = vpop.f32.mrb[52].mxu0 }
 0x405   :  { %v2703_v16 = vpop.f32.mrb[53].mxu0 }
 0x406   :  { %v10967_v38 = vadd.f32 %v10672_v62, %v2703_v16  ;;  %v7144_v32 = vpop.f32.mrb[54].mxu0  ;;  %v10983_v16 = vadd.f32 %v7143_v21, %v10672_v62  ;;  %v10998_v21 = vadd.f32 %v7128_v7, %v10672_v62 }
 0x407   :  { %v2706_v11 = vpop.f32.mrb[55].mxu0 }
 0x408   :  { %13588 = vst [vmem:[#allocation338_spill] sm:$0xff] %v10967_v38  ;;  %v10973_v22 = vadd.f32 %v10672_v62, %v2706_v11  ;;  %v2906_v34 = vsel %vm2364_vm0, %v10967_v38, -inf  ;;  %13592 = vst [vmem:[#allocation272_spill] sm:$0xff] %v10983_v16  ;;  %v10988_v11 = vadd.f32 %v7144_v32, %v10672_v62  ;;  %v2864_v32 = vsel %vm2364_vm0, %v10993_v50, -inf }
 0x409   :  { %2907 = vmax.xlane.f32.xlu0 %v2906_v34  ;;  %v2861_v34 = vsel %vm2364_vm0, %v10978_v33, -inf  ;;  %13595 = vst [vmem:[#allocation369_spill] sm:$0xff] %v10998_v21  ;;  %v2752_v33 = vpop.xlane.xlu0 %2751  ;;  %v11024_v50 = vadd.f32 %v10672_v62, %v10916_v59 }
 0x40a   :  { %13590 = vst [vmem:[#allocation271_spill] sm:$0xff] %v10973_v22  ;;  %v2909_v3 = vsel %vm2364_vm0, %v10973_v22, -inf  ;;  %13593 = vst [vmem:[#allocation292_spill] sm:$0xff] %v10988_v11  ;;  %v2942_v48 = vsub.f32 %v10692_v51, %v2752_v33 }
 0x40b   :  { %2910 = vmax.xlane.f32.xlu1 %v2909_v3  ;;  %v2912_v3 = vsel %vm2364_vm0, %v10983_v16, -inf  ;;  %13599 = vst [vmem:[#allocation348_spill] sm:$0xff] %v11024_v50  ;;  %v2873_v59 = vsel %vm2364_vm0, %v11024_v50, -inf }
 0x40d   :  { %2859 = vmax.xlane.f32.xlu0 %v2858_v63  ;;  %v2915_v63 = vsel %vm2364_vm0, %v10988_v11, -inf }
 0x40f   :  { %2862 = vmax.xlane.f32.xlu1 %v2861_v34  ;;  %v2867_v34 = vsel %vm2364_vm0, %v10998_v21, -inf }
 0x411   :  { %2913 = vmax.xlane.f32.xlu0 %v2912_v3  ;;  %v11006_v3 = vpop.xlane.xlu1 %2754 }
 0x413   :  { %2916 = vmax.xlane.f32.xlu1 %v2915_v63  ;;  %v11011_v63 = vpop.xlane.xlu0 %2805 }
 0x414   :  { %v2960_v44 = vsub.f32 %v10713_v25, %v11011_v63 }
 0x415   :  { %2865 = vmax.xlane.f32.xlu0 %v2864_v32  ;;  %v11015_v32 = vadd.f32 %v10672_v62, %v10912_v53  ;;  %v11028_v38 = vpop.xlane.xlu1 %2808 }
 0x417   :  { %2868 = vmax.xlane.f32.xlu1 %v2867_v34  ;;  %13597 = vst [vmem:[#allocation339_spill] sm:$0xff] %v11015_v32  ;;  %v11035_v43 = vpop.xlane.xlu0 %2757 }
 0x418   :  { %v2944_v63 = vsub.f32 %v10728_v31, %v11035_v43 }
 0x41a   :  { %v3010_v43 = vmul.f32 1.442695, %v2944_v63 }
 0x427   :  { %v7147_v16 = vpop.f32.mrb[56].mxu0 }
 0x428   :  { %v2719_v7 = vpop.f32.mrb[57].mxu0  ;;  %v11031_v53 = vadd.f32 %v7147_v16, %v10672_v62 }
 0x429   :  { %v11009_v18 = vadd.f32 %v10672_v62, %v2719_v7  ;;  %v7148_v11 = vpop.f32.mrb[58].mxu0 }
 0x42a   :  { %v2722_v22 = vpop.f32.mrb[59].mxu0  ;;  %13600 = vst [vmem:[#allocation294_spill] sm:$0xff] %v11031_v53  ;;  %v2924_v16 = vsel %vm2364_vm0, %v11031_v53, -inf }
 0x42b   :  { %13596 = vst [vmem:[#allocation293_spill] sm:$0xff] %v11009_v18  ;;  %v11018_v34 = vadd.f32 %v10672_v62, %v2722_v22  ;;  %v2918_v21 = vsel %vm2364_vm0, %v11009_v18, -inf  ;;  %v2870_v22 = vsel %vm2364_vm0, %v11015_v32, -inf  ;;  %v11056_v32 = vpop.xlane.xlu0 %2811 }
 0x42c   :  { %2919 = vmax.xlane.f32.xlu0 %v2918_v21  ;;  %v11038_v21 = vadd.f32 %v7148_v11, %v10672_v62 }
 0x42d   :  { %13598 = vst [vmem:[#allocation370_spill] sm:$0xff] %v11018_v34  ;;  %v2921_v7 = vsel %vm2364_vm0, %v11018_v34, -inf  ;;  %v11044_v34 = vadd.f32 %v10910_v26, %v10672_v62 }
 0x42e   :  { %2922 = vmax.xlane.f32.xlu1 %v2921_v7  ;;  %13601 = vst [vmem:[#allocation295_spill] sm:$0xff] %v11038_v21  ;;  %v11048_v7 = vpop.xlane.xlu1 %2760  ;;  %v2927_v11 = vsel %vm2364_vm0, %v11038_v21, -inf  ;;  %v2958_v21 = vsub.f32 %v10678_v4, %v2800_v37 }
 0x42f   :  { %13602 = vst [vmem:[#allocation350_spill] sm:$0xff] %v11044_v34  ;;  %v2876_v26 = vsel %vm2364_vm0, %v11044_v34, -inf  ;;  %v2959_v34 = vsub.f32 %v10684_v20, %v2803_v24  ;;  %v2943_v24 = vsub.f32 %v10681_v30, %v11006_v3 }
 0x430   :  { %2871 = vmax.xlane.f32.xlu0 %v2870_v22  ;;  %v11052_v22 = vadd.f32 %v10914_v54, %v10672_v62  ;;  %v3038_v9 = vmul.f32 1.442695, %v2958_v21  ;;  %v11093_v21 = vadd.f32 %v10672_v62, %v10924_v28  ;;  %v2882_v28 = vsel %vm2364_vm0, %v11082_v15, -inf }
 0x431   :  { %v3040_v20 = vmul.f32 1.442695, %v2959_v34  ;;  %v3008_v3 = vmul.f32 1.442695, %v2943_v24  ;;  %v2962_v24 = vsub.f32 %v10742_v0, %v11056_v32 }
 0x432   :  { %2874 = vmax.xlane.f32.xlu1 %v2873_v59  ;;  %13603 = vst [vmem:[#allocation371_spill] sm:$0xff] %v11052_v22  ;;  %v2879_v59 = vsel %vm2364_vm0, %v11052_v22, -inf  ;;  %v11062_v53 = vpop.xlane.xlu1 %2814  ;;  %7284 = vpow2.f32 %v3038_v9  ;;  %v2885_v25 = vsel %vm2364_vm0, %v11093_v21, -inf  ;;  %v3042_v9 = vmul.f32 1.442695, %v2960_v44 }
 0x433   :  { %7286 = vpow2.f32 %v3040_v20  ;;  %v11129_v20 = vadd.f32 %v10922_v29, %v10672_v62  ;;  %v3046_v0 = vmul.f32 1.442695, %v2962_v24 }
 0x434   :  { %2925 = vmax.xlane.f32.xlu0 %v2924_v16  ;;  %v11064_v16 = vpop.xlane.xlu0 %2763 }
 0x435   :  { %v2946_v32 = vsub.f32 %v10756_v17, %v11064_v16 }
 0x436   :  { %2928 = vmax.xlane.f32.xlu1 %v2927_v11  ;;  %v11066_v54 = vpop.xlane.xlu1 %2766 }
 0x437   :  { %v3014_v17 = vmul.f32 1.442695, %v2946_v32 }
 0x438   :  { %2877 = vmax.xlane.f32.xlu0 %v2876_v26  ;;  %v11068_v50 = vpop.xlane.xlu0 %2817 }
 0x439   :  { %v2964_v16 = vsub.f32 %v10768_v40, %v11068_v50 }
 0x43a   :  { %2880 = vmax.xlane.f32.xlu1 %v2879_v59  ;;  %v11071_v18 = vpop.xlane.xlu1 %2820 }
 0x43b   :  { %v3050_v50 = vmul.f32 1.442695, %v2964_v16 }
 0x43c   :  { %v11074_v57 = vpop.xlane.xlu0 %2769 }
 0x43e   :  { %v11095_v33 = vpop.xlane.xlu1 %2772 }
 0x440   :  { %v11101_v34 = vpop.xlane.xlu0 %2823 }
 0x444   :  { %v11131_v31 = vpop.xlane.xlu0 %2775 }
 0x446   :  { %v7151_v11 = vpop.f32.mrb[60].mxu0 }
 0x447   :  { %v2735_v26 = vpop.f32.mrb[61].mxu0  ;;  %v11104_v30 = vadd.f32 %v7151_v11, %v10672_v62  ;;  %v11119_v11 = vadd.f32 %v10918_v35, %v10672_v62 }
 0x448   :  { %v11077_v22 = vadd.f32 %v10672_v62, %v2735_v26  ;;  %v7152_v59 = vpop.f32.mrb[62].mxu0  ;;  %v2961_v26 = vsub.f32 %v10705_v58, %v11028_v38 }
 0x449   :  { %v2738_v46 = vpop.f32.mrb[63].mxu0  ;;  %v2936_v38 = vsel %vm2364_vm0, %v11104_v30, -inf }
 0x44a   :  { %v11085_v37 = vadd.f32 %v10672_v62, %v2738_v46  ;;  %v2930_v4 = vsel %vm2364_vm0, %v11077_v22, -inf  ;;  %v3006_v46 = vmul.f32 1.442695, %v2942_v48  ;;  %v11111_v48 = vadd.f32 %v7152_v59, %v10672_v62 }
 0x44b   :  { %2931 = vmax.xlane.f32.xlu0 %v2930_v4  ;;  %v11121_v4 = vpop.xlane.xlu1 %2826  ;;  %v3044_v58 = vmul.f32 1.442695, %v2961_v26  ;;  %v2945_v59 = vsub.f32 %v10718_v55, %v11048_v7  ;;  %v11139_v55 = vpop.eup %7284  ;;  %v2963_v62 = vsub.f32 %v10738_v2, %v11062_v53  ;;  %v2947_v26 = vsub.f32 %v10748_v45, %v11066_v54 }
 0x44c   :  { %v2933_v51 = vsel %vm2364_vm0, %v11085_v37, -inf  ;;  %7288 = vpow2.f32 %v3006_v46  ;;  %v2939_v35 = vsel %vm2364_vm0, %v11111_v48, -inf  ;;  %v2891_v46 = vsel %vm2364_vm0, %v11129_v20, -inf  ;;  %v11147_v44 = vpop.eup %7286 }
 0x44d   :  { %2934 = vmax.xlane.f32.xlu1 %v2933_v51  ;;  %7290 = vpow2.f32 %v3008_v3  ;;  %v2888_v51 = vsel %vm2364_vm0, %v11119_v11, -inf  ;;  %v3012_v7 = vmul.f32 1.442695, %v2945_v59  ;;  %v3182_v3 = vsel %vm2364_vm0, %v11139_v55, 0.0 }
 0x44e   :  { %7292 = vpow2.f32 %v3042_v9  ;;  %v3048_v53 = vmul.f32 1.442695, %v2963_v62  ;;  %v3016_v45 = vmul.f32 1.442695, %v2947_v26  ;;  %v2965_v54 = vsub.f32 %v10763_v1, %v11071_v18 }
 0x44f   :  { %2883 = vmax.xlane.f32.xlu0 %v2882_v28  ;;  %7294 = vpow2.f32 %v3044_v58  ;;  %v11143_v29 = vpop.xlane.xlu1 %2778  ;;  %v11151_v28 = vpop.xlane.xlu0 %2829  ;;  %v2949_v18 = vsub.f32 %v10774_v42, %v11095_v33 }
 0x450   :  { %7296 = vpow2.f32 %v3010_v43  ;;  %v2948_v43 = vsub.f32 %v10780_v8, %v11074_v57  ;;  %v3052_v1 = vmul.f32 1.442695, %v2965_v54  ;;  %v2966_v57 = vsub.f32 %v10794_v5, %v11101_v34 }
 0x451   :  { %2886 = vmax.xlane.f32.xlu1 %v2885_v25  ;;  %7298 = vpow2.f32 %v3012_v7  ;;  %v3185_v25 = vsel %vm2364_vm0, %v11147_v44, 0.0  ;;  %v3020_v33 = vmul.f32 1.442695, %v2949_v18 }
 0x452   :  { %7300 = vpow2.f32 %v3046_v0  ;;  %v3018_v8 = vmul.f32 1.442695, %v2948_v43  ;;  %v3054_v34 = vmul.f32 1.442695, %v2966_v57 }
 0x453   :  { %2937 = vmax.xlane.f32.xlu0 %v2936_v38  ;;  %v11165_v63 = vpop.xlane.xlu1 %2832  ;;  %7302 = vpow2.f32 %v3048_v53  ;;  %v11173_v59 = vpop.xlane.xlu0 %2781 }
 0x454   :  { %7304 = vpow2.f32 %v3014_v17 }
 0x455   :  { %2940 = vmax.xlane.f32.xlu1 %v2939_v35  ;;  %7306 = vpow2.f32 %v3016_v45 }
 0x456   :  { %v11155_v2 = vpop.eup %7288  ;;  %7308 = vpow2.f32 %v3050_v50 }
 0x457   :  { %2889 = vmax.xlane.f32.xlu0 %v2888_v51  ;;  %v11161_v9 = vpop.eup %7290  ;;  %v3134_v38 = vsel %vm2364_vm0, %v11155_v2, 0.0  ;;  %v11187_v7 = vpop.xlane.xlu1 %2784  ;;  %7310 = vpow2.f32 %v3052_v1 }
 0x458   :  { %v11169_v58 = vpop.eup %7292  ;;  %v3137_v35 = vsel %vm2364_vm0, %v11161_v9, 0.0  ;;  %v11195_v0 = vpop.xlane.xlu0 %2835  ;;  %7312 = vpow2.f32 %v3018_v8 }
 0x459   :  { %2892 = vmax.xlane.f32.xlu1 %v2891_v46  ;;  %v11177_v40 = vpop.eup %7294  ;;  %v3188_v24 = vsel %vm2364_vm0, %v11169_v58, 0.0  ;;  %7314 = vpow2.f32 %v3020_v33 }
 0x45a   :  { %v11183_v51 = vpop.eup %7296  ;;  %v3191_v62 = vsel %vm2364_vm0, %v11177_v40, 0.0  ;;  %7316 = vpow2.f32 %v3054_v34 }
 0x45b   :  { %3183 = vadd.xlane.f32.xlu0 %v3182_v3  ;;  %v11191_v46 = vpop.eup %7298  ;;  %v3140_v32 = vsel %vm2364_vm0, %v11183_v51, 0.0  ;;  %v2967_v3 = vsub.f32 %v10785_v14, %v11121_v4  ;;  %v11203_v53 = vpop.xlane.xlu1 %2838  ;;  %v2951_v4 = vsub.f32 %v10805_v12, %v11143_v29  ;;  %v2969_v29 = vsub.f32 %v10825_v47, %v11165_v63 }
 0x45c   :  { %v11199_v42 = vpop.eup %7300  ;;  %v3143_v26 = vsel %vm2364_vm0, %v11191_v46, 0.0  ;;  %v2953_v63 = vsub.f32 %v10842_v39, %v11187_v7  ;;  %v2971_v7 = vsub.f32 %v10868_v52, %v11203_v53 }
 0x45d   :  { %3186 = vadd.xlane.f32.xlu1 %v3185_v25  ;;  %v11207_v5 = vpop.eup %7302  ;;  %v2950_v25 = vsub.f32 %v10816_v36, %v11131_v31  ;;  %v3194_v17 = vsel %vm2364_vm0, %v11199_v42, 0.0  ;;  %v3056_v14 = vmul.f32 1.442695, %v2967_v3  ;;  %v2968_v31 = vsub.f32 %v10834_v41, %v11151_v28 }
 0x45e   :  { %v11213_v16 = vpop.eup %7304  ;;  %v3197_v45 = vsel %vm2364_vm0, %v11207_v5, 0.0  ;;  %v3024_v12 = vmul.f32 1.442695, %v2951_v4  ;;  %v2952_v28 = vsub.f32 %v10849_v27, %v11173_v59  ;;  %v3060_v47 = vmul.f32 1.442695, %v2969_v29 }
 0x45f   :  { %3135 = vadd.xlane.f32.xlu0 %v3134_v38  ;;  %v2788_v38 = vpop.xlane.xlu0 %2787  ;;  %v11219_v54 = vpop.eup %7306  ;;  %v3022_v36 = vmul.f32 1.442695, %v2950_v25  ;;  %v3146_v50 = vsel %vm2364_vm0, %v11213_v16, 0.0  ;;  %7318 = vpow2.f32 %v3056_v14  ;;  %v3058_v41 = vmul.f32 1.442695, %v2968_v31 }
 0x460   :  { %v11225_v43 = vpop.eup %7308  ;;  %v3026_v27 = vmul.f32 1.442695, %v2952_v28  ;;  %v2970_v59 = vsub.f32 %v10861_v49, %v11195_v0  ;;  %v3028_v39 = vmul.f32 1.442695, %v2953_v63  ;;  %v2954_v0 = vsub.f32 %v10874_v61, %v2788_v38 }
 0x461   :  { %3138 = vadd.xlane.f32.xlu1 %v3137_v35  ;;  %v2791_v35 = vpop.xlane.xlu1 %2790  ;;  %v11231_v1 = vpop.eup %7310  ;;  %7320 = vpow2.f32 %v3022_v36  ;;  %v3064_v52 = vmul.f32 1.442695, %v2971_v7 }
 0x462   :  { %v11237_v8 = vpop.eup %7312  ;;  %7322 = vpow2.f32 %v3024_v12  ;;  %v3062_v49 = vmul.f32 1.442695, %v2970_v59  ;;  %v2955_v53 = vsub.f32 %v10878_v10, %v2791_v35  ;;  %v3030_v61 = vmul.f32 1.442695, %v2954_v0 }
 0x463   :  { %3189 = vadd.xlane.f32.xlu0 %v3188_v24  ;;  %v3149_v24 = vsel %vm2364_vm0, %v11219_v54, 0.0  ;;  %v2842_v18 = vpop.xlane.xlu0 %2841  ;;  %v11243_v33 = vpop.eup %7314  ;;  %7324 = vpow2.f32 %v3058_v41  ;;  %v3152_v3 = vsel %vm2364_vm0, %v11237_v8, 0.0 }
 0x464   :  { %7326 = vpow2.f32 %v3060_v47  ;;  %v3155_v25 = vsel %vm2364_vm0, %v11243_v33, 0.0  ;;  %v2972_v38 = vsub.f32 %v10885_v6, %v2842_v18  ;;  %v3032_v10 = vmul.f32 1.442695, %v2955_v53 }
 0x465   :  { %3192 = vadd.xlane.f32.xlu1 %v3191_v62  ;;  %v3200_v62 = vsel %vm2364_vm0, %v11225_v43, 0.0  ;;  %v2845_v57 = vpop.xlane.xlu1 %2844  ;;  %7328 = vpow2.f32 %v3026_v27 }
 0x466   :  { %7330 = vpow2.f32 %v3028_v39  ;;  %v2973_v35 = vsub.f32 %v10888_v60, %v2845_v57 }
 0x467   :  { %3141 = vadd.xlane.f32.xlu0 %v3140_v32  ;;  %v3203_v32 = vsel %vm2364_vm0, %v11231_v1, 0.0  ;;  %v2794_v34 = vpop.xlane.xlu0 %2793  ;;  %7332 = vpow2.f32 %v3062_v49 }
 0x468   :  { %7334 = vpow2.f32 %v3064_v52  ;;  %v2956_v6 = vsub.f32 %v10896_v56, %v2794_v34 }
 0x469   :  { %3144 = vadd.xlane.f32.xlu1 %v3143_v26  ;;  %v11249_v26 = vpop.eup %7316  ;;  %v2797_v14 = vpop.xlane.xlu1 %2796  ;;  %7336 = vpow2.f32 %v3030_v61 }
 0x46a   :  { %v3206_v4 = vsel %vm2364_vm0, %v11249_v26, 0.0  ;;  %7338 = vpow2.f32 %v3032_v10  ;;  %v2957_v60 = vsub.f32 %v10900_v13, %v2797_v14  ;;  %v3034_v56 = vmul.f32 1.442695, %v2956_v6  ;;  %v13606_v10 = vld [vmem:[#allocation288_spill] sm:$0xff] }
 0x46b   :  { %3195 = vadd.xlane.f32.xlu0 %v3194_v17  ;;  %v11255_v17 = vpop.eup %7318 }
 0x46c   :  { %v3209_v31 = vsel %vm2364_vm0, %v11255_v17, 0.0  ;;  %v3036_v34 = vmul.f32 1.442695, %v2957_v60 }
 0x46d   :  { %3198 = vadd.xlane.f32.xlu1 %v3197_v45  ;;  %v11260_v45 = vpop.eup %7320 }
 0x46e   :  { %v3158_v29 = vsel %vm2364_vm0, %v11260_v45, 0.0 }
 0x46f   :  { %3147 = vadd.xlane.f32.xlu0 %v3146_v50  ;;  %v11265_v50 = vpop.eup %7322 }
 0x470   :  { %v3161_v41 = vsel %vm2364_vm0, %v11265_v50, 0.0 }
 0x471   :  { %3150 = vadd.xlane.f32.xlu1 %v3149_v24  ;;  %v11270_v24 = vpop.eup %7324 }
 0x472   :  { %v11275_v28 = vpop.eup %7326  ;;  %v3212_v47 = vsel %vm2364_vm0, %v11270_v24, 0.0 }
 0x473   :  { %3201 = vadd.xlane.f32.xlu0 %v3200_v62  ;;  %v3066_v62 = vmul.f32 1.442695, %v2972_v38  ;;  %v11280_v63 = vpop.eup %7328  ;;  %v3215_v27 = vsel %vm2364_vm0, %v11275_v28, 0.0 }
 0x474   :  { %v11285_v59 = vpop.eup %7330  ;;  %v3164_v39 = vsel %vm2364_vm0, %v11280_v63, 0.0 }
 0x475   :  { %3204 = vadd.xlane.f32.xlu1 %v3203_v32  ;;  %v3068_v32 = vmul.f32 1.442695, %v2973_v35  ;;  %7340 = vpow2.f32 %v3066_v62  ;;  %v11290_v7 = vpop.eup %7332  ;;  %v3167_v49 = vsel %vm2364_vm0, %v11285_v59, 0.0 }
 0x476   :  { %v11295_v0 = vpop.eup %7334  ;;  %v3218_v53 = vsel %vm2364_vm0, %v11290_v7, 0.0 }
 0x477   :  { %3153 = vadd.xlane.f32.xlu0 %v3152_v3  ;;  %v2896_v36 = vpop.xlane.xlu0 %2895  ;;  %7342 = vpow2.f32 %v3068_v32  ;;  %v3221_v38 = vsel %vm2364_vm0, %v11295_v0, 0.0 }
 0x478   :  { %v2990_v3 = vsub.f32 %v10927_v23, %v2896_v36  ;;  %7344 = vpow2.f32 %v3034_v56  ;;  %v13604_v23 = vld [vmem:[#allocation340_spill] sm:$0xff]  ;;  %v11300_v36 = vpop.eup %7336 }
 0x479   :  { %3156 = vadd.xlane.f32.xlu1 %v3155_v25  ;;  %v2899_v12 = vpop.xlane.xlu1 %2898  ;;  %7346 = vpow2.f32 %v3036_v34  ;;  %v3170_v62 = vsel %vm2364_vm0, %v11300_v36, 0.0 }
 0x47a   :  { %v2991_v13 = vsub.f32 %v10930_v19, %v2899_v12  ;;  %v3102_v14 = vmul.f32 1.442695, %v2990_v3  ;;  %v11305_v12 = vpop.eup %7338  ;;  %v13608_v3 = vld [vmem:[#allocation290_spill] sm:$0xff] }
 0x47b   :  { %3207 = vadd.xlane.f32.xlu0 %v3206_v4  ;;  %v2848_v18 = vpop.xlane.xlu0 %2847 }
 0x47c   :  { %v2974_v4 = vsub.f32 %v13604_v23, %v2848_v18  ;;  %v3104_v19 = vmul.f32 1.442695, %v2991_v13  ;;  %7348 = vpow2.f32 %v3102_v14 }
 0x47d   :  { %3210 = vadd.xlane.f32.xlu1 %v3209_v31  ;;  %v2851_v57 = vpop.xlane.xlu1 %2850  ;;  %v13605_v31 = vld [vmem:[#allocation336_spill] sm:$0xff] }
 0x47e   :  { %v2975_v61 = vsub.f32 %v13605_v31, %v2851_v57  ;;  %7350 = vpow2.f32 %v3104_v19  ;;  %v3173_v57 = vsel %vm2364_vm0, %v11305_v12, 0.0 }
 0x47f   :  { %3159 = vadd.xlane.f32.xlu0 %v3158_v29  ;;  %v2902_v25 = vpop.xlane.xlu0 %2901  ;;  %v3070_v29 = vmul.f32 1.442695, %v2974_v4  ;;  %v11310_v6 = vpop.eup %7340 }
 0x480   :  { %v2992_v35 = vsub.f32 %v13606_v10, %v2902_v25  ;;  %v3072_v18 = vmul.f32 1.442695, %v2975_v61  ;;  %v3224_v34 = vsel %vm2364_vm0, %v11310_v6, 0.0 }
 0x481   :  { %3162 = vadd.xlane.f32.xlu1 %v3161_v41  ;;  %v2905_v52 = vpop.xlane.xlu1 %2904  ;;  %7352 = vpow2.f32 %v3070_v29 }
 0x482   :  { %v3106_v56 = vmul.f32 1.442695, %v2992_v35  ;;  %7354 = vpow2.f32 %v3072_v18  ;;  %v13611_v18 = vld [vmem:[#allocation271_spill] sm:$0xff] }
 0x483   :  { %3213 = vadd.xlane.f32.xlu0 %v3212_v47  ;;  %v2854_v41 = vpop.xlane.xlu0 %2853  ;;  %v13607_v47 = vld [vmem:[#allocation289_spill] sm:$0xff] }
 0x484   :  { %v2993_v32 = vsub.f32 %v13607_v47, %v2905_v52  ;;  %7356 = vpow2.f32 %v3106_v56 }
 0x485   :  { %3216 = vadd.xlane.f32.xlu1 %v3215_v27  ;;  %v2857_v60 = vpop.xlane.xlu1 %2856  ;;  %v11315_v27 = vpop.eup %7342 }
 0x486   :  { %v11320_v13 = vpop.eup %7344  ;;  %v3108_v25 = vmul.f32 1.442695, %v2993_v32  ;;  %v3227_v23 = vsel %vm2364_vm0, %v11315_v27, 0.0 }
 0x487   :  { %3165 = vadd.xlane.f32.xlu0 %v3164_v39  ;;  %v2976_v39 = vsub.f32 %v13608_v3, %v2854_v41  ;;  %v11325_v4 = vpop.eup %7346  ;;  %v3176_v19 = vsel %vm2364_vm0, %v11320_v13, 0.0  ;;  %v13612_v3 = vld [vmem:[#allocation387_spill] sm:$0xff] }
 0x488   :  { %v11329_v31 = vpop.eup %7348  ;;  %7358 = vpow2.f32 %v3108_v25  ;;  %v3179_v35 = vsel %vm2364_vm0, %v11325_v4, 0.0 }
 0x489   :  { %3168 = vadd.xlane.f32.xlu1 %v3167_v49  ;;  %v13609_v49 = vld [vmem:[#allocation291_spill] sm:$0xff]  ;;  %v3074_v52 = vmul.f32 1.442695, %v2976_v39  ;;  %v11334_v41 = vpop.eup %7350 }
 0x48a   :  { %v2977_v14 = vsub.f32 %v13609_v49, %v2857_v60  ;;  %v3278_v60 = vsel %vm2364_vm0, %v11329_v31, 0.0  ;;  %v3281_v25 = vsel %vm2364_vm0, %v11334_v41, 0.0 }
 0x48b   :  { %3219 = vadd.xlane.f32.xlu0 %v3218_v53  ;;  %7360 = vpow2.f32 %v3074_v52 }
 0x48c   :  { %v3076_v61 = vmul.f32 1.442695, %v2977_v14 }
 0x48d   :  { %3222 = vadd.xlane.f32.xlu1 %v3221_v38  ;;  %v13610_v38 = vld [vmem:[#allocation338_spill] sm:$0xff] }
 0x48e   :  { %7362 = vpow2.f32 %v3076_v61 }
 0x48f   :  { %3171 = vadd.xlane.f32.xlu0 %v3170_v62 }
 0x491   :  { %3174 = vadd.xlane.f32.xlu1 %v3173_v57  ;;  %v11339_v57 = vpop.eup %7352 }
 0x492   :  { %v11344_v49 = vpop.eup %7354 }
 0x493   :  { %3225 = vadd.xlane.f32.xlu0 %v3224_v34  ;;  %v11349_v61 = vpop.eup %7356 }
 0x494   :  { %13614 = vst [vmem:[#allocation341_spill] sm:$0xff] %v11349_v61 }
 0x495   :  { %3228 = vadd.xlane.f32.xlu1 %v3227_v23  ;;  %v13613_v23 = vld [vmem:[#allocation344_spill] sm:$0xff] }
 0x496   :  { %v2908_v53 = vpop.xlane.xlu0 %2907 }
 0x497   :  { %v2994_v29 = vsub.f32 %v13610_v38, %v2908_v53  ;;  %3177 = vadd.xlane.f32.xlu0 %v3176_v19  ;;  %v3230_v19 = vsel %vm2364_vm0, %v11339_v57, 0.0 }
 0x498   :  { %v2911_v10 = vpop.xlane.xlu1 %2910 }
 0x499   :  { %v3110_v62 = vmul.f32 1.442695, %v2994_v29  ;;  %v2995_v47 = vsub.f32 %v13611_v18, %v2911_v10  ;;  %3180 = vadd.xlane.f32.xlu1 %v3179_v35  ;;  %v13615_v29 = vld [vmem:[#allocation272_spill] sm:$0xff]  ;;  %v3233_v18 = vsel %vm2364_vm0, %v11344_v49, 0.0 }
 0x49a   :  { %v2860_v32 = vpop.xlane.xlu0 %2859 }
 0x49b   :  { %v3112_v56 = vmul.f32 1.442695, %v2995_v47  ;;  %v2978_v39 = vsub.f32 %v13612_v3, %v2860_v32  ;;  %3279 = vadd.xlane.f32.xlu0 %v3278_v60  ;;  %7364 = vpow2.f32 %v3110_v62  ;;  %v11354_v62 = vpop.eup %7358  ;;  %v13616_v32 = vld [vmem:[#allocation292_spill] sm:$0xff] }
 0x49c   :  { %v2863_v34 = vpop.xlane.xlu1 %2862 }
 0x49d   :  { %v3078_v14 = vmul.f32 1.442695, %v2978_v39  ;;  %v2979_v52 = vsub.f32 %v13613_v23, %v2863_v34  ;;  %3282 = vadd.xlane.f32.xlu1 %v3281_v25  ;;  %7366 = vpow2.f32 %v3112_v56  ;;  %v3284_v39 = vsel %vm2364_vm0, %v11349_v61, 0.0  ;;  %v11359_v56 = vpop.eup %7360  ;;  %v13618_v25 = vld [vmem:[#allocation346_spill] sm:$0xff] }
 0x49e   :  { %v2914_v53 = vpop.xlane.xlu0 %2913  ;;  %13617 = vst [vmem:[#allocation296_spill] sm:$0xff] %v11359_v56 }
 0x49f   :  { %v3080_v38 = vmul.f32 1.442695, %v2979_v52  ;;  %v2996_v10 = vsub.f32 %v13615_v29, %v2914_v53  ;;  %3231 = vadd.xlane.f32.xlu0 %v3230_v19  ;;  %7368 = vpow2.f32 %v3078_v14  ;;  %v3287_v53 = vsel %vm2364_vm0, %v11354_v62, 0.0  ;;  %v11364_v14 = vpop.eup %7362  ;;  %v13620_v29 = vld [vmem:[#allocation369_spill] sm:$0xff] }
 0x4a0   :  { %v2917_v35 = vpop.xlane.xlu1 %2916  ;;  %13619 = vst [vmem:[#allocation297_spill] sm:$0xff] %v11364_v14 }
 0x4a1   :  { %v3114_v47 = vmul.f32 1.442695, %v2996_v10  ;;  %v2997_v60 = vsub.f32 %v13616_v32, %v2917_v35  ;;  %3234 = vadd.xlane.f32.xlu1 %v3233_v18  ;;  %7370 = vpow2.f32 %v3080_v38  ;;  %v3236_v35 = vsel %vm2364_vm0, %v11359_v56, 0.0 }
 0x4a2   :  { %v2866_v3 = vpop.xlane.xlu0 %2865  ;;  %v3239_v32 = vsel %vm2364_vm0, %v11364_v14, 0.0 }
 0x4a3   :  { %v3116_v34 = vmul.f32 1.442695, %v2997_v60  ;;  %v2980_v23 = vsub.f32 %v13618_v25, %v2866_v3  ;;  %3285 = vadd.xlane.f32.xlu0 %v3284_v39  ;;  %7372 = vpow2.f32 %v3114_v47 }
 0x4a4   :  { %v2869_v52 = vpop.xlane.xlu1 %2868 }
 0x4a5   :  { %v3082_v19 = vmul.f32 1.442695, %v2980_v23  ;;  %v2981_v10 = vsub.f32 %v13620_v29, %v2869_v52  ;;  %3288 = vadd.xlane.f32.xlu1 %v3287_v53  ;;  %v11369_v18 = vpop.eup %7364  ;;  %7374 = vpow2.f32 %v3116_v34 }
 0x4a6   :  { %13621 = vst [vmem:[#allocation372_spill] sm:$0xff] %v11369_v18  ;;  %v3290_v47 = vsel %vm2364_vm0, %v11369_v18, 0.0 }
 0x4a7   :  { %v3084_v38 = vmul.f32 1.442695, %v2981_v10  ;;  %3237 = vadd.xlane.f32.xlu0 %v3236_v35  ;;  %v11373_v60 = vpop.eup %7366  ;;  %7376 = vpow2.f32 %v3082_v19 }
 0x4a8   :  { %13622 = vst [vmem:[#allocation352_spill] sm:$0xff] %v11373_v60  ;;  %v3293_v39 = vsel %vm2364_vm0, %v11373_v60, 0.0  ;;  %v13631_v60 = vld [vmem:[#allocation339_spill] sm:$0xff] }
 0x4a9   :  { %3240 = vadd.xlane.f32.xlu1 %v3239_v32  ;;  %v11377_v3 = vpop.eup %7368  ;;  %7378 = vpow2.f32 %v3084_v38 }
 0x4aa   :  { %13623 = vst [vmem:[#allocation298_spill] sm:$0xff] %v11377_v3  ;;  %v3242_v25 = vsel %vm2364_vm0, %v11377_v3, 0.0 }
 0x4ab   :  { %3291 = vadd.xlane.f32.xlu0 %v3290_v47  ;;  %v11381_v34 = vpop.eup %7370 }
 0x4ac   :  { %13624 = vst [vmem:[#allocation299_spill] sm:$0xff] %v11381_v34  ;;  %v3245_v52 = vsel %vm2364_vm0, %v11381_v34, 0.0 }
 0x4ad   :  { %3294 = vadd.xlane.f32.xlu1 %v3293_v39  ;;  %v11385_v23 = vpop.eup %7372  ;;  %v13629_v39 = vld [vmem:[#allocation293_spill] sm:$0xff] }
 0x4ae   :  { %13625 = vst [vmem:[#allocation342_spill] sm:$0xff] %v11385_v23  ;;  %v3296_v19 = vsel %vm2364_vm0, %v11385_v23, 0.0 }
 0x4af   :  { %3243 = vadd.xlane.f32.xlu0 %v3242_v25  ;;  %v11389_v53 = vpop.eup %7374 }
 0x4b0   :  { %13626 = vst [vmem:[#allocation354_spill] sm:$0xff] %v11389_v53  ;;  %v3299_v10 = vsel %vm2364_vm0, %v11389_v53, 0.0 }
 0x4b1   :  { %3246 = vadd.xlane.f32.xlu1 %v3245_v52  ;;  %v11393_v29 = vpop.eup %7376 }
 0x4b2   :  { %13627 = vst [vmem:[#allocation373_spill] sm:$0xff] %v11393_v29  ;;  %v3248_v38 = vsel %vm2364_vm0, %v11393_v29, 0.0 }
 0x4b3   :  { %3297 = vadd.xlane.f32.xlu0 %v3296_v19  ;;  %v11397_v35 = vpop.eup %7378  ;;  %v13630_v19 = vld [vmem:[#allocation370_spill] sm:$0xff] }
 0x4b4   :  { %13628 = vst [vmem:[#allocation300_spill] sm:$0xff] %v11397_v35  ;;  %v3251_v32 = vsel %vm2364_vm0, %v11397_v35, 0.0  ;;  %v13633_v35 = vld [vmem:[#allocation294_spill] sm:$0xff] }
 0x4b5   :  { %3300 = vadd.xlane.f32.xlu1 %v3299_v10 }
 0x4b7   :  { %3249 = vadd.xlane.f32.xlu0 %v3248_v38  ;;  %v13632_v38 = vld [vmem:[#allocation348_spill] sm:$0xff] }
 0x4b9   :  { %3252 = vadd.xlane.f32.xlu1 %v3251_v32  ;;  %v2920_v47 = vpop.xlane.xlu0 %2919 }
 0x4ba   :  { %v2998_v25 = vsub.f32 %v13629_v39, %v2920_v47 }
 0x4bb   :  { %v2923_v52 = vpop.xlane.xlu1 %2922 }
 0x4bc   :  { %v3118_v23 = vmul.f32 1.442695, %v2998_v25  ;;  %v2999_v34 = vsub.f32 %v13630_v19, %v2923_v52  ;;  %v13634_v25 = vld [vmem:[#allocation295_spill] sm:$0xff] }
 0x4bd   :  { %v2872_v3 = vpop.xlane.xlu0 %2871 }
 0x4be   :  { %7380 = vpow2.f32 %v3118_v23  ;;  %v3120_v53 = vmul.f32 1.442695, %v2999_v34  ;;  %v2982_v10 = vsub.f32 %v13631_v60, %v2872_v3  ;;  %v13635_v23 = vld [vmem:[#allocation350_spill] sm:$0xff] }
 0x4bf   :  { %v2875_v18 = vpop.xlane.xlu1 %2874 }
 0x4c0   :  { %7382 = vpow2.f32 %v3120_v53  ;;  %v3086_v29 = vmul.f32 1.442695, %v2982_v10  ;;  %v2983_v56 = vsub.f32 %v13632_v38, %v2875_v18  ;;  %v13636_v10 = vld [vmem:[#allocation371_spill] sm:$0xff] }
 0x4c1   :  { %v2926_v14 = vpop.xlane.xlu0 %2925 }
 0x4c2   :  { %7384 = vpow2.f32 %v3086_v29  ;;  %v3088_v32 = vmul.f32 1.442695, %v2983_v56  ;;  %v3000_v61 = vsub.f32 %v13633_v35, %v2926_v14 }
 0x4c3   :  { %v2929_v47 = vpop.xlane.xlu1 %2928 }
 0x4c4   :  { %7386 = vpow2.f32 %v3088_v32  ;;  %v3122_v39 = vmul.f32 1.442695, %v3000_v61  ;;  %v3001_v52 = vsub.f32 %v13634_v25, %v2929_v47 }
 0x4c5   :  { %v2878_v19 = vpop.xlane.xlu0 %2877 }
 0x4c6   :  { %7388 = vpow2.f32 %v3122_v39  ;;  %v3124_v34 = vmul.f32 1.442695, %v3001_v52  ;;  %v2984_v60 = vsub.f32 %v13635_v23, %v2878_v19 }
 0x4c7   :  { %v2881_v3 = vpop.xlane.xlu1 %2880 }
 0x4c8   :  { %v11410_v53 = vpop.eup %7380  ;;  %7390 = vpow2.f32 %v3124_v34  ;;  %v3090_v18 = vmul.f32 1.442695, %v2984_v60  ;;  %v2985_v29 = vsub.f32 %v13636_v10, %v2881_v3 }
 0x4c9   :  { %v3302_v56 = vsel %vm2364_vm0, %v11410_v53, 0.0 }
 0x4ca   :  { %v11415_v14 = vpop.eup %7382  ;;  %7392 = vpow2.f32 %v3090_v18  ;;  %v3092_v61 = vmul.f32 1.442695, %v2985_v29  ;;  %3303 = vadd.xlane.f32.xlu0 %v3302_v56 }
 0x4cb   :  { %v3305_v35 = vsel %vm2364_vm0, %v11415_v14, 0.0 }
 0x4cc   :  { %v11419_v38 = vpop.eup %7384  ;;  %7394 = vpow2.f32 %v3092_v61  ;;  %3306 = vadd.xlane.f32.xlu1 %v3305_v35 }
 0x4cd   :  { %v3254_v32 = vsel %vm2364_vm0, %v11419_v38, 0.0 }
 0x4ce   :  { %v11423_v47 = vpop.eup %7386  ;;  %3255 = vadd.xlane.f32.xlu0 %v3254_v32 }
 0x4cf   :  { %v3257_v39 = vsel %vm2364_vm0, %v11423_v47, 0.0 }
 0x4d0   :  { %v11427_v25 = vpop.eup %7388  ;;  %3258 = vadd.xlane.f32.xlu1 %v3257_v39 }
 0x4d1   :  { %13637 = vst [vmem:[#allocation301_spill] sm:$0xff] %v11427_v25  ;;  %v3308_v52 = vsel %vm2364_vm0, %v11427_v25, 0.0 }
 0x4d2   :  { %v11431_v19 = vpop.eup %7390  ;;  %3309 = vadd.xlane.f32.xlu0 %v3308_v52 }
 0x4d3   :  { %13638 = vst [vmem:[#allocation374_spill] sm:$0xff] %v11431_v19  ;;  %v3311_v34 = vsel %vm2364_vm0, %v11431_v19, 0.0 }
 0x4d4   :  { %v11435_v23 = vpop.eup %7392  ;;  %3312 = vadd.xlane.f32.xlu1 %v3311_v34 }
 0x4d5   :  { %13639 = vst [vmem:[#allocation356_spill] sm:$0xff] %v11435_v23  ;;  %v3260_v60 = vsel %vm2364_vm0, %v11435_v23, 0.0 }
 0x4d6   :  { %v11439_v3 = vpop.eup %7394  ;;  %3261 = vadd.xlane.f32.xlu0 %v3260_v60 }
 0x4d7   :  { %13640 = vst [vmem:[#allocation302_spill] sm:$0xff] %v11439_v3  ;;  %v3263_v18 = vsel %vm2364_vm0, %v11439_v3, 0.0 }
 0x4d8   :  { %3264 = vadd.xlane.f32.xlu1 %v3263_v18  ;;  %v2932_v10 = vpop.xlane.xlu0 %2931 }
 0x4d9   :  { %v3002_v29 = vsub.f32 %v11077_v22, %v2932_v10 }
 0x4da   :  { %v2935_v56 = vpop.xlane.xlu1 %2934 }
 0x4db   :  { %v3126_v61 = vmul.f32 1.442695, %v3002_v29  ;;  %v3003_v35 = vsub.f32 %v11085_v37, %v2935_v56 }
 0x4dc   :  { %v2884_v32 = vpop.xlane.xlu0 %2883 }
 0x4dd   :  { %7396 = vpow2.f32 %v3126_v61  ;;  %v3128_v39 = vmul.f32 1.442695, %v3003_v35  ;;  %v2986_v52 = vsub.f32 %v11082_v15, %v2884_v32 }
 0x4de   :  { %v2887_v34 = vpop.xlane.xlu1 %2886 }
 0x4df   :  { %7398 = vpow2.f32 %v3128_v39  ;;  %v3094_v23 = vmul.f32 1.442695, %v2986_v52  ;;  %v2987_v60 = vsub.f32 %v11093_v21, %v2887_v34 }
 0x4e0   :  { %v2938_v19 = vpop.xlane.xlu0 %2937 }
 0x4e1   :  { %7400 = vpow2.f32 %v3094_v23  ;;  %v3096_v18 = vmul.f32 1.442695, %v2987_v60  ;;  %v3004_v3 = vsub.f32 %v11104_v30, %v2938_v19 }
 0x4e2   :  { %v2941_v22 = vpop.xlane.xlu1 %2940 }
 0x4e3   :  { %7402 = vpow2.f32 %v3096_v18  ;;  %v3130_v10 = vmul.f32 1.442695, %v3004_v3  ;;  %v3005_v37 = vsub.f32 %v11111_v48, %v2941_v22 }
 0x4e4   :  { %v2890_v29 = vpop.xlane.xlu0 %2889 }
 0x4e5   :  { %7404 = vpow2.f32 %v3130_v10  ;;  %v3132_v56 = vmul.f32 1.442695, %v3005_v37  ;;  %v2988_v15 = vsub.f32 %v11119_v11, %v2890_v29 }
 0x4e6   :  { %v2893_v61 = vpop.xlane.xlu1 %2892 }
 0x4e7   :  { %v11450_v35 = vpop.eup %7396  ;;  %7406 = vpow2.f32 %v3132_v56  ;;  %v3098_v21 = vmul.f32 1.442695, %v2988_v15  ;;  %v2989_v23 = vsub.f32 %v11129_v20, %v2893_v61 }
 0x4e8   :  { %13641 = vst [vmem:[#allocation303_spill] sm:$0xff] %v11450_v35  ;;  %v11453_v32 = vpop.xlane.xlu0 %3183  ;;  %v3314_v30 = vsel %vm2364_vm0, %v11450_v35, 0.0 }
 0x4e9   :  { %v11457_v19 = vpop.eup %7398  ;;  %7408 = vpow2.f32 %v3098_v21  ;;  %v3100_v48 = vmul.f32 1.442695, %v2989_v23  ;;  %3315 = vadd.xlane.f32.xlu0 %v3314_v30 }
 0x4ea   :  { %13642 = vst [vmem:[#allocation343_spill] sm:$0xff] %v11457_v19  ;;  %v11459_v3 = vpop.xlane.xlu1 %3186  ;;  %v3317_v11 = vsel %vm2364_vm0, %v11457_v19, 0.0 }
 0x4eb   :  { %v11463_v39 = vpop.eup %7400  ;;  %7410 = vpow2.f32 %v3100_v48  ;;  %3318 = vadd.xlane.f32.xlu1 %v3317_v11 }
 0x4ec   :  { %13643 = vst [vmem:[#allocation358_spill] sm:$0xff] %v11463_v39  ;;  %v3136_v20 = vpop.xlane.xlu0 %3135  ;;  %v3266_v52 = vsel %vm2364_vm0, %v11463_v39, 0.0 }
 0x4ed   :  { %v11467_v34 = vpop.eup %7402  ;;  %3267 = vadd.xlane.f32.xlu0 %v3266_v52 }
 0x4ee   :  { %13644 = vst [vmem:[#allocation375_spill] sm:$0xff] %v11467_v34  ;;  %v3139_v60 = vpop.xlane.xlu1 %3138  ;;  %v3269_v18 = vsel %vm2364_vm0, %v11467_v34, 0.0 }
 0x4ef   :  { %v11471_v22 = vpop.eup %7404  ;;  %3270 = vadd.xlane.f32.xlu1 %v3269_v18  ;;  %7412 = vrcp.f32 %v3139_v60 }
 0x4f0   :  { %13645 = vst [vmem:[#allocation304_spill] sm:$0xff] %v11471_v22  ;;  %v11473_v10 = vpop.xlane.xlu0 %3189  ;;  %v3320_v37 = vsel %vm2364_vm0, %v11471_v22, 0.0  ;;  %7414 = vrcp.f32 %v3136_v20 }
 0x4f1   :  { %v11477_v29 = vpop.eup %7406  ;;  %3321 = vadd.xlane.f32.xlu0 %v3320_v37 }
 0x4f2   :  { %13646 = vst [vmem:[#allocation305_spill] sm:$0xff] %v11477_v29  ;;  %v3193_v56 = vpop.xlane.xlu1 %3192  ;;  %v3323_v15 = vsel %vm2364_vm0, %v11477_v29, 0.0 }
 0x4f3   :  { %v11481_v61 = vpop.eup %7408  ;;  %3324 = vadd.xlane.f32.xlu1 %v3323_v15 }
 0x4f4   :  { %13647 = vst [vmem:[#allocation376_spill] sm:$0xff] %v11481_v61  ;;  %v3142_v21 = vpop.xlane.xlu0 %3141  ;;  %v3272_v23 = vsel %vm2364_vm0, %v11481_v61, 0.0 }
 0x4f5   :  { %v11485_v30 = vpop.eup %7410  ;;  %3273 = vadd.xlane.f32.xlu0 %v3272_v23  ;;  %7416 = vrcp.f32 %v3142_v21 }
 0x4f6   :  { %13648 = vst [vmem:[#allocation360_spill] sm:$0xff] %v11485_v30  ;;  %v3145_v48 = vpop.xlane.xlu1 %3144  ;;  %v3275_v11 = vsel %vm2364_vm0, %v11485_v30, 0.0 }
 0x4f7   :  { %3276 = vadd.xlane.f32.xlu1 %v3275_v11  ;;  %7418 = vrcp.f32 %v3145_v48 }
 0x4f8   :  { %v3196_v52 = vpop.xlane.xlu0 %3195 }
 0x4f9   :  { %v7413_v22 = vpop.eup %7412 }
 0x4fa   :  { %v3199_v18 = vpop.xlane.xlu1 %3198  ;;  %v7415_v34 = vpop.eup %7414  ;;  %v11492_v11 = vmul.f32 %v7413_v22, %v11161_v9 }
 0x4fb   :  { %v11497_v60 = vmul.f32 %v7415_v34, %v11155_v2 }
 0x4fc   :  { %v3148_v37 = vpop.xlane.xlu0 %3147  ;;  %v3455_v30 = vsel %vm2364_vm0, %v11492_v11, 0.0 }
 0x4fd   :  { %7420 = vrcp.f32 %v3148_v37  ;;  %v3454_v9 = vsel %vm2364_vm0, %v11497_v60, 0.0 }
 0x4fe   :  { %v3151_v29 = vpop.xlane.xlu1 %3150 }
 0x4ff   :  { %v7417_v39 = vpop.eup %7416  ;;  %7422 = vrcp.f32 %v3151_v29 }
 0x500   :  { %v11489_v15 = vpop.xlane.xlu0 %3201  ;;  %v11500_v21 = vmul.f32 %v7417_v39, %v11183_v51  ;;  %v3456_v51 = vadd.f32 %v3455_v30, %v3454_v9 }
 0x501   :  { %v7419_v48 = vpop.eup %7418 }
 0x502   :  { %v3205_v61 = vpop.xlane.xlu1 %3204  ;;  %v11507_v22 = vmul.f32 %v7419_v48, %v11191_v46  ;;  %v3457_v2 = vsel %vm2364_vm0, %v11500_v21, 0.0 }
 0x504   :  { %v3154_v23 = vpop.xlane.xlu0 %3153  ;;  %v3459_v46 = vsel %vm2364_vm0, %v11507_v22, 0.0 }
 0x505   :  { %7424 = vrcp.f32 %v3154_v23 }
 0x506   :  { %v3157_v19 = vpop.xlane.xlu1 %3156 }
 0x507   :  { %v7421_v35 = vpop.eup %7420  ;;  %7426 = vrcp.f32 %v3157_v19  ;;  %v3458_v19 = vadd.f32 %v3457_v2, %v3456_v51 }
 0x508   :  { %v11494_v20 = vpop.xlane.xlu0 %3207  ;;  %v11512_v34 = vmul.f32 %v7421_v35, %v11213_v16 }
 0x509   :  { %v7423_v23 = vpop.eup %7422  ;;  %v3460_v35 = vadd.f32 %v3459_v46, %v3458_v19 }
 0x50a   :  { %v3211_v37 = vpop.xlane.xlu1 %3210  ;;  %v11521_v30 = vmul.f32 %v7423_v23, %v11219_v54  ;;  %v3461_v16 = vsel %vm2364_vm0, %v11512_v34, 0.0 }
 0x50b   :  { %v3462_v2 = vadd.f32 %v3461_v16, %v3460_v35 }
 0x50c   :  { %v3160_v29 = vpop.xlane.xlu0 %3159 }
 0x50d   :  { %7428 = vrcp.f32 %v3160_v29 }
 0x50e   :  { %v3163_v39 = vpop.xlane.xlu1 %3162  ;;  %7430 = vrcp.f32 %v11459_v3 }
 0x50f   :  { %7432 = vrcp.f32 %v11453_v32  ;;  %v7425_v48 = vpop.eup %7424 }
 0x510   :  { %v11516_v25 = vpop.xlane.xlu0 %3213  ;;  %7434 = vrcp.f32 %v3163_v39  ;;  %v11527_v32 = vmul.f32 %v7425_v48, %v11237_v8 }
 0x511   :  { %7436 = vrcp.f32 %v3193_v56  ;;  %v7427_v9 = vpop.eup %7426  ;;  %v3463_v56 = vsel %vm2364_vm0, %v11521_v30, 0.0 }
 0x512   :  { %v3217_v29 = vpop.xlane.xlu1 %3216  ;;  %7438 = vrcp.f32 %v11473_v10  ;;  %v11534_v23 = vmul.f32 %v7427_v9, %v11243_v33  ;;  %v3465_v10 = vsel %vm2364_vm0, %v11527_v32, 0.0  ;;  %v3464_v19 = vadd.f32 %v3463_v56, %v3462_v2 }
 0x514   :  { %v3166_v3 = vpop.xlane.xlu0 %3165  ;;  %v3466_v35 = vadd.f32 %v3465_v10, %v3464_v19  ;;  %v3467_v9 = vsel %vm2364_vm0, %v11534_v23, 0.0 }
 0x515   :  { %7440 = vrcp.f32 %v3166_v3 }
 0x516   :  { %7442 = vrcp.f32 %v3199_v18  ;;  %v3169_v51 = vpop.xlane.xlu1 %3168 }
 0x517   :  { %v7429_v54 = vpop.eup %7428  ;;  %7444 = vrcp.f32 %v3169_v51 }
 0x518   :  { %v11531_v39 = vpop.xlane.xlu0 %3219  ;;  %v7431_v8 = vpop.eup %7430  ;;  %7446 = vrcp.f32 %v3196_v52  ;;  %v11539_v18 = vmul.f32 %v7429_v54, %v11260_v45  ;;  %v3468_v54 = vadd.f32 %v3467_v9, %v3466_v35 }
 0x519   :  { %v7433_v46 = vpop.eup %7432  ;;  %7448 = vrcp.f32 %v3205_v61  ;;  %v11543_v33 = vmul.f32 %v7431_v8, %v11147_v44 }
 0x51a   :  { %v3223_v48 = vpop.xlane.xlu1 %3222  ;;  %v7435_v16 = vpop.eup %7434  ;;  %7450 = vrcp.f32 %v11489_v15  ;;  %v11548_v45 = vmul.f32 %v7433_v46, %v11139_v55  ;;  %v3469_v15 = vsel %vm2364_vm0, %v11539_v18, 0.0 }
 0x51b   :  { %v7437_v3 = vpop.eup %7436  ;;  %v11551_v61 = vmul.f32 %v7435_v16, %v11265_v50  ;;  %v3470_v46 = vadd.f32 %v3469_v15, %v3468_v54 }
 0x51c   :  { %v3172_v51 = vpop.xlane.xlu0 %3171  ;;  %v7439_v52 = vpop.eup %7438  ;;  %v11556_v44 = vmul.f32 %v7437_v3, %v11177_v40  ;;  %v3592_v40 = vpack.c.bf16 %v11492_v11, %v11497_v60 }
 0x51d   :  { %7452 = vrcp.f32 %v3172_v51  ;;  %v11565_v50 = vmul.f32 %v7439_v52, %v11169_v58  ;;  %v3471_v35 = vsel %vm2364_vm0, %v11551_v61, 0.0 }
 0x51e   :  { %7454 = vrcp.f32 %v3211_v37  ;;  %v3175_v2 = vpop.xlane.xlu1 %3174  ;;  %v3600_v37 = vpack.c.bf16 %v11543_v33, %v11548_v45  ;;  %v3472_v9 = vadd.f32 %v3471_v35, %v3470_v46 }
 0x51f   :  { %v7441_v56 = vpop.eup %7440  ;;  %7456 = vrcp.f32 %v3175_v2 }
 0x520   :  { %v7443_v10 = vpop.eup %7442  ;;  %v3226_v8 = vpop.xlane.xlu0 %3225  ;;  %v11561_v55 = vmul.f32 %v7441_v56, %v11280_v63  ;;  %7458 = vrcp.f32 %v11494_v20  ;;  %v3601_v63 = vpack.c.bf16 %v11556_v44, %v11565_v50 }
 0x521   :  { %v7445_v19 = vpop.eup %7444  ;;  %7460 = vrcp.f32 %v3217_v29  ;;  %v11575_v58 = vmul.f32 %v7443_v10, %v11207_v5 }
 0x522   :  { %v3229_v16 = vpop.xlane.xlu1 %3228  ;;  %3640 = vxpose.xlu0.c.b16.start [1/8] (narrow) %v3600_v37, 64  ;;  %v7447_v3 = vpop.eup %7446  ;;  %7462 = vrcp.f32 %v11516_v25  ;;  %v11578_v51 = vmul.f32 %v7445_v19, %v11285_v59  ;;  %v3473_v11 = vsel %vm2364_vm0, %v11561_v55, 0.0  ;;  %v3593_v25 = vpack.c.bf16 %v11507_v22, %v11500_v21 }
 0x523   :  { %v7449_v60 = vpop.eup %7448  ;;  %v11585_v2 = vmul.f32 %v7447_v3, %v11199_v42  ;;  %v3474_v59 = vadd.f32 %v3473_v11, %v3472_v9  ;;  %v3594_v37 = vpack.c.bf16 %v11521_v30, %v11512_v34 }
 0x524   :  { %3624 = vxpose.xlu1.c.b16.start [1/8] (narrow) %v3592_v40, 64  ;;  %v3178_v20 = vpop.xlane.xlu0 %3177  ;;  %v7451_v29 = vpop.eup %7450  ;;  %v11590_v10 = vmul.f32 %v7449_v60, %v11231_v1 }
 0x525   :  { %7464 = vrcp.f32 %v3178_v20  ;;  %v3602_v54 = vpack.c.bf16 %v11575_v58, %v11585_v2  ;;  %v11601_v19 = vmul.f32 %v7451_v29, %v11225_v43 }
 0x526   :  { %7466 = vrcp.f32 %v3223_v48  ;;  %v3181_v52 = vpop.xlane.xlu1 %3180  ;;  %3641 = vxpose.xlu0.c.b16.cont [2/8] (narrow) %v3601_v63, 64  ;;  %v3475_v48 = vsel %vm2364_vm0, %v11578_v51, 0.0  ;;  %v3595_v63 = vpack.c.bf16 %v11534_v23, %v11527_v32  ;;  %v3596_v23 = vpack.c.bf16 %v11551_v61, %v11539_v18 }
 0x527   :  { %v7453_v5 = vpop.eup %7452  ;;  %7468 = vrcp.f32 %v3181_v52 }
 0x528   :  { %v7455_v15 = vpop.eup %7454  ;;  %3625 = vxpose.xlu1.c.b16.cont [2/8] (narrow) %v3593_v25, 64  ;;  %v3280_v56 = vpop.xlane.xlu0 %3279  ;;  %v11595_v21 = vmul.f32 %v7453_v5, %v11300_v36  ;;  %7470 = vrcp.f32 %v11531_v39  ;;  %v3476_v36 = vadd.f32 %v3475_v48, %v3474_v59  ;;  %v3603_v39 = vpack.c.bf16 %v11590_v10, %v11601_v19 }
 0x529   :  { %v7457_v42 = vpop.eup %7456  ;;  %7472 = vrcp.f32 %v3229_v16  ;;  %v11611_v3 = vmul.f32 %v7455_v15, %v11255_v17 }
 0x52a   :  { %v3283_v22 = vpop.xlane.xlu1 %3282  ;;  %3642 = vxpose.xlu0.c.b16.cont [3/8] (narrow) %v3602_v54, 64  ;;  %v11604_v1 = vmul.f32 %v7457_v42, %v11305_v12  ;;  %v3477_v46 = vsel %vm2364_vm0, %v11595_v21, 0.0  ;;  %v7459_v40 = vpop.eup %7458  ;;  %7474 = vrcp.f32 %v3226_v8  ;;  %v3597_v42 = vpack.c.bf16 %v11578_v51, %v11561_v55 }
 0x52b   :  { %v7461_v34 = vpop.eup %7460  ;;  %v3478_v43 = vadd.f32 %v3477_v46, %v3476_v36  ;;  %v11616_v16 = vmul.f32 %v7459_v40, %v11249_v26  ;;  %7476 = vrcp.f32 %v3283_v22  ;;  %v3487_v46 = vsel %vm2364_vm0, %v11543_v33, 0.0 }
 0x52c   :  { %3626 = vxpose.xlu1.c.b16.cont [3/8] (narrow) %v3594_v37, 64  ;;  %v3232_v35 = vpop.xlane.xlu0 %3231  ;;  %v7463_v30 = vpop.eup %7462  ;;  %v3479_v20 = vsel %vm2364_vm0, %v11604_v1, 0.0  ;;  %7478 = vrcp.f32 %v3280_v56  ;;  %v11623_v9 = vmul.f32 %v7461_v34, %v11275_v28  ;;  %v3598_v33 = vpack.c.bf16 %v11604_v1, %v11595_v21 }
 0x52d   :  { %v3604_v8 = vpack.c.bf16 %v11611_v3, %v11616_v16  ;;  %v3480_v29 = vadd.f32 %v3479_v20, %v3478_v43  ;;  %v11631_v25 = vmul.f32 %v7463_v30, %v11270_v24 }
 0x52e   :  { %v3235_v12 = vpop.xlane.xlu1 %3234  ;;  %3643 = vxpose.xlu0.c.b16.cont [4/8] (narrow) %v3603_v39, 64 }
 0x52f   :  { %v7465_v11 = vpop.eup %7464  ;;  %7480 = vrcp.f32 %v3235_v12  ;;  %v3605_v18 = vpack.c.bf16 %v11623_v9, %v11631_v25  ;;  %v3491_v12 = vsel %vm2364_vm0, %v11556_v44, 0.0 }
 0x530   :  { %v7467_v60 = vpop.eup %7466  ;;  %3627 = vxpose.xlu1.c.b16.cont [4/8] (narrow) %v3595_v63, 64  ;;  %v3286_v17 = vpop.xlane.xlu0 %3285  ;;  %v11626_v32 = vmul.f32 %v7465_v11, %v11320_v13  ;;  %7482 = vrcp.f32 %v3232_v35 }
 0x531   :  { %v7469_v26 = vpop.eup %7468  ;;  %v11639_v61 = vmul.f32 %v7467_v60, %v11295_v0 }
 0x532   :  { %v3289_v52 = vpop.xlane.xlu1 %3288  ;;  %3644 = vxpose.xlu0.c.b16.cont [5/8] (narrow) %v3604_v8, 64  ;;  %v3405_v5 = vmul.f32 %v7469_v26, %v11325_v4  ;;  %v3481_v28 = vsel %vm2364_vm0, %v11626_v32, 0.0  ;;  %v7471_v59 = vpop.eup %7470  ;;  %v3485_v4 = vsel %vm2364_vm0, %v11548_v45, 0.0 }
 0x533   :  { %7484 = vrcp.f32 %v3289_v52  ;;  %v3482_v13 = vadd.f32 %v3481_v28, %v3480_v29  ;;  %v7473_v24 = vpop.eup %7472  ;;  %v11647_v22 = vmul.f32 %v7471_v59, %v11290_v7  ;;  %v3489_v7 = vsel %vm2364_vm0, %v11565_v50, 0.0  ;;  %v13649_v59 = vld [vmem:[#allocation341_spill] sm:$0xff] }
 0x534   :  { %3628 = vxpose.xlu1.c.b16.cont [5/8] (narrow) %v3596_v23, 64  ;;  %v3238_v15 = vpop.xlane.xlu0 %3237  ;;  %v3483_v56 = vsel %vm2364_vm0, %v3405_v5, 0.0  ;;  %7486 = vrcp.f32 %v3286_v17  ;;  %v7475_v37 = vpop.eup %7474  ;;  %v11654_v36 = vmul.f32 %v7473_v24, %v11315_v27  ;;  %v3599_v60 = vpack.c.bf16 %v3405_v5, %v11626_v32 }
 0x535   :  { %v3484_v54 = vadd.f32 %v3483_v56, %v3482_v13  ;;  %7488 = vrcp.f32 %v3238_v15  ;;  %v3606_v45 = vpack.c.bf16 %v11639_v61, %v11647_v22  ;;  %v7477_v35 = vpop.eup %7476  ;;  %v11661_v34 = vmul.f32 %v7475_v37, %v11310_v6  ;;  %v13650_v15 = vld [vmem:[#allocation297_spill] sm:$0xff] }
 0x536   :  { %v3241_v48 = vpop.xlane.xlu1 %3240  ;;  %3645 = vxpose.xlu0.c.b16.cont [6/8] (narrow) %v3605_v18, 64  ;;  %v7479_v51 = vpop.eup %7478  ;;  %v11668_v20 = vmul.f32 %v7477_v35, %v11334_v41  ;;  %v3493_v6 = vsel %vm2364_vm0, %v11585_v2, 0.0  ;;  %v3495_v23 = vsel %vm2364_vm0, %v11575_v58, 0.0  ;;  %v3497_v5 = vsel %vm2364_vm0, %v11601_v19, 0.0 }
 0x537   :  { %7490 = vrcp.f32 %v3241_v48  ;;  %v3486_v0 = vadd.f32 %v3485_v4, %v3484_v54  ;;  %v3607_v50 = vpack.c.bf16 %v11654_v36, %v11661_v34  ;;  %v11674_v44 = vmul.f32 %v7479_v51, %v11329_v31  ;;  %v13651_v54 = vld [vmem:[#allocation296_spill] sm:$0xff] }
 0x538   :  { %3629 = vxpose.xlu1.c.b16.cont [6/8] (narrow) %v3597_v42, 64  ;;  %v3292_v40 = vpop.xlane.xlu0 %3291  ;;  %v3499_v56 = vsel %vm2364_vm0, %v11590_v10, 0.0  ;;  %v3501_v37 = vsel %vm2364_vm0, %v11616_v16, 0.0  ;;  %v13652_v10 = vld [vmem:[#allocation372_spill] sm:$0xff] }
 0x539   :  { %7492 = vrcp.f32 %v3292_v40  ;;  %v3488_v55 = vadd.f32 %v3487_v46, %v3486_v0  ;;  %v7481_v43 = vpop.eup %7480  ;;  %v3616_v2 = vpack.c.bf16 %v11668_v20, %v11674_v44 }
 0x53a   :  { %v3295_v39 = vpop.xlane.xlu1 %3294  ;;  %3646 = vxpose.xlu0.c.b16.cont [7/8] (narrow) %v3606_v45, 64  ;;  %v7483_v27 = vpop.eup %7482  ;;  %v11677_v17 = vmul.f32 %v7481_v43, %v11344_v49  ;;  %v13653_v45 = vld [vmem:[#allocation352_spill] sm:$0xff]  ;;  %v3505_v43 = vsel %vm2364_vm0, %v11631_v25, 0.0  ;;  %v3509_v25 = vsel %vm2364_vm0, %v11647_v22, 0.0  ;;  %v3513_v22 = vsel %vm2364_vm0, %v11661_v34, 0.0 }
 0x53b   :  { %7494 = vrcp.f32 %v3295_v39  ;;  %v3490_v30 = vadd.f32 %v3489_v7, %v3488_v55  ;;  %v11684_v32 = vmul.f32 %v7483_v27, %v11339_v57  ;;  %v3503_v7 = vsel %vm2364_vm0, %v11611_v3, 0.0 }
 0x53c   :  { %3630 = vxpose.xlu1.c.b16.cont [7/8] (narrow) %v3598_v33, 64  ;;  %v3244_v63 = vpop.xlane.xlu0 %3243  ;;  %v3507_v3 = vsel %vm2364_vm0, %v11623_v9, 0.0  ;;  %v3511_v9 = vsel %vm2364_vm0, %v11639_v61, 0.0 }
 0x53d   :  { %v7485_v11 = vpop.eup %7484  ;;  %7496 = vrcp.f32 %v3244_v63  ;;  %v3492_v21 = vadd.f32 %v3491_v12, %v3490_v30  ;;  %v3608_v58 = vpack.c.bf16 %v11677_v17, %v11684_v32  ;;  %v13654_v30 = vld [vmem:[#allocation298_spill] sm:$0xff]  ;;  %v13655_v12 = vld [vmem:[#allocation299_spill] sm:$0xff] }
 0x53e   :  { %v3247_v1 = vpop.xlane.xlu1 %3246  ;;  %3647 = vxpose.xlu0.c.b16.end [8/8] (narrow) %v3607_v50, 64  ;;  %v7487_v8 = vpop.eup %7486  ;;  %v11687_v31 = vmul.f32 %v7485_v11, %v11354_v62 }
 0x53f   :  { %7498 = vrcp.f32 %v3247_v1  ;;  %v3494_v41 = vadd.f32 %v3493_v6, %v3492_v21  ;;  %v7489_v26 = vpop.eup %7488  ;;  %v11694_v13 = vmul.f32 %v7487_v8, %v13649_v59 }
 0x540   :  { %3631 = vxpose.xlu1.c.b16.end [8/8] (narrow) %v3599_v60, 64  ;;  %v3298_v29 = vpop.xlane.xlu0 %3297  ;;  %v11704_v4 = vmul.f32 %v7489_v26, %v13651_v54  ;;  %v13656_v60 = vld [vmem:[#allocation342_spill] sm:$0xff] }
 0x541   :  { %v7491_v49 = vpop.eup %7490  ;;  %v3496_v52 = vadd.f32 %v3495_v23, %v3494_v41  ;;  %7500 = vrcp.f32 %v3298_v29  ;;  %v3617_v19 = vpack.c.bf16 %v11687_v31, %v11694_v13  ;;  %v13657_v41 = vld [vmem:[#allocation354_spill] sm:$0xff] }
 0x542   :  { %v3301_v28 = vpop.xlane.xlu1 %3300  ;;  %3737 = vxpose.xlu0.c.b16.start [1/8] (narrow) %v3616_v2, 64  ;;  %v11697_v57 = vmul.f32 %v7491_v49, %v13650_v15 }
 0x543   :  { %v7493_v18 = vpop.eup %7492  ;;  %v3498_v62 = vadd.f32 %v3497_v5, %v3496_v52  ;;  %7502 = vrcp.f32 %v3301_v28  ;;  %v13658_v5 = vld [vmem:[#allocation373_spill] sm:$0xff] }
 0x544   :  { %3721 = vxpose.xlu1.c.b16.start [1/8] (narrow) %v3608_v58, 64  ;;  %v3250_v24 = vpop.xlane.xlu0 %3249  ;;  %v3609_v46 = vpack.c.bf16 %v11697_v57, %v11704_v4  ;;  %v11711_v40 = vmul.f32 %v7493_v18, %v13652_v10  ;;  %v13659_v58 = vld [vmem:[#allocation300_spill] sm:$0xff]  ;;  %v3515_v18 = vsel %vm2364_vm0, %v11654_v36, 0.0 }
 0x545   :  { %v7495_v48 = vpop.eup %7494  ;;  %v3500_v42 = vadd.f32 %v3499_v56, %v3498_v62  ;;  %7504 = vrcp.f32 %v3250_v24 }
 0x546   :  { %v3253_v0 = vpop.xlane.xlu1 %3252  ;;  %3738 = vxpose.xlu0.c.b16.cont [2/8] (narrow) %v3617_v19, 64  ;;  %v11714_v35 = vmul.f32 %v7495_v48, %v13653_v45 }
 0x547   :  { %v7497_v55 = vpop.eup %7496  ;;  %v3502_v51 = vadd.f32 %v3501_v37, %v3500_v42  ;;  %7506 = vrcp.f32 %v3253_v0 }
 0x548   :  { %3722 = vxpose.xlu1.c.b16.cont [2/8] (narrow) %v3609_v46, 64  ;;  %v3618_v16 = vpack.c.bf16 %v11714_v35, %v11711_v40  ;;  %v11723_v27 = vmul.f32 %v7497_v55, %v13654_v30 }
 0x549   :  { %v7499_v39 = vpop.eup %7498  ;;  %v3504_v33 = vadd.f32 %v3503_v7, %v3502_v51  ;;  %v3524_v7 = vsel %vm2364_vm0, %v11677_v17, 0.0  ;;  %v13661_v17 = vld [vmem:[#allocation374_spill] sm:$0xff] }
 0x54a   :  { %3739 = vxpose.xlu0.c.b16.cont [3/8] (narrow) %v3618_v16, 64  ;;  %v11726_v63 = vmul.f32 %v7499_v39, %v13655_v12 }
 0x54b   :  { %v7501_v50 = vpop.eup %7500  ;;  %v3506_v11 = vadd.f32 %v3505_v43, %v3504_v33 }
 0x54c   :  { %v3610_v21 = vpack.c.bf16 %v11726_v63, %v11723_v27  ;;  %v11735_v8 = vmul.f32 %v7501_v50, %v13656_v60 }
 0x54d   :  { %v7503_v6 = vpop.eup %7502  ;;  %v3508_v1 = vadd.f32 %v3507_v3, %v3506_v11  ;;  %v13660_v11 = vld [vmem:[#allocation301_spill] sm:$0xff] }
 0x54e   :  { %3723 = vxpose.xlu1.c.b16.cont [3/8] (narrow) %v3610_v21, 64  ;;  %v11738_v26 = vmul.f32 %v7503_v6, %v13657_v41  ;;  %v13663_v41 = vld [vmem:[#allocation302_spill] sm:$0xff] }
 0x54f   :  { %v7505_v23 = vpop.eup %7504  ;;  %v3510_v29 = vadd.f32 %v3509_v25, %v3508_v1  ;;  %v13662_v25 = vld [vmem:[#allocation356_spill] sm:$0xff] }
 0x550   :  { %v3619_v2 = vpack.c.bf16 %v11738_v26, %v11735_v8  ;;  %v3428_v28 = vmul.f32 %v7505_v23, %v13658_v5 }
 0x551   :  { %v7507_v49 = vpop.eup %7506  ;;  %v3512_v52 = vadd.f32 %v3511_v9, %v3510_v29 }
 0x552   :  { %3740 = vxpose.xlu0.c.b16.cont [4/8] (narrow) %v3619_v2, 64  ;;  %v11748_v59 = vmul.f32 %v7507_v49, %v13659_v58  ;;  %v3532_v2 = vsel %vm2364_vm0, %v11726_v63, 0.0 }
 0x553   :  { %v3514_v15 = vadd.f32 %v3513_v22, %v3512_v52 }
 0x554   :  { %v3611_v61 = vpack.c.bf16 %v11748_v59, %v3428_v28 }
 0x555   :  { %v11753_v62 = vadd.f32 %v3515_v18, %v3514_v15 }
 0x556   :  { %3724 = vxpose.xlu1.c.b16.cont [4/8] (narrow) %v3611_v61, 64 }
 0x557   :  { %v3304_v56 = vpop.xlane.xlu0 %3303 }
 0x558   :  { %7508 = vrcp.f32 %v3304_v56 }
 0x559   :  { %v3307_v24 = vpop.xlane.xlu1 %3306 }
 0x55a   :  { %7510 = vrcp.f32 %v3307_v24 }
 0x55b   :  { %v3256_v34 = vpop.xlane.xlu0 %3255 }
 0x55c   :  { %7512 = vrcp.f32 %v3256_v34 }
 0x55d   :  { %v3259_v19 = vpop.xlane.xlu1 %3258 }
 0x55e   :  { %7514 = vrcp.f32 %v3259_v19 }
 0x55f   :  { %v3310_v54 = vpop.xlane.xlu0 %3309 }
 0x560   :  { %7516 = vrcp.f32 %v3310_v54 }
 0x561   :  { %v3313_v48 = vpop.xlane.xlu1 %3312 }
 0x562   :  { %v7509_v42 = vpop.eup %7508  ;;  %7518 = vrcp.f32 %v3313_v48 }
 0x563   :  { %v3262_v37 = vpop.xlane.xlu0 %3261  ;;  %v11756_v46 = vmul.f32 %v7509_v42, %v11410_v53  ;;  %v3523_v53 = vsel %vm2364_vm0, %v11684_v32, 0.0 }
 0x564   :  { %v7511_v36 = vpop.eup %7510  ;;  %7520 = vrcp.f32 %v3262_v37  ;;  %v3525_v43 = vadd.f32 %v3524_v7, %v3523_v53 }
 0x565   :  { %v3265_v0 = vpop.xlane.xlu1 %3264  ;;  %v11759_v10 = vmul.f32 %v7511_v36, %v11415_v14  ;;  %v3526_v14 = vsel %vm2364_vm0, %v11704_v4, 0.0  ;;  %v3530_v4 = vsel %vm2364_vm0, %v11723_v27, 0.0  ;;  %v3536_v27 = vsel %vm2364_vm0, %v11748_v59, 0.0  ;;  %v13664_v36 = vld [vmem:[#allocation303_spill] sm:$0xff] }
 0x566   :  { %v7513_v45 = vpop.eup %7512  ;;  %7522 = vrcp.f32 %v3265_v0  ;;  %v3527_v50 = vadd.f32 %v3526_v14, %v3525_v43  ;;  %v3517_v59 = vrot.slane %v11753_v62, 4 }
 0x567   :  { %v3620_v55 = vpack.c.bf16 %v11759_v10, %v11756_v46  ;;  %v3430_v16 = vmul.f32 %v7513_v45, %v11419_v38  ;;  %v13665_v45 = vld [vmem:[#allocation343_spill] sm:$0xff] }
 0x568   :  { %v7515_v51 = vpop.eup %7514  ;;  %v3518_v14 = vadd.f32 %v3517_v59, %v11753_v62 }
 0x569   :  { %3741 = vxpose.xlu0.c.b16.cont [5/8] (narrow) %v3620_v55, 64  ;;  %v3431_v39 = vmul.f32 %v7515_v51, %v11423_v47  ;;  %v3528_v47 = vsel %vm2364_vm0, %v11697_v57, 0.0  ;;  %v3534_v57 = vsel %vm2364_vm0, %v3428_v28, 0.0  ;;  %v3538_v15 = vsel %vm2364_vm0, %v3430_v16, 0.0 }
 0x56a   :  { %v7517_v33 = vpop.eup %7516  ;;  %v3529_v1 = vadd.f32 %v3528_v47, %v3527_v50 }
 0x56b   :  { %v3612_v30 = vpack.c.bf16 %v3431_v39, %v3430_v16  ;;  %v11772_v3 = vmul.f32 %v7517_v33, %v13660_v11  ;;  %v3540_v28 = vsel %vm2364_vm0, %v3431_v39, 0.0  ;;  %v13666_v33 = vld [vmem:[#allocation358_spill] sm:$0xff] }
 0x56c   :  { %v7519_v12 = vpop.eup %7518  ;;  %v3531_v29 = vadd.f32 %v3530_v4, %v3529_v1 }
 0x56d   :  { %3725 = vxpose.xlu1.c.b16.cont [5/8] (narrow) %v3612_v30, 64  ;;  %v11775_v21 = vmul.f32 %v7519_v12, %v13661_v17  ;;  %v13667_v12 = vld [vmem:[#allocation375_spill] sm:$0xff] }
 0x56e   :  { %v7521_v38 = vpop.eup %7520  ;;  %v3533_v52 = vadd.f32 %v3532_v2, %v3531_v29 }
 0x56f   :  { %v3621_v32 = vpack.c.bf16 %v11775_v21, %v11772_v3  ;;  %v3432_v60 = vmul.f32 %v7521_v38, %v13662_v25  ;;  %v13668_v25 = vld [vmem:[#allocation274_spill] sm:$0xff] }
 0x570   :  { %v7523_v6 = vpop.eup %7522  ;;  %v3535_v5 = vadd.f32 %v3534_v57, %v3533_v52  ;;  %v13671_v57 = vld [vmem:[#allocation283_spill] sm:$0xff]  ;;  %v13672_v52 = vld [vmem:[#allocation376_spill] sm:$0xff] }
 0x571   :  { %3742 = vxpose.xlu0.c.b16.cont [6/8] (narrow) %v3621_v32, 64  ;;  %v3433_v23 = vmul.f32 %v7523_v6, %v13663_v41  ;;  %v3542_v19 = vsel %vm2364_vm0, %v3432_v60, 0.0  ;;  %v3519_v6 = vrot.slane %v3518_v14, 2 }
 0x572   :  { %v3537_v61 = vadd.f32 %v3536_v27, %v3535_v5 }
 0x573   :  { %v3613_v9 = vpack.c.bf16 %v3433_v23, %v3432_v60  ;;  %v3544_v16 = vsel %vm2364_vm0, %v3433_v23, 0.0  ;;  %v13669_v60 = vld [vmem:[#allocation304_spill] sm:$0xff]  ;;  %v13670_v23 = vld [vmem:[#allocation305_spill] sm:$0xff]  ;;  %v3520_v5 = vadd.f32 %v3519_v6, %v3518_v14 }
 0x574   :  { %v3539_v56 = vadd.f32 %v3538_v15, %v3537_v61  ;;  %v13673_v15 = vld [vmem:[#allocation276_spill] sm:$0xff]  ;;  %v13679_v14 = vld [vmem:[#allocation337_spill] sm:$0xff] }
 0x575   :  { %3726 = vxpose.xlu1.c.b16.cont [6/8] (narrow) %v3613_v9, 64  ;;  %v13674_v61 = vld [vmem:[#allocation360_spill] sm:$0xff] }
 0x576   :  { %v3316_v49 = vpop.xlane.xlu0 %3315  ;;  %v3541_v42 = vadd.f32 %v3540_v28, %v3539_v56  ;;  %v13675_v28 = vld [vmem:[#allocation284_spill] sm:$0xff] }
 0x577   :  { %7524 = vrcp.f32 %v3316_v49 }
 0x578   :  { %v3319_v22 = vpop.xlane.xlu1 %3318  ;;  %v3543_v7 = vadd.f32 %v3542_v19, %v3541_v42  ;;  %v3554_v42 = vsel %vm2364_vm0, %v11674_v44, 0.0 }
 0x579   :  { %7526 = vrcp.f32 %v3319_v22 }
 0x57a   :  { %v3268_v58 = vpop.xlane.xlu0 %3267  ;;  %v3545_v38 = vadd.f32 %v3544_v16, %v3543_v7 }
 0x57b   :  { %7528 = vrcp.f32 %v3268_v58 }
 0x57c   :  { %v3271_v18 = vpop.xlane.xlu1 %3270 }
 0x57d   :  { %7530 = vrcp.f32 %v3271_v18 }
 0x57e   :  { %v3322_v63 = vpop.xlane.xlu0 %3321 }
 0x57f   :  { %7532 = vrcp.f32 %v3322_v63 }
 0x580   :  { %v3325_v24 = vpop.xlane.xlu1 %3324 }
 0x581   :  { %v7525_v34 = vpop.eup %7524  ;;  %7534 = vrcp.f32 %v3325_v24 }
 0x582   :  { %v3274_v54 = vpop.xlane.xlu0 %3273  ;;  %v11795_v0 = vmul.f32 %v7525_v34, %v13664_v36 }
 0x583   :  { %v7527_v48 = vpop.eup %7526  ;;  %7536 = vrcp.f32 %v3274_v54  ;;  %v3521_v54 = vrot.slane %v3520_v5, 1 }
 0x584   :  { %v3277_v37 = vpop.xlane.xlu1 %3276  ;;  %v11798_v55 = vmul.f32 %v7527_v48, %v13665_v45  ;;  %v13677_v45 = vld [vmem:[#allocation285_spill] sm:$0xff] }
 0x585   :  { %v7529_v51 = vpop.eup %7528  ;;  %7538 = vrcp.f32 %v3277_v37  ;;  %v13676_v37 = vld [vmem:[#allocation277_spill] sm:$0xff]  ;;  %v11830_v7 = vadd.f32 %v3521_v54, %v3520_v5 }
 0x586   :  { %v3622_v39 = vpack.c.bf16 %v11798_v55, %v11795_v0  ;;  %v3434_v53 = vmul.f32 %v7529_v51, %v13666_v33  ;;  %v3556_v51 = vsel %vm2364_vm0, %v11668_v20, 0.0  ;;  %v13678_v33 = vld [vmem:[#allocation278_spill] sm:$0xff]  ;;  %v3560_v20 = vsel %vm2364_vm0, %v11687_v31, 0.0 }
 0x587   :  { %v7531_v43 = vpop.eup %7530 }
 0x588   :  { %3743 = vxpose.xlu0.c.b16.cont [7/8] (narrow) %v3622_v39, 64  ;;  %v3648_v30 = vpop.trf.xlu0  ;;  %v3435_v50 = vmul.f32 %v7531_v43, %v13667_v12  ;;  %v3546_v11 = vsel %vm2364_vm0, %v3434_v53, 0.0  ;;  %v3558_v39 = vsel %vm2364_vm0, %v11694_v13, 0.0  ;;  %v3562_v12 = vsel %vm2364_vm0, %v11711_v40, 0.0  ;;  %v13680_v13 = vld [vmem:[#allocation279_spill] sm:$0xff] }
 0x589   :  { %v7533_v17 = vpop.eup %7532  ;;  %3688 = vmatprep.mubr.bf16.mxu1 %v3648_v30  ;;  %v3547_v1 = vadd.f32 %v3546_v11, %v3545_v38  ;;  %v13681_v11 = vld [vmem:[#allocation286_spill] sm:$0xff]  ;;  %v3568_v40 = vsel %vm2364_vm0, %v11738_v26, 0.0 }
 0x58a   :  { %v3632_v47 = vpop.trf.xlu1  ;;  %v3614_v32 = vpack.c.bf16 %v3435_v50, %v3434_v53  ;;  %v3548_v62 = vsel %vm2364_vm0, %v3435_v50, 0.0  ;;  %v11810_v41 = vmul.f32 %v7533_v17, %v13669_v60  ;;  %v3564_v17 = vsel %vm2364_vm0, %v11714_v35, 0.0  ;;  %v13685_v60 = vld [vmem:[#allocation287_spill] sm:$0xff] }
 0x58b   :  { %v7535_v4 = vpop.eup %7534  ;;  %3689 = vmatmul.mubr.bf16.vlgmr.msra.gmra.mrb[0].mxu1 %v3632_v47  ;;  %v3549_v58 = vadd.f32 %v3548_v62, %v3547_v1  ;;  %v3566_v47 = vsel %vm2364_vm0, %v11735_v8, 0.0  ;;  %v13684_v62 = vld [vmem:[#allocation281_spill] sm:$0xff]  ;;  %v3572_v8 = vsel %vm2364_vm0, %v11759_v10, 0.0 }
 0x58c   :  { %6664 = vmatpush3.bf16.msra.mxu1 %v13668_v25  ;;  %3727 = vxpose.xlu1.c.b16.cont [7/8] (narrow) %v3614_v32, 64  ;;  %v11813_v29 = vmul.f32 %v7535_v4, %v13670_v23  ;;  %v3649_v9 = vpop.trf.xlu0  ;;  %v13682_v32 = vld [vmem:[#allocation280_spill] sm:$0xff]  ;;  %v3570_v25 = vsel %vm2364_vm0, %v11756_v46, 0.0  ;;  %v3578_v46 = vsel %vm2364_vm0, %v11795_v0, 0.0  ;;  %v3582_v10 = vsel %vm2364_vm0, %v11810_v41, 0.0 }
 0x58d   :  { %v7537_v2 = vpop.eup %7536  ;;  %6665 = vmatprep.subr.bf16.mxu1 %v13671_v57  ;;  %3696 = vmatprep.mubr.bf16.mxu1 %v3649_v9  ;;  %v13683_v4 = vld [vmem:[#allocation268_spill] sm:$0xff]  ;;  %v3574_v9 = vsel %vm2364_vm0, %v11772_v3, 0.0  ;;  %v3576_v57 = vsel %vm2364_vm0, %v11775_v21, 0.0 }
 0x58e   :  { %v3623_v49 = vpack.c.bf16 %v11813_v29, %v11810_v41  ;;  %v3436_v22 = vmul.f32 %v7537_v2, %v13672_v52  ;;  %v3633_v18 = vpop.trf.xlu1  ;;  %v13686_v2 = vld [vmem:[#allocation282_spill] sm:$0xff]  ;;  %v3584_v3 = vsel %vm2364_vm0, %v11813_v29, 0.0 }
 0x58f   :  { %v7539_v27 = vpop.eup %7538 }
 0x590   :  { %6666 = vmatpush3.bf16.msra.mxu1 %v13673_v15  ;;  %3744 = vxpose.xlu0.c.b16.end [8/8] (narrow) %v3623_v49, 64  ;;  %v3437_v63 = vmul.f32 %v7539_v27, %v13674_v61  ;;  %v3550_v56 = vsel %vm2364_vm0, %v3436_v22, 0.0  ;;  %v3650_v59 = vpop.trf.xlu0 }
 0x591   :  { %6667 = vmatprep.subr.bf16.mxu1 %v13675_v28  ;;  %v3551_v24 = vadd.f32 %v3550_v56, %v3549_v58 }
 0x592   :  { %v3552_v34 = vsel %vm2364_vm0, %v3437_v63, 0.0  ;;  %v3615_v19 = vpack.c.bf16 %v3437_v63, %v3436_v22  ;;  %v3634_v44 = vpop.trf.xlu1  ;;  %v3580_v22 = vsel %vm2364_vm0, %v11798_v55, 0.0 }
 0x593   :  { %3697 = vmatmul.mubr.bf16.gmra.mrb[4].mxu1 %v3633_v18  ;;  %v3553_v48 = vadd.f32 %v3552_v34, %v3551_v24 }
 0x594   :  { %6668 = vmatpush3.bf16.msra.mxu1 %v13676_v37  ;;  %3728 = vxpose.xlu1.c.b16.end [8/8] (narrow) %v3615_v19, 64  ;;  %v3651_v43 = vpop.trf.xlu0 }
 0x595   :  { %v3555_v36 = vadd.f32 %v3554_v42, %v3553_v48  ;;  %6669 = vmatprep.subr.bf16.mxu1 %v13677_v45  ;;  %3704 = vmatprep.mubr.bf16.mxu1 %v3650_v59  ;;  %v3880_v59 = vld [vmem:[%s12968_s7] sm:$0xff] }
 0x596   :  { %v3635_v31 = vpop.trf.xlu1 }
 0x597   :  { %v3557_v16 = vadd.f32 %v3556_v51, %v3555_v36  ;;  %v11885_v51 = vld [vmem:[%s12968_s7 + $0x8] sm:$0xff] }
 0x598   :  { %6670 = vmatpush3.bf16.msra.mxu1 %v13678_v33  ;;  %3823 = vbcast.lane.b32.xlu1 %v11830_v7, 264 }
 0x599   :  { %v3559_v53 = vadd.f32 %v3558_v39, %v3557_v16  ;;  %6671 = vmatprep.subr.bf16.mxu1 %v13679_v14  ;;  %3819 = vbcast.lane.b32.xlu0 %v11830_v7, 256 }
 0x59b   :  { %v3561_v30 = vadd.f32 %v3560_v20, %v3559_v53  ;;  %3705 = vmatmul.mubr.bf16.gmra.mrb[8].mxu1 %v3634_v44 }
 0x59c   :  { %6672 = vmatpush3.bf16.msra.mxu1 %v13680_v13  ;;  %3712 = vmatprep.mubr.bf16.mxu1 %v3651_v43  ;;  %v11897_v13 = vld [vmem:[%s12968_s7 + $0x10] sm:$0xff] }
 0x59d   :  { %v3563_v50 = vadd.f32 %v3562_v12, %v3561_v30  ;;  %6673 = vmatprep.subr.bf16.mxu1 %v13681_v11 }
 0x59f   :  { %v3565_v38 = vadd.f32 %v3564_v17, %v3563_v50 }
 0x5a0   :  { %6674 = vmatpush3.bf16.msra.mxu1 %v13682_v32 }
 0x5a1   :  { %v3567_v6 = vadd.f32 %v3566_v47, %v3565_v38  ;;  %6675 = vmatprep.subr.bf16.mxu1 %v13683_v4  ;;  %v11905_v38 = vld [vmem:[%s12968_s7 + $0x18] sm:$0xff] }
 0x5a3   :  { %v3569_v1 = vadd.f32 %v3568_v40, %v3567_v6  ;;  %3713 = vmatmul.mubr.bf16.gmra.mrb[12].mxu1 %v3635_v31 }
 0x5a4   :  { %6676 = vmatpush3.bf16.msra.mxu1 %v13684_v62 }
 0x5a5   :  { %v3571_v35 = vadd.f32 %v3570_v25, %v3569_v1  ;;  %6677 = vmatprep.subr.bf16.mxu1 %v13685_v60 }
 0x5a7   :  { %v3573_v23 = vadd.f32 %v3572_v8, %v3571_v35 }
 0x5a8   :  { %6678 = vmatpush3.bf16.msra.mxu1 %v13686_v2 }
 0x5a9   :  { %v3575_v26 = vadd.f32 %v3574_v9, %v3573_v23  ;;  %v11919_v23 = vld [vmem:[%s12968_s7 + $0x20] sm:$0xff] }
 0x5ab   :  { %v3577_v49 = vadd.f32 %v3576_v57, %v3575_v26  ;;  %v11927_v57 = vld [vmem:[%s12968_s7 + $0x28] sm:$0xff] }
 0x5ad   :  { %v3579_v52 = vadd.f32 %v3578_v46, %v3577_v49 }
 0x5af   :  { %v3581_v5 = vadd.f32 %v3580_v22, %v3579_v52 }
 0x5b1   :  { %v3583_v27 = vadd.f32 %v3582_v10, %v3581_v5 }
 0x5b3   :  { %v3585_v58 = vadd.f32 %v3584_v3, %v3583_v27 }
 0x5b5   :  { %v3586_v15 = vrot.slane %v3585_v58, 4 }
 0x5b7   :  { %v3587_v18 = vadd.f32 %v3586_v15, %v3585_v58 }
 0x5b9   :  { %v3588_v21 = vrot.slane %v3587_v18, 2 }
 0x5bb   :  { %v3589_v61 = vadd.f32 %v3588_v21, %v3587_v18 }
 0x5bd   :  { %v3590_v63 = vrot.slane %v3589_v61, 1 }
 0x5bf   :  { %v3591_v56 = vadd.f32 %v3590_v63, %v3589_v61 }
 0x5c1   :  { %3854 = vbcast.lane.b32.xlu0 %v3591_v56, 264  ;;  %3850 = vbcast.lane.b32.xlu1 %v3591_v56, 256 }
 0x5c5   :  { %3858 = vbcast.lane.b32.xlu0 %v3591_v56, 272  ;;  %3827 = vbcast.lane.b32.xlu1 %v11830_v7, 272 }
 0x5c9   :  { %3862 = vbcast.lane.b32.xlu0 %v3591_v56, 280  ;;  %3831 = vbcast.lane.b32.xlu1 %v11830_v7, 280 }
 0x5cd   :  { %3866 = vbcast.lane.b32.xlu0 %v3591_v56, 288  ;;  %3835 = vbcast.lane.b32.xlu1 %v11830_v7, 288 }
 0x5d1   :  { %3870 = vbcast.lane.b32.xlu0 %v3591_v56, 296  ;;  %3839 = vbcast.lane.b32.xlu1 %v11830_v7, 296 }
 0x5d5   :  { %3874 = vbcast.lane.b32.xlu0 %v3591_v56, 304  ;;  %3843 = vbcast.lane.b32.xlu1 %v11830_v7, 304 }
 0x5d9   :  { %3878 = vbcast.lane.b32.xlu0 %v3591_v56, 312  ;;  %3847 = vbcast.lane.b32.xlu1 %v11830_v7, 312 }
 0x5da   :  { %v3745_v0 = vpop.trf.xlu0 }
 0x5db   :  { %3785 = vmatprep.mubr.bf16.mxu1 %v3745_v0 }
 0x5de   :  { %v3729_v55 = vpop.trf.xlu1  ;;  %v3746_v41 = vpop.trf.xlu0 }
 0x5df   :  { %3786 = vmatmul.mubr.bf16.vlgmr.msra.gmra.mrb[16].mxu1 %v3729_v55 }
 0x5e0   :  { %3793 = vmatprep.mubr.bf16.mxu1 %v3746_v41 }
 0x5e2   :  { %v3730_v29 = vpop.trf.xlu1  ;;  %v3747_v28 = vpop.trf.xlu0 }
 0x5e6   :  { %v3731_v24 = vpop.trf.xlu1  ;;  %v3748_v34 = vpop.trf.xlu0 }
 0x5e7   :  { %3794 = vmatmul.mubr.bf16.gmra.mrb[20].mxu1 %v3730_v29 }
 0x5e8   :  { %3801 = vmatprep.mubr.bf16.mxu1 %v3747_v28 }
 0x5ea   :  { %v3732_v19 = vpop.trf.xlu1 }
 0x5ef   :  { %3802 = vmatmul.mubr.bf16.gmra.mrb[24].mxu1 %v3731_v24 }
 0x5f0   :  { %3809 = vmatprep.mubr.bf16.mxu1 %v3748_v34 }
 0x5f7   :  { %3810 = vmatmul.mubr.bf16.gmra.mrb[28].mxu1 %v3732_v19 }
 0x60a   :  { %v3824_v54 = vpop.permute.xlu1 %3823 }
 0x60b   :  { %v3820_v37 = vpop.permute.xlu0 %3819  ;;  %v3889_v53 = vmul.f32 %v11885_v51, %v3824_v54 }
 0x60c   :  { %v3888_v16 = vmul.f32 %v3880_v59, %v3820_v37 }
 0x633   :  { %v3851_v48 = vpop.permute.xlu1 %3850  ;;  %v3855_v34 = vpop.permute.xlu0 %3854 }
 0x634   :  { %v11880_v42 = vmul.f32 %v3880_v59, %v3851_v48  ;;  %v11945_v59 = vld [vmem:[%s12968_s7 + $0x30] sm:$0xff] }
 0x637   :  { %v3828_v36 = vpop.permute.xlu1 %3827  ;;  %v3859_v19 = vpop.permute.xlu0 %3858 }
 0x638   :  { %v3890_v32 = vmul.f32 %v11897_v13, %v3828_v36 }
 0x63b   :  { %v3832_v20 = vpop.permute.xlu1 %3831  ;;  %v3863_v37 = vpop.permute.xlu0 %3862 }
 0x63c   :  { %v3891_v25 = vmul.f32 %v11905_v38, %v3832_v20 }
 0x63f   :  { %v3836_v40 = vpop.permute.xlu1 %3835 }
 0x640   :  { %v3892_v52 = vmul.f32 %v11919_v23, %v3836_v40  ;;  %v3898_v40 = vmul.f32 %v11897_v13, %v3859_v19 }
 0x643   :  { %v3840_v49 = vpop.permute.xlu1 %3839 }
 0x644   :  { %v3893_v27 = vmul.f32 %v11927_v57, %v3840_v49 }
 0x647   :  { %v3844_v54 = vpop.permute.xlu1 %3843 }
 0x65e   :  { %v6639_v45 = vpop.f32.mrb[0].mxu1 }
 0x65f   :  { %v6640_v7 = vpop.f32.mrb[1].mxu1 }
 0x660   :  { %v6641_v39 = vadd.f32 %v6640_v7, %v6639_v45  ;;  %v6642_v33 = vpop.f32.mrb[2].mxu1  ;;  %v3894_v45 = vmul.f32 %v11945_v59, %v3844_v54 }
 0x661   :  { %v6643_v44 = vpop.f32.mrb[3].mxu1 }
 0x662   :  { %v11888_v14 = vsub.f32 %v6641_v39, %v3888_v16  ;;  %v6644_v43 = vadd.f32 %v6643_v44, %v6642_v33  ;;  %v3887_v39 = vld [vmem:[%s12968_s7 + $0x38] sm:$0xff]  ;;  %v3848_v33 = vpop.permute.xlu1 %3847  ;;  %s7717_s7 = smov 64  }
 0x664   :  { %v11890_v30 = vsub.f32 %v6644_v43, %v3889_v53  ;;  %v3920_v12 = vmul.f32 %v11888_v14, %v11888_v14  ;;  %v3897_v53 = vmul.f32 %v11885_v51, %v3855_v34 }
 0x666   :  { %v6645_v50 = vpop.f32.mrb[4].mxu1  ;;  %v3936_v11 = vsel %vm2364_vm0, %v3920_v12, 0.0  ;;  %v3921_v17 = vmul.f32 %v11890_v30, %v11890_v30 }
 0x667   :  { %v6646_v47 = vpop.f32.mrb[5].mxu1  ;;  %3937 = vadd.xlane.f32.xlu1 %v3936_v11 }
 0x668   :  { %v6647_v31 = vadd.f32 %v6646_v47, %v6645_v50  ;;  %v6648_v6 = vpop.f32.mrb[6].mxu1  ;;  %v3939_v4 = vsel %vm2364_vm0, %v3921_v17, 0.0  ;;  %v3895_v50 = vmul.f32 %v3887_v39, %v3848_v33  ;;  %v3867_v47 = vpop.permute.xlu0 %3866 }
 0x669   :  { %3940 = vadd.xlane.f32.xlu0 %v3939_v4  ;;  %v6649_v1 = vpop.f32.mrb[7].mxu1 }
 0x66a   :  { %v11910_v62 = vsub.f32 %v6647_v31, %v3890_v32  ;;  %v6650_v35 = vadd.f32 %v6649_v1, %v6648_v6 }
 0x66c   :  { %v11912_v60 = vsub.f32 %v6650_v35, %v3891_v25  ;;  %v3922_v8 = vmul.f32 %v11910_v62, %v11910_v62 }
 0x66e   :  { %v6651_v9 = vpop.f32.mrb[8].mxu1  ;;  %v3942_v2 = vsel %vm2364_vm0, %v3922_v8, 0.0  ;;  %v3923_v26 = vmul.f32 %v11912_v60, %v11912_v60  ;;  %v3899_v8 = vmul.f32 %v11905_v38, %v3863_v37 }
 0x66f   :  { %3943 = vadd.xlane.f32.xlu0 %v3942_v2  ;;  %v6652_v46 = vpop.f32.mrb[9].mxu1 }
 0x670   :  { %v6653_v22 = vadd.f32 %v6652_v46, %v6651_v9  ;;  %v6654_v5 = vpop.f32.mrb[10].mxu1  ;;  %v3945_v15 = vsel %vm2364_vm0, %v3923_v26, 0.0 }
 0x671   :  { %v6655_v10 = vpop.f32.mrb[11].mxu1 }
 0x672   :  { %v11931_v3 = vsub.f32 %v6653_v22, %v3892_v52  ;;  %v6656_v58 = vadd.f32 %v6655_v10, %v6654_v5  ;;  %v3871_v52 = vpop.permute.xlu0 %3870 }
 0x673   :  { %3946 = vadd.xlane.f32.xlu0 %v3945_v15  ;;  %v3900_v15 = vmul.f32 %v11919_v23, %v3867_v47 }
 0x674   :  { %v11934_v18 = vsub.f32 %v6656_v58, %v3893_v27  ;;  %v3924_v21 = vmul.f32 %v11931_v3, %v11931_v3 }
 0x676   :  { %v6657_v61 = vpop.f32.mrb[12].mxu1  ;;  %v3948_v63 = vsel %vm2364_vm0, %v3924_v21, 0.0  ;;  %v3925_v56 = vmul.f32 %v11934_v18, %v11934_v18 }
 0x677   :  { %3949 = vadd.xlane.f32.xlu0 %v3948_v63  ;;  %v6658_v0 = vpop.f32.mrb[13].mxu1  ;;  %v3875_v63 = vpop.permute.xlu0 %3874 }
 0x678   :  { %v6659_v55 = vadd.f32 %v6658_v0, %v6657_v61  ;;  %v6660_v41 = vpop.f32.mrb[14].mxu1  ;;  %v3951_v24 = vsel %vm2364_vm0, %v3925_v56, 0.0  ;;  %v3901_v0 = vmul.f32 %v11927_v57, %v3871_v52  ;;  %v3902_v57 = vmul.f32 %v11945_v59, %v3875_v63 }
 0x679   :  { %v6661_v29 = vpop.f32.mrb[15].mxu1 }
 0x67a   :  { %v6662_v28 = vadd.f32 %v6661_v29, %v6660_v41  ;;  %v11952_v43 = vsub.f32 %v6659_v55, %v3894_v45 }
 0x67b   :  { %3952 = vadd.xlane.f32.xlu0 %v3951_v24  ;;  %v3879_v54 = vpop.permute.xlu0 %3878 }
 0x67c   :  { %v11961_v32 = vsub.f32 %v6662_v28, %v3895_v50 }
 0x67e   :  { %v3927_v46 = vmul.f32 %v11961_v32, %v11961_v32 }
 0x680   :  { %v3957_v38 = vsel %vm2364_vm0, %v3927_v46, 0.0 }
 0x6b2   :  { %v6679_v48 = vpop.f32.mrb[16].mxu1 }
 0x6b3   :  { %v6680_v36 = vpop.f32.mrb[17].mxu1 }
 0x6b4   :  { %v6681_v7 = vadd.f32 %v6680_v36, %v6679_v48  ;;  %v6682_v16 = vpop.f32.mrb[18].mxu1 }
 0x6b5   :  { %v6683_v44 = vpop.f32.mrb[19].mxu1 }
 0x6b6   :  { %v11955_v20 = vsub.f32 %v6681_v7, %v11880_v42  ;;  %v6684_v12 = vadd.f32 %v6683_v44, %v6682_v16  ;;  %v3926_v42 = vmul.f32 %v11952_v43, %v11952_v43  ;;  %v3903_v7 = vmul.f32 %v3887_v39, %v3879_v54 }
 0x6b8   :  { %v11957_v11 = vsub.f32 %v6684_v12, %v3897_v53  ;;  %v3928_v17 = vmul.f32 %v11955_v20, %v11955_v20  ;;  %v3954_v49 = vsel %vm2364_vm0, %v3926_v42, 0.0 }
 0x6ba   :  { %v6685_v31 = vpop.f32.mrb[20].mxu1  ;;  %v3960_v6 = vsel %vm2364_vm0, %v3928_v17, 0.0  ;;  %v3929_v51 = vmul.f32 %v11957_v11, %v11957_v11 }
 0x6bb   :  { %3961 = vadd.xlane.f32.xlu0 %v3960_v6  ;;  %v6686_v4 = vpop.f32.mrb[21].mxu1 }
 0x6bc   :  { %v6687_v1 = vadd.f32 %v6686_v4, %v6685_v31  ;;  %v6688_v25 = vpop.f32.mrb[22].mxu1  ;;  %v3963_v35 = vsel %vm2364_vm0, %v3929_v51, 0.0 }
 0x6bd   :  { %v6689_v9 = vpop.f32.mrb[23].mxu1  ;;  %3964 = vadd.xlane.f32.xlu1 %v3963_v35 }
 0x6be   :  { %v11971_v2 = vsub.f32 %v6687_v1, %v3898_v40  ;;  %v6690_v26 = vadd.f32 %v6689_v9, %v6688_v25 }
 0x6bf   :  { %3955 = vadd.xlane.f32.xlu0 %v3954_v49 }
 0x6c0   :  { %v11976_v22 = vsub.f32 %v6690_v26, %v3899_v8  ;;  %v3930_v13 = vmul.f32 %v11971_v2, %v11971_v2 }
 0x6c2   :  { %v6691_v5 = vpop.f32.mrb[24].mxu1  ;;  %v3966_v10 = vsel %vm2364_vm0, %v3930_v13, 0.0  ;;  %v3931_v27 = vmul.f32 %v11976_v22, %v11976_v22 }
 0x6c3   :  { %3958 = vadd.xlane.f32.xlu0 %v3957_v38  ;;  %v6692_v58 = vpop.f32.mrb[25].mxu1  ;;  %3967 = vadd.xlane.f32.xlu1 %v3966_v10 }
 0x6c4   :  { %v6693_v21 = vadd.f32 %v6692_v58, %v6691_v5  ;;  %v6694_v61 = vpop.f32.mrb[26].mxu1  ;;  %v3969_v29 = vsel %vm2364_vm0, %v3931_v27, 0.0 }
 0x6c5   :  { %v6695_v56 = vpop.f32.mrb[27].mxu1 }
 0x6c6   :  { %v11986_v55 = vsub.f32 %v6693_v21, %v3900_v15  ;;  %v6696_v41 = vadd.f32 %v6695_v56, %v6694_v61 }
 0x6c7   :  { %3970 = vadd.xlane.f32.xlu1 %v3969_v29 }
 0x6c8   :  { %v11989_v28 = vsub.f32 %v6696_v41, %v3901_v0  ;;  %v3932_v24 = vmul.f32 %v11986_v55, %v11986_v55 }
 0x6ca   :  { %v6697_v34 = vpop.f32.mrb[28].mxu1  ;;  %v3972_v23 = vsel %vm2364_vm0, %v3932_v24, 0.0  ;;  %v3933_v19 = vmul.f32 %v11989_v28, %v11989_v28 }
 0x6cb   :  { %v6698_v48 = vpop.f32.mrb[29].mxu1  ;;  %3973 = vadd.xlane.f32.xlu1 %v3972_v23 }
 0x6cc   :  { %v6699_v37 = vadd.f32 %v6698_v48, %v6697_v34  ;;  %v6700_v36 = vpop.f32.mrb[30].mxu1  ;;  %v3975_v44 = vsel %vm2364_vm0, %v3933_v19, 0.0 }
 0x6cd   :  { %v6701_v45 = vpop.f32.mrb[31].mxu1 }
 0x6ce   :  { %v11997_v16 = vsub.f32 %v6699_v37, %v3902_v57  ;;  %v6702_v33 = vadd.f32 %v6701_v45, %v6700_v36 }
 0x6cf   :  { %3976 = vadd.xlane.f32.xlu1 %v3975_v44  ;;  %v7715_v44 = vmov 1983009808  }
 0x6d0   :  { %v12000_v53 = vsub.f32 %v6702_v33, %v3903_v7  ;;  %v3934_v12 = vmul.f32 %v11997_v16, %v11997_v16 }
 0x6d2   :  { %v3978_v50 = vsel %vm2364_vm0, %v3934_v12, 0.0  ;;  %v3935_v59 = vmul.f32 %v12000_v53, %v12000_v53  ;;  %v4263_v12 = vunpack.c.l.s4 %v7715_v44 }
 0x6d3   :  { %3979 = vadd.xlane.f32.xlu1 %v3978_v50  ;;  %v7716_v50 = vmov 1934713408  }
 0x6d4   :  { %v3981_v17 = vsel %vm2364_vm0, %v3935_v59, 0.0  ;;  %v4278_v59 = vunpack.c.l.s4 %v7716_v50 }
 0x6d7   :  { %3982 = vadd.xlane.f32.xlu1 %v3981_v17 }
 0x6f4   :  { %v3938_v39 = vpop.xlane.xlu1 %3937 }
 0x6f5   :  { %v3984_v47 = vadd.f32 1e-12, %v3938_v39 }
 0x6f6   :  { %v3941_v31 = vpop.xlane.xlu0 %3940 }
 0x6f7   :  { %7540 = vrsqrt.f32 %v3984_v47  ;;  %v3985_v6 = vadd.f32 1e-12, %v3941_v31  ;;  %v4264_v31 = vunpack.c.0.s8 %v4263_v12 }
 0x6f9   :  { %7542 = vrsqrt.f32 %v3985_v6 }
 0x6fc   :  { %v3944_v51 = vpop.xlane.xlu0 %3943 }
 0x6fd   :  { %v3986_v42 = vadd.f32 1e-12, %v3944_v51  ;;  %v4279_v51 = vunpack.c.0.s8 %v4278_v59 }
 0x6ff   :  { %7544 = vrsqrt.f32 %v3986_v42 }
 0x700   :  { %v3947_v4 = vpop.xlane.xlu0 %3946 }
 0x701   :  { %v7541_v40 = vpop.eup %7540  ;;  %v3987_v1 = vadd.f32 1e-12, %v3947_v4 }
 0x702   :  { %v4016_v25 = vmul.f32 %v7541_v40, %v11888_v14 }
 0x703   :  { %v7543_v35 = vpop.eup %7542  ;;  %7546 = vrsqrt.f32 %v3987_v1 }
 0x704   :  { %v3950_v8 = vpop.xlane.xlu0 %3949  ;;  %v4032_v9 = vmul.f32 %v4016_v25, %v4016_v25  ;;  %v4017_v26 = vmul.f32 %v7543_v35, %v11890_v30 }
 0x705   :  { %v3988_v49 = vadd.f32 1e-12, %v3950_v8 }
 0x706   :  { %v4048_v46 = vsel %vm2364_vm0, %v4032_v9, 0.0  ;;  %v4033_v52 = vmul.f32 %v4017_v26, %v4017_v26  ;;  %v12011_v13 = vpack.c.bf16 %v4017_v26, %v4016_v25  ;;  %v13687_v9 = vld [vmem:[#allocation386_spill] sm:$0xff] }
 0x707   :  { %7548 = vrsqrt.f32 %v3988_v49  ;;  %4049 = vadd.xlane.f32.xlu0 %v4048_v46  ;;  %v12030_v26 = vsub.s32 %v4264_v31, %v13687_v9 }
 0x708   :  { %v3953_v5 = vpop.xlane.xlu0 %3952  ;;  %v4051_v38 = vsel %vm2364_vm0, %v4033_v52, 0.0  ;;  %v4227_v49 = vshrl.u32 %v12011_v13, 16  ;;  %v12034_v52 = vsub.s32 %v4279_v51, %v13687_v9 }
 0x709   :  { %v7545_v10 = vpop.eup %7544  ;;  %v3989_v27 = vadd.f32 1e-12, %v3953_v5  ;;  %4052 = vadd.xlane.f32.xlu1 %v4051_v38  ;;  %v13688_v5 = vmov 0  }
 0x70a   :  { %v4018_v14 = vmul.f32 %v7545_v10, %v11910_v62  ;;  %v12038_v38 = vpack.i.b16 %v13688_v5, %v13688_v5 }
 0x70b   :  { %7550 = vrsqrt.f32 %v3989_v27 }
 0x70c   :  { %v4034_v58 = vmul.f32 %v4018_v14, %v4018_v14 }
 0x70d   :  { %v7547_v15 = vpop.eup %7546 }
 0x70e   :  { %v4054_v30 = vsel %vm2364_vm0, %v4034_v58, 0.0  ;;  %v4019_v21 = vmul.f32 %v7547_v15, %v11912_v60 }
 0x70f   :  { %4055 = vadd.xlane.f32.xlu0 %v4054_v30 }
 0x710   :  { %v4035_v61 = vmul.f32 %v4019_v21, %v4019_v21  ;;  %v12017_v63 = vpack.c.bf16 %v4019_v21, %v4018_v14 }
 0x711   :  { %v7549_v56 = vpop.eup %7548 }
 0x712   :  { %v4057_v0 = vsel %vm2364_vm0, %v4035_v61, 0.0  ;;  %v4020_v41 = vmul.f32 %v7549_v56, %v11931_v3 }
 0x713   :  { %4058 = vadd.xlane.f32.xlu0 %v4057_v0 }
 0x714   :  { %v4036_v29 = vmul.f32 %v4020_v41, %v4020_v41 }
 0x715   :  { %v7551_v24 = vpop.eup %7550 }
 0x716   :  { %v4060_v62 = vsel %vm2364_vm0, %v4036_v29, 0.0  ;;  %v4021_v34 = vmul.f32 %v7551_v24, %v11934_v18 }
 0x717   :  { %4061 = vadd.xlane.f32.xlu0 %v4060_v62 }
 0x718   :  { %v4037_v23 = vmul.f32 %v4021_v34, %v4021_v34  ;;  %v12023_v19 = vpack.c.bf16 %v4021_v34, %v4020_v41 }
 0x71a   :  { %v4063_v60 = vsel %vm2364_vm0, %v4037_v23, 0.0 }
 0x71b   :  { %4064 = vadd.xlane.f32.xlu0 %v4063_v60 }
 0x748   :  { %v3962_v54 = vpop.xlane.xlu0 %3961 }
 0x749   :  { %v3992_v48 = vadd.f32 1e-12, %v3962_v54 }
 0x74a   :  { %v3965_v57 = vpop.xlane.xlu1 %3964 }
 0x74b   :  { %7552 = vrsqrt.f32 %v3992_v48  ;;  %v3993_v37 = vadd.f32 1e-12, %v3965_v57 }
 0x74c   :  { %v3956_v3 = vpop.xlane.xlu0 %3955 }
 0x74d   :  { %7554 = vrsqrt.f32 %v3993_v37  ;;  %v3990_v36 = vadd.f32 1e-12, %v3956_v3 }
 0x74f   :  { %7556 = vrsqrt.f32 %v3990_v36 }
 0x750   :  { %v3968_v45 = vpop.xlane.xlu1 %3967  ;;  %v3959_v7 = vpop.xlane.xlu0 %3958 }
 0x751   :  { %v3994_v33 = vadd.f32 1e-12, %v3968_v45  ;;  %v3991_v18 = vadd.f32 1e-12, %v3959_v7 }
 0x753   :  { %7558 = vrsqrt.f32 %v3994_v33 }
 0x754   :  { %7560 = vrsqrt.f32 %v3991_v18  ;;  %v3971_v17 = vpop.xlane.xlu1 %3970 }
 0x755   :  { %v7553_v39 = vpop.eup %7552  ;;  %v3995_v47 = vadd.f32 1e-12, %v3971_v17 }
 0x756   :  { %v4024_v40 = vmul.f32 %v7553_v39, %v11955_v20 }
 0x757   :  { %v7555_v6 = vpop.eup %7554  ;;  %7562 = vrsqrt.f32 %v3995_v47 }
 0x758   :  { %v3974_v42 = vpop.xlane.xlu1 %3973  ;;  %v4025_v4 = vmul.f32 %v7555_v6, %v11957_v11  ;;  %v4040_v37 = vmul.f32 %v4024_v40, %v4024_v40 }
 0x759   :  { %v7557_v1 = vpop.eup %7556  ;;  %v3996_v46 = vadd.f32 1e-12, %v3974_v42 }
 0x75a   :  { %v4041_v25 = vmul.f32 %v4025_v4, %v4025_v4  ;;  %v4022_v35 = vmul.f32 %v7557_v1, %v11952_v43  ;;  %v4219_v8 = vpack.c.bf16 %v4025_v4, %v4024_v40  ;;  %v4072_v18 = vsel %vm2364_vm0, %v4040_v37, 0.0 }
 0x75c   :  { %v3977_v11 = vpop.xlane.xlu1 %3976  ;;  %v4075_v20 = vsel %vm2364_vm0, %v4041_v25, 0.0  ;;  %v4038_v10 = vmul.f32 %v4022_v35, %v4022_v35  ;;  %v4225_v43 = vpack.i.b16 %v4219_v8, %v12011_v13  ;;  %v4228_v27 = vshrl.u32 %v4219_v8, 16 }
 0x75d   :  { %v7559_v14 = vpop.eup %7558  ;;  %v3997_v58 = vadd.f32 1e-12, %v3977_v11  ;;  %4076 = vadd.xlane.f32.xlu1 %v4075_v20 }
 0x75e   :  { %v7561_v15 = vpop.eup %7560  ;;  %v4066_v30 = vsel %vm2364_vm0, %v4038_v10, 0.0  ;;  %v4026_v21 = vmul.f32 %v7559_v14, %v11971_v2  ;;  %v12044_v61 = vpack.i.b16 %v4228_v27, %v4227_v49  ;;  %v4268_v56 = vrot.slane %v4225_v43, %v12030_v26 }
 0x75f   :  { %7564 = vrsqrt.f32 %v3997_v58  ;;  %4067 = vadd.xlane.f32.xlu0 %v4066_v30  ;;  %v4023_v0 = vmul.f32 %v7561_v15, %v11961_v32  ;;  %v4261_v41 = vcombine.high %v4225_v43, %v12038_v38 }
 0x760   :  { %7566 = vrsqrt.f32 %v3996_v46  ;;  %v3980_v13 = vpop.xlane.xlu1 %3979  ;;  %v4042_v29 = vmul.f32 %v4026_v21, %v4026_v21  ;;  %v4317_v24 = vrot.slane %v12044_v61, %v12030_v26  ;;  %v12052_v62 = vrot.slane %v4268_v56, %v12034_v52 }
 0x761   :  { %v7563_v2 = vpop.eup %7562  ;;  %v4039_v34 = vmul.f32 %v4023_v0, %v4023_v0  ;;  %v4218_v23 = vpack.c.bf16 %v4023_v0, %v4022_v35  ;;  %v4275_v60 = vrot.slane %v4261_v41, %v12030_v26  ;;  %v3998_v54 = vadd.f32 1e-12, %v3980_v13 }
 0x762   :  { %v12056_v48 = vmul.f32 %v7563_v2, %v11976_v22  ;;  %v4078_v32 = vsel %vm2364_vm0, %v4042_v29, 0.0  ;;  %v4325_v3 = vcombine.high %v4317_v24, %v13688_v5  ;;  %v4310_v14 = vcombine.high %v12044_v61, %v12038_v38 }
 0x763   :  { %4079 = vadd.xlane.f32.xlu1 %v4078_v32  ;;  %v4069_v57 = vsel %vm2364_vm0, %v4039_v34, 0.0  ;;  %7568 = vrsqrt.f32 %v3998_v54  ;;  %v12071_v44 = vrot.slane %v4275_v60, %v12034_v52  ;;  %v4291_v50 = vcombine.high %v4275_v60, %v13688_v5 }
 0x764   :  { %v12062_v36 = vpack.c.bf16 %v12056_v48, %v4026_v21  ;;  %4070 = vadd.xlane.f32.xlu0 %v4069_v57  ;;  %v3983_v45 = vpop.xlane.xlu1 %3982  ;;  %v12065_v33 = vrot.slane %v4325_v3, %v12034_v52  ;;  %v4257_v58 = vshrl.u32 %v4218_v23, 16 }
 0x765   :  { %v3999_v7 = vadd.f32 1e-12, %v3983_v45  ;;  %v12080_v31 = vrot.slane %v4291_v50, %v12034_v52 }
 0x766   :  { %v4239_v22 = vpack.i.b16 %v12062_v36, %v12017_v63  ;;  %v4242_v54 = vshrl.u32 %v12062_v36, 16 }
 0x767   :  { %7570 = vrsqrt.f32 %v3999_v7  ;;  %v4241_v7 = vshrl.u32 %v12017_v63, 16 }
 0x768   :  { %4073 = vadd.xlane.f32.xlu0 %v4072_v18  ;;  %v4366_v59 = vrot.slane %v4239_v22, %v12030_v26  ;;  %v4359_v17 = vcombine.high %v4239_v22, %v12038_v38 }
 0x769   :  { %v7565_v12 = vpop.eup %7564 }
 0x76a   :  { %v7567_v39 = vpop.eup %7566  ;;  %v12077_v47 = vmul.f32 %v7565_v12, %v11989_v28  ;;  %v12083_v6 = vrot.slane %v4366_v59, %v12034_v52  ;;  %v4374_v42 = vcombine.high %v4366_v59, %v13688_v5  ;;  %v4373_v4 = vrot.slane %v4359_v17, %v12030_v26 }
 0x76b   :  { %v12086_v51 = vmul.f32 %v7567_v39, %v11986_v55  ;;  %v4276_v28 = vcombine.high %v4268_v56, %v13688_v5  ;;  %v4332_v55 = vrot.slane %v4317_v24, %v12034_v52  ;;  %v4324_v24 = vrot.slane %v4310_v14, %v12030_v26 }
 0x76c   :  { %v12096_v35 = vrot.slane %v4374_v42, %v12034_v52  ;;  %v12099_v8 = vrot.slane %v4373_v4, %v12034_v52  ;;  %v4389_v11 = vcombine.high %v4373_v4, %v13688_v5  ;;  %v4243_v59 = vpack.i.b16 %v4242_v54, %v4241_v7 }
 0x76d   :  { %v12092_v40 = vpack.c.bf16 %v12077_v47, %v12086_v51  ;;  %v7569_v1 = vpop.eup %7568  ;;  %v12112_v10 = vrot.slane %v4276_v28, %v12034_v52  ;;  %v4355_v2 = vcombine.high %v4332_v55, %v13688_v5  ;;  %v12167_v12 = vrot.slane %v4324_v24, %v12034_v52 }
 0x76e   :  { %v12106_v46 = vmul.f32 %v7569_v1, %v11997_v16  ;;  %v4340_v50 = vcombine.high %v4324_v24, %v13688_v5  ;;  %v4415_v42 = vrot.slane %v4243_v59, %v12030_v26 }
 0x76f   :  { %v4247_v20 = vpack.i.b16 %v12092_v40, %v12023_v19 }
 0x770   :  { %v4354_v39 = vrot.slane %v4340_v50, %v12034_v52  ;;  %v4430_v28 = vrot.slane %v4415_v42, %v12034_v52  ;;  %v4423_v1 = vcombine.high %v4415_v42, %v13688_v5 }
 0x771   :  { %v7571_v25 = vpop.eup %7570  ;;  %v4464_v16 = vrot.slane %v4247_v20, %v12030_v26  ;;  %v4457_v27 = vcombine.high %v4247_v20, %v12038_v38  ;;  %v4250_v20 = vshrl.u32 %v12092_v40, 16  ;;  %v4044_v40 = vmul.f32 %v12086_v51, %v12086_v51 }
 0x772   :  { %v12103_v49 = vmul.f32 %v7571_v25, %v12000_v53  ;;  %v12118_v53 = vrot.slane %v4389_v11, %v12034_v52  ;;  %v4408_v25 = vcombine.high %v4243_v59, %v12038_v38  ;;  %v4358_v59 = vcombine.high %v4354_v39, %v13688_v5 }
 0x773   :  { %v12125_v21 = vrot.slane %v4464_v16, %v12034_v52  ;;  %v4472_v56 = vcombine.high %v4464_v16, %v13688_v5  ;;  %v4471_v41 = vrot.slane %v4457_v27, %v12030_v26 }
 0x774   :  { %4654 = vrot.lane.b32.xlu1 %v4332_v55, %s7717_s7  ;;  %v4222_v43 = vpack.c.bf16 %v12103_v49, %v12106_v46  ;;  %v4437_v55 = vrot.slane %v4423_v1, %v12034_v52  ;;  %v4422_v11 = vrot.slane %v4408_v25, %v12030_v26  ;;  %v4047_v54 = vmul.f32 %v12103_v49, %v12103_v49 }
 0x775   :  { %v12135_v61 = vrot.slane %v4472_v56, %v12034_v52  ;;  %v4487_v60 = vcombine.high %v4471_v41, %v13688_v5 }
 0x776   :  { %v4258_v15 = vshrl.u32 %v4222_v43, 16  ;;  %v4255_v30 = vpack.i.b16 %v4222_v43, %v4218_v23  ;;  %v12141_v23 = vrot.slane %v4471_v41, %v12034_v52  ;;  %v4249_v43 = vshrl.u32 %v12023_v19, 16 }
 0x777   :  { %v12154_v45 = vrot.slane %v4487_v60, %v12034_v52  ;;  %v4445_v16 = vrot.slane %v4422_v11, %v12034_v52  ;;  %v4438_v27 = vcombine.high %v4422_v11, %v13688_v5 }
 0x778   :  { %v12128_v0 = vpack.i.b16 %v4258_v15, %v4257_v58  ;;  %v4562_v13 = vrot.slane %v4255_v30, %v12030_v26  ;;  %v4555_v29 = vcombine.high %v4255_v30, %v12038_v38  ;;  %v4251_v14 = vpack.i.b16 %v4250_v20, %v4249_v43 }
 0x779   :  { %v4043_v58 = vmul.f32 %v12056_v48, %v12056_v48  ;;  %v4452_v15 = vrot.slane %v4438_v27, %v12034_v52  ;;  %v4084_v48 = vsel %vm2364_vm0, %v4044_v40, 0.0 }
 0x77a   :  { %v4604_v34 = vcombine.high %v12128_v0, %v12038_v38  ;;  %v12146_v32 = vrot.slane %v4562_v13, %v12034_v52  ;;  %v4570_v57 = vcombine.high %v4562_v13, %v13688_v5  ;;  %v4569_v37 = vrot.slane %v4555_v29, %v12030_v26 }
 0x77b   :  { %v4513_v30 = vrot.slane %v4251_v14, %v12030_v26  ;;  %v4081_v19 = vsel %vm2364_vm0, %v4043_v58, 0.0  ;;  %v4506_v13 = vcombine.high %v4251_v14, %v12038_v38  ;;  %v4045_v29 = vmul.f32 %v12077_v47, %v12077_v47 }
 0x77c   :  { %v12151_v3 = vrot.slane %v4604_v34, %v12030_v26  ;;  %v12159_v22 = vrot.slane %v4570_v57, %v12034_v52  ;;  %v12162_v36 = vrot.slane %v4569_v37, %v12034_v52  ;;  %v4585_v63 = vcombine.high %v4569_v37, %v13688_v5 }
 0x77d   :  { %v4528_v56 = vrot.slane %v4513_v30, %v12034_v52  ;;  %v4521_v41 = vcombine.high %v4513_v30, %v13688_v5  ;;  %v4087_v51 = vsel %vm2364_vm0, %v4045_v29, 0.0  ;;  %v4046_v34 = vmul.f32 %v12106_v46, %v12106_v46 }
 0x77e   :  { %4657 = vrot.lane.b32.xlu0 %v4355_v2, %s7717_s7  ;;  %v4634_v18 = vcombine.high %v12151_v3, %v13688_v5  ;;  %v12179_v4 = vrot.slane %v4585_v63, %v12034_v52  ;;  %v4520_v2 = vrot.slane %v4506_v13, %v12030_v26  ;;  %v4611_v37 = vrot.slane %v12128_v0, %v12030_v26 }
 0x77f   :  { %v4535_v24 = vrot.slane %v4521_v41, %v12034_v52  ;;  %v4090_v47 = vsel %vm2364_vm0, %v4046_v34, 0.0  ;;  %v4093_v46 = vsel %vm2364_vm0, %v4047_v54, 0.0  ;;  %v4641_v49 = vrot.slane %v12151_v3, %v12034_v52 }
 0x780   :  { %v12171_v17 = vrot.slane %v4634_v18, %v12034_v52  ;;  %v4543_v38 = vrot.slane %v4520_v2, %v12034_v52  ;;  %v4536_v60 = vcombine.high %v4520_v2, %v13688_v5  ;;  %v4626_v7 = vrot.slane %v4611_v37, %v12034_v52 }
 0x781   :  { %v4619_v18 = vcombine.high %v4611_v37, %v13688_v5  ;;  %v4356_v26 = vcombine.high %v12065_v33, %v13688_v5  ;;  %v4357_v0 = vcombine.high %v12167_v12, %v13688_v5  ;;  %v4454_v3 = vcombine.high %v4437_v55, %v13688_v5 }
 0x782   :  { %4666 = vrot.lane.b32.xlu0 %v12167_v12, %s7717_s7  ;;  %v4550_v57 = vrot.slane %v4536_v60, %v12034_v52  ;;  %v4456_v12 = vcombine.high %v4452_v15, %v13688_v5  ;;  %v4551_v42 = vcombine.high %v4528_v56, %v13688_v5  ;;  %v4553_v25 = vcombine.high %v4543_v38, %v13688_v5 }
 0x783   :  { %v4633_v50 = vrot.slane %v4619_v18, %v12034_v52  ;;  %v4453_v52 = vcombine.high %v4430_v28, %v13688_v5  ;;  %v4649_v20 = vcombine.high %v4626_v7, %v13688_v5  ;;  %v4652_v40 = vcombine.high %v12171_v17, %v13688_v5 }
 0x784   :  { %v4554_v11 = vcombine.high %v4550_v57, %v13688_v5 }
 0x785   :  { %v4650_v27 = vcombine.high %v4633_v50, %v13688_v5 }
 0x786   :  { %4672 = vrot.lane.b32.xlu0 %v4354_v39, %s7717_s7 }
 0x78a   :  { %4678 = vrot.lane.b32.xlu0 %v4430_v28, %s7717_s7  ;;  %v4552_v28 = vcombine.high %v4535_v24, %v13688_v5 }
 0x78e   :  { %4684 = vrot.lane.b32.xlu0 %v4437_v55, %s7717_s7 }
 0x792   :  { %4690 = vrot.lane.b32.xlu0 %v4445_v16, %s7717_s7 }
 0x794   :  { %v12250_v63 = vpop.xlane.xlu0 %4049 }
 0x796   :  { %4696 = vrot.lane.b32.xlu0 %v4452_v15, %s7717_s7  ;;  %v12269_v43 = vpop.xlane.xlu1 %4052  ;;  %v4651_v15 = vcombine.high %v4641_v49, %v13688_v5 }
 0x798   :  { %4082 = vadd.xlane.f32.xlu1 %v4081_v19 }
 0x79a   :  { %4702 = vrot.lane.b32.xlu0 %v4528_v56, %s7717_s7 }
 0x79c   :  { %4085 = vadd.xlane.f32.xlu1 %v4084_v48  ;;  %v12254_v39 = vpop.xlane.xlu0 %4055  ;;  %v4306_v48 = vcombine.high %v12052_v62, %v13688_v5 }
 0x79e   :  { %4708 = vrot.lane.b32.xlu0 %v4535_v24, %s7717_s7 }
 0x7a0   :  { %4088 = vadd.xlane.f32.xlu1 %v4087_v51  ;;  %v12259_v1 = vpop.xlane.xlu0 %4058 }
 0x7a2   :  { %4714 = vrot.lane.b32.xlu0 %v4543_v38, %s7717_s7 }
 0x7a4   :  { %4091 = vadd.xlane.f32.xlu1 %v4090_v47  ;;  %v12264_v55 = vpop.xlane.xlu0 %4061 }
 0x7a6   :  { %4720 = vrot.lane.b32.xlu0 %v4550_v57, %s7717_s7 }
 0x7a8   :  { %4094 = vadd.xlane.f32.xlu1 %v4093_v46 }
 0x7aa   :  { %4726 = vrot.lane.b32.xlu0 %v4626_v7, %s7717_s7 }
 0x7ae   :  { %4732 = vrot.lane.b32.xlu0 %v4633_v50, %s7717_s7 }
 0x7b2   :  { %4738 = vrot.lane.b32.xlu0 %v4641_v49, %s7717_s7 }
 0x7b9   :  { %4660 = vrot.lane.b32.xlu1 %v12065_v33, %s7717_s7  ;;  %v4455_v33 = vcombine.high %v4445_v16, %v13688_v5  ;;  %v12271_v16 = vpop.xlane.xlu0 %4064 }
 0x7bd   :  { %4663 = vrot.lane.b32.xlu1 %v4356_v26, %s7717_s7 }
 0x7c1   :  { %4669 = vrot.lane.b32.xlu1 %v4357_v0, %s7717_s7 }
 0x7c5   :  { %4675 = vrot.lane.b32.xlu1 %v4358_v59, %s7717_s7 }
 0x7c9   :  { %4681 = vrot.lane.b32.xlu1 %v4453_v52, %s7717_s7 }
 0x7cd   :  { %4687 = vrot.lane.b32.xlu1 %v4454_v3, %s7717_s7  ;;  %v13689_v3 = vlaneseq }
 0x7d1   :  { %4693 = vrot.lane.b32.xlu1 %v4455_v33, %s7717_s7  ;;  %v4113_v33 = vand.u32 127, %v13689_v3 }
 0x7d5   :  { %4699 = vrot.lane.b32.xlu1 %v4456_v12, %s7717_s7 }
 0x7d9   :  { %4705 = vrot.lane.b32.xlu1 %v4551_v42, %s7717_s7 }
 0x7dd   :  { %4711 = vrot.lane.b32.xlu1 %v4552_v28, %s7717_s7 }
 0x7e1   :  { %4717 = vrot.lane.b32.xlu1 %v4553_v25, %s7717_s7  ;;  %v4118_v25 = vadd.s32 4294967288, %v4113_v33 }
 0x7e5   :  { %4723 = vrot.lane.b32.xlu1 %v4554_v11, %s7717_s7 }
 0x7e9   :  { %4729 = vrot.lane.b32.xlu1 %v4649_v20, %s7717_s7  ;;  %v4125_v20 = vadd.s32 4294967280, %v4113_v33 }
 0x7ea   :  { %v12275_v14 = vpop.xlane.xlu1 %4076 }
 0x7ec   :  { %v12277_v58 = vpop.xlane.xlu0 %4067 }
 0x7ed   :  { %4735 = vrot.lane.b32.xlu1 %v4650_v27, %s7717_s7  ;;  %v4132_v27 = vadd.s32 4294967272, %v4113_v33 }
 0x7f0   :  { %v12281_v30 = vpop.xlane.xlu1 %4079 }
 0x7f1   :  { %v12283_v19 = vpop.xlane.xlu0 %4070  ;;  %4741 = vrot.lane.b32.xlu1 %v4651_v15, %s7717_s7  ;;  %v4139_v15 = vadd.s32 4294967264, %v4113_v33 }
 0x7f4   :  { %v4655_v56 = vpop.permute.xlu1 %4654 }
 0x7f5   :  { %v12290_v41 = vsel %vm2364_vm0, %v12052_v62, %v4655_v56  ;;  %v4074_v13 = vpop.xlane.xlu0 %4073  ;;  %4747 = vrot.lane.b32.xlu1 %v4652_v40, %s7717_s7 }
 0x7f9   :  { %v4658_v29 = vpop.permute.xlu0 %4657 }
 0x7fa   :  { %v12296_v24 = vsel %vm2364_vm0, %v4306_v48, %v4658_v29  ;;  %v4116_v48 = vsub.s32 %v4113_v33, %v13687_v9  ;;  %v4121_v29 = vsub.s32 %v4118_v25, %v13687_v9 }
 0x7fb   :  { %5169 = vmatprep.mubr.bf16.mxu1 %v12296_v24 }
 0x7fc   :  { %v4122_v3 = vrot.slane %v12269_v43, %v4121_v29  ;;  %v4174_v25 = vrot.slane %v12275_v14, %v4121_v29 }
 0x7fd   :  { %v4667_v2 = vpop.permute.xlu0 %4666 }
 0x7fe   :  { %v12300_v51 = vsel %vm2364_vm0, %v12071_v44, %v4667_v2  ;;  %v4146_v2 = vadd.s32 4294967256, %v4113_v33 }
 0x801   :  { %v4673_v34 = vpop.permute.xlu0 %4672 }
 0x802   :  { %v12304_v38 = vsel %vm2364_vm0, %v12080_v31, %v4673_v34 }
 0x805   :  { %v4679_v60 = vpop.permute.xlu0 %4678 }
 0x806   :  { %v12308_v47 = vsel %vm2364_vm0, %v12083_v6, %v4679_v60  ;;  %v4128_v60 = vsub.s32 %v4125_v20, %v13687_v9 }
 0x808   :  { %v4179_v29 = vrot.slane %v12281_v30, %v4128_v60 }
 0x809   :  { %v4685_v62 = vpop.permute.xlu0 %4684 }
 0x80a   :  { %v12312_v54 = vsel %vm2364_vm0, %v12096_v35, %v4685_v62  ;;  %v4153_v62 = vadd.s32 4294967248, %v4113_v33 }
 0x80d   :  { %v4691_v57 = vpop.permute.xlu0 %4690 }
 0x80e   :  { %v12316_v37 = vsel %vm2364_vm0, %v12099_v8, %v4691_v57  ;;  %v4160_v57 = vadd.s32 4294967240, %v4113_v33  ;;  %v4129_v33 = vrot.slane %v12254_v39, %v4128_v60 }
 0x811   :  { %v4697_v46 = vpop.permute.xlu0 %4696 }
 0x812   :  { %v12320_v7 = vsel %vm2364_vm0, %v12118_v53, %v4697_v46  ;;  %v4135_v46 = vsub.s32 %v4132_v27, %v13687_v9  ;;  %v4163_v27 = vsub.s32 %v4160_v57, %v13687_v9 }
 0x815   :  { %v4703_v18 = vpop.permute.xlu0 %4702 }
 0x816   :  { %v12324_v50 = vsel %vm2364_vm0, %v12125_v21, %v4703_v18  ;;  %v4170_v18 = vrot.slane %v4074_v13, %v4116_v48  ;;  %v4156_v13 = vsub.s32 %v4153_v62, %v13687_v9 }
 0x818   :  { %v4175_v43 = vsel %vm4123_vm1, %v4174_v25, %v4170_v18 }
 0x819   :  { %v4709_v49 = vpop.permute.xlu0 %4708 }
 0x81a   :  { %v12328_v26 = vsel %vm2364_vm0, %v12135_v61, %v4709_v49  ;;  %v4142_v49 = vsub.s32 %v4139_v15, %v13687_v9  ;;  %v4117_v15 = vrot.slane %v12250_v63, %v4116_v48  ;;  %v4180_v48 = vsel %vm4130_vm2, %v4179_v29, %v4175_v43 }
 0x81c   :  { %v4143_v14 = vrot.slane %v12264_v55, %v4142_v49  ;;  %v4124_v39 = vsel %vm4123_vm1, %v4122_v3, %v4117_v15  ;;  %v4164_v55 = vrot.slane %v12283_v19, %v4163_v27 }
 0x81d   :  { %v4715_v0 = vpop.permute.xlu0 %4714  ;;  %v4131_v63 = vsel %vm4130_vm2, %v4129_v33, %v4124_v39 }
 0x81e   :  { %v12332_v59 = vsel %vm2364_vm0, %v12141_v23, %v4715_v0 }
 0x821   :  { %v4721_v52 = vpop.permute.xlu0 %4720 }
 0x822   :  { %v12337_v12 = vsel %vm2364_vm0, %v12154_v45, %v4721_v52 }
 0x825   :  { %v4727_v42 = vpop.permute.xlu0 %4726  ;;  %v4083_v28 = vpop.xlane.xlu1 %4082 }
 0x826   :  { %v12341_v11 = vsel %vm2364_vm0, %v12146_v32, %v4727_v42  ;;  %v4149_v42 = vsub.s32 %v4146_v2, %v13687_v9  ;;  %v4184_v2 = vrot.slane %v4083_v28, %v4135_v46 }
 0x828   :  { %v4150_v62 = vrot.slane %v12271_v16, %v4149_v42  ;;  %v4185_v30 = vsel %vm4137_vm3, %v4184_v2, %v4180_v48  ;;  %v4407_v48 = vcombine.high %v12118_v53, %v13688_v5  ;;  %v4504_v53 = vcombine.high %v12141_v23, %v13688_v5 }
 0x829   :  { %v4733_v40 = vpop.permute.xlu0 %4732  ;;  %v4086_v56 = vpop.xlane.xlu1 %4085  ;;  %v4601_v23 = vcombine.high %v12159_v22, %v13688_v5 }
 0x82a   :  { %v12347_v34 = vsel %vm2364_vm0, %v12159_v22, %v4733_v40  ;;  %v4136_v40 = vrot.slane %v12259_v1, %v4135_v46  ;;  %v4157_v1 = vrot.slane %v12277_v58, %v4156_v13 }
 0x82b   :  { %13690 = vst [vmem:[#allocation306_spill] sm:$0xff] %v12347_v34 }
 0x82c   :  { %v4138_v57 = vsel %vm4137_vm3, %v4136_v40, %v4131_v63  ;;  %v4308_v40 = vcombine.high %v12071_v44, %v13688_v5  ;;  %v4405_v44 = vcombine.high %v12096_v35, %v13688_v5 }
 0x82d   :  { %v4739_v0 = vpop.permute.xlu0 %4738  ;;  %v4089_v52 = vpop.xlane.xlu1 %4088 }
 0x82e   :  { %v12357_v20 = vsel %vm2364_vm0, %v12162_v36, %v4739_v0  ;;  %v4189_v0 = vrot.slane %v4086_v56, %v4142_v49  ;;  %v4194_v9 = vrot.slane %v4089_v52, %v4149_v42  ;;  %v4145_v56 = vsel %vm4144_vm4, %v4143_v14, %v4138_v57 }
 0x82f   :  { %v4152_v46 = vsel %vm4151_vm5, %v4150_v62, %v4145_v56  ;;  %v4309_v14 = vcombine.high %v12080_v31, %v13688_v5  ;;  %v4406_v31 = vcombine.high %v12099_v8, %v13688_v5  ;;  %v4502_v57 = vcombine.high %v12125_v21, %v13688_v5 }
 0x830   :  { %v4190_v60 = vsel %vm4144_vm4, %v4189_v0, %v4185_v30  ;;  %v4505_v21 = vcombine.high %v12154_v45, %v13688_v5  ;;  %v4602_v45 = vcombine.high %v12162_v36, %v13688_v5 }
 0x831   :  { %v4092_v34 = vpop.xlane.xlu1 %4091  ;;  %v4195_v58 = vsel %vm4151_vm5, %v4194_v9, %v4190_v60 }
 0x832   :  { %v4199_v28 = vrot.slane %v4092_v34, %v4156_v13  ;;  %v4159_v34 = vsel %vm4158_vm6, %v4157_v1, %v4152_v46  ;;  %v4307_v13 = vcombine.high %v12112_v10, %v13688_v5 }
 0x833   :  { %v4166_v52 = vsel %vm4165_vm7, %v4164_v55, %v4159_v34 }
 0x834   :  { %v4200_v49 = vsel %vm4158_vm6, %v4199_v28, %v4195_v58 }
 0x835   :  { %v4095_v16 = vpop.xlane.xlu1 %4094 }
 0x836   :  { %v4204_v18 = vrot.slane %v4095_v16, %v4163_v27 }
 0x838   :  { %v4205_v3 = vsel %vm4165_vm7, %v4204_v18, %v4200_v49 }
 0x839   :  { %v4661_v19 = vpop.permute.xlu1 %4660  ;;  %v4207_v42 = vsel %vm4206_vm8, %v4205_v3, %v4166_v52 }
 0x83a   :  { %v12381_v25 = vsel %vm2364_vm0, %v12112_v10, %v4661_v19  ;;  %v4210_v33 = vsel %vm4209_vm9, %v4207_v42, 0.0  ;;  %v4404_v10 = vcombine.high %v12083_v6, %v13688_v5 }
 0x83b   :  { %4211 = vadd.xlane.f32.xlu0 %v4210_v33 }
 0x83d   :  { %v4664_v15 = vpop.permute.xlu1 %4663 }
 0x83e   :  { %v12386_v27 = vsel %vm2364_vm0, %v4307_v13, %v4664_v15 }
 0x841   :  { %v4670_v43 = vpop.permute.xlu1 %4669 }
 0x842   :  { %v4771_v2 = vsel %vm2364_vm0, %v4308_v40, %v4670_v43  ;;  %v13691_v43 = vld [vmem:[#allocation20_spill] sm:$0xff] }
 0x843   :  { %6703 = vmatprep.subr.bf16.mxu1 %v13691_v43 }
 0x845   :  { %v4676_v29 = vpop.permute.xlu1 %4675 }
 0x846   :  { %v12394_v0 = vsel %vm2364_vm0, %v4309_v14, %v4676_v29 }
 0x849   :  { %v4682_v39 = vpop.permute.xlu1 %4681 }
 0x84a   :  { %v12399_v62 = vsel %vm2364_vm0, %v4404_v10, %v4682_v39 }
 0x84d   :  { %v4688_v9 = vpop.permute.xlu1 %4687 }
 0x84e   :  { %v12404_v63 = vsel %vm2364_vm0, %v4405_v44, %v4688_v9 }
 0x851   :  { %v4694_v1 = vpop.permute.xlu1 %4693  ;;  %4744 = vrot.lane.b32.xlu0 %v12171_v17, %s7717_s7  ;;  %v4503_v17 = vcombine.high %v12135_v61, %v13688_v5  ;;  %v4600_v61 = vcombine.high %v12146_v32, %v13688_v5  ;;  %v4603_v32 = vcombine.high %v12179_v4, %v13688_v5 }
 0x852   :  { %v12411_v6 = vsel %vm2364_vm0, %v4406_v31, %v4694_v1 }
 0x855   :  { %v4700_v28 = vpop.permute.xlu1 %4699 }
 0x856   :  { %v12416_v35 = vsel %vm2364_vm0, %v4407_v48, %v4700_v28 }
 0x859   :  { %v4706_v55 = vpop.permute.xlu1 %4705 }
 0x85a   :  { %v12421_v8 = vsel %vm2364_vm0, %v4502_v57, %v4706_v55 }
 0x85d   :  { %v4712_v30 = vpop.permute.xlu1 %4711 }
 0x85e   :  { %v12426_v56 = vsel %vm2364_vm0, %v4503_v17, %v4712_v30 }
 0x861   :  { %v4718_v60 = vpop.permute.xlu1 %4717 }
 0x862   :  { %v12431_v16 = vsel %vm2364_vm0, %v4504_v53, %v4718_v60 }
 0x865   :  { %v4724_v46 = vpop.permute.xlu1 %4723 }
 0x866   :  { %v12436_v58 = vsel %vm2364_vm0, %v4505_v21, %v4724_v46 }
 0x869   :  { %v4730_v18 = vpop.permute.xlu1 %4729 }
 0x86a   :  { %v12441_v34 = vsel %vm2364_vm0, %v4600_v61, %v4730_v18 }
 0x86d   :  { %v4736_v49 = vpop.permute.xlu1 %4735 }
 0x86e   :  { %v12446_v52 = vsel %vm2364_vm0, %v4601_v23, %v4736_v49 }
 0x871   :  { %v4742_v3 = vpop.permute.xlu1 %4741 }
 0x872   :  { %v12451_v19 = vsel %vm2364_vm0, %v4602_v45, %v4742_v3 }
 0x875   :  { %v4748_v42 = vpop.permute.xlu1 %4747 }
 0x876   :  { %v12456_v33 = vsel %vm2364_vm0, %v4603_v32, %v4748_v42 }
 0x8c8   :  { %v4212_v13 = vpop.xlane.xlu0 %4211 }
 0x8c9   :  { %v4213_v22 = vadd.f32 1e-12, %v4212_v13 }
 0x8cb   :  { %7572 = vrsqrt.f32 %v4213_v22 }
 0x8cc   :  { %v4745_v15 = vpop.permute.xlu0 %4744 }
 0x8cd   :  { %v12460_v40 = vsel %vm2364_vm0, %v12179_v4, %v4745_v15 }
 0x8d5   :  { %v12462_v36 = vpop.eup %7572 }
 0x8d6   :  { %7705 = dma.done.wait [#allocation3], 32768 }
 0x8d7   :  { %7706 = vsyncadd [#allocation3], 4294934528  ;;  %v13692_v14 = vld [vmem:[#allocation12_spill] sm:$0xff]  ;;  %v13694_v10 = vld [vmem:[#allocation21_spill] sm:$0xff]  ;;  %5249 = vmatprep.mubr.bf16.mxu0 %v4771_v2  ;;  %7598 = vset.pattern.permute.xlu1 %v13688_v5  ;;  %vm7719_vm10 = vmmov 0   ;;  %vm5838_vm11 = vcmask 261120  }
 0x8d8   :  { %6704 = vmatpush3.bf16.msra.mxu1 %v13692_v14  ;;  %v13693_v29 = vld [vmem:[#allocation52_spill] sm:$0xff]  ;;  %v13696_v44 = vld [vmem:[#allocation53_spill] sm:$0xff]  ;;  %7599 = vset.pattern.permute.xlu0 %v13688_v5  ;;  %v13698_v24 = vld [vmem:[#allocation22_spill] sm:$0xff]  ;;  %vm5787_vm7 = vcmask 254976   ;;  %s7721_s27 = smov [#allocation4]  }
 0x8d9   :  { %6747 = vmatprep.subr.bf16.mxu0 %v13693_v29  ;;  %6705 = vmatprep.subr.bf16.mxu1 %v13694_v10  ;;  %v13695_v39 = vld [vmem:[#allocation44_spill] sm:$0xff]  ;;  %v13697_v4 = vld [vmem:[#allocation13_spill] sm:$0xff]  ;;  %v13700_v31 = vld [vmem:[#allocation54_spill] sm:$0xff] }
 0x8da   :  { %6748 = vmatpush3.bf16.msra.mxu0 %v13695_v39  ;;  %v13699_v9 = vld [vmem:[#allocation45_spill] sm:$0xff]  ;;  %v13701_v1 = vld [vmem:[#allocation14_spill] sm:$0xff]  ;;  %v13702_v48 = vld [vmem:[#allocation23_spill] sm:$0xff] }
 0x8db   :  { %6749 = vmatprep.subr.bf16.mxu0 %v13696_v44  ;;  %v13703_v28 = vld [vmem:[#allocation46_spill] sm:$0xff]  ;;  %v13704_v57 = vld [vmem:[#allocation55_spill] sm:$0xff]  ;;  %v13706_v55 = vld [vmem:[#allocation24_spill] sm:$0xff] }
 0x8dc   :  { %6706 = vmatpush3.bf16.msra.mxu1 %v13697_v4  ;;  %v13705_v2 = vld [vmem:[#allocation15_spill] sm:$0xff]  ;;  %v13708_v30 = vld [vmem:[#allocation56_spill] sm:$0xff]  ;;  %v13710_v60 = vld [vmem:[#allocation25_spill] sm:$0xff] }
 0x8dd   :  { %6707 = vmatprep.subr.bf16.mxu1 %v13698_v24  ;;  %v13707_v17 = vld [vmem:[#allocation47_spill] sm:$0xff]  ;;  %v13709_v53 = vld [vmem:[#allocation16_spill] sm:$0xff]  ;;  %v13712_v46 = vld [vmem:[#allocation57_spill] sm:$0xff] }
 0x8de   :  { %6750 = vmatpush3.bf16.msra.mxu0 %v13699_v9  ;;  %v13711_v21 = vld [vmem:[#allocation48_spill] sm:$0xff]  ;;  %v13713_v61 = vld [vmem:[#allocation17_spill] sm:$0xff]  ;;  %v13714_v18 = vld [vmem:[#allocation26_spill] sm:$0xff] }
 0x8df   :  { %6751 = vmatprep.subr.bf16.mxu0 %v13700_v31  ;;  %v13715_v23 = vld [vmem:[#allocation49_spill] sm:$0xff]  ;;  %v13716_v49 = vld [vmem:[#allocation58_spill] sm:$0xff]  ;;  %v13718_v3 = vld [vmem:[#allocation27_spill] sm:$0xff] }
 0x8e0   :  { %6708 = vmatpush3.bf16.msra.mxu1 %v13701_v1  ;;  %v13717_v45 = vld [vmem:[#allocation18_spill] sm:$0xff]  ;;  %v13720_v42 = vld [vmem:[#allocation59_spill] sm:$0xff]  ;;  %v13722_v22 = vld [vmem:[#allocation36_spill] sm:$0xff] }
 0x8e1   :  { %6709 = vmatprep.subr.bf16.mxu1 %v13702_v48  ;;  %v13719_v32 = vld [vmem:[#allocation50_spill] sm:$0xff]  ;;  %v13721_v13 = vld [vmem:[#allocation19_spill] sm:$0xff]  ;;  %v13724_v43 = vld [vmem:[#allocation84_spill] sm:$0xff] }
 0x8e2   :  { %6752 = vmatpush3.bf16.msra.mxu0 %v13703_v28  ;;  %v13723_v15 = vld [vmem:[#allocation51_spill] sm:$0xff]  ;;  %v13725_v14 = vld [vmem:[#allocation28_spill] sm:$0xff]  ;;  %v13726_v29 = vld [vmem:[#allocation37_spill] sm:$0xff] }
 0x8e3   :  { %6753 = vmatprep.subr.bf16.mxu0 %v13704_v57  ;;  %v13727_v10 = vld [vmem:[#allocation76_spill] sm:$0xff]  ;;  %v13728_v39 = vld [vmem:[#allocation85_spill] sm:$0xff]  ;;  %v13730_v4 = vld [vmem:[#allocation38_spill] sm:$0xff] }
 0x8e4   :  { %6710 = vmatpush3.bf16.msra.mxu1 %v13705_v2  ;;  %v13729_v44 = vld [vmem:[#allocation29_spill] sm:$0xff]  ;;  %v13733_v9 = vld [vmem:[#allocation30_spill] sm:$0xff]  ;;  %v13737_v1 = vld [vmem:[#allocation31_spill] sm:$0xff] }
 0x8e5   :  { %6711 = vmatprep.subr.bf16.mxu1 %v13706_v55  ;;  %v13731_v24 = vld [vmem:[#allocation77_spill] sm:$0xff]  ;;  %v13735_v31 = vld [vmem:[#allocation78_spill] sm:$0xff]  ;;  %v13739_v48 = vld [vmem:[#allocation79_spill] sm:$0xff] }
 0x8e6   :  { %6754 = vmatpush3.bf16.msra.mxu0 %v13707_v17  ;;  %v13740_v28 = vld [vmem:[#allocation88_spill] sm:$0xff]  ;;  %v13742_v2 = vld [vmem:[#allocation41_spill] sm:$0xff] }
 0x8e7   :  { %6755 = vmatprep.subr.bf16.mxu0 %v13708_v30  ;;  %v13741_v57 = vld [vmem:[#allocation32_spill] sm:$0xff]  ;;  %v13744_v17 = vld [vmem:[#allocation89_spill] sm:$0xff] }
 0x8e8   :  { %6712 = vmatpush3.bf16.msra.mxu1 %v13709_v53  ;;  %v13743_v55 = vld [vmem:[#allocation80_spill] sm:$0xff]  ;;  %v13745_v30 = vld [vmem:[#allocation33_spill] sm:$0xff]  ;;  %v13746_v53 = vld [vmem:[#allocation42_spill] sm:$0xff] }
 0x8e9   :  { %6713 = vmatprep.subr.bf16.mxu1 %v13710_v60  ;;  %v13747_v60 = vld [vmem:[#allocation81_spill] sm:$0xff] }
 0x8ea   :  { %6756 = vmatpush3.bf16.msra.mxu0 %v13711_v21  ;;  %v13748_v21 = vld [vmem:[#allocation90_spill] sm:$0xff] }
 0x8eb   :  { %6757 = vmatprep.subr.bf16.mxu0 %v13712_v46  ;;  %v13749_v46 = vld [vmem:[#allocation34_spill] sm:$0xff] }
 0x8ec   :  { %6714 = vmatpush3.bf16.msra.mxu1 %v13713_v61  ;;  %v13750_v61 = vld [vmem:[#allocation43_spill] sm:$0xff] }
 0x8ed   :  { %6715 = vmatprep.subr.bf16.mxu1 %v13714_v18  ;;  %v13751_v18 = vld [vmem:[#allocation82_spill] sm:$0xff] }
 0x8ee   :  { %6758 = vmatpush3.bf16.msra.mxu0 %v13715_v23  ;;  %v13752_v23 = vld [vmem:[#allocation91_spill] sm:$0xff] }
 0x8ef   :  { %6759 = vmatprep.subr.bf16.mxu0 %v13716_v49  ;;  %v13753_v49 = vld [vmem:[#allocation35_spill] sm:$0xff] }
 0x8f0   :  { %6716 = vmatpush3.bf16.msra.mxu1 %v13717_v45  ;;  %v13754_v45 = vld [vmem:[#allocation68_spill] sm:$0xff] }
 0x8f1   :  { %6717 = vmatprep.subr.bf16.mxu1 %v13718_v3  ;;  %v13755_v3 = vld [vmem:[#allocation83_spill] sm:$0xff] }
 0x8f2   :  { %6760 = vmatpush3.bf16.msra.mxu0 %v13719_v32  ;;  %v13756_v32 = vld [vmem:[#allocation116_spill] sm:$0xff] }
 0x8f3   :  { %6761 = vmatprep.subr.bf16.mxu0 %v13720_v42  ;;  %v13757_v42 = vld [vmem:[#allocation60_spill] sm:$0xff] }
 0x8f4   :  { %6718 = vmatpush3.bf16.msra.mxu1 %v13721_v13  ;;  %v13758_v13 = vld [vmem:[#allocation69_spill] sm:$0xff] }
 0x8f5   :  { %6725 = vmatprep.subr.bf16.mxu1 %v13722_v22  ;;  %v13759_v22 = vld [vmem:[#allocation108_spill] sm:$0xff] }
 0x8f6   :  { %6762 = vmatpush3.bf16.msra.mxu0 %v13723_v15  ;;  %v13760_v15 = vld [vmem:[#allocation117_spill] sm:$0xff] }
 0x8f7   :  { %6791 = vmatprep.subr.bf16.mxu0 %v13724_v43  ;;  %5170 = vmatmul.mubr.bf16.vlgmr.msra.gmra.mrb[32].mxu1 %v12290_v41  ;;  %v13732_v41 = vld [vmem:[#allocation86_spill] sm:$0xff]  ;;  %v13761_v43 = vld [vmem:[#allocation61_spill] sm:$0xff] }
 0x8f8   :  { %6726 = vmatpush3.bf16.msra.mxu1 %v13725_v14  ;;  %5209 = vmatprep.mubr.bf16.mxu1 %v12386_v27  ;;  %v13734_v27 = vld [vmem:[#allocation39_spill] sm:$0xff]  ;;  %v13762_v14 = vld [vmem:[#allocation70_spill] sm:$0xff] }
 0x8f9   :  { %6727 = vmatprep.subr.bf16.mxu1 %v13726_v29  ;;  %5250 = vmatmul.mubr.bf16.vlgmr.msra.gmra.mrb[64].mxu0 %v12300_v51  ;;  %v13736_v51 = vld [vmem:[#allocation87_spill] sm:$0xff]  ;;  %v13764_v29 = vld [vmem:[#allocation118_spill] sm:$0xff] }
 0x8fa   :  { %6792 = vmatpush3.bf16.msra.mxu0 %v13727_v10  ;;  %5329 = vmatprep.mubr.bf16.mxu0 %v12399_v62  ;;  %v13738_v62 = vld [vmem:[#allocation40_spill] sm:$0xff]  ;;  %v13765_v10 = vld [vmem:[#allocation62_spill] sm:$0xff] }
 0x8fb   :  { %6793 = vmatprep.subr.bf16.mxu0 %v13728_v39  ;;  %v13767_v39 = vld [vmem:[#allocation110_spill] sm:$0xff] }
 0x8fc   :  { %6728 = vmatpush3.bf16.msra.mxu1 %v13729_v44  ;;  %v13769_v44 = vld [vmem:[#allocation63_spill] sm:$0xff] }
 0x8fd   :  { %6729 = vmatprep.subr.bf16.mxu1 %v13730_v4  ;;  %v13771_v4 = vld [vmem:[#allocation111_spill] sm:$0xff] }
 0x8fe   :  { %6794 = vmatpush3.bf16.msra.mxu0 %v13731_v24  ;;  %v13772_v24 = vld [vmem:[#allocation120_spill] sm:$0xff] }
 0x8ff   :  { %6795 = vmatprep.subr.bf16.mxu0 %v13732_v41  ;;  %v13773_v41 = vld [vmem:[#allocation64_spill] sm:$0xff] }
 0x900   :  { %6730 = vmatpush3.bf16.msra.mxu1 %v13733_v9  ;;  %v13774_v9 = vld [vmem:[#allocation73_spill] sm:$0xff] }
 0x901   :  { %6731 = vmatprep.subr.bf16.mxu1 %v13734_v27  ;;  %v13775_v27 = vld [vmem:[#allocation112_spill] sm:$0xff] }
 0x902   :  { %6796 = vmatpush3.bf16.msra.mxu0 %v13735_v31  ;;  %v13776_v31 = vld [vmem:[#allocation121_spill] sm:$0xff] }
 0x903   :  { %6797 = vmatprep.subr.bf16.mxu0 %v13736_v51  ;;  %v13777_v51 = vld [vmem:[#allocation65_spill] sm:$0xff] }
 0x904   :  { %6732 = vmatpush3.bf16.msra.mxu1 %v13737_v1  ;;  %v13778_v1 = vld [vmem:[#allocation74_spill] sm:$0xff] }
 0x905   :  { %6733 = vmatprep.subr.bf16.mxu1 %v13738_v62  ;;  %v13779_v62 = vld [vmem:[#allocation113_spill] sm:$0xff] }
 0x906   :  { %6798 = vmatpush3.bf16.msra.mxu0 %v13739_v48  ;;  %v13780_v48 = vld [vmem:[#allocation122_spill] sm:$0xff] }
 0x907   :  { %6799 = vmatprep.subr.bf16.mxu0 %v13740_v28  ;;  %v13781_v28 = vld [vmem:[#allocation66_spill] sm:$0xff] }
 0x908   :  { %6734 = vmatpush3.bf16.msra.mxu1 %v13741_v57  ;;  %v13782_v57 = vld [vmem:[#allocation75_spill] sm:$0xff] }
 0x909   :  { %6735 = vmatprep.subr.bf16.mxu1 %v13742_v2  ;;  %v13783_v2 = vld [vmem:[#allocation114_spill] sm:$0xff] }
 0x90a   :  { %6800 = vmatpush3.bf16.msra.mxu0 %v13743_v55  ;;  %v13784_v55 = vld [vmem:[#allocation123_spill] sm:$0xff] }
 0x90b   :  { %6801 = vmatprep.subr.bf16.mxu0 %v13744_v17  ;;  %v13785_v17 = vld [vmem:[#allocation67_spill] sm:$0xff] }
 0x90c   :  { %6736 = vmatpush3.bf16.msra.mxu1 %v13745_v30  ;;  %v13786_v30 = vld [vmem:[#allocation100_spill] sm:$0xff] }
 0x90d   :  { %6737 = vmatprep.subr.bf16.mxu1 %v13746_v53  ;;  %v13787_v53 = vld [vmem:[#allocation115_spill] sm:$0xff] }
 0x90e   :  { %6802 = vmatpush3.bf16.msra.mxu0 %v13747_v60  ;;  %v13788_v60 = vld [vmem:[#allocation148_spill] sm:$0xff] }
 0x90f   :  { %6803 = vmatprep.subr.bf16.mxu0 %v13748_v21  ;;  %v13789_v21 = vld [vmem:[#allocation92_spill] sm:$0xff] }
 0x910   :  { %6738 = vmatpush3.bf16.msra.mxu1 %v13749_v46  ;;  %v13790_v46 = vld [vmem:[#allocation101_spill] sm:$0xff] }
 0x911   :  { %6739 = vmatprep.subr.bf16.mxu1 %v13750_v61  ;;  %v13791_v61 = vld [vmem:[#allocation140_spill] sm:$0xff] }
 0x912   :  { %6804 = vmatpush3.bf16.msra.mxu0 %v13751_v18  ;;  %v13792_v18 = vld [vmem:[#allocation149_spill] sm:$0xff] }
 0x913   :  { %6805 = vmatprep.subr.bf16.mxu0 %v13752_v23  ;;  %v13793_v23 = vld [vmem:[#allocation93_spill] sm:$0xff] }
 0x914   :  { %6740 = vmatpush3.bf16.msra.mxu1 %v13753_v49  ;;  %v13794_v49 = vld [vmem:[#allocation102_spill] sm:$0xff] }
 0x915   :  { %6769 = vmatprep.subr.bf16.mxu1 %v13754_v45  ;;  %v13796_v45 = vld [vmem:[#allocation150_spill] sm:$0xff] }
 0x916   :  { %6806 = vmatpush3.bf16.msra.mxu0 %v13755_v3  ;;  %v13797_v3 = vld [vmem:[#allocation94_spill] sm:$0xff] }
 0x917   :  { %5210 = vmatmul.mubr.bf16.vlgmr.msra.gmra.mrb[36].mxu1 %v12381_v25  ;;  %6835 = vmatprep.subr.bf16.mxu0 %v13756_v32  ;;  %v13763_v25 = vld [vmem:[#allocation109_spill] sm:$0xff]  ;;  %v13799_v32 = vld [vmem:[#allocation142_spill] sm:$0xff] }
 0x918   :  { %6770 = vmatpush3.bf16.msra.mxu1 %v13757_v42  ;;  %5289 = vmatprep.mubr.bf16.mxu1 %v12394_v0  ;;  %v13766_v0 = vld [vmem:[#allocation71_spill] sm:$0xff] }
 0x919   :  { %6771 = vmatprep.subr.bf16.mxu1 %v13758_v13  ;;  %5330 = vmatmul.mubr.bf16.vlgmr.msra.gmra.mrb[68].mxu0 %v12308_v47  ;;  %v13768_v47 = vld [vmem:[#allocation119_spill] sm:$0xff] }
 0x91a   :  { %6836 = vmatpush3.bf16.msra.mxu0 %v13759_v22  ;;  %5409 = vmatprep.mubr.bf16.mxu0 %v12411_v6  ;;  %v13770_v6 = vld [vmem:[#allocation72_spill] sm:$0xff]  ;;  %v13801_v42 = vld [vmem:[#allocation95_spill] sm:$0xff] }
 0x91b   :  { %6837 = vmatprep.subr.bf16.mxu0 %v13760_v15  ;;  %v13803_v13 = vld [vmem:[#allocation143_spill] sm:$0xff]  ;;  %v13804_v22 = vld [vmem:[#allocation152_spill] sm:$0xff] }
 0x91c   :  { %6772 = vmatpush3.bf16.msra.mxu1 %v13761_v43  ;;  %v13805_v15 = vld [vmem:[#allocation96_spill] sm:$0xff]  ;;  %v13806_v43 = vld [vmem:[#allocation105_spill] sm:$0xff] }
 0x91d   :  { %6773 = vmatprep.subr.bf16.mxu1 %v13762_v14  ;;  %v13807_v14 = vld [vmem:[#allocation144_spill] sm:$0xff] }
 0x91e   :  { %6838 = vmatpush3.bf16.msra.mxu0 %v13763_v25  ;;  %v13808_v25 = vld [vmem:[#allocation153_spill] sm:$0xff] }
 0x91f   :  { %6839 = vmatprep.subr.bf16.mxu0 %v13764_v29  ;;  %v13809_v29 = vld [vmem:[#allocation97_spill] sm:$0xff] }
 0x920   :  { %6774 = vmatpush3.bf16.msra.mxu1 %v13765_v10  ;;  %v13810_v10 = vld [vmem:[#allocation106_spill] sm:$0xff] }
 0x921   :  { %6775 = vmatprep.subr.bf16.mxu1 %v13766_v0  ;;  %v13811_v0 = vld [vmem:[#allocation145_spill] sm:$0xff] }
 0x922   :  { %6840 = vmatpush3.bf16.msra.mxu0 %v13767_v39  ;;  %v13812_v39 = vld [vmem:[#allocation154_spill] sm:$0xff] }
 0x923   :  { %6841 = vmatprep.subr.bf16.mxu0 %v13768_v47  ;;  %v13813_v47 = vld [vmem:[#allocation98_spill] sm:$0xff] }
 0x924   :  { %6776 = vmatpush3.bf16.msra.mxu1 %v13769_v44  ;;  %v13814_v44 = vld [vmem:[#allocation107_spill] sm:$0xff] }
 0x925   :  { %6777 = vmatprep.subr.bf16.mxu1 %v13770_v6  ;;  %v13815_v6 = vld [vmem:[#allocation146_spill] sm:$0xff] }
 0x926   :  { %6842 = vmatpush3.bf16.msra.mxu0 %v13771_v4  ;;  %v13816_v4 = vld [vmem:[#allocation155_spill] sm:$0xff] }
 0x927   :  { %6843 = vmatprep.subr.bf16.mxu0 %v13772_v24  ;;  %v13817_v24 = vld [vmem:[#allocation99_spill] sm:$0xff] }
 0x928   :  { %6778 = vmatpush3.bf16.msra.mxu1 %v13773_v41  ;;  %v13818_v41 = vld [vmem:[#allocation132_spill] sm:$0xff] }
 0x929   :  { %6779 = vmatprep.subr.bf16.mxu1 %v13774_v9  ;;  %v13819_v9 = vld [vmem:[#allocation147_spill] sm:$0xff] }
 0x92a   :  { %6844 = vmatpush3.bf16.msra.mxu0 %v13775_v27  ;;  %v13820_v27 = vld [vmem:[#allocation180_spill] sm:$0xff] }
 0x92b   :  { %6845 = vmatprep.subr.bf16.mxu0 %v13776_v31  ;;  %v13821_v31 = vld [vmem:[#allocation124_spill] sm:$0xff] }
 0x92c   :  { %6780 = vmatpush3.bf16.msra.mxu1 %v13777_v51  ;;  %v13822_v51 = vld [vmem:[#allocation133_spill] sm:$0xff] }
 0x92d   :  { %6781 = vmatprep.subr.bf16.mxu1 %v13778_v1  ;;  %v13823_v1 = vld [vmem:[#allocation172_spill] sm:$0xff] }
 0x92e   :  { %6846 = vmatpush3.bf16.msra.mxu0 %v13779_v62  ;;  %v13824_v62 = vld [vmem:[#allocation181_spill] sm:$0xff] }
 0x92f   :  { %6847 = vmatprep.subr.bf16.mxu0 %v13780_v48  ;;  %v13825_v48 = vld [vmem:[#allocation125_spill] sm:$0xff] }
 0x930   :  { %6782 = vmatpush3.bf16.msra.mxu1 %v13781_v28  ;;  %v13826_v28 = vld [vmem:[#allocation134_spill] sm:$0xff] }
 0x931   :  { %6783 = vmatprep.subr.bf16.mxu1 %v13782_v57  ;;  %v13828_v57 = vld [vmem:[#allocation182_spill] sm:$0xff] }
 0x932   :  { %6848 = vmatpush3.bf16.msra.mxu0 %v13783_v2  ;;  %v13829_v2 = vld [vmem:[#allocation126_spill] sm:$0xff] }
 0x933   :  { %6849 = vmatprep.subr.bf16.mxu0 %v13784_v55  ;;  %v13831_v55 = vld [vmem:[#allocation174_spill] sm:$0xff] }
 0x934   :  { %6784 = vmatpush3.bf16.msra.mxu1 %v13785_v17  ;;  %v13833_v17 = vld [vmem:[#allocation127_spill] sm:$0xff] }
 0x935   :  { %6813 = vmatprep.subr.bf16.mxu1 %v13786_v30  ;;  %v13835_v30 = vld [vmem:[#allocation175_spill] sm:$0xff] }
 0x936   :  { %6850 = vmatpush3.bf16.msra.mxu0 %v13787_v53  ;;  %v13836_v53 = vld [vmem:[#allocation184_spill] sm:$0xff] }
 0x937   :  { %5290 = vmatmul.mubr.bf16.vlgmr.msra.gmra.mrb[40].mxu1 %v12304_v38  ;;  %6879 = vmatprep.subr.bf16.mxu0 %v13788_v60  ;;  %v13795_v38 = vld [vmem:[#allocation141_spill] sm:$0xff]  ;;  %v13837_v60 = vld [vmem:[#allocation128_spill] sm:$0xff] }
 0x938   :  { %6814 = vmatpush3.bf16.msra.mxu1 %v13789_v21  ;;  %5369 = vmatprep.mubr.bf16.mxu1 %v12404_v63  ;;  %v13798_v63 = vld [vmem:[#allocation103_spill] sm:$0xff]  ;;  %v13838_v21 = vld [vmem:[#allocation137_spill] sm:$0xff] }
 0x939   :  { %6815 = vmatprep.subr.bf16.mxu1 %v13790_v46  ;;  %5410 = vmatmul.mubr.bf16.vlgmr.msra.gmra.mrb[72].mxu0 %v12316_v37  ;;  %v13800_v37 = vld [vmem:[#allocation151_spill] sm:$0xff]  ;;  %v13839_v46 = vld [vmem:[#allocation176_spill] sm:$0xff] }
 0x93a   :  { %6880 = vmatpush3.bf16.msra.mxu0 %v13791_v61  ;;  %5489 = vmatprep.mubr.bf16.mxu0 %v12421_v8  ;;  %v13802_v8 = vld [vmem:[#allocation104_spill] sm:$0xff]  ;;  %v13840_v61 = vld [vmem:[#allocation185_spill] sm:$0xff] }
 0x93b   :  { %6881 = vmatprep.subr.bf16.mxu0 %v13792_v18  ;;  %v13841_v18 = vld [vmem:[#allocation129_spill] sm:$0xff] }
 0x93c   :  { %6816 = vmatpush3.bf16.msra.mxu1 %v13793_v23  ;;  %v13842_v23 = vld [vmem:[#allocation138_spill] sm:$0xff] }
 0x93d   :  { %6817 = vmatprep.subr.bf16.mxu1 %v13794_v49  ;;  %v13843_v49 = vld [vmem:[#allocation177_spill] sm:$0xff] }
 0x93e   :  { %6882 = vmatpush3.bf16.msra.mxu0 %v13795_v38  ;;  %v13844_v38 = vld [vmem:[#allocation186_spill] sm:$0xff] }
 0x93f   :  { %6883 = vmatprep.subr.bf16.mxu0 %v13796_v45  ;;  %v13845_v45 = vld [vmem:[#allocation130_spill] sm:$0xff] }
 0x940   :  { %6818 = vmatpush3.bf16.msra.mxu1 %v13797_v3  ;;  %v13846_v3 = vld [vmem:[#allocation139_spill] sm:$0xff] }
 0x941   :  { %6819 = vmatprep.subr.bf16.mxu1 %v13798_v63  ;;  %v13847_v63 = vld [vmem:[#allocation178_spill] sm:$0xff] }
 0x942   :  { %6884 = vmatpush3.bf16.msra.mxu0 %v13799_v32  ;;  %v13848_v32 = vld [vmem:[#allocation187_spill] sm:$0xff] }
 0x943   :  { %6885 = vmatprep.subr.bf16.mxu0 %v13800_v37  ;;  %v13849_v37 = vld [vmem:[#allocation131_spill] sm:$0xff] }
 0x944   :  { %6820 = vmatpush3.bf16.msra.mxu1 %v13801_v42  ;;  %v13850_v42 = vld [vmem:[#allocation164_spill] sm:$0xff] }
 0x945   :  { %6821 = vmatprep.subr.bf16.mxu1 %v13802_v8  ;;  %v13851_v8 = vld [vmem:[#allocation179_spill] sm:$0xff] }
 0x946   :  { %6886 = vmatpush3.bf16.msra.mxu0 %v13803_v13  ;;  %v13852_v13 = vld [vmem:[#allocation212_spill] sm:$0xff] }
 0x947   :  { %6887 = vmatprep.subr.bf16.mxu0 %v13804_v22  ;;  %v13853_v22 = vld [vmem:[#allocation156_spill] sm:$0xff] }
 0x948   :  { %6822 = vmatpush3.bf16.msra.mxu1 %v13805_v15  ;;  %v13854_v15 = vld [vmem:[#allocation165_spill] sm:$0xff] }
 0x949   :  { %6823 = vmatprep.subr.bf16.mxu1 %v13806_v43  ;;  %v13855_v43 = vld [vmem:[#allocation204_spill] sm:$0xff] }
 0x94a   :  { %6888 = vmatpush3.bf16.msra.mxu0 %v13807_v14  ;;  %v13856_v14 = vld [vmem:[#allocation213_spill] sm:$0xff] }
 0x94b   :  { %6889 = vmatprep.subr.bf16.mxu0 %v13808_v25  ;;  %v13857_v25 = vld [vmem:[#allocation157_spill] sm:$0xff] }
 0x94c   :  { %6824 = vmatpush3.bf16.msra.mxu1 %v13809_v29  ;;  %v13858_v29 = vld [vmem:[#allocation166_spill] sm:$0xff] }
 0x94d   :  { %6825 = vmatprep.subr.bf16.mxu1 %v13810_v10  ;;  %v13860_v10 = vld [vmem:[#allocation214_spill] sm:$0xff] }
 0x94e   :  { %6890 = vmatpush3.bf16.msra.mxu0 %v13811_v0  ;;  %v13861_v0 = vld [vmem:[#allocation158_spill] sm:$0xff] }
 0x94f   :  { %6891 = vmatprep.subr.bf16.mxu0 %v13812_v39  ;;  %v13863_v39 = vld [vmem:[#allocation206_spill] sm:$0xff] }
 0x950   :  { %6826 = vmatpush3.bf16.msra.mxu1 %v13813_v47  ;;  %v13865_v47 = vld [vmem:[#allocation159_spill] sm:$0xff] }
 0x951   :  { %6827 = vmatprep.subr.bf16.mxu1 %v13814_v44  ;;  %v13867_v44 = vld [vmem:[#allocation207_spill] sm:$0xff] }
 0x952   :  { %6892 = vmatpush3.bf16.msra.mxu0 %v13815_v6  ;;  %v13868_v6 = vld [vmem:[#allocation216_spill] sm:$0xff] }
 0x953   :  { %6893 = vmatprep.subr.bf16.mxu0 %v13816_v4  ;;  %v13869_v4 = vld [vmem:[#allocation160_spill] sm:$0xff] }
 0x954   :  { %6828 = vmatpush3.bf16.msra.mxu1 %v13817_v24  ;;  %v13870_v24 = vld [vmem:[#allocation169_spill] sm:$0xff] }
 0x955   :  { %6857 = vmatprep.subr.bf16.mxu1 %v13818_v41  ;;  %v13871_v41 = vld [vmem:[#allocation208_spill] sm:$0xff] }
 0x956   :  { %6894 = vmatpush3.bf16.msra.mxu0 %v13819_v9  ;;  %v13872_v9 = vld [vmem:[#allocation217_spill] sm:$0xff] }
 0x957   :  { %5370 = vmatmul.mubr.bf16.vlgmr.msra.gmra.mrb[44].mxu1 %v12312_v54  ;;  %6923 = vmatprep.subr.bf16.mxu0 %v13820_v27  ;;  %v13827_v54 = vld [vmem:[#allocation173_spill] sm:$0xff] }
 0x958   :  { %6858 = vmatpush3.bf16.msra.mxu1 %v13821_v31  ;;  %5449 = vmatprep.mubr.bf16.mxu1 %v12416_v35  ;;  %v13830_v35 = vld [vmem:[#allocation135_spill] sm:$0xff]  ;;  %v13873_v27 = vld [vmem:[#allocation161_spill] sm:$0xff]  ;;  %v13874_v31 = vld [vmem:[#allocation170_spill] sm:$0xff] }
 0x959   :  { %6859 = vmatprep.subr.bf16.mxu1 %v13822_v51  ;;  %5490 = vmatmul.mubr.bf16.vlgmr.msra.gmra.mrb[76].mxu0 %v12324_v50  ;;  %v13832_v50 = vld [vmem:[#allocation183_spill] sm:$0xff]  ;;  %v13875_v51 = vld [vmem:[#allocation209_spill] sm:$0xff] }
 0x95a   :  { %6924 = vmatpush3.bf16.msra.mxu0 %v13823_v1  ;;  %5569 = vmatprep.mubr.bf16.mxu0 %v12431_v16  ;;  %v13834_v16 = vld [vmem:[#allocation136_spill] sm:$0xff]  ;;  %v13876_v1 = vld [vmem:[#allocation218_spill] sm:$0xff] }
 0x95b   :  { %6925 = vmatprep.subr.bf16.mxu0 %v13824_v62  ;;  %v13877_v62 = vld [vmem:[#allocation162_spill] sm:$0xff] }
 0x95c   :  { %6860 = vmatpush3.bf16.msra.mxu1 %v13825_v48  ;;  %v13878_v48 = vld [vmem:[#allocation171_spill] sm:$0xff] }
 0x95d   :  { %6861 = vmatprep.subr.bf16.mxu1 %v13826_v28  ;;  %v13879_v28 = vld [vmem:[#allocation210_spill] sm:$0xff] }
 0x95e   :  { %6926 = vmatpush3.bf16.msra.mxu0 %v13827_v54  ;;  %v13880_v54 = vld [vmem:[#allocation219_spill] sm:$0xff] }
 0x95f   :  { %6927 = vmatprep.subr.bf16.mxu0 %v13828_v57  ;;  %v13881_v57 = vld [vmem:[#allocation163_spill] sm:$0xff] }
 0x960   :  { %6862 = vmatpush3.bf16.msra.mxu1 %v13829_v2  ;;  %v13882_v2 = vld [vmem:[#allocation196_spill] sm:$0xff] }
 0x961   :  { %6863 = vmatprep.subr.bf16.mxu1 %v13830_v35  ;;  %v13883_v35 = vld [vmem:[#allocation211_spill] sm:$0xff] }
 0x962   :  { %6928 = vmatpush3.bf16.msra.mxu0 %v13831_v55  ;;  %v13884_v55 = vld [vmem:[#allocation244_spill] sm:$0xff] }
 0x963   :  { %6929 = vmatprep.subr.bf16.mxu0 %v13832_v50  ;;  %v13885_v50 = vld [vmem:[#allocation188_spill] sm:$0xff] }
 0x964   :  { %6864 = vmatpush3.bf16.msra.mxu1 %v13833_v17  ;;  %v13886_v17 = vld [vmem:[#allocation197_spill] sm:$0xff] }
 0x965   :  { %6865 = vmatprep.subr.bf16.mxu1 %v13834_v16  ;;  %v13887_v16 = vld [vmem:[#allocation236_spill] sm:$0xff] }
 0x966   :  { %6930 = vmatpush3.bf16.msra.mxu0 %v13835_v30  ;;  %v13888_v30 = vld [vmem:[#allocation245_spill] sm:$0xff] }
 0x967   :  { %6931 = vmatprep.subr.bf16.mxu0 %v13836_v53  ;;  %v13889_v53 = vld [vmem:[#allocation189_spill] sm:$0xff] }
 0x968   :  { %6866 = vmatpush3.bf16.msra.mxu1 %v13837_v60  ;;  %v13890_v60 = vld [vmem:[#allocation198_spill] sm:$0xff] }
 0x969   :  { %6867 = vmatprep.subr.bf16.mxu1 %v13838_v21  ;;  %v13892_v21 = vld [vmem:[#allocation246_spill] sm:$0xff] }
 0x96a   :  { %6932 = vmatpush3.bf16.msra.mxu0 %v13839_v46  ;;  %v13893_v46 = vld [vmem:[#allocation190_spill] sm:$0xff] }
 0x96b   :  { %6933 = vmatprep.subr.bf16.mxu0 %v13840_v61  ;;  %v13895_v61 = vld [vmem:[#allocation238_spill] sm:$0xff] }
 0x96c   :  { %6868 = vmatpush3.bf16.msra.mxu1 %v13841_v18  ;;  %v13897_v18 = vld [vmem:[#allocation191_spill] sm:$0xff] }
 0x96d   :  { %6869 = vmatprep.subr.bf16.mxu1 %v13842_v23  ;;  %v13899_v23 = vld [vmem:[#allocation239_spill] sm:$0xff] }
 0x96e   :  { %6934 = vmatpush3.bf16.msra.mxu0 %v13843_v49  ;;  %v13900_v49 = vld [vmem:[#allocation248_spill] sm:$0xff] }
 0x96f   :  { %6935 = vmatprep.subr.bf16.mxu0 %v13844_v38  ;;  %v13901_v38 = vld [vmem:[#allocation192_spill] sm:$0xff] }
 0x970   :  { %6870 = vmatpush3.bf16.msra.mxu1 %v13845_v45  ;;  %v13902_v45 = vld [vmem:[#allocation201_spill] sm:$0xff] }
 0x971   :  { %6871 = vmatprep.subr.bf16.mxu1 %v13846_v3  ;;  %v13903_v3 = vld [vmem:[#allocation240_spill] sm:$0xff] }
 0x972   :  { %6936 = vmatpush3.bf16.msra.mxu0 %v13847_v63  ;;  %v13904_v63 = vld [vmem:[#allocation249_spill] sm:$0xff] }
 0x973   :  { %6937 = vmatprep.subr.bf16.mxu0 %v13848_v32  ;;  %v13905_v32 = vld [vmem:[#allocation193_spill] sm:$0xff] }
 0x974   :  { %6872 = vmatpush3.bf16.msra.mxu1 %v13849_v37  ;;  %v13906_v37 = vld [vmem:[#allocation202_spill] sm:$0xff] }
 0x975   :  { %6901 = vmatprep.subr.bf16.mxu1 %v13850_v42  ;;  %v13907_v42 = vld [vmem:[#allocation241_spill] sm:$0xff] }
 0x976   :  { %6938 = vmatpush3.bf16.msra.mxu0 %v13851_v8  ;;  %v13908_v8 = vld [vmem:[#allocation250_spill] sm:$0xff] }
 0x977   :  { %5450 = vmatmul.mubr.bf16.vlgmr.msra.gmra.mrb[48].mxu1 %v12320_v7  ;;  %6967 = vmatprep.subr.bf16.mxu0 %v13852_v13  ;;  %v13859_v7 = vld [vmem:[#allocation205_spill] sm:$0xff]  ;;  %v13909_v13 = vld [vmem:[#allocation194_spill] sm:$0xff] }
 0x978   :  { %6902 = vmatpush3.bf16.msra.mxu1 %v13853_v22  ;;  %5529 = vmatprep.mubr.bf16.mxu1 %v12426_v56  ;;  %v13862_v56 = vld [vmem:[#allocation167_spill] sm:$0xff] }
 0x979   :  { %6903 = vmatprep.subr.bf16.mxu1 %v13854_v15  ;;  %5570 = vmatmul.mubr.bf16.vlgmr.msra.gmra.mrb[80].mxu0 %v12332_v59  ;;  %v13864_v59 = vld [vmem:[#allocation215_spill] sm:$0xff]  ;;  %v13911_v15 = vld [vmem:[#allocation242_spill] sm:$0xff] }
 0x97a   :  { %6968 = vmatpush3.bf16.msra.mxu0 %v13855_v43  ;;  %5649 = vmatprep.mubr.bf16.mxu0 %v12441_v34  ;;  %v13866_v34 = vld [vmem:[#allocation168_spill] sm:$0xff]  ;;  %v13910_v22 = vld [vmem:[#allocation203_spill] sm:$0xff] }
 0x97b   :  { %6969 = vmatprep.subr.bf16.mxu0 %v13856_v14  ;;  %v13912_v43 = vld [vmem:[#allocation251_spill] sm:$0xff] }
 0x97c   :  { %6904 = vmatpush3.bf16.msra.mxu1 %v13857_v25  ;;  %v13913_v14 = vld [vmem:[#allocation195_spill] sm:$0xff]  ;;  %v13914_v25 = vld [vmem:[#allocation228_spill] sm:$0xff] }
 0x97d   :  { %6905 = vmatprep.subr.bf16.mxu1 %v13858_v29  ;;  %v13915_v29 = vld [vmem:[#allocation243_spill] sm:$0xff] }
 0x97e   :  { %6970 = vmatpush3.bf16.msra.mxu0 %v13859_v7  ;;  %v7600_v7 = vld [vmem:[%s12971_s10] sm:$0xff]  }
 0x97f   :  { %6971 = vmatprep.subr.bf16.mxu0 %v13860_v10  ;;  %v7718_v10 = vmov 0.0  }
 0x980   :  { %6906 = vmatpush3.bf16.msra.mxu1 %v13861_v0  ;;  %v13916_v0 = vld [vmem:[#allocation220_spill] sm:$0xff] }
 0x981   :  { %6907 = vmatprep.subr.bf16.mxu1 %v13862_v56  ;;  %v13917_v56 = vld [vmem:[#allocation229_spill] sm:$0xff] }
 0x982   :  { %6972 = vmatpush3.bf16.msra.mxu0 %v13863_v39  ;;  %v7601_v39 = vld [vmem:[%s12971_s10 + $0x8] sm:$0xff]  }
 0x983   :  { %6973 = vmatprep.subr.bf16.mxu0 %v13864_v59  ;;  %v13919_v59 = vld [vmem:[#allocation230_spill] sm:$0xff] }
 0x984   :  { %6908 = vmatpush3.bf16.msra.mxu1 %v13865_v47  ;;  %v12741_v47 = vld [vmem:[%s12972_s11] sm:$0xff]  }
 0x985   :  { %6909 = vmatprep.subr.bf16.mxu1 %v13866_v34  ;;  %v13921_v34 = vld [vmem:[#allocation231_spill] sm:$0xff] }
 0x986   :  { %6974 = vmatpush3.bf16.msra.mxu0 %v13867_v44  ;;  %v13922_v44 = vld [vmem:[#allocation223_spill] sm:$0xff] }
 0x987   :  { %6975 = vmatprep.subr.bf16.mxu0 %v13868_v6  ;;  %v12753_v6 = vld [vmem:[%s12972_s11 + $0x8] sm:$0xff]   ;;  %s6485_s11 = sshll.u32 %s7721_s27, 4  ;;  %s6486_s11 = int_to_ptr.vmem [resolvable:$true] %s6485_s11 }
 0x988   :  { %6910 = vmatpush3.bf16.msra.mxu1 %v13869_v4  ;;  %v13923_v4 = vld [vmem:[#allocation232_spill] sm:$0xff]  ;;  %s7661_s8 = scalar_lea.vmem %s6486_s11, 32  ;;  %p7666_p1 = scmp.lt.s32.totalorder %s6486_s11, %s6486_s11 }
 0x989   :  { %6911 = vmatprep.subr.bf16.mxu1 %v13870_v24  ;;  %v13924_v24 = vld [vmem:[#allocation224_spill] sm:$0xff]  ;;  %p7662_p0 = scmp.ne.s32.totalorder %s6486_s11, %s7661_s8  ;;  %p7667_p2 = scmp.lt.s32.totalorder %s7661_s8, %s7661_s8 }
 0x98a   :  { %6976 = vmatpush3.bf16.msra.mxu0 %v13871_v41  ;;  %v13925_v41 = vld [vmem:[#allocation233_spill] sm:$0xff] }
 0x98b   :  { %6977 = vmatprep.subr.bf16.mxu0 %v13872_v9  ;;  %p7668_p3 = por %p7667_p2, %p7666_p1 }
 0x98c   :  { %6912 = vmatpush3.bf16.msra.mxu1 %v13873_v27 }
 0x98d   :  { %6913 = vmatprep.subr.bf16.mxu1 %v13874_v31  ;;  %p7669_p4 = pnand %p7668_p3, %p7662_p0 }
 0x98e   :  { %6978 = vmatpush3.bf16.msra.mxu0 %v13875_v51 }
 0x98f   :  { %6979 = vmatprep.subr.bf16.mxu0 %v13876_v1  ;;  %v13926_v1 = vld [vmem:[#allocation225_spill] sm:$0xff] }
 0x990   :  { %6914 = vmatpush3.bf16.msra.mxu1 %v13877_v62 }
 0x991   :  { %6915 = vmatprep.subr.bf16.mxu1 %v13878_v48 }
 0x992   :  { %6980 = vmatpush3.bf16.msra.mxu0 %v13879_v28  ;;  %v13927_v28 = vld [vmem:[#allocation234_spill] sm:$0xff] }
 0x993   :  { %6981 = vmatprep.subr.bf16.mxu0 %v13880_v54 }
 0x994   :  { %6916 = vmatpush3.bf16.msra.mxu1 %v13881_v57 }
 0x995   :  { %6945 = vmatprep.subr.bf16.mxu1 %v13882_v2 }
 0x996   :  { %6982 = vmatpush3.bf16.msra.mxu0 %v13883_v35 }
 0x997   :  { %5530 = vmatmul.mubr.bf16.vlgmr.msra.gmra.mrb[52].mxu1 %v12328_v26  ;;  %7011 = vmatprep.subr.bf16.mxu0 %v13884_v55  ;;  %v13891_v26 = vld [vmem:[#allocation237_spill] sm:$0xff]  ;;  %v13928_v55 = vld [vmem:[#allocation226_spill] sm:$0xff] }
 0x998   :  { %6946 = vmatpush3.bf16.msra.mxu1 %v13885_v50  ;;  %5609 = vmatprep.mubr.bf16.mxu1 %v12436_v58  ;;  %v13894_v58 = vld [vmem:[#allocation199_spill] sm:$0xff] }
 0x999   :  { %6947 = vmatprep.subr.bf16.mxu1 %v13886_v17  ;;  %5650 = vmatmul.mubr.bf16.vlgmr.msra.gmra.mrb[84].mxu0 %v12341_v11  ;;  %v13896_v11 = vld [vmem:[#allocation247_spill] sm:$0xff] }
 0x99a   :  { %7012 = vmatpush3.bf16.msra.mxu0 %v13887_v16  ;;  %5729 = vmatprep.mubr.bf16.mxu0 %v12451_v19  ;;  %v13898_v19 = vld [vmem:[#allocation200_spill] sm:$0xff]  ;;  %v13929_v50 = vld [vmem:[#allocation235_spill] sm:$0xff] }
 0x99b   :  { %7013 = vmatprep.subr.bf16.mxu0 %v13888_v30  ;;  %v13930_v17 = vld [vmem:[#allocation227_spill] sm:$0xff]  ;;  %v13931_v16 = vld [vmem:[#allocation260_spill] sm:$0xff]  ;;  %v13932_v30 = vld [vmem:[#allocation306_spill] sm:$0xff] }
 0x99c   :  { %6948 = vmatpush3.bf16.msra.mxu1 %v13889_v53  ;;  %v13933_v53 = vld [vmem:[#allocation252_spill] sm:$0xff] }
 0x99d   :  { %6949 = vmatprep.subr.bf16.mxu1 %v13890_v60  ;;  %v13934_v60 = vld [vmem:[#allocation261_spill] sm:$0xff] }
 0x99e   :  { %7014 = vmatpush3.bf16.msra.mxu0 %v13891_v26  ;;  %v13935_v26 = vld [vmem:[#allocation253_spill] sm:$0xff] }
 0x99f   :  { %7015 = vmatprep.subr.bf16.mxu0 %v13892_v21  ;;  %v13936_v21 = vld [vmem:[#allocation262_spill] sm:$0xff] }
 0x9a0   :  { %6950 = vmatpush3.bf16.msra.mxu1 %v13893_v46  ;;  %v13937_v46 = vld [vmem:[#allocation254_spill] sm:$0xff] }
 0x9a1   :  { %6951 = vmatprep.subr.bf16.mxu1 %v13894_v58  ;;  %v13938_v58 = vld [vmem:[#allocation263_spill] sm:$0xff] }
 0x9a2   :  { %7016 = vmatpush3.bf16.msra.mxu0 %v13895_v61  ;;  %v13939_v61 = vld [vmem:[#allocation255_spill] sm:$0xff] }
 0x9a3   :  { %7017 = vmatprep.subr.bf16.mxu0 %v13896_v11  ;;  %v13940_v11 = vld [vmem:[#allocation264_spill] sm:$0xff] }
 0x9a4   :  { %6952 = vmatpush3.bf16.msra.mxu1 %v13897_v18  ;;  %v13941_v18 = vld [vmem:[#allocation256_spill] sm:$0xff] }
 0x9a5   :  { %6953 = vmatprep.subr.bf16.mxu1 %v13898_v19  ;;  %v13942_v19 = vld [vmem:[#allocation265_spill] sm:$0xff] }
 0x9a6   :  { %7018 = vmatpush3.bf16.msra.mxu0 %v13899_v23 }
 0x9a7   :  { %7019 = vmatprep.subr.bf16.mxu0 %v13900_v49 }
 0x9a8   :  { %6954 = vmatpush3.bf16.msra.mxu1 %v13901_v38 }
 0x9a9   :  { %6955 = vmatprep.subr.bf16.mxu1 %v13902_v45  ;;  %v13943_v45 = vld [vmem:[#allocation257_spill] sm:$0xff] }
 0x9aa   :  { %7020 = vmatpush3.bf16.msra.mxu0 %v13903_v3 }
 0x9ab   :  { %7021 = vmatprep.subr.bf16.mxu0 %v13904_v63 }
 0x9ac   :  { %6956 = vmatpush3.bf16.msra.mxu1 %v13905_v32  ;;  %v13944_v32 = vld [vmem:[#allocation266_spill] sm:$0xff] }
 0x9ad   :  { %6957 = vmatprep.subr.bf16.mxu1 %v13906_v37 }
 0x9ae   :  { %7022 = vmatpush3.bf16.msra.mxu0 %v13907_v42 }
 0x9af   :  { %7023 = vmatprep.subr.bf16.mxu0 %v13908_v8 }
 0x9b0   :  { %6958 = vmatpush3.bf16.msra.mxu1 %v13909_v13 }
 0x9b1   :  { %6959 = vmatprep.subr.bf16.mxu1 %v13910_v22 }
 0x9b2   :  { %7024 = vmatpush3.bf16.msra.mxu0 %v13911_v15 }
 0x9b3   :  { %7025 = vmatprep.subr.bf16.mxu0 %v13912_v43  ;;  %v13945_v43 = vld [vmem:[#allocation258_spill] sm:$0xff] }
 0x9b4   :  { %6960 = vmatpush3.bf16.msra.mxu1 %v13913_v14  ;;  %v13946_v14 = vld [vmem:[#allocation267_spill] sm:$0xff] }
 0x9b5   :  { %6989 = vmatprep.subr.bf16.mxu1 %v13914_v25  ;;  %v13947_v25 = vld [vmem:[#allocation259_spill] sm:$0xff] }
 0x9b6   :  { %7026 = vmatpush3.bf16.msra.mxu0 %v13915_v29 }
 0x9b7   :  { %5610 = vmatmul.mubr.bf16.vlgmr.msra.gmra.mrb[56].mxu1 %v12337_v12  ;;  %7153 = vmatprep.subr.bf16.mxu0 %v7718_v10  ;;  %v13918_v12 = vld [vmem:[#allocation221_spill] sm:$0xff] }
 0x9b8   :  { %6990 = vmatpush3.bf16.msra.mxu1 %v13916_v0  ;;  %5689 = vmatprep.mubr.bf16.mxu1 %v12446_v52  ;;  %v7603_v52 = vld [vmem:[%s12962_s1] sm:$0xff]  }
 0x9b9   :  { %6991 = vmatprep.subr.bf16.mxu1 %v13917_v56  ;;  %5730 = vmatmul.mubr.bf16.vlgmr.msra.gmra.mrb[88].mxu0 %v12357_v20  ;;  %v13920_v20 = vld [vmem:[#allocation222_spill] sm:$0xff] }
 0x9ba   :  { %7154 = vmatpush3.bf16.msra.mxu0 %v7600_v7  ;;  %7157 = vmatprep.mubr.msk.bf16.mxu0 %vm7719_vm10, %v7718_v10 }
 0x9bb   :  { %7155 = vmatprep.subr.bf16.mxu0 %v7718_v10 }
 0x9bc   :  { %6992 = vmatpush3.bf16.msra.mxu1 %v13918_v12 }
 0x9bd   :  { %6993 = vmatprep.subr.bf16.mxu1 %v13919_v59 }
 0x9be   :  { %7156 = vmatpush3.bf16.msra.mxu0 %v7601_v39 }
 0x9bf   :  { %7177 = vmatprep.subr.bf16.mxu0 %v7718_v10 }
 0x9c0   :  { %6994 = vmatpush3.bf16.msra.mxu1 %v13920_v20 }
 0x9c1   :  { %6995 = vmatprep.subr.bf16.mxu1 %v13921_v34  ;;  %7158 = vmatmul.mubr.msk.bf16.vlgmr.msra.gmra.mrb[92].mxu0 %vm5838_vm11, %v7603_v52 }
 0x9c2   :  { %7178 = vmatpush3.bf16.msra.mxu0 %v12741_v47  ;;  %7161 = vmatprep.mubr.msk.bf16.mxu0 %vm7719_vm10, %v7718_v10 }
 0x9c3   :  { %7179 = vmatprep.subr.bf16.mxu0 %v7718_v10 }
 0x9c4   :  { %6996 = vmatpush3.bf16.msra.mxu1 %v13922_v44 }
 0x9c5   :  { %6997 = vmatprep.subr.bf16.mxu1 %v13923_v4 }
 0x9c6   :  { %7180 = vmatpush3.bf16.msra.mxu0 %v12753_v6 }
 0x9c7   :  { %7193 = vmatprep.subr.bf16.mxu0 %v7718_v10 }
 0x9c8   :  { %6998 = vmatpush3.bf16.msra.mxu1 %v13924_v24 }
 0x9c9   :  { %6999 = vmatprep.subr.bf16.mxu1 %v13925_v41 }
 0x9ca   :  { %v6719_v9 = vpop.f32.mrb[32].mxu1 }
 0x9cb   :  { %v6720_v27 = vpop.f32.mrb[33].mxu1 }
 0x9cc   :  { %v6721_v31 = vadd.f32 %v6720_v27, %v6719_v9  ;;  %v6722_v51 = vpop.f32.mrb[34].mxu1  ;;  %7000 = vmatpush3.bf16.msra.mxu1 %v13926_v1  ;;  %v6763_v62 = vpop.f32.mrb[64].mxu0 }
 0x9cd   :  { %v6723_v48 = vpop.f32.mrb[35].mxu1  ;;  %7001 = vmatprep.subr.bf16.mxu1 %v13927_v28  ;;  %v6764_v54 = vpop.f32.mrb[65].mxu0 }
 0x9ce   :  { %v6765_v57 = vadd.f32 %v6764_v54, %v6763_v62  ;;  %v6766_v2 = vpop.f32.mrb[66].mxu0 }
 0x9cf   :  { %v6767_v35 = vpop.f32.mrb[67].mxu0 }
 0x9d0   :  { %7002 = vmatpush3.bf16.msra.mxu1 %v13928_v55 }
 0x9d1   :  { %7003 = vmatprep.subr.bf16.mxu1 %v13929_v50 }
 0x9d4   :  { %7004 = vmatpush3.bf16.msra.mxu1 %v13930_v17 }
 0x9d5   :  { %7033 = vmatprep.subr.bf16.mxu1 %v13931_v16 }
 0x9d7   :  { %5690 = vmatmul.mubr.bf16.vlgmr.msra.gmra.mrb[60].mxu1 %v13932_v30 }
 0x9d8   :  { %7034 = vmatpush3.bf16.msra.mxu1 %v13933_v53  ;;  %5769 = vmatprep.mubr.bf16.mxu1 %v12456_v33 }
 0x9d9   :  { %7035 = vmatprep.subr.bf16.mxu1 %v13934_v60 }
 0x9dc   :  { %7036 = vmatpush3.bf16.msra.mxu1 %v13935_v26 }
 0x9dd   :  { %7037 = vmatprep.subr.bf16.mxu1 %v13936_v21 }
 0x9e0   :  { %7038 = vmatpush3.bf16.msra.mxu1 %v13937_v46  ;;  %v5905_v46 = vld [vmem:[%s12963_s2] sm:$0xff] }
 0x9e1   :  { %7039 = vmatprep.subr.bf16.mxu1 %v13938_v58  ;;  %vm5911_vm12 = vcmp.gt.f32.partialorder %v5905_v46, 0.0 }
 0x9e2   :  { %v5995_v58 = vsel %vm5911_vm12, 1, %v13688_v5 }
 0x9e3   :  { %5997 = vperm.xlu1 %7598, %v5995_v58   ;;  %v7605_v58 = vld [vmem:[%s12962_s1 + $0x8] sm:$0xff]  }
 0x9e4   :  { %7040 = vmatpush3.bf16.msra.mxu1 %v13939_v61  ;;  %7162 = vmatmul.mubr.msk.bf16.gmra.mrb[96].mxu0 %vm5838_vm11, %v7605_v58 }
 0x9e5   :  { %7041 = vmatprep.subr.bf16.mxu1 %v13940_v11  ;;  %7165 = vmatprep.mubr.msk.bf16.mxu0 %vm7719_vm10, %v7718_v10 }
 0x9e8   :  { %7042 = vmatpush3.bf16.msra.mxu1 %v13941_v18 }
 0x9e9   :  { %7043 = vmatprep.subr.bf16.mxu1 %v13942_v19 }
 0x9ea   :  { %v6741_v23 = vpop.f32.mrb[36].mxu1 }
 0x9eb   :  { %v6742_v33 = vpop.f32.mrb[37].mxu1 }
 0x9ec   :  { %v6743_v49 = vadd.f32 %v6742_v33, %v6741_v23  ;;  %v6744_v38 = vpop.f32.mrb[38].mxu1  ;;  %7044 = vmatpush3.bf16.msra.mxu1 %v13943_v45  ;;  %v6807_v3 = vpop.f32.mrb[68].mxu0 }
 0x9ed   :  { %v6745_v63 = vpop.f32.mrb[39].mxu1  ;;  %7045 = vmatprep.subr.bf16.mxu1 %v13944_v32  ;;  %v6808_v37 = vpop.f32.mrb[69].mxu0 }
 0x9ee   :  { %v5212_v42 = vadd.f32 %v6743_v49, %v6721_v31  ;;  %v6809_v8 = vadd.f32 %v6808_v37, %v6807_v3  ;;  %v6810_v13 = vpop.f32.mrb[70].mxu0 }
 0x9ef   :  { %v6811_v22 = vpop.f32.mrb[71].mxu0 }
 0x9f0   :  { %v5252_v15 = vadd.f32 %v6765_v57, %v5212_v42  ;;  %7046 = vmatpush3.bf16.msra.mxu1 %v13945_v43 }
 0x9f1   :  { %7047 = vmatprep.subr.bf16.mxu1 %v13946_v14 }
 0x9f4   :  { %7048 = vmatpush3.bf16.msra.mxu1 %v13947_v25 }
 0x9f5   :  { %7169 = vmatprep.subr.bf16.mxu1 %v7718_v10 }
 0x9f7   :  { %5770 = vmatmul.mubr.bf16.vlgmr.msra.gmra.mrb[64].mxu1 %v12460_v40 }
 0x9f8   :  { %7170 = vmatpush3.bf16.msra.mxu1 %v12741_v47  ;;  %7173 = vmatprep.mubr.msk.bf16.mxu1 %vm7719_vm10, %v7718_v10 }
 0x9f9   :  { %7171 = vmatprep.subr.bf16.mxu1 %v7718_v10 }
 0x9fc   :  { %7172 = vmatpush3.bf16.msra.mxu1 %v12753_v6 }
 0x9fd   :  { %7185 = vmatprep.subr.bf16.mxu1 %v7718_v10 }
 0x9ff   :  { %7174 = vmatmul.mubr.bf16.vlgmr.msra.gmra.mrb[68].mxu1 %v13688_v5 }
 0xa00   :  { %7186 = vmatpush3.bf16.msra.mxu1 %v12741_v47  ;;  %7189 = vmatprep.mubr.msk.bf16.mxu1 %vm7719_vm10, %v7718_v10 }
 0xa01   :  { %7187 = vmatprep.subr.bf16.mxu1 %v7718_v10 }
 0xa04   :  { %7188 = vmatpush3.bf16.msra.mxu1 %v12753_v6 }
 0xa05   :  { %7201 = vmatprep.subr.bf16.mxu1 %v7718_v10 }
 0xa0a   :  { %v6785_v40 = vpop.f32.mrb[40].mxu1 }
 0xa0b   :  { %v6786_v29 = vpop.f32.mrb[41].mxu1 }
 0xa0c   :  { %v6787_v7 = vadd.f32 %v6786_v29, %v6785_v40  ;;  %v6788_v0 = vpop.f32.mrb[42].mxu1  ;;  %v6851_v56 = vpop.f32.mrb[72].mxu0 }
 0xa0d   :  { %v6789_v39 = vpop.f32.mrb[43].mxu1  ;;  %v6852_v12 = vpop.f32.mrb[73].mxu0 }
 0xa0e   :  { %v5292_v59 = vadd.f32 %v6787_v7, %v5252_v15  ;;  %v6853_v52 = vadd.f32 %v6852_v12, %v6851_v56  ;;  %v6854_v20 = vpop.f32.mrb[74].mxu0 }
 0xa0f   :  { %v6855_v34 = vpop.f32.mrb[75].mxu0 }
 0xa10   :  { %v5332_v44 = vadd.f32 %v6809_v8, %v5292_v59 }
 0xa2a   :  { %v6829_v4 = vpop.f32.mrb[44].mxu1 }
 0xa2b   :  { %v6830_v24 = vpop.f32.mrb[45].mxu1 }
 0xa2c   :  { %v6831_v41 = vadd.f32 %v6830_v24, %v6829_v4  ;;  %v6832_v9 = vpop.f32.mrb[46].mxu1  ;;  %v6895_v27 = vpop.f32.mrb[76].mxu0 }
 0xa2d   :  { %v6833_v31 = vpop.f32.mrb[47].mxu1  ;;  %v6896_v51 = vpop.f32.mrb[77].mxu0 }
 0xa2e   :  { %v5372_v1 = vadd.f32 %v6831_v41, %v5332_v44  ;;  %v6897_v62 = vadd.f32 %v6896_v51, %v6895_v27  ;;  %v6898_v48 = vpop.f32.mrb[78].mxu0  ;;  %v12807_v51 = vld [vmem:[%s12973_s12] ss:$0 sm:$0xff]  ;;  %s7720_s12 = smov 32  }
 0xa2f   :  { %v6899_v28 = vpop.f32.mrb[79].mxu0 }
 0xa30   :  { %v5412_v54 = vadd.f32 %v6853_v52, %v5372_v1 }
 0xa4a   :  { %v6873_v57 = vpop.f32.mrb[48].mxu1 }
 0xa4b   :  { %v6874_v2 = vpop.f32.mrb[49].mxu1 }
 0xa4c   :  { %v6875_v35 = vadd.f32 %v6874_v2, %v6873_v57  ;;  %v6876_v55 = vpop.f32.mrb[50].mxu1  ;;  %v6939_v50 = vpop.f32.mrb[80].mxu0 }
 0xa4d   :  { %v6877_v17 = vpop.f32.mrb[51].mxu1  ;;  %v6940_v16 = vpop.f32.mrb[81].mxu0 }
 0xa4e   :  { %v5452_v30 = vadd.f32 %v6875_v35, %v5412_v54  ;;  %v6941_v53 = vadd.f32 %v6940_v16, %v6939_v50  ;;  %v6942_v60 = vpop.f32.mrb[82].mxu0 }
 0xa4f   :  { %v6943_v26 = vpop.f32.mrb[83].mxu0 }
 0xa50   :  { %v5492_v21 = vadd.f32 %v6897_v62, %v5452_v30 }
 0xa6a   :  { %v6917_v61 = vpop.f32.mrb[52].mxu1 }
 0xa6b   :  { %v6918_v11 = vpop.f32.mrb[53].mxu1 }
 0xa6c   :  { %v6919_v18 = vadd.f32 %v6918_v11, %v6917_v61  ;;  %v6920_v19 = vpop.f32.mrb[54].mxu1  ;;  %v6983_v23 = vpop.f32.mrb[84].mxu0  ;;  %v7606_v61 = vld [vmem:[%s12962_s1 + $0x10] sm:$0xff]  }
 0xa6d   :  { %v6921_v33 = vpop.f32.mrb[55].mxu1  ;;  %v6984_v49 = vpop.f32.mrb[85].mxu0  ;;  %7166 = vmatmul.mubr.msk.bf16.gmra.mrb[100].mxu0 %vm5838_vm11, %v7606_v61 }
 0xa6e   :  { %v5532_v38 = vadd.f32 %v6919_v18, %v5492_v21  ;;  %v6985_v45 = vadd.f32 %v6984_v49, %v6983_v23  ;;  %v6986_v3 = vpop.f32.mrb[86].mxu0  ;;  %7181 = vmatprep.mubr.msk.bf16.mxu0 %vm7719_vm10, %v7718_v10  ;;  %v5998_v18 = vpop.permute.xlu1 %5997 }
 0xa6f   :  { %v6987_v63 = vpop.f32.mrb[87].mxu0  ;;  %vm5999_vm13 = vcmp.eq.s32.totalorder %v5998_v18, 1 }
 0xa70   :  { %v5572_v32 = vadd.f32 %v6941_v53, %v5532_v38 }
 0xa8a   :  { %v6961_v37 = vpop.f32.mrb[56].mxu1 }
 0xa8b   :  { %v6962_v42 = vpop.f32.mrb[57].mxu1 }
 0xa8c   :  { %v6963_v8 = vadd.f32 %v6962_v42, %v6961_v37  ;;  %v6964_v13 = vpop.f32.mrb[58].mxu1  ;;  %v7027_v22 = vpop.f32.mrb[88].mxu0 }
 0xa8d   :  { %v6965_v15 = vpop.f32.mrb[59].mxu1  ;;  %v7028_v43 = vpop.f32.mrb[89].mxu0 }
 0xa8e   :  { %v5612_v14 = vadd.f32 %v6963_v8, %v5572_v32  ;;  %v7029_v25 = vadd.f32 %v7028_v43, %v7027_v22  ;;  %v7030_v40 = vpop.f32.mrb[90].mxu0 }
 0xa8f   :  { %v7031_v29 = vpop.f32.mrb[91].mxu0 }
 0xa90   :  { %v5652_v7 = vadd.f32 %v6985_v45, %v5612_v14  ;;  %v5906_v29 = vld [vmem:[%s12963_s2 + $0x8] sm:$0xff] }
 0xa91   :  { %vm6002_vm14 = vcmp.gt.f32.partialorder %v5906_v29, 0.0 }
 0xa94   :  { %v5882_v0 = vpop.f32.mrb[92].mxu0 }
 0xa95   :  { %v7159_v56 = vpop.f32.mrb[93].mxu0  ;;  %v5883_v48 = vadd.f32 %v12807_v51, %v5882_v0  ;;  %v6075_v0 = vsel %vm6002_vm14, 1, %v13688_v5 }
 0xa96   :  { %v12802_v39 = vpop.f32.mrb[94].mxu0 }
 0xa97   :  { %v7160_v12 = vpop.f32.mrb[95].mxu0  ;;  %v5886_v22 = vadd.f32 %v12807_v51, %v12802_v39 }
 0xaaa   :  { %v7005_v59 = vpop.f32.mrb[60].mxu1 }
 0xaab   :  { %v7006_v52 = vpop.f32.mrb[61].mxu1 }
 0xaac   :  { %v7007_v20 = vadd.f32 %v7006_v52, %v7005_v59  ;;  %v7008_v34 = vpop.f32.mrb[62].mxu1 }
 0xaad   :  { %v7009_v44 = vpop.f32.mrb[63].mxu1 }
 0xaae   :  { %v5692_v4 = vadd.f32 %v7007_v20, %v5652_v7 }
 0xab0   :  { %v5732_v24 = vadd.f32 %v7029_v25, %v5692_v4 }
 0xab7   :  { %v5890_v38 = vpop.f32.mrb[96].mxu0 }
 0xab8   :  { %v7163_v45 = vpop.f32.mrb[97].mxu0 }
 0xab9   :  { %v12829_v3 = vpop.f32.mrb[98].mxu0 }
 0xaba   :  { %v7164_v63 = vpop.f32.mrb[99].mxu0 }
 0xaca   :  { %v7049_v41 = vpop.f32.mrb[64].mxu1 }
 0xacb   :  { %v7050_v9 = vpop.f32.mrb[65].mxu1 }
 0xacc   :  { %v7051_v27 = vadd.f32 %v7050_v9, %v7049_v41  ;;  %v7052_v31 = vpop.f32.mrb[66].mxu1 }
 0xacd   :  { %v7053_v1 = vpop.f32.mrb[67].mxu1 }
 0xace   :  { %v12809_v62 = vadd.f32 %v7051_v27, %v5732_v24 }
 0xad2   :  { %v5964_v28 = vpop.f32.mrb[68].mxu1 }
 0xad3   :  { %v5970_v54 = vadd.f32 %v5964_v28, %v5883_v48  ;;  %v7175_v57 = vpop.f32.mrb[69].mxu1 }
 0xad4   :  { %v5967_v2 = vpop.f32.mrb[70].mxu1 }
 0xad5   :  { %v7176_v35 = vpop.f32.mrb[71].mxu1  ;;  %7609 = vtanh.f32 %v5970_v54  ;;  %v6571_v50 = vmul.f32 -1.442695, %v5970_v54  ;;  %v5891_v54 = vadd.f32 %v12807_v51, %v5890_v38 }
 0xad7   :  { %7611 = vpow2.f32 %v6571_v50 }
 0xadf   :  { %v7610_v55 = vpop.eup %7609 }
 0xae0   :  { %5980 = vrot.lane.b32.xlu0 %v7610_v55, %s7717_s7 }
 0xae1   :  { %v7612_v17 = vpop.eup %7611 }
 0xae2   :  { %v5974_v16 = vadd.f32 1.0, %v7612_v17  ;;  %v5907_v17 = vld [vmem:[%s12963_s2 + $0x10] sm:$0xff] }
 0xae3   :  { %vm6082_vm0 = vcmp.gt.f32.partialorder %v5907_v17, 0.0 }
 0xae4   :  { %7613 = vrcp.f32 %v5974_v16 }
 0xaee   :  { %v7614_v30 = vpop.eup %7613 }
 0xaef   :  { %v5978_v26 = vmul.f32 0.0, %v7614_v30 }
 0xb40   :  { %v12831_v32 = vpop.f32.mrb[100].mxu0 }
 0xb41   :  { %v7167_v37 = vpop.f32.mrb[101].mxu0 }
 0xb42   :  { %v12833_v42 = vpop.f32.mrb[102].mxu0 }
 0xb43   :  { %v7168_v8 = vpop.f32.mrb[103].mxu0 }
 0xb44   :  { %v5894_v8 = vadd.f32 %v12807_v51, %v12829_v3 }
 0xb52   :  { %v5981_v53 = vpop.permute.xlu0 %5980 }
 0xb53   :  { %v5983_v60 = vmul.f32 %v7614_v30, %v5981_v53 }
 0xb55   :  { %5985 = vrot.lane.b32.xlu0 %v5983_v60, %s7720_s12 }
 0xbc7   :  { %v5986_v21 = vpop.permute.xlu0 %5985 }
 0xbc8   :  { %v5988_v46 = vadd.f32 %v5986_v21, %v5978_v26 }
 0xbca   :  { %7615 = vtanh.f32 %v5988_v46  ;;  %v6001_v34 = vsel %vm5999_vm13, %v5988_v46, 0.0 }
 0xbd4   :  { %v7616_v11 = vpop.eup %7615 }
 0xbd5   :  { %5991 = vrot.lane.b32.xlu1 %v7616_v11, %s7717_s7 }
 0xc47   :  { %v5992_v19 = vpop.permute.xlu1 %5991 }
 0xc48   :  { %v5994_v23 = vmul.f32 %v7614_v30, %v5992_v19  ;;  %v6155_v30 = vsel %vm6082_vm0, 1, %v13688_v5 }
 0xc4a   :  { %v6000_v33 = vsel %vm5999_vm13, %v5994_v23, 0.0 }
 0xc4b   :  { %v6003_v49 = vpack.c.bf16 %v6000_v33, %v6000_v33 }
 0xc4d   :  { %6005 = vrot.lane.b32.xlu0 %v6003_v49, %s7720_s12 }
 0xcbf   :  { %v6006_v13 = vpop.permute.xlu0 %6005 }
 0xcc0   :  { %7182 = vmatmul.mubr.msk.bf16.vlgmr.msra.gmra.mrb[104].mxu0 %vm5838_vm11, %v6006_v13 }
 0xcc1   :  { %7194 = vmatpush3.bf16.msra.mxu0 %v12741_v47  ;;  %7197 = vmatprep.mubr.msk.bf16.mxu0 %vm7719_vm10, %v7718_v10 }
 0xcc2   :  { %7195 = vmatprep.subr.bf16.mxu0 %v7718_v10 }
 0xcc5   :  { %7196 = vmatpush3.bf16.msra.mxu0 %v12753_v6 }
 0xcc6   :  { %7209 = vmatprep.subr.bf16.mxu0 %v7718_v10 }
 0xd93   :  { %v6044_v15 = vpop.f32.mrb[104].mxu0 }
 0xd94   :  { %v6050_v43 = vadd.f32 %v6044_v15, %v5886_v22  ;;  %v7183_v14 = vpop.f32.mrb[105].mxu0 }
 0xd95   :  { %v6047_v25 = vpop.f32.mrb[106].mxu0 }
 0xd96   :  { %7617 = vtanh.f32 %v6050_v43  ;;  %v7184_v40 = vpop.f32.mrb[107].mxu0  ;;  %v6573_v56 = vmul.f32 -1.442695, %v6050_v43 }
 0xd98   :  { %7619 = vpow2.f32 %v6573_v56 }
 0xda0   :  { %v7618_v7 = vpop.eup %7617 }
 0xda1   :  { %6060 = vrot.lane.b32.xlu1 %v7618_v7, %s7717_s7 }
 0xda2   :  { %v7620_v39 = vpop.eup %7619 }
 0xda3   :  { %v6054_v12 = vadd.f32 1.0, %v7620_v39 }
 0xda5   :  { %6077 = vperm.xlu1 %7598, %v6075_v0   ;;  %7621 = vrcp.f32 %v6054_v12 }
 0xdaf   :  { %v7622_v59 = vpop.eup %7621 }
 0xdb0   :  { %v6058_v44 = vmul.f32 %v7622_v59, %v6001_v34 }
 0xe13   :  { %v6061_v52 = vpop.permute.xlu1 %6060 }
 0xe14   :  { %v6063_v20 = vmul.f32 %v7622_v59, %v6061_v52 }
 0xe16   :  { %6065 = vrot.lane.b32.xlu0 %v6063_v20, %s7720_s12 }
 0xe24   :  { %v6078_v9 = vpop.permute.xlu1 %6077 }
 0xe25   :  { %vm6079_vm15 = vcmp.eq.s32.totalorder %v6078_v9, 1 }
 0xe88   :  { %v6066_v4 = vpop.permute.xlu0 %6065 }
 0xe89   :  { %v6068_v24 = vadd.f32 %v6066_v4, %v6058_v44 }
 0xe8b   :  { %7623 = vtanh.f32 %v6068_v24  ;;  %v6081_v61 = vsel %vm6079_vm15, %v6068_v24, %v6001_v34 }
 0xe95   :  { %v7624_v41 = vpop.eup %7623 }
 0xe96   :  { %6071 = vrot.lane.b32.xlu0 %v7624_v41, %s7717_s7 }
 0xf08   :  { %v6072_v27 = vpop.permute.xlu0 %6071 }
 0xf09   :  { %v6074_v31 = vmul.f32 %v7622_v59, %v6072_v27  ;;  %v5899_v27 = vadd.f32 %v12807_v51, %v12831_v32 }
 0xf0b   :  { %v6080_v1 = vsel %vm6079_vm15, %v6074_v31, %v6000_v33 }
 0xf0c   :  { %v6083_v48 = vpack.c.bf16 %v6080_v1, %v6080_v1 }
 0xf0e   :  { %6085 = vrot.lane.b32.xlu1 %v6083_v48, %s7720_s12 }
 0xf80   :  { %v6086_v28 = vpop.permute.xlu1 %6085 }
 0xf81   :  { %7190 = vmatmul.mubr.msk.bf16.vlgmr.msra.gmra.mrb[72].mxu1 %vm5838_vm11, %v6086_v28 }
 0xf82   :  { %7202 = vmatpush3.bf16.msra.mxu1 %v12741_v47  ;;  %7205 = vmatprep.mubr.msk.bf16.mxu1 %vm7719_vm10, %v7718_v10 }
 0xf83   :  { %7203 = vmatprep.subr.bf16.mxu1 %v7718_v10 }
 0xf86   :  { %7204 = vmatpush3.bf16.msra.mxu1 %v12753_v6 }
 0xf87   :  { %7217 = vmatprep.subr.bf16.mxu1 %v7718_v10 }
0x1054   :  { %v6124_v57 = vpop.f32.mrb[72].mxu1 }
0x1055   :  { %v6130_v2 = vadd.f32 %v6124_v57, %v5891_v54  ;;  %v7191_v35 = vpop.f32.mrb[73].mxu1  ;;  %v5909_v57 = vld [vmem:[%s12963_s2 + $0x20] sm:$0xff] }
0x1056   :  { %v6127_v55 = vpop.f32.mrb[74].mxu1  ;;  %vm6242_vm4 = vcmp.gt.f32.partialorder %v5909_v57, 0.0 }
0x1057   :  { %7625 = vtanh.f32 %v6130_v2  ;;  %v7192_v50 = vpop.f32.mrb[75].mxu1  ;;  %v6575_v53 = vmul.f32 -1.442695, %v6130_v2  ;;  %v6315_v35 = vsel %vm6242_vm4, 1, %v13688_v5 }
0x1059   :  { %7627 = vpow2.f32 %v6575_v53 }
0x1061   :  { %v7626_v16 = vpop.eup %7625 }
0x1062   :  { %6140 = vrot.lane.b32.xlu0 %v7626_v16, %s7717_s7 }
0x1063   :  { %v7628_v60 = vpop.eup %7627 }
0x1064   :  { %v6134_v26 = vadd.f32 1.0, %v7628_v60 }
0x1066   :  { %6157 = vperm.xlu0 %7599, %v6155_v30   ;;  %7629 = vrcp.f32 %v6134_v26 }
0x1070   :  { %v7630_v21 = vpop.eup %7629 }
0x1071   :  { %v6138_v11 = vmul.f32 %v7630_v21, %v6081_v61 }
0x10d4   :  { %v6141_v46 = vpop.permute.xlu0 %6140 }
0x10d5   :  { %v6143_v58 = vmul.f32 %v7630_v21, %v6141_v46 }
0x10d7   :  { %6145 = vrot.lane.b32.xlu1 %v6143_v58, %s7720_s12 }
0x10e5   :  { %v6158_v33 = vpop.permute.xlu0 %6157 }
0x10e6   :  { %vm6159_vm1 = vcmp.eq.s32.totalorder %v6158_v33, 1  ;;  %v5902_v33 = vadd.f32 %v12807_v51, %v12833_v42 }
0x1149   :  { %v6146_v18 = vpop.permute.xlu1 %6145 }
0x114a   :  { %v6148_v19 = vadd.f32 %v6146_v18, %v6138_v11 }
0x114c   :  { %7631 = vtanh.f32 %v6148_v19  ;;  %v6161_v39 = vsel %vm6159_vm1, %v6148_v19, %v6081_v61 }
0x1156   :  { %v7632_v23 = vpop.eup %7631 }
0x1157   :  { %6151 = vrot.lane.b32.xlu1 %v7632_v23, %s7717_s7 }
0x11c9   :  { %v6152_v49 = vpop.permute.xlu1 %6151 }
0x11ca   :  { %v6154_v38 = vmul.f32 %v7630_v21, %v6152_v49 }
0x11cc   :  { %v6160_v45 = vsel %vm6159_vm1, %v6154_v38, %v6080_v1 }
0x11cd   :  { %v6163_v63 = vpack.c.bf16 %v6160_v45, %v6160_v45 }
0x11cf   :  { %6165 = vrot.lane.b32.xlu1 %v6163_v63, %s7720_s12 }
0x1241   :  { %v6166_v37 = vpop.permute.xlu1 %6165 }
0x1242   :  { %7198 = vmatmul.mubr.msk.bf16.vlgmr.msra.gmra.mrb[108].mxu0 %vm5838_vm11, %v6166_v37 }
0x1243   :  { %7210 = vmatpush3.bf16.msra.mxu0 %v12741_v47  ;;  %7213 = vmatprep.mubr.msk.bf16.mxu0 %vm7719_vm10, %v7718_v10  ;;  %v5908_v47 = vld [vmem:[%s12963_s2 + $0x18] sm:$0xff] }
0x1244   :  { %7211 = vmatprep.subr.bf16.mxu0 %v7718_v10  ;;  %vm6162_vm2 = vcmp.gt.f32.partialorder %v5908_v47, 0.0 }
0x1245   :  { %v6235_v40 = vsel %vm6162_vm2, 1, %v13688_v5 }
0x1247   :  { %7212 = vmatpush3.bf16.msra.mxu0 %v12753_v6 }
0x1315   :  { %v6204_v13 = vpop.f32.mrb[108].mxu0 }
0x1316   :  { %v6210_v22 = vadd.f32 %v6204_v13, %v5894_v8  ;;  %v7199_v15 = vpop.f32.mrb[109].mxu0  ;;  %v5910_v8 = vld [vmem:[%s12963_s2 + $0x28] sm:$0xff] }
0x1317   :  { %v6207_v43 = vpop.f32.mrb[110].mxu0  ;;  %vm6322_vm6 = vcmp.gt.f32.partialorder %v5910_v8, 0.0 }
0x1318   :  { %7633 = vtanh.f32 %v6210_v22  ;;  %v7200_v14 = vpop.f32.mrb[111].mxu0  ;;  %v6577_v6 = vmul.f32 -1.442695, %v6210_v22  ;;  %v6395_v22 = vsel %vm6322_vm6, 1, %v13688_v5  ;;  %v5777_v5 = vmul.f32 %v12462_v36, %v12809_v62 }
0x131a   :  { %7635 = vpow2.f32 %v6577_v6 }
0x1322   :  { %v7634_v25 = vpop.eup %7633 }
0x1323   :  { %6220 = vrot.lane.b32.xlu0 %v7634_v25, %s7717_s7 }
0x1324   :  { %v7636_v3 = vpop.eup %7635 }
0x1325   :  { %v6214_v29 = vadd.f32 1.0, %v7636_v3 }
0x1327   :  { %6237 = vperm.xlu0 %7599, %v6235_v40   ;;  %7637 = vrcp.f32 %v6214_v29 }
0x1331   :  { %v7638_v7 = vpop.eup %7637 }
0x1332   :  { %v6218_v12 = vmul.f32 %v7638_v7, %v6161_v39 }
0x1395   :  { %v6221_v0 = vpop.permute.xlu0 %6220 }
0x1396   :  { %v6223_v56 = vmul.f32 %v7638_v7, %v6221_v0 }
0x1398   :  { %6225 = vrot.lane.b32.xlu1 %v6223_v56, %s7720_s12 }
0x13a6   :  { %v6238_v34 = vpop.permute.xlu0 %6237 }
0x13a7   :  { %vm6239_vm3 = vcmp.eq.s32.totalorder %v6238_v34, 1 }
0x140a   :  { %v6226_v59 = vpop.permute.xlu1 %6225 }
0x140b   :  { %v6228_v52 = vadd.f32 %v6226_v59, %v6218_v12  ;;  %v7607_v12 = vld [vmem:[%s12974_s13] sm:$0xff]   ;;  %v7608_v59 = vld [vmem:[%s12974_s13 + $0x8] sm:$0xff]  }
0x140d   :  { %7639 = vtanh.f32 %v6228_v52  ;;  %v6241_v53 = vsel %vm6239_vm3, %v6228_v52, %v6161_v39 }
0x1417   :  { %v7640_v20 = vpop.eup %7639 }
0x1418   :  { %6231 = vrot.lane.b32.xlu1 %v7640_v20, %s7717_s7 }
0x148a   :  { %v6232_v44 = vpop.permute.xlu1 %6231 }
0x148b   :  { %v6234_v4 = vmul.f32 %v7638_v7, %v6232_v44  ;;  %v6559_v7 = vld [vmem:[%s12970_s9] ss:$0 sm:$0xff] }
0x148c   :  { %v5785_v0 = vadd.f32 %v6559_v7, %v5777_v5 }
0x148d   :  { %v6240_v24 = vsel %vm6239_vm3, %v6234_v4, %v6160_v45 }
0x148e   :  { %v6243_v41 = vpack.c.bf16 %v6240_v24, %v6240_v24  ;;  %v5786_v56 = vmul.f32 %v5785_v0, %v5785_v0 }
0x1490   :  { %6245 = vrot.lane.b32.xlu0 %v6243_v41, %s7720_s12  ;;  %v5788_v39 = vsel %vm5787_vm7, %v5786_v56, 0.0 }
0x1502   :  { %v6246_v9 = vpop.permute.xlu0 %6245 }
0x1503   :  { %7206 = vmatmul.mubr.msk.bf16.vlgmr.msra.gmra.mrb[76].mxu1 %vm5838_vm11, %v6246_v9 }
0x1504   :  { %7221 = vmatprep.mubr.msk.bf16.mxu1 %vm7719_vm10, %v7718_v10  ;;  %7218 = vmatpush3.bf16.msra.mxu1 %v7607_v12 }
0x1505   :  { %7219 = vmatprep.subr.bf16.mxu1 %v7718_v10  ;;  %v6582_v10 = vld [vmem:[%s12975_s14] ss:$0 sm:$0xff] }
0x1508   :  { %7220 = vmatpush3.bf16.msra.mxu1 %v7608_v59 }
0x15d6   :  { %v6284_v31 = vpop.f32.mrb[76].mxu1 }
0x15d7   :  { %v6290_v1 = vadd.f32 %v6284_v31, %v5899_v27  ;;  %v7207_v48 = vpop.f32.mrb[77].mxu1 }
0x15d8   :  { %v6287_v28 = vpop.f32.mrb[78].mxu1 }
0x15d9   :  { %7641 = vtanh.f32 %v6290_v1  ;;  %v7208_v54 = vpop.f32.mrb[79].mxu1  ;;  %v6579_v55 = vmul.f32 -1.442695, %v6290_v1 }
0x15db   :  { %7643 = vpow2.f32 %v6579_v55 }
0x15e3   :  { %v7642_v2 = vpop.eup %7641 }
0x15e4   :  { %6300 = vrot.lane.b32.xlu1 %v7642_v2, %s7717_s7 }
0x15e5   :  { %v7644_v32 = vpop.eup %7643 }
0x15e6   :  { %v6294_v50 = vadd.f32 1.0, %v7644_v32 }
0x15e8   :  { %6317 = vperm.xlu1 %7598, %v6315_v35   ;;  %7645 = vrcp.f32 %v6294_v50 }
0x15f2   :  { %v7646_v17 = vpop.eup %7645 }
0x15f3   :  { %v6298_v60 = vmul.f32 %v7646_v17, %v6241_v53 }
0x1656   :  { %v6301_v16 = vpop.permute.xlu1 %6300 }
0x1657   :  { %v6303_v30 = vmul.f32 %v7646_v17, %v6301_v16 }
0x1659   :  { %6305 = vrot.lane.b32.xlu0 %v6303_v30, %s7720_s12 }
0x1667   :  { %v6318_v58 = vpop.permute.xlu1 %6317 }
0x1668   :  { %vm6319_vm5 = vcmp.eq.s32.totalorder %v6318_v58, 1 }
0x16cb   :  { %v6306_v26 = vpop.permute.xlu0 %6305 }
0x16cc   :  { %v6308_v21 = vadd.f32 %v6306_v26, %v6298_v60 }
0x16ce   :  { %7647 = vtanh.f32 %v6308_v21  ;;  %v6321_v25 = vsel %vm6319_vm5, %v6308_v21, %v6241_v53 }
0x16d8   :  { %v7648_v46 = vpop.eup %7647 }
0x16d9   :  { %6311 = vrot.lane.b32.xlu0 %v7648_v46, %s7717_s7 }
0x174b   :  { %v6312_v61 = vpop.permute.xlu0 %6311 }
0x174c   :  { %v6314_v11 = vmul.f32 %v7646_v17, %v6312_v61 }
0x174e   :  { %v6320_v18 = vsel %vm6319_vm5, %v6314_v11, %v6240_v24 }
0x174f   :  { %v6323_v19 = vpack.c.bf16 %v6320_v18, %v6320_v18 }
0x1751   :  { %6325 = vrot.lane.b32.xlu1 %v6323_v19, %s7720_s12 }
0x17c3   :  { %v6326_v23 = vpop.permute.xlu1 %6325 }
0x17c4   :  { %7214 = vmatmul.mubr.msk.bf16.vlgmr.msra.gmra.mrb[112].mxu0 %vm5838_vm11, %v6326_v23 }
0x1897   :  { %v6364_v49 = vpop.f32.mrb[112].mxu0 }
0x1898   :  { %v6370_v38 = vadd.f32 %v6364_v49, %v5902_v33  ;;  %v7215_v45 = vpop.f32.mrb[113].mxu0 }
0x1899   :  { %v6367_v63 = vpop.f32.mrb[114].mxu0 }
0x189a   :  { %7649 = vtanh.f32 %v6370_v38  ;;  %v7216_v37 = vpop.f32.mrb[115].mxu0  ;;  %v6581_v15 = vmul.f32 -1.442695, %v6370_v38 }
0x189c   :  { %7651 = vpow2.f32 %v6581_v15 }
0x18a4   :  { %v7650_v13 = vpop.eup %7649 }
0x18a5   :  { %6380 = vrot.lane.b32.xlu0 %v7650_v13, %s7717_s7 }
0x18a6   :  { %v7652_v51 = vpop.eup %7651 }
0x18a7   :  { %v6374_v42 = vadd.f32 1.0, %v7652_v51 }
0x18a9   :  { %6397 = vperm.xlu0 %7599, %v6395_v22   ;;  %7653 = vrcp.f32 %v6374_v42 }
0x18b3   :  { %v7654_v43 = vpop.eup %7653 }
0x18b4   :  { %v6378_v40 = vmul.f32 %v7654_v43, %v6321_v25 }
0x1917   :  { %v6381_v14 = vpop.permute.xlu0 %6380 }
0x1918   :  { %v6383_v47 = vmul.f32 %v7654_v43, %v6381_v14 }
0x191a   :  { %6385 = vrot.lane.b32.xlu1 %v6383_v47, %s7720_s12 }
0x1928   :  { %v6398_v36 = vpop.permute.xlu0 %6397 }
0x1929   :  { %vm6399_vm8 = vcmp.eq.s32.totalorder %v6398_v36, 1 }
0x198c   :  { %v6386_v6 = vpop.permute.xlu1 %6385 }
0x198d   :  { %v6388_v3 = vadd.f32 %v6386_v6, %v6378_v40 }
0x198f   :  { %7655 = vtanh.f32 %v6388_v3 }
0x1999   :  { %v7656_v29 = vpop.eup %7655 }
0x199a   :  { %6391 = vrot.lane.b32.xlu1 %v7656_v29, %s7717_s7 }
0x19be   :  { %5789 = vadd.xlane.f32.xlu1 %v5788_v39 }
0x1a0c   :  { %v6392_v62 = vpop.permute.xlu1 %6391 }
0x1a0d   :  { %v6394_v52 = vmul.f32 %v7654_v43, %v6392_v62 }
0x1a0f   :  { %v6400_v20 = vsel %vm6399_vm8, %v6394_v52, %v6320_v18 }
0x1a10   :  { %v6401_v34 = vmax.f32 %v6400_v20, 0.0 }
0x1a12   :  { %v6402_v44 = vpack.c.bf16 %v6401_v34, %v6401_v34 }
0x1a14   :  { %6415 = vrot.lane.b32.xlu0 %v6402_v44, %s7720_s12 }
0x1a4b   :  { %v5790_v4 = vpop.xlane.xlu1 %5789 }
0x1a4c   :  { %7657 = vrsqrt.f32 %v5790_v4 }
0x1a56   :  { %v7658_v24 = vpop.eup %7657 }
0x1a57   :  { %v5792_v41 = vmul.f32 %v7658_v24, %v5785_v0 }
0x1a59   :  { %5793 = vst.msk [vmem:[#allocation4] sm:$0x3] %vm5787_vm7, %v5792_v41 }
0x1a86   :  { %v6416_v9 = vpop.permute.xlu0 %6415 }
0x1a87   :  { %7222 = vmatmul.mubr.msk.bf16.vlgmr.msra.gmra.mrb[80].mxu1 %vm5838_vm11, %v6416_v9 }
0x1b5a   :  { %v6466_v27 = vpop.f32.mrb[80].mxu1 }
0x1b5b   :  { %v6467_v31 = vadd.f32 %v6582_v10, %v6466_v27  ;;  %v7223_v1 = vpop.f32.mrb[81].mxu1 }
0x1b5c   :  { %v6469_v48 = vpop.f32.mrb[82].mxu1 }
0x1b5d   :  { %v7224_v28 = vpop.f32.mrb[83].mxu1  ;;  %v6472_v54 = vmul.f32 %v6467_v31, %v6467_v31 }
0x1b5f   :  { %v6473_v57 = vsel %vm5838_vm11, %v6472_v54, 0.0 }
0x1b60   :  { %6474 = vadd.xlane.f32.xlu0 %v6473_v57 }
0x1b61   :  { %7672 = shalt.err (!%p7669_p4)
}
0x1b62   :  { %s7673_s29 = scalar_lea.hbm %s12976_s15, 32 }
0x1b63   :  { %p7674_p5 = scmp.ne.s32.totalorder %s12976_s15, %s7673_s29  ;;  %p7677_p6 = scmp.lt.u32.totalorder %s7673_s29, %s12976_s15 }
0x1b65   :  { %p7679_p7 = pnand %p7677_p6, %p7674_p5 }
0x1b67   :  { %7682 = shalt.err (!%p7679_p7)
}
0x1b68   :  { %6488 = dma.vmem_to_hbm [thread:$0]  %s6486_s11, 32, %s12976_s15, [#allocation5]  }
0x1b69   :  { %s7722_s19 = smov [#allocation6]  }
0x1b6a   :  { %s6495_s20 = sshll.u32 %s7722_s19, 4  ;;  %s6496_s20 = int_to_ptr.vmem [resolvable:$true] %s6495_s20 }
0x1b6b   :  { %s7683_s21 = scalar_lea.vmem %s6496_s20, 128  ;;  %p7688_p9 = scmp.lt.s32.totalorder %s6496_s20, %s6496_s20 }
0x1b6c   :  { %p7684_p8 = scmp.ne.s32.totalorder %s6496_s20, %s7683_s21  ;;  %p7689_p10 = scmp.lt.s32.totalorder %s7683_s21, %s7683_s21 }
0x1b6e   :  { %p7690_p11 = por %p7689_p10, %p7688_p9 }
0x1b70   :  { %p7691_p12 = pnand %p7690_p11, %p7684_p8 }
0x1bed   :  { %v6475_v2 = vpop.xlane.xlu0 %6474 }
0x1bee   :  { %7659 = vrsqrt.f32 %v6475_v2 }
0x1bf8   :  { %v7660_v35 = vpop.eup %7659 }
0x1bf9   :  { %v6477_v55 = vmul.f32 %v7660_v35, %v6467_v31 }
0x1bfb   :  { %6478 = vst.msk [vmem:[#allocation6] sm:$0xff] %vm5838_vm11, %v6477_v55 }
0x1bfc   :  { %7694 = shalt.err (!%p7691_p12)
}
0x1bfd   :  { %s7695_s15 = scalar_lea.hbm %s12977_s16, 128 }
0x1bfe   :  { %p7696_p13 = scmp.ne.s32.totalorder %s12977_s16, %s7695_s15  ;;  %p7699_p0 = scmp.lt.u32.totalorder %s7695_s15, %s12977_s16 }
0x1c00   :  { %p7701_p1 = pnand %p7699_p0, %p7696_p13 }
0x1c02   :  { %7704 = shalt.err (!%p7701_p1)
}
0x1c03   :  { %6498 = dma.vmem_to_hbm [thread:$0]  %s6496_s20, 128, %s12977_s16, [#allocation7]  }
0x1c04   :  { %7707 = dma.done.wait [#allocation5], 32  }
0x1c05   :  { %7708 = vsyncadd [#allocation5], 4294967264 }
0x1c06   :  { %7709 = dma.done.wait [#allocation7], 128  }
0x1c07   :  { %7710 = vsyncadd [#allocation7], 4294967168 }
0x1c08   :  { %6505 = vsyncpa [#allocation5], 1 }
0x1c09   :  { %6506 = vsyncpa [#allocation7], 1 }
0x1c0a   :  { %6507 = vsyncmov [#allocation3] }
0x1c0d   :  { %s6508_s10 = vpop.sfrf %6507 }
0x1c0e   :  { %p6586_p2 = scmp.ne.s32.totalorder %s6508_s10, 0 }
0x1c10   :  { %6512 = shalt.err (%p6586_p2)  }

</bundles_post_ra>
